<compile_context>
chip_gen: v7x
topology: tpu7x:2x2x1
jax: 0.10.0
libtpu: 0.0.40
codegen_flags: <defaults>
</compile_context>

<pallas_src>
import functools

import jax
import jax.numpy as jnp
from jax.experimental import pallas as pl
from jax.experimental.pallas import tpu as pltpu


def _layer_norm(x, gamma, beta, eps=1e-5):
    mu = jnp.mean(x, axis=-1, keepdims=True)
    var = jnp.mean(jnp.square(x - mu), axis=-1, keepdims=True)
    return (x - mu) * jax.lax.rsqrt(var + eps) * gamma + beta


def _interp_kernel(num_heads, batch_tile,
                   q_ref, qpos_ref, f_ref, fpos_ref, mask_ref, hsel_ref,
                   wfe_ref, bfe_ref,
                   wq_ref, bq_ref, wk_ref, bk_ref, wv_ref, bv_ref,
                   wo_ref, bo_ref, g1_ref, bn1_ref,
                   w1_ref, b1_ref, w2_ref, b2_ref, g2_ref, bn2_ref,
                   out_ref):
    f32 = jnp.float32
    mmt = wq_ref.dtype                       # matmul compute dtype (bf16)
    bt = batch_tile
    nq = mask_ref.shape[1]                   # queries per batch element
    hnk = mask_ref.shape[2]                  # num_heads * nk
    nk = hnk // num_heads
    d = q_ref.shape[-1]                      # query_dim (d_model)
    hd = d // num_heads
    scale = 1.0 / float(hd) ** 0.5

    q = q_ref[...].astype(f32)               # (bt*nq, d)
    qpos = qpos_ref[...].astype(f32)
    fpos = fpos_ref[...].astype(f32)
    hsel = hsel_ref[...]                     # (hnk, d) bf16 0/1 head selector (precomputed)

    # ---- feat_emb + attention in-projections: bt batches stacked on rows,
    #      one fat MXU matmul each (bf16 inputs, f32 accumulation) ----
    mem = jnp.dot(f_ref[...].astype(mmt), wfe_ref[...],
                  preferred_element_type=f32) + bfe_ref[...]             # (bt*nk, d)
    Q = jnp.dot((q + qpos).astype(mmt), wq_ref[...],
                preferred_element_type=f32) + bq_ref[...]                # (bt*nq, d)
    K = jnp.dot((mem + fpos).astype(mmt), wk_ref[...],
                preferred_element_type=f32) + bk_ref[...]                # (bt*nk, d)
    V = jnp.dot(mem.astype(mmt), wv_ref[...],
                preferred_element_type=f32) + bv_ref[...]                # (bt*nk, d)

    # cast once (hoisted out of the per-batch loop); all expansion work is bf16
    Qc = Q.astype(mmt)
    Kc = K.astype(mmt)
    Vc = V.astype(mmt)

    # ---- attention: all heads of one batch element via two big matmuls on a
    #      block-diagonal K/V expansion (row h*nk+k keeps only head-h columns).
    #      Operands are intrinsically per-batch, so the loop is a static unroll;
    #      all constant/castable work has been hoisted above. ----
    ctx_parts = []
    for bi in range(bt):
        qb = Qc[bi * nq:(bi + 1) * nq, :]                                # (nq, d) bf16
        kb = Kc[bi * nk:(bi + 1) * nk, :]                                # (nk, d) bf16
        vb = Vc[bi * nk:(bi + 1) * nk, :]
        kexp = jnp.concatenate([kb] * num_heads, axis=0) * hsel          # (hnk, d) bf16
        vexp = jnp.concatenate([vb] * num_heads, axis=0) * hsel
        # scores for all heads at once: (nq, hnk), lane-dense.
        # (If the bundle dump shows a vxpose of kexp here, build kexp in
        #  (d, hnk) layout instead and use a plain (nq,d)@(d,hnk) dot.)
        s = jnp.einsum('qd,kd->qk', qb, kexp,
                       preferred_element_type=f32) * scale
        s = s + mask_ref[bi].astype(f32)                                 # additive mask
        # per-head stabilized softmax (unnormalized): heads are contiguous
        # nk-lane groups of s -> per-head max via static lane slices.
        p_parts = []
        for h in range(num_heads):
            sh = s[:, h * nk:(h + 1) * nk]                               # (nq, nk) f32
            p_parts.append(jnp.exp(sh - jnp.max(sh, axis=-1, keepdims=True)))
        p = jnp.concatenate(p_parts, axis=-1)                            # (nq, hnk) f32
        pmm = p.astype(mmt)
        ctx_un = jnp.dot(pmm, vexp, preferred_element_type=f32)          # (nq, d)
        # per-head denominator broadcast to head columns in ONE bf16 matmul
        # (seg @ expand == hsel, so p @ hsel is the full denominator map).
        den = jnp.dot(pmm, hsel, preferred_element_type=f32)             # (nq, d)
        ctx_parts.append(ctx_un * pl.reciprocal(den, approx=False))
    ctx = jnp.concatenate(ctx_parts, axis=0) if bt > 1 else ctx_parts[0]  # (bt*nq, d)

    # ---- output projection + residual + post-LN (cross attention block) ----
    attn = jnp.dot(ctx.astype(mmt), wo_ref[...],
                   preferred_element_type=f32) + bo_ref[...]
    tgt = _layer_norm(q + attn, g1_ref[...], bn1_ref[...])

    # ---- FFN block: linear1 -> relu -> linear2 -> residual -> LayerNorm ----
    h1 = jnp.maximum(jnp.dot(tgt.astype(mmt), w1_ref[...],
                             preferred_element_type=f32) + b1_ref[...], 0.0)
    h2 = jnp.dot(h1.astype(mmt), w2_ref[...],
                 preferred_element_type=f32) + b2_ref[...]
    out = _layer_norm(tgt + h2, g2_ref[...], bn2_ref[...])               # (bt*nq, d)

    # ---- lane-dense output: (nq, bt*d) slab via a single lane-axis concat of the
    #      per-batch row blocks (no f32 placement matmuls), one wide store ----
    if bt == 1:
        out_ref[...] = out.astype(out_ref.dtype)
    else:
        slab = jnp.concatenate([out[bi * nq:(bi + 1) * nq, :] for bi in range(bt)],
                               axis=1)                                   # (nq, bt*d)
        out_ref[...] = slab.astype(out_ref.dtype)


_WEIGHT_ORDER = ('wfe', 'bfe', 'wq', 'bq', 'wk', 'bk', 'wv', 'bv', 'wo', 'bo',
                 'g1', 'bn1', 'w1', 'b1', 'w2', 'b2', 'g2', 'bn2')
_MATMUL_WEIGHTS = frozenset({'wfe', 'wq', 'wk', 'wv', 'wo', 'w1', 'w2'})


def _num_tensorcores():
    """Best-effort TensorCore count of the local chip (1 on v5e/v6e, 2 on v7x)."""
    try:
        dev = jax.devices()[0]
        for attr in ('num_cores', 'core_count'):
            v = getattr(dev, attr, None)
            if isinstance(v, int) and v >= 1:
                return v
    except Exception:
        pass
    return 1


def _pick_batch_tile(b, dq, num_tensorcores):
    """Single grid step on 1-TC chips (grid steps are sequential loop overhead);
    on 2-TC chips pick the widest tile giving an even step count, preferring a
    128-aligned output lane width."""
    if num_tensorcores < 2 or b < 2:
        return b
    cands = [t for t in range(1, b) if b % t == 0 and (b // t) % 2 == 0]
    if not cands:
        return b
    aligned = [t for t in cands if (t * dq) % 128 == 0]
    return max(aligned) if aligned else max(cands)


def sparse_to_dense_interpolator(queries, query_pos, features, feature_pos,
                                 mask, params, num_heads=8, batch_tile=None,
                                 matmul_dtype=jnp.bfloat16,
                                 mask_dtype=jnp.bfloat16):
    """queries/query_pos: (Nq, B, Dq); features: (Nk, B, Df);
    feature_pos: (Nk, B, Dq); mask: (B*num_heads, Nq, Nk) float additive."""
    nq, b, dq = queries.shape
    nk, _, df = features.shape
    assert dq % num_heads == 0
    hd = dq // num_heads
    bt = _pick_batch_tile(b, dq, _num_tensorcores()) if batch_tile is None else batch_tile
    assert b % bt == 0

    # seq-first (torch MHA layout) -> batch-row-stacked 2-D slabs for the kernel
    q2 = jnp.transpose(queries, (1, 0, 2)).reshape(b * nq, dq)
    qp2 = jnp.transpose(query_pos, (1, 0, 2)).reshape(b * nq, dq)
    f2 = jnp.transpose(features, (1, 0, 2)).reshape(b * nk, df)
    fp2 = jnp.transpose(feature_pos, (1, 0, 2)).reshape(b * nk, dq)
    # torch packs the mask batch-major over heads: (b*H, nq, nk) -> (b, nq, H*nk)
    # so the kernel's score rows are lane-dense and head-major.  bf16 halves the
    # largest streamed block; 0 / -1e9 style masks survive bf16 exactly enough
    # (exp underflows to 0 either way).
    m3 = mask.reshape(b, num_heads, nq, nk).transpose(0, 2, 1, 3)
    m3 = m3.reshape(b, nq, num_heads * nk).astype(mask_dtype)

    # precomputed head-selector 0/1 matrix (hnk, dq), bf16: hsel[h*nk+k, c] = 1 iff
    # column c belongs to head h.  Also serves as the softmax-denominator map.
    hnk = num_heads * nk
    row_head = (jnp.arange(hnk, dtype=jnp.int32) // nk)[:, None]
    col_head = (jnp.arange(dq, dtype=jnp.int32) // hd)[None, :]
    hsel = (row_head == col_head).astype(matmul_dtype)

    # weight matrices shipped in bf16 (half the DMA/VMEM); biases/LN params in f32
    weights = [params[k].astype(matmul_dtype) if k in _MATMUL_WEIGHTS
               else params[k].astype(jnp.float32) for k in _WEIGHT_ORDER]

    grid = (b // bt,)
    in_specs = [
        pl.BlockSpec((bt * nq, dq), lambda i: (i, 0)),                  # queries
        pl.BlockSpec((bt * nq, dq), lambda i: (i, 0)),                  # query pos
        pl.BlockSpec((bt * nk, df), lambda i: (i, 0)),                  # features
        pl.BlockSpec((bt * nk, dq), lambda i: (i, 0)),                  # feature pos
        pl.BlockSpec((bt, nq, hnk), lambda i: (i, 0, 0)),               # mask
        pl.BlockSpec((hnk, dq), lambda i: (0, 0)),                      # hsel (const)
    ] + [pl.BlockSpec(w.shape, lambda i: (0, 0)) for w in weights]      # const weights
    out_specs = pl.BlockSpec((nq, bt * dq), lambda i: (0, i))

    # explicit scoped-VMEM budget: per-step blocks (x2 double buffering) + weights,
    # with headroom; capped at 48 MiB (v7x has only 64 MiB per TensorCore).
    def _nbytes(shape, dtype):
        n = 1
        for s_ in shape:
            n *= int(s_)
        return n * jnp.dtype(dtype).itemsize

    block_bytes = (2 * _nbytes((bt * nq, dq), jnp.float32)
                   + _nbytes((bt * nk, df), jnp.float32)
                   + _nbytes((bt * nk, dq), jnp.float32)
                   + _nbytes((bt, nq, hnk), mask_dtype)
                   + _nbytes((nq, bt * dq), queries.dtype)
                   + _nbytes((hnk, dq), matmul_dtype)
                   + sum(int(w.size) * w.dtype.itemsize for w in weights))
    vmem_limit = int(min(48 * 2**20, max(16 * 2**20, 2 * block_bytes + 8 * 2**20)))

    out2 = pl.pallas_call(
        functools.partial(_interp_kernel, num_heads, bt),
        out_shape=jax.ShapeDtypeStruct((nq, b * dq), queries.dtype),
        grid=grid,
        in_specs=in_specs,
        out_specs=out_specs,
        compiler_params=pltpu.CompilerParams(
            dimension_semantics=("parallel",),
            vmem_limit_bytes=vmem_limit),
    )(q2, qp2, f2, fp2, m3, hsel, *weights)

    # (nq, b*dq): column (i*bt + bi)*dq + c of grid block i is batch i*bt + bi
    return out2.reshape(nq, b, dq)


def _reference(queries, query_pos, features, feature_pos, mask, p, num_heads,
               mm_dtype=jnp.float32):
    """Pure-JAX reference mirroring the PyTorch module (post-norm, no dropout,
    per-head softmax stabilization exactly as torch MultiheadAttention).
    `mm_dtype` casts matmul operands (e.g. bf16) to mirror the kernel's MXU
    precision; all other math stays f32."""
    cast = lambda x: x.astype(mm_dtype)
    mm = lambda a, w: jnp.dot(cast(a), cast(w), preferred_element_type=jnp.float32)

    q = jnp.transpose(queries, (1, 0, 2)).astype(jnp.float32)
    qp = jnp.transpose(query_pos, (1, 0, 2)).astype(jnp.float32)
    f = jnp.transpose(features, (1, 0, 2)).astype(jnp.float32)
    fp = jnp.transpose(feature_pos, (1, 0, 2)).astype(jnp.float32)
    B, Nq, Dq = q.shape
    Nk = f.shape[1]
    hd = Dq // num_heads
    scale = 1.0 / float(hd) ** 0.5

    mem = mm(f, p['wfe']) + p['bfe']
    Q = mm(q + qp, p['wq']) + p['bq']
    K = mm(mem + fp, p['wk']) + p['bk']
    V = mm(mem, p['wv']) + p['bv']
    Qh = Q.reshape(B, Nq, num_heads, hd).transpose(0, 2, 1, 3)
    Kh = K.reshape(B, Nk, num_heads, hd).transpose(0, 2, 1, 3)
    Vh = V.reshape(B, Nk, num_heads, hd).transpose(0, 2, 1, 3)
    s = jnp.einsum('bhqd,bhkd->bhqk', cast(Qh), cast(Kh),
                   preferred_element_type=jnp.float32) * scale
    s = s + mask.reshape(B, num_heads, Nq, Nk)
    m = jnp.max(s, axis=-1, keepdims=True)        # per-head max (torch-faithful)
    pe = jnp.exp(s - m)
    pec = cast(pe)
    denom = jnp.sum(pec.astype(jnp.float32), axis=-1, keepdims=True)
    ctx = jnp.einsum('bhqk,bhkd->bhqd', pec, cast(Vh),
                     preferred_element_type=jnp.float32) / denom
    ctx = ctx.transpose(0, 2, 1, 3).reshape(B, Nq, Dq)
    attn = mm(ctx, p['wo']) + p['bo']
    tgt = _layer_norm(q + attn, p['g1'], p['bn1'])
    h1 = jax.nn.relu(mm(tgt, p['w1']) + p['b1'])
    out = _layer_norm(tgt + mm(h1, p['w2']) + p['b2'], p['g2'], p['bn2'])
    return jnp.transpose(out, (1, 0, 2))


def _init_params(key, feature_dim, query_dim, dim_feedforward):
    ks = jax.random.split(key, 12)
    n = lambda k, shp, s=0.1: (jax.random.normal(k, shp, jnp.float32) * s)
    # Linear weights stored already transposed to (in, out): y = x @ W + b
    return {
        'wfe': n(ks[0], (feature_dim, query_dim)),
        'bfe': n(ks[1], (1, query_dim), 0.01),
        'wq': n(ks[2], (query_dim, query_dim)),
        'bq': n(ks[3], (1, query_dim), 0.01),
        'wk': n(ks[4], (query_dim, query_dim)),
        'bk': n(ks[5], (1, query_dim), 0.01),
        'wv': n(ks[6], (query_dim, query_dim)),
        'bv': n(ks[7], (1, query_dim), 0.01),
        'wo': n(ks[8], (query_dim, query_dim)),
        'bo': n(ks[9], (1, query_dim), 0.01),
        'g1': jnp.ones((1, query_dim), jnp.float32),
        'bn1': jnp.zeros((1, query_dim), jnp.float32),
        'w1': n(ks[10], (query_dim, dim_feedforward)),
        'b1': jnp.zeros((1, dim_feedforward), jnp.float32),
        'w2': n(ks[11], (dim_feedforward, query_dim)),
        'b2': jnp.zeros((1, query_dim), jnp.float32),
        'g2': jnp.ones((1, query_dim), jnp.float32),
        'bn2': jnp.zeros((1, query_dim), jnp.float32),
    }


if __name__ == "__main__":
    B, H = 8, 8
    Nq, Nk = 16, 32
    feature_dim, query_dim, dim_feedforward = 16, 32, 64

    key = jax.random.PRNGKey(0)
    kq, kqp, kf, kfp, km, kp = jax.random.split(key, 6)

    queries = jax.random.normal(kq, (Nq, B, query_dim), jnp.float32)
    query_pos = jax.random.normal(kqp, (Nq, B, query_dim), jnp.float32)
    features = jax.random.normal(kf, (Nk, B, feature_dim), jnp.float32)
    feature_pos = jax.random.normal(kfp, (Nk, B, query_dim), jnp.float32)

    # additive attention mask (B*H, Nq, Nk); ~30% masked, first key always visible
    mask = jnp.where(jax.random.uniform(km, (B * H, Nq, Nk)) < 0.3, -1e9, 0.0)
    mask = mask.at[:, :, 0].set(0.0).astype(jnp.float32)

    params = _init_params(kp, feature_dim, query_dim, dim_feedforward)

    out = sparse_to_dense_interpolator(queries, query_pos, features,
                                       feature_pos, mask, params, num_heads=H)
    out = jax.block_until_ready(out)

    # reference with the same bf16-matmul / f32-accumulate precision as the kernel
    ref = _reference(queries, query_pos, features, feature_pos, mask, params, H,
                     mm_dtype=jnp.bfloat16)
    assert out.shape == (Nq, B, query_dim)
    err = float(jnp.max(jnp.abs(out - ref)))
    assert jnp.allclose(out, ref, atol=3e-2, rtol=3e-2), f"max abs err {err}"

    print("KERNEL_OK")
</pallas_src>

<mosaic_0001>
module attributes {stable_mosaic.version = 11 : i64} {
  func.func @_interp_kernel(%arg0: i32, %arg1: memref<128x32xf32, #tpu.memory_space<vmem>>, %arg2: memref<128x32xf32, #tpu.memory_space<vmem>>, %arg3: memref<256x16xf32, #tpu.memory_space<vmem>>, %arg4: memref<256x32xf32, #tpu.memory_space<vmem>>, %arg5: memref<8x16x256xbf16, #tpu.memory_space<vmem>>, %arg6: memref<256x32xbf16, #tpu.memory_space<vmem>>, %arg7: memref<16x32xbf16, #tpu.memory_space<vmem>>, %arg8: memref<1x32xf32, #tpu.memory_space<vmem>>, %arg9: memref<32x32xbf16, #tpu.memory_space<vmem>>, %arg10: memref<1x32xf32, #tpu.memory_space<vmem>>, %arg11: memref<32x32xbf16, #tpu.memory_space<vmem>>, %arg12: memref<1x32xf32, #tpu.memory_space<vmem>>, %arg13: memref<32x32xbf16, #tpu.memory_space<vmem>>, %arg14: memref<1x32xf32, #tpu.memory_space<vmem>>, %arg15: memref<32x32xbf16, #tpu.memory_space<vmem>>, %arg16: memref<1x32xf32, #tpu.memory_space<vmem>>, %arg17: memref<1x32xf32, #tpu.memory_space<vmem>>, %arg18: memref<1x32xf32, #tpu.memory_space<vmem>>, %arg19: memref<32x64xbf16, #tpu.memory_space<vmem>>, %arg20: memref<1x64xf32, #tpu.memory_space<vmem>>, %arg21: memref<64x32xbf16, #tpu.memory_space<vmem>>, %arg22: memref<1x32xf32, #tpu.memory_space<vmem>>, %arg23: memref<1x32xf32, #tpu.memory_space<vmem>>, %arg24: memref<1x32xf32, #tpu.memory_space<vmem>>, %arg25: memref<16x256xf32, #tpu.memory_space<vmem>>) attributes {dimension_semantics = [#tpu.dimension_semantics<parallel>], iteration_bounds = array<i64: 1>, scalar_prefetch = 0 : i64, scratch_operands = 0 : i64, tpu.core_type = #tpu.core_type<tc>, window_params = [{transform_indices = @transform_0, window_bounds = array<i64: 128, 32>}, {transform_indices = @transform_1, window_bounds = array<i64: 128, 32>}, {transform_indices = @transform_2, window_bounds = array<i64: 256, 16>}, {transform_indices = @transform_3, window_bounds = array<i64: 256, 32>}, {transform_indices = @transform_4, window_bounds = array<i64: 8, 16, 256>}, {pipeline_mode = #tpu.pipeline_mode<synchronous>, transform_indices = @transform_5, window_bounds = array<i64: 256, 32>}, {pipeline_mode = #tpu.pipeline_mode<synchronous>, transform_indices = @transform_6, window_bounds = array<i64: 16, 32>}, {pipeline_mode = #tpu.pipeline_mode<synchronous>, transform_indices = @transform_7, window_bounds = array<i64: 1, 32>}, {pipeline_mode = #tpu.pipeline_mode<synchronous>, transform_indices = @transform_8, window_bounds = array<i64: 32, 32>}, {pipeline_mode = #tpu.pipeline_mode<synchronous>, transform_indices = @transform_9, window_bounds = array<i64: 1, 32>}, {pipeline_mode = #tpu.pipeline_mode<synchronous>, transform_indices = @transform_10, window_bounds = array<i64: 32, 32>}, {pipeline_mode = #tpu.pipeline_mode<synchronous>, transform_indices = @transform_11, window_bounds = array<i64: 1, 32>}, {pipeline_mode = #tpu.pipeline_mode<synchronous>, transform_indices = @transform_12, window_bounds = array<i64: 32, 32>}, {pipeline_mode = #tpu.pipeline_mode<synchronous>, transform_indices = @transform_13, window_bounds = array<i64: 1, 32>}, {pipeline_mode = #tpu.pipeline_mode<synchronous>, transform_indices = @transform_14, window_bounds = array<i64: 32, 32>}, {pipeline_mode = #tpu.pipeline_mode<synchronous>, transform_indices = @transform_15, window_bounds = array<i64: 1, 32>}, {pipeline_mode = #tpu.pipeline_mode<synchronous>, transform_indices = @transform_16, window_bounds = array<i64: 1, 32>}, {pipeline_mode = #tpu.pipeline_mode<synchronous>, transform_indices = @transform_17, window_bounds = array<i64: 1, 32>}, {pipeline_mode = #tpu.pipeline_mode<synchronous>, transform_indices = @transform_18, window_bounds = array<i64: 32, 64>}, {pipeline_mode = #tpu.pipeline_mode<synchronous>, transform_indices = @transform_19, window_bounds = array<i64: 1, 64>}, {pipeline_mode = #tpu.pipeline_mode<synchronous>, transform_indices = @transform_20, window_bounds = array<i64: 64, 32>}, {pipeline_mode = #tpu.pipeline_mode<synchronous>, transform_indices = @transform_21, window_bounds = array<i64: 1, 32>}, {pipeline_mode = #tpu.pipeline_mode<synchronous>, transform_indices = @transform_22, window_bounds = array<i64: 1, 32>}, {pipeline_mode = #tpu.pipeline_mode<synchronous>, transform_indices = @transform_23, window_bounds = array<i64: 1, 32>}, {transform_indices = @transform_24, window_bounds = array<i64: 16, 256>}]} {
    %c0 = arith.constant 0 : index
    %c0_0 = arith.constant 0 : index
    %0 = vector.load %arg1[%c0, %c0_0] : memref<128x32xf32, #tpu.memory_space<vmem>>, vector<128x32xf32>
    %c0_1 = arith.constant 0 : index
    %c0_2 = arith.constant 0 : index
    %1 = vector.load %arg2[%c0_1, %c0_2] : memref<128x32xf32, #tpu.memory_space<vmem>>, vector<128x32xf32>
    %c0_3 = arith.constant 0 : index
    %c0_4 = arith.constant 0 : index
    %2 = vector.load %arg4[%c0_3, %c0_4] : memref<256x32xf32, #tpu.memory_space<vmem>>, vector<256x32xf32>
    %c0_5 = arith.constant 0 : index
    %c0_6 = arith.constant 0 : index
    %3 = vector.load %arg6[%c0_5, %c0_6] : memref<256x32xbf16, #tpu.memory_space<vmem>>, vector<256x32xbf16>
    %c0_7 = arith.constant 0 : index
    %c0_8 = arith.constant 0 : index
    %4 = vector.load %arg3[%c0_7, %c0_8] : memref<256x16xf32, #tpu.memory_space<vmem>>, vector<256x16xf32>
    %5 = arith.truncf %4 : vector<256x16xf32> to vector<256x16xbf16>
    %c0_9 = arith.constant 0 : index
    %c0_10 = arith.constant 0 : index
    %6 = vector.load %arg7[%c0_9, %c0_10] : memref<16x32xbf16, #tpu.memory_space<vmem>>, vector<16x32xbf16>
    %cst = arith.constant dense<0.000000e+00> : vector<256x32xf32>
    %7 = tpu.matmul %5, %6, %cst {dimension_numbers = #tpu.dot_dimension_numbers<[1], [0], [0], [1], [0, 0, 1, 1], [], []>} : vector<256x16xbf16>, vector<16x32xbf16>, vector<256x32xf32> -> vector<256x32xf32>
    %c0_11 = arith.constant 0 : index
    %c0_12 = arith.constant 0 : index
    %8 = vector.load %arg8[%c0_11, %c0_12] : memref<1x32xf32, #tpu.memory_space<vmem>>, vector<1x32xf32>
    %9 = vector.broadcast %8 : vector<1x32xf32> to vector<256x32xf32>
    %10 = arith.addf %7, %9 : vector<256x32xf32>
    %11 = arith.addf %0, %1 : vector<128x32xf32>
    %12 = arith.truncf %11 : vector<128x32xf32> to vector<128x32xbf16>
    %c0_13 = arith.constant 0 : index
    %c0_14 = arith.constant 0 : index
    %13 = vector.load %arg9[%c0_13, %c0_14] : memref<32x32xbf16, #tpu.memory_space<vmem>>, vector<32x32xbf16>
    %cst_15 = arith.constant dense<0.000000e+00> : vector<128x32xf32>
    %14 = tpu.matmul %12, %13, %cst_15 {dimension_numbers = #tpu.dot_dimension_numbers<[1], [0], [0], [1], [0, 0, 1, 1], [], []>} : vector<128x32xbf16>, vector<32x32xbf16>, vector<128x32xf32> -> vector<128x32xf32>
    %c0_16 = arith.constant 0 : index
    %c0_17 = arith.constant 0 : index
    %15 = vector.load %arg10[%c0_16, %c0_17] : memref<1x32xf32, #tpu.memory_space<vmem>>, vector<1x32xf32>
    %16 = vector.broadcast %15 : vector<1x32xf32> to vector<128x32xf32>
    %17 = arith.addf %14, %16 : vector<128x32xf32>
    %18 = arith.addf %10, %2 : vector<256x32xf32>
    %19 = arith.truncf %18 : vector<256x32xf32> to vector<256x32xbf16>
    %c0_18 = arith.constant 0 : index
    %c0_19 = arith.constant 0 : index
    %20 = vector.load %arg11[%c0_18, %c0_19] : memref<32x32xbf16, #tpu.memory_space<vmem>>, vector<32x32xbf16>
    %cst_20 = arith.constant dense<0.000000e+00> : vector<256x32xf32>
    %21 = tpu.matmul %19, %20, %cst_20 {dimension_numbers = #tpu.dot_dimension_numbers<[1], [0], [0], [1], [0, 0, 1, 1], [], []>} : vector<256x32xbf16>, vector<32x32xbf16>, vector<256x32xf32> -> vector<256x32xf32>
    %c0_21 = arith.constant 0 : index
    %c0_22 = arith.constant 0 : index
    %22 = vector.load %arg12[%c0_21, %c0_22] : memref<1x32xf32, #tpu.memory_space<vmem>>, vector<1x32xf32>
    %23 = vector.broadcast %22 : vector<1x32xf32> to vector<256x32xf32>
    %24 = arith.addf %21, %23 : vector<256x32xf32>
    %25 = arith.truncf %10 : vector<256x32xf32> to vector<256x32xbf16>
    %c0_23 = arith.constant 0 : index
    %c0_24 = arith.constant 0 : index
    %26 = vector.load %arg13[%c0_23, %c0_24] : memref<32x32xbf16, #tpu.memory_space<vmem>>, vector<32x32xbf16>
    %cst_25 = arith.constant dense<0.000000e+00> : vector<256x32xf32>
    %27 = tpu.matmul %25, %26, %cst_25 {dimension_numbers = #tpu.dot_dimension_numbers<[1], [0], [0], [1], [0, 0, 1, 1], [], []>} : vector<256x32xbf16>, vector<32x32xbf16>, vector<256x32xf32> -> vector<256x32xf32>
    %c0_26 = arith.constant 0 : index
    %c0_27 = arith.constant 0 : index
    %28 = vector.load %arg14[%c0_26, %c0_27] : memref<1x32xf32, #tpu.memory_space<vmem>>, vector<1x32xf32>
    %29 = vector.broadcast %28 : vector<1x32xf32> to vector<256x32xf32>
    %30 = arith.addf %27, %29 : vector<256x32xf32>
    %31 = arith.truncf %17 : vector<128x32xf32> to vector<128x32xbf16>
    %32 = arith.truncf %24 : vector<256x32xf32> to vector<256x32xbf16>
    %33 = arith.truncf %30 : vector<256x32xf32> to vector<256x32xbf16>
    %34 = vector.extract_strided_slice %31 {offsets = [0, 0], sizes = [16, 32], strides = [1, 1]} : vector<128x32xbf16> to vector<16x32xbf16>
    %35 = vector.extract_strided_slice %32 {offsets = [0, 0], sizes = [32, 32], strides = [1, 1]} : vector<256x32xbf16> to vector<32x32xbf16>
    %36 = vector.extract_strided_slice %33 {offsets = [0, 0], sizes = [32, 32], strides = [1, 1]} : vector<256x32xbf16> to vector<32x32xbf16>
    %37 = tpu.concatenate %35, %35, %35, %35, %35, %35, %35, %35 in 0 : vector<32x32xbf16>, vector<32x32xbf16>, vector<32x32xbf16>, vector<32x32xbf16>, vector<32x32xbf16>, vector<32x32xbf16>, vector<32x32xbf16>, vector<32x32xbf16> -> vector<256x32xbf16>
    %38 = arith.mulf %37, %3 : vector<256x32xbf16>
    %39 = tpu.concatenate %36, %36, %36, %36, %36, %36, %36, %36 in 0 : vector<32x32xbf16>, vector<32x32xbf16>, vector<32x32xbf16>, vector<32x32xbf16>, vector<32x32xbf16>, vector<32x32xbf16>, vector<32x32xbf16>, vector<32x32xbf16> -> vector<256x32xbf16>
    %40 = arith.mulf %39, %3 : vector<256x32xbf16>
    "tpu.trace_start"() <{level = 10 : i32, message = "qd,kd->qk"}> : () -> ()
    %cst_28 = arith.constant dense<0.000000e+00> : vector<16x256xf32>
    %41 = tpu.matmul %34, %38, %cst_28 {dimension_numbers = #tpu.dot_dimension_numbers<[1], [1], [0], [0], [0, 0, 1, 0], [], []>} : vector<16x32xbf16>, vector<256x32xbf16>, vector<16x256xf32> -> vector<16x256xf32>
    "tpu.trace_stop"() : () -> ()
    %cst_29 = arith.constant 5.000000e-01 : f32
    %42 = vector.broadcast %cst_29 : f32 to vector<16x256xf32>
    %43 = arith.mulf %41, %42 : vector<16x256xf32>
    %c0_30 = arith.constant 0 : index
    %c0_31 = arith.constant 0 : index
    %c0_32 = arith.constant 0 : index
    %44 = vector.load %arg5[%c0_30, %c0_31, %c0_32] : memref<8x16x256xbf16, #tpu.memory_space<vmem>>, vector<1x16x256xbf16>
    %45 = vector.shape_cast %44 : vector<1x16x256xbf16> to vector<16x256xbf16>
    %46 = arith.extf %45 : vector<16x256xbf16> to vector<16x256xf32>
    %47 = arith.addf %43, %46 : vector<16x256xf32>
    %48 = vector.extract_strided_slice %47 {offsets = [0, 0], sizes = [16, 32], strides = [1, 1]} : vector<16x256xf32> to vector<16x32xf32>
    %cst_33 = arith.constant dense<0xFF800000> : vector<16xf32>
    %49 = vector.multi_reduction <maximumf>, %48, %cst_33 [1] : vector<16x32xf32> to vector<16xf32>
    %50 = vector.shape_cast %49 : vector<16xf32> to vector<16x1xf32>
    %51 = vector.broadcast %50 : vector<16x1xf32> to vector<16x32xf32>
    %52 = arith.subf %48, %51 : vector<16x32xf32>
    %53 = math.exp %52 : vector<16x32xf32>
    %54 = vector.extract_strided_slice %47 {offsets = [0, 32], sizes = [16, 32], strides = [1, 1]} : vector<16x256xf32> to vector<16x32xf32>
    %cst_34 = arith.constant dense<0xFF800000> : vector<16xf32>
    %55 = vector.multi_reduction <maximumf>, %54, %cst_34 [1] : vector<16x32xf32> to vector<16xf32>
    %56 = vector.shape_cast %55 : vector<16xf32> to vector<16x1xf32>
    %57 = vector.broadcast %56 : vector<16x1xf32> to vector<16x32xf32>
    %58 = arith.subf %54, %57 : vector<16x32xf32>
    %59 = math.exp %58 : vector<16x32xf32>
    %60 = vector.extract_strided_slice %47 {offsets = [0, 64], sizes = [16, 32], strides = [1, 1]} : vector<16x256xf32> to vector<16x32xf32>
    %cst_35 = arith.constant dense<0xFF800000> : vector<16xf32>
    %61 = vector.multi_reduction <maximumf>, %60, %cst_35 [1] : vector<16x32xf32> to vector<16xf32>
    %62 = vector.shape_cast %61 : vector<16xf32> to vector<16x1xf32>
    %63 = vector.broadcast %62 : vector<16x1xf32> to vector<16x32xf32>
    %64 = arith.subf %60, %63 : vector<16x32xf32>
    %65 = math.exp %64 : vector<16x32xf32>
    %66 = vector.extract_strided_slice %47 {offsets = [0, 96], sizes = [16, 32], strides = [1, 1]} : vector<16x256xf32> to vector<16x32xf32>
    %cst_36 = arith.constant dense<0xFF800000> : vector<16xf32>
    %67 = vector.multi_reduction <maximumf>, %66, %cst_36 [1] : vector<16x32xf32> to vector<16xf32>
    %68 = vector.shape_cast %67 : vector<16xf32> to vector<16x1xf32>
    %69 = vector.broadcast %68 : vector<16x1xf32> to vector<16x32xf32>
    %70 = arith.subf %66, %69 : vector<16x32xf32>
    %71 = math.exp %70 : vector<16x32xf32>
    %72 = vector.extract_strided_slice %47 {offsets = [0, 128], sizes = [16, 32], strides = [1, 1]} : vector<16x256xf32> to vector<16x32xf32>
    %cst_37 = arith.constant dense<0xFF800000> : vector<16xf32>
    %73 = vector.multi_reduction <maximumf>, %72, %cst_37 [1] : vector<16x32xf32> to vector<16xf32>
    %74 = vector.shape_cast %73 : vector<16xf32> to vector<16x1xf32>
    %75 = vector.broadcast %74 : vector<16x1xf32> to vector<16x32xf32>
    %76 = arith.subf %72, %75 : vector<16x32xf32>
    %77 = math.exp %76 : vector<16x32xf32>
    %78 = vector.extract_strided_slice %47 {offsets = [0, 160], sizes = [16, 32], strides = [1, 1]} : vector<16x256xf32> to vector<16x32xf32>
    %cst_38 = arith.constant dense<0xFF800000> : vector<16xf32>
    %79 = vector.multi_reduction <maximumf>, %78, %cst_38 [1] : vector<16x32xf32> to vector<16xf32>
    %80 = vector.shape_cast %79 : vector<16xf32> to vector<16x1xf32>
    %81 = vector.broadcast %80 : vector<16x1xf32> to vector<16x32xf32>
    %82 = arith.subf %78, %81 : vector<16x32xf32>
    %83 = math.exp %82 : vector<16x32xf32>
    %84 = vector.extract_strided_slice %47 {offsets = [0, 192], sizes = [16, 32], strides = [1, 1]} : vector<16x256xf32> to vector<16x32xf32>
    %cst_39 = arith.constant dense<0xFF800000> : vector<16xf32>
    %85 = vector.multi_reduction <maximumf>, %84, %cst_39 [1] : vector<16x32xf32> to vector<16xf32>
    %86 = vector.shape_cast %85 : vector<16xf32> to vector<16x1xf32>
    %87 = vector.broadcast %86 : vector<16x1xf32> to vector<16x32xf32>
    %88 = arith.subf %84, %87 : vector<16x32xf32>
    %89 = math.exp %88 : vector<16x32xf32>
    %90 = vector.extract_strided_slice %47 {offsets = [0, 224], sizes = [16, 32], strides = [1, 1]} : vector<16x256xf32> to vector<16x32xf32>
    %cst_40 = arith.constant dense<0xFF800000> : vector<16xf32>
    %91 = vector.multi_reduction <maximumf>, %90, %cst_40 [1] : vector<16x32xf32> to vector<16xf32>
    %92 = vector.shape_cast %91 : vector<16xf32> to vector<16x1xf32>
    %93 = vector.broadcast %92 : vector<16x1xf32> to vector<16x32xf32>
    %94 = arith.subf %90, %93 : vector<16x32xf32>
    %95 = math.exp %94 : vector<16x32xf32>
    %96 = tpu.concatenate %53, %59, %65, %71, %77, %83, %89, %95 in 1 : vector<16x32xf32>, vector<16x32xf32>, vector<16x32xf32>, vector<16x32xf32>, vector<16x32xf32>, vector<16x32xf32>, vector<16x32xf32>, vector<16x32xf32> -> vector<16x256xf32>
    %97 = arith.truncf %96 : vector<16x256xf32> to vector<16x256xbf16>
    %cst_41 = arith.constant dense<0.000000e+00> : vector<16x32xf32>
    %98 = tpu.matmul %97, %40, %cst_41 {dimension_numbers = #tpu.dot_dimension_numbers<[1], [0], [0], [1], [0, 0, 1, 1], [], []>} : vector<16x256xbf16>, vector<256x32xbf16>, vector<16x32xf32> -> vector<16x32xf32>
    %cst_42 = arith.constant dense<0.000000e+00> : vector<16x32xf32>
    %99 = tpu.matmul %97, %3, %cst_42 {dimension_numbers = #tpu.dot_dimension_numbers<[1], [0], [0], [1], [0, 0, 1, 1], [], []>} : vector<16x256xbf16>, vector<256x32xbf16>, vector<16x32xf32> -> vector<16x32xf32>
    %100 = tpu.reciprocal %99 : vector<16x32xf32> -> vector<16x32xf32>
    %101 = arith.mulf %98, %100 : vector<16x32xf32>
    %102 = vector.extract_strided_slice %31 {offsets = [16, 0], sizes = [16, 32], strides = [1, 1]} : vector<128x32xbf16> to vector<16x32xbf16>
    %103 = vector.extract_strided_slice %32 {offsets = [32, 0], sizes = [32, 32], strides = [1, 1]} : vector<256x32xbf16> to vector<32x32xbf16>
    %104 = vector.extract_strided_slice %33 {offsets = [32, 0], sizes = [32, 32], strides = [1, 1]} : vector<256x32xbf16> to vector<32x32xbf16>
    %105 = tpu.concatenate %103, %103, %103, %103, %103, %103, %103, %103 in 0 : vector<32x32xbf16>, vector<32x32xbf16>, vector<32x32xbf16>, vector<32x32xbf16>, vector<32x32xbf16>, vector<32x32xbf16>, vector<32x32xbf16>, vector<32x32xbf16> -> vector<256x32xbf16>
    %106 = arith.mulf %105, %3 : vector<256x32xbf16>
    %107 = tpu.concatenate %104, %104, %104, %104, %104, %104, %104, %104 in 0 : vector<32x32xbf16>, vector<32x32xbf16>, vector<32x32xbf16>, vector<32x32xbf16>, vector<32x32xbf16>, vector<32x32xbf16>, vector<32x32xbf16>, vector<32x32xbf16> -> vector<256x32xbf16>
    %108 = arith.mulf %107, %3 : vector<256x32xbf16>
    "tpu.trace_start"() <{level = 10 : i32, message = "qd,kd->qk"}> : () -> ()
    %cst_43 = arith.constant dense<0.000000e+00> : vector<16x256xf32>
    %109 = tpu.matmul %102, %106, %cst_43 {dimension_numbers = #tpu.dot_dimension_numbers<[1], [1], [0], [0], [0, 0, 1, 0], [], []>} : vector<16x32xbf16>, vector<256x32xbf16>, vector<16x256xf32> -> vector<16x256xf32>
    "tpu.trace_stop"() : () -> ()
    %cst_44 = arith.constant 5.000000e-01 : f32
    %110 = vector.broadcast %cst_44 : f32 to vector<16x256xf32>
    %111 = arith.mulf %109, %110 : vector<16x256xf32>
    %c1 = arith.constant 1 : index
    %c0_45 = arith.constant 0 : index
    %c0_46 = arith.constant 0 : index
    %112 = vector.load %arg5[%c1, %c0_45, %c0_46] : memref<8x16x256xbf16, #tpu.memory_space<vmem>>, vector<1x16x256xbf16>
    %113 = vector.shape_cast %112 : vector<1x16x256xbf16> to vector<16x256xbf16>
    %114 = arith.extf %113 : vector<16x256xbf16> to vector<16x256xf32>
    %115 = arith.addf %111, %114 : vector<16x256xf32>
    %116 = vector.extract_strided_slice %115 {offsets = [0, 0], sizes = [16, 32], strides = [1, 1]} : vector<16x256xf32> to vector<16x32xf32>
    %cst_47 = arith.constant dense<0xFF800000> : vector<16xf32>
    %117 = vector.multi_reduction <maximumf>, %116, %cst_47 [1] : vector<16x32xf32> to vector<16xf32>
    %118 = vector.shape_cast %117 : vector<16xf32> to vector<16x1xf32>
    %119 = vector.broadcast %118 : vector<16x1xf32> to vector<16x32xf32>
    %120 = arith.subf %116, %119 : vector<16x32xf32>
    %121 = math.exp %120 : vector<16x32xf32>
    %122 = vector.extract_strided_slice %115 {offsets = [0, 32], sizes = [16, 32], strides = [1, 1]} : vector<16x256xf32> to vector<16x32xf32>
    %cst_48 = arith.constant dense<0xFF800000> : vector<16xf32>
    %123 = vector.multi_reduction <maximumf>, %122, %cst_48 [1] : vector<16x32xf32> to vector<16xf32>
    %124 = vector.shape_cast %123 : vector<16xf32> to vector<16x1xf32>
    %125 = vector.broadcast %124 : vector<16x1xf32> to vector<16x32xf32>
    %126 = arith.subf %122, %125 : vector<16x32xf32>
    %127 = math.exp %126 : vector<16x32xf32>
    %128 = vector.extract_strided_slice %115 {offsets = [0, 64], sizes = [16, 32], strides = [1, 1]} : vector<16x256xf32> to vector<16x32xf32>
    %cst_49 = arith.constant dense<0xFF800000> : vector<16xf32>
    %129 = vector.multi_reduction <maximumf>, %128, %cst_49 [1] : vector<16x32xf32> to vector<16xf32>
    %130 = vector.shape_cast %129 : vector<16xf32> to vector<16x1xf32>
    %131 = vector.broadcast %130 : vector<16x1xf32> to vector<16x32xf32>
    %132 = arith.subf %128, %131 : vector<16x32xf32>
    %133 = math.exp %132 : vector<16x32xf32>
    %134 = vector.extract_strided_slice %115 {offsets = [0, 96], sizes = [16, 32], strides = [1, 1]} : vector<16x256xf32> to vector<16x32xf32>
    %cst_50 = arith.constant dense<0xFF800000> : vector<16xf32>
    %135 = vector.multi_reduction <maximumf>, %134, %cst_50 [1] : vector<16x32xf32> to vector<16xf32>
    %136 = vector.shape_cast %135 : vector<16xf32> to vector<16x1xf32>
    %137 = vector.broadcast %136 : vector<16x1xf32> to vector<16x32xf32>
    %138 = arith.subf %134, %137 : vector<16x32xf32>
    %139 = math.exp %138 : vector<16x32xf32>
    %140 = vector.extract_strided_slice %115 {offsets = [0, 128], sizes = [16, 32], strides = [1, 1]} : vector<16x256xf32> to vector<16x32xf32>
    %cst_51 = arith.constant dense<0xFF800000> : vector<16xf32>
    %141 = vector.multi_reduction <maximumf>, %140, %cst_51 [1] : vector<16x32xf32> to vector<16xf32>
    %142 = vector.shape_cast %141 : vector<16xf32> to vector<16x1xf32>
    %143 = vector.broadcast %142 : vector<16x1xf32> to vector<16x32xf32>
    %144 = arith.subf %140, %143 : vector<16x32xf32>
    %145 = math.exp %144 : vector<16x32xf32>
    %146 = vector.extract_strided_slice %115 {offsets = [0, 160], sizes = [16, 32], strides = [1, 1]} : vector<16x256xf32> to vector<16x32xf32>
    %cst_52 = arith.constant dense<0xFF800000> : vector<16xf32>
    %147 = vector.multi_reduction <maximumf>, %146, %cst_52 [1] : vector<16x32xf32> to vector<16xf32>
    %148 = vector.shape_cast %147 : vector<16xf32> to vector<16x1xf32>
    %149 = vector.broadcast %148 : vector<16x1xf32> to vector<16x32xf32>
    %150 = arith.subf %146, %149 : vector<16x32xf32>
    %151 = math.exp %150 : vector<16x32xf32>
    %152 = vector.extract_strided_slice %115 {offsets = [0, 192], sizes = [16, 32], strides = [1, 1]} : vector<16x256xf32> to vector<16x32xf32>
    %cst_53 = arith.constant dense<0xFF800000> : vector<16xf32>
    %153 = vector.multi_reduction <maximumf>, %152, %cst_53 [1] : vector<16x32xf32> to vector<16xf32>
    %154 = vector.shape_cast %153 : vector<16xf32> to vector<16x1xf32>
    %155 = vector.broadcast %154 : vector<16x1xf32> to vector<16x32xf32>
    %156 = arith.subf %152, %155 : vector<16x32xf32>
    %157 = math.exp %156 : vector<16x32xf32>
    %158 = vector.extract_strided_slice %115 {offsets = [0, 224], sizes = [16, 32], strides = [1, 1]} : vector<16x256xf32> to vector<16x32xf32>
    %cst_54 = arith.constant dense<0xFF800000> : vector<16xf32>
    %159 = vector.multi_reduction <maximumf>, %158, %cst_54 [1] : vector<16x32xf32> to vector<16xf32>
    %160 = vector.shape_cast %159 : vector<16xf32> to vector<16x1xf32>
    %161 = vector.broadcast %160 : vector<16x1xf32> to vector<16x32xf32>
    %162 = arith.subf %158, %161 : vector<16x32xf32>
    %163 = math.exp %162 : vector<16x32xf32>
    %164 = tpu.concatenate %121, %127, %133, %139, %145, %151, %157, %163 in 1 : vector<16x32xf32>, vector<16x32xf32>, vector<16x32xf32>, vector<16x32xf32>, vector<16x32xf32>, vector<16x32xf32>, vector<16x32xf32>, vector<16x32xf32> -> vector<16x256xf32>
    %165 = arith.truncf %164 : vector<16x256xf32> to vector<16x256xbf16>
    %cst_55 = arith.constant dense<0.000000e+00> : vector<16x32xf32>
    %166 = tpu.matmul %165, %108, %cst_55 {dimension_numbers = #tpu.dot_dimension_numbers<[1], [0], [0], [1], [0, 0, 1, 1], [], []>} : vector<16x256xbf16>, vector<256x32xbf16>, vector<16x32xf32> -> vector<16x32xf32>
    %cst_56 = arith.constant dense<0.000000e+00> : vector<16x32xf32>
    %167 = tpu.matmul %165, %3, %cst_56 {dimension_numbers = #tpu.dot_dimension_numbers<[1], [0], [0], [1], [0, 0, 1, 1], [], []>} : vector<16x256xbf16>, vector<256x32xbf16>, vector<16x32xf32> -> vector<16x32xf32>
    %168 = tpu.reciprocal %167 : vector<16x32xf32> -> vector<16x32xf32>
    %169 = arith.mulf %166, %168 : vector<16x32xf32>
    %170 = vector.extract_strided_slice %31 {offsets = [32, 0], sizes = [16, 32], strides = [1, 1]} : vector<128x32xbf16> to vector<16x32xbf16>
    %171 = vector.extract_strided_slice %32 {offsets = [64, 0], sizes = [32, 32], strides = [1, 1]} : vector<256x32xbf16> to vector<32x32xbf16>
    %172 = vector.extract_strided_slice %33 {offsets = [64, 0], sizes = [32, 32], strides = [1, 1]} : vector<256x32xbf16> to vector<32x32xbf16>
    %173 = tpu.concatenate %171, %171, %171, %171, %171, %171, %171, %171 in 0 : vector<32x32xbf16>, vector<32x32xbf16>, vector<32x32xbf16>, vector<32x32xbf16>, vector<32x32xbf16>, vector<32x32xbf16>, vector<32x32xbf16>, vector<32x32xbf16> -> vector<256x32xbf16>
    %174 = arith.mulf %173, %3 : vector<256x32xbf16>
    %175 = tpu.concatenate %172, %172, %172, %172, %172, %172, %172, %172 in 0 : vector<32x32xbf16>, vector<32x32xbf16>, vector<32x32xbf16>, vector<32x32xbf16>, vector<32x32xbf16>, vector<32x32xbf16>, vector<32x32xbf16>, vector<32x32xbf16> -> vector<256x32xbf16>
    %176 = arith.mulf %175, %3 : vector<256x32xbf16>
    "tpu.trace_start"() <{level = 10 : i32, message = "qd,kd->qk"}> : () -> ()
    %cst_57 = arith.constant dense<0.000000e+00> : vector<16x256xf32>
    %177 = tpu.matmul %170, %174, %cst_57 {dimension_numbers = #tpu.dot_dimension_numbers<[1], [1], [0], [0], [0, 0, 1, 0], [], []>} : vector<16x32xbf16>, vector<256x32xbf16>, vector<16x256xf32> -> vector<16x256xf32>
    "tpu.trace_stop"() : () -> ()
    %cst_58 = arith.constant 5.000000e-01 : f32
    %178 = vector.broadcast %cst_58 : f32 to vector<16x256xf32>
    %179 = arith.mulf %177, %178 : vector<16x256xf32>
    %c2 = arith.constant 2 : index
    %c0_59 = arith.constant 0 : index
    %c0_60 = arith.constant 0 : index
    %180 = vector.load %arg5[%c2, %c0_59, %c0_60] : memref<8x16x256xbf16, #tpu.memory_space<vmem>>, vector<1x16x256xbf16>
    %181 = vector.shape_cast %180 : vector<1x16x256xbf16> to vector<16x256xbf16>
    %182 = arith.extf %181 : vector<16x256xbf16> to vector<16x256xf32>
    %183 = arith.addf %179, %182 : vector<16x256xf32>
    %184 = vector.extract_strided_slice %183 {offsets = [0, 0], sizes = [16, 32], strides = [1, 1]} : vector<16x256xf32> to vector<16x32xf32>
    %cst_61 = arith.constant dense<0xFF800000> : vector<16xf32>
    %185 = vector.multi_reduction <maximumf>, %184, %cst_61 [1] : vector<16x32xf32> to vector<16xf32>
    %186 = vector.shape_cast %185 : vector<16xf32> to vector<16x1xf32>
    %187 = vector.broadcast %186 : vector<16x1xf32> to vector<16x32xf32>
    %188 = arith.subf %184, %187 : vector<16x32xf32>
    %189 = math.exp %188 : vector<16x32xf32>
    %190 = vector.extract_strided_slice %183 {offsets = [0, 32], sizes = [16, 32], strides = [1, 1]} : vector<16x256xf32> to vector<16x32xf32>
    %cst_62 = arith.constant dense<0xFF800000> : vector<16xf32>
    %191 = vector.multi_reduction <maximumf>, %190, %cst_62 [1] : vector<16x32xf32> to vector<16xf32>
    %192 = vector.shape_cast %191 : vector<16xf32> to vector<16x1xf32>
    %193 = vector.broadcast %192 : vector<16x1xf32> to vector<16x32xf32>
    %194 = arith.subf %190, %193 : vector<16x32xf32>
    %195 = math.exp %194 : vector<16x32xf32>
    %196 = vector.extract_strided_slice %183 {offsets = [0, 64], sizes = [16, 32], strides = [1, 1]} : vector<16x256xf32> to vector<16x32xf32>
    %cst_63 = arith.constant dense<0xFF800000> : vector<16xf32>
    %197 = vector.multi_reduction <maximumf>, %196, %cst_63 [1] : vector<16x32xf32> to vector<16xf32>
    %198 = vector.shape_cast %197 : vector<16xf32> to vector<16x1xf32>
    %199 = vector.broadcast %198 : vector<16x1xf32> to vector<16x32xf32>
    %200 = arith.subf %196, %199 : vector<16x32xf32>
    %201 = math.exp %200 : vector<16x32xf32>
    %202 = vector.extract_strided_slice %183 {offsets = [0, 96], sizes = [16, 32], strides = [1, 1]} : vector<16x256xf32> to vector<16x32xf32>
    %cst_64 = arith.constant dense<0xFF800000> : vector<16xf32>
    %203 = vector.multi_reduction <maximumf>, %202, %cst_64 [1] : vector<16x32xf32> to vector<16xf32>
    %204 = vector.shape_cast %203 : vector<16xf32> to vector<16x1xf32>
    %205 = vector.broadcast %204 : vector<16x1xf32> to vector<16x32xf32>
    %206 = arith.subf %202, %205 : vector<16x32xf32>
    %207 = math.exp %206 : vector<16x32xf32>
    %208 = vector.extract_strided_slice %183 {offsets = [0, 128], sizes = [16, 32], strides = [1, 1]} : vector<16x256xf32> to vector<16x32xf32>
    %cst_65 = arith.constant dense<0xFF800000> : vector<16xf32>
    %209 = vector.multi_reduction <maximumf>, %208, %cst_65 [1] : vector<16x32xf32> to vector<16xf32>
    %210 = vector.shape_cast %209 : vector<16xf32> to vector<16x1xf32>
    %211 = vector.broadcast %210 : vector<16x1xf32> to vector<16x32xf32>
    %212 = arith.subf %208, %211 : vector<16x32xf32>
    %213 = math.exp %212 : vector<16x32xf32>
    %214 = vector.extract_strided_slice %183 {offsets = [0, 160], sizes = [16, 32], strides = [1, 1]} : vector<16x256xf32> to vector<16x32xf32>
    %cst_66 = arith.constant dense<0xFF800000> : vector<16xf32>
    %215 = vector.multi_reduction <maximumf>, %214, %cst_66 [1] : vector<16x32xf32> to vector<16xf32>
    %216 = vector.shape_cast %215 : vector<16xf32> to vector<16x1xf32>
    %217 = vector.broadcast %216 : vector<16x1xf32> to vector<16x32xf32>
    %218 = arith.subf %214, %217 : vector<16x32xf32>
    %219 = math.exp %218 : vector<16x32xf32>
    %220 = vector.extract_strided_slice %183 {offsets = [0, 192], sizes = [16, 32], strides = [1, 1]} : vector<16x256xf32> to vector<16x32xf32>
    %cst_67 = arith.constant dense<0xFF800000> : vector<16xf32>
    %221 = vector.multi_reduction <maximumf>, %220, %cst_67 [1] : vector<16x32xf32> to vector<16xf32>
    %222 = vector.shape_cast %221 : vector<16xf32> to vector<16x1xf32>
    %223 = vector.broadcast %222 : vector<16x1xf32> to vector<16x32xf32>
    %224 = arith.subf %220, %223 : vector<16x32xf32>
    %225 = math.exp %224 : vector<16x32xf32>
    %226 = vector.extract_strided_slice %183 {offsets = [0, 224], sizes = [16, 32], strides = [1, 1]} : vector<16x256xf32> to vector<16x32xf32>
    %cst_68 = arith.constant dense<0xFF800000> : vector<16xf32>
    %227 = vector.multi_reduction <maximumf>, %226, %cst_68 [1] : vector<16x32xf32> to vector<16xf32>
    %228 = vector.shape_cast %227 : vector<16xf32> to vector<16x1xf32>
    %229 = vector.broadcast %228 : vector<16x1xf32> to vector<16x32xf32>
    %230 = arith.subf %226, %229 : vector<16x32xf32>
    %231 = math.exp %230 : vector<16x32xf32>
    %232 = tpu.concatenate %189, %195, %201, %207, %213, %219, %225, %231 in 1 : vector<16x32xf32>, vector<16x32xf32>, vector<16x32xf32>, vector<16x32xf32>, vector<16x32xf32>, vector<16x32xf32>, vector<16x32xf32>, vector<16x32xf32> -> vector<16x256xf32>
    %233 = arith.truncf %232 : vector<16x256xf32> to vector<16x256xbf16>
    %cst_69 = arith.constant dense<0.000000e+00> : vector<16x32xf32>
    %234 = tpu.matmul %233, %176, %cst_69 {dimension_numbers = #tpu.dot_dimension_numbers<[1], [0], [0], [1], [0, 0, 1, 1], [], []>} : vector<16x256xbf16>, vector<256x32xbf16>, vector<16x32xf32> -> vector<16x32xf32>
    %cst_70 = arith.constant dense<0.000000e+00> : vector<16x32xf32>
    %235 = tpu.matmul %233, %3, %cst_70 {dimension_numbers = #tpu.dot_dimension_numbers<[1], [0], [0], [1], [0, 0, 1, 1], [], []>} : vector<16x256xbf16>, vector<256x32xbf16>, vector<16x32xf32> -> vector<16x32xf32>
    %236 = tpu.reciprocal %235 : vector<16x32xf32> -> vector<16x32xf32>
    %237 = arith.mulf %234, %236 : vector<16x32xf32>
    %238 = vector.extract_strided_slice %31 {offsets = [48, 0], sizes = [16, 32], strides = [1, 1]} : vector<128x32xbf16> to vector<16x32xbf16>
    %239 = vector.extract_strided_slice %32 {offsets = [96, 0], sizes = [32, 32], strides = [1, 1]} : vector<256x32xbf16> to vector<32x32xbf16>
    %240 = vector.extract_strided_slice %33 {offsets = [96, 0], sizes = [32, 32], strides = [1, 1]} : vector<256x32xbf16> to vector<32x32xbf16>
    %241 = tpu.concatenate %239, %239, %239, %239, %239, %239, %239, %239 in 0 : vector<32x32xbf16>, vector<32x32xbf16>, vector<32x32xbf16>, vector<32x32xbf16>, vector<32x32xbf16>, vector<32x32xbf16>, vector<32x32xbf16>, vector<32x32xbf16> -> vector<256x32xbf16>
    %242 = arith.mulf %241, %3 : vector<256x32xbf16>
    %243 = tpu.concatenate %240, %240, %240, %240, %240, %240, %240, %240 in 0 : vector<32x32xbf16>, vector<32x32xbf16>, vector<32x32xbf16>, vector<32x32xbf16>, vector<32x32xbf16>, vector<32x32xbf16>, vector<32x32xbf16>, vector<32x32xbf16> -> vector<256x32xbf16>
    %244 = arith.mulf %243, %3 : vector<256x32xbf16>
    "tpu.trace_start"() <{level = 10 : i32, message = "qd,kd->qk"}> : () -> ()
    %cst_71 = arith.constant dense<0.000000e+00> : vector<16x256xf32>
    %245 = tpu.matmul %238, %242, %cst_71 {dimension_numbers = #tpu.dot_dimension_numbers<[1], [1], [0], [0], [0, 0, 1, 0], [], []>} : vector<16x32xbf16>, vector<256x32xbf16>, vector<16x256xf32> -> vector<16x256xf32>
    "tpu.trace_stop"() : () -> ()
    %cst_72 = arith.constant 5.000000e-01 : f32
    %246 = vector.broadcast %cst_72 : f32 to vector<16x256xf32>
    %247 = arith.mulf %245, %246 : vector<16x256xf32>
    %c3 = arith.constant 3 : index
    %c0_73 = arith.constant 0 : index
    %c0_74 = arith.constant 0 : index
    %248 = vector.load %arg5[%c3, %c0_73, %c0_74] : memref<8x16x256xbf16, #tpu.memory_space<vmem>>, vector<1x16x256xbf16>
    %249 = vector.shape_cast %248 : vector<1x16x256xbf16> to vector<16x256xbf16>
    %250 = arith.extf %249 : vector<16x256xbf16> to vector<16x256xf32>
    %251 = arith.addf %247, %250 : vector<16x256xf32>
    %252 = vector.extract_strided_slice %251 {offsets = [0, 0], sizes = [16, 32], strides = [1, 1]} : vector<16x256xf32> to vector<16x32xf32>
    %cst_75 = arith.constant dense<0xFF800000> : vector<16xf32>
    %253 = vector.multi_reduction <maximumf>, %252, %cst_75 [1] : vector<16x32xf32> to vector<16xf32>
    %254 = vector.shape_cast %253 : vector<16xf32> to vector<16x1xf32>
    %255 = vector.broadcast %254 : vector<16x1xf32> to vector<16x32xf32>
    %256 = arith.subf %252, %255 : vector<16x32xf32>
    %257 = math.exp %256 : vector<16x32xf32>
    %258 = vector.extract_strided_slice %251 {offsets = [0, 32], sizes = [16, 32], strides = [1, 1]} : vector<16x256xf32> to vector<16x32xf32>
    %cst_76 = arith.constant dense<0xFF800000> : vector<16xf32>
    %259 = vector.multi_reduction <maximumf>, %258, %cst_76 [1] : vector<16x32xf32> to vector<16xf32>
    %260 = vector.shape_cast %259 : vector<16xf32> to vector<16x1xf32>
    %261 = vector.broadcast %260 : vector<16x1xf32> to vector<16x32xf32>
    %262 = arith.subf %258, %261 : vector<16x32xf32>
    %263 = math.exp %262 : vector<16x32xf32>
    %264 = vector.extract_strided_slice %251 {offsets = [0, 64], sizes = [16, 32], strides = [1, 1]} : vector<16x256xf32> to vector<16x32xf32>
    %cst_77 = arith.constant dense<0xFF800000> : vector<16xf32>
    %265 = vector.multi_reduction <maximumf>, %264, %cst_77 [1] : vector<16x32xf32> to vector<16xf32>
    %266 = vector.shape_cast %265 : vector<16xf32> to vector<16x1xf32>
    %267 = vector.broadcast %266 : vector<16x1xf32> to vector<16x32xf32>
    %268 = arith.subf %264, %267 : vector<16x32xf32>
    %269 = math.exp %268 : vector<16x32xf32>
    %270 = vector.extract_strided_slice %251 {offsets = [0, 96], sizes = [16, 32], strides = [1, 1]} : vector<16x256xf32> to vector<16x32xf32>
    %cst_78 = arith.constant dense<0xFF800000> : vector<16xf32>
    %271 = vector.multi_reduction <maximumf>, %270, %cst_78 [1] : vector<16x32xf32> to vector<16xf32>
    %272 = vector.shape_cast %271 : vector<16xf32> to vector<16x1xf32>
    %273 = vector.broadcast %272 : vector<16x1xf32> to vector<16x32xf32>
    %274 = arith.subf %270, %273 : vector<16x32xf32>
    %275 = math.exp %274 : vector<16x32xf32>
    %276 = vector.extract_strided_slice %251 {offsets = [0, 128], sizes = [16, 32], strides = [1, 1]} : vector<16x256xf32> to vector<16x32xf32>
    %cst_79 = arith.constant dense<0xFF800000> : vector<16xf32>
    %277 = vector.multi_reduction <maximumf>, %276, %cst_79 [1] : vector<16x32xf32> to vector<16xf32>
    %278 = vector.shape_cast %277 : vector<16xf32> to vector<16x1xf32>
    %279 = vector.broadcast %278 : vector<16x1xf32> to vector<16x32xf32>
    %280 = arith.subf %276, %279 : vector<16x32xf32>
    %281 = math.exp %280 : vector<16x32xf32>
    %282 = vector.extract_strided_slice %251 {offsets = [0, 160], sizes = [16, 32], strides = [1, 1]} : vector<16x256xf32> to vector<16x32xf32>
    %cst_80 = arith.constant dense<0xFF800000> : vector<16xf32>
    %283 = vector.multi_reduction <maximumf>, %282, %cst_80 [1] : vector<16x32xf32> to vector<16xf32>
    %284 = vector.shape_cast %283 : vector<16xf32> to vector<16x1xf32>
    %285 = vector.broadcast %284 : vector<16x1xf32> to vector<16x32xf32>
    %286 = arith.subf %282, %285 : vector<16x32xf32>
    %287 = math.exp %286 : vector<16x32xf32>
    %288 = vector.extract_strided_slice %251 {offsets = [0, 192], sizes = [16, 32], strides = [1, 1]} : vector<16x256xf32> to vector<16x32xf32>
    %cst_81 = arith.constant dense<0xFF800000> : vector<16xf32>
    %289 = vector.multi_reduction <maximumf>, %288, %cst_81 [1] : vector<16x32xf32> to vector<16xf32>
    %290 = vector.shape_cast %289 : vector<16xf32> to vector<16x1xf32>
    %291 = vector.broadcast %290 : vector<16x1xf32> to vector<16x32xf32>
    %292 = arith.subf %288, %291 : vector<16x32xf32>
    %293 = math.exp %292 : vector<16x32xf32>
    %294 = vector.extract_strided_slice %251 {offsets = [0, 224], sizes = [16, 32], strides = [1, 1]} : vector<16x256xf32> to vector<16x32xf32>
    %cst_82 = arith.constant dense<0xFF800000> : vector<16xf32>
    %295 = vector.multi_reduction <maximumf>, %294, %cst_82 [1] : vector<16x32xf32> to vector<16xf32>
    %296 = vector.shape_cast %295 : vector<16xf32> to vector<16x1xf32>
    %297 = vector.broadcast %296 : vector<16x1xf32> to vector<16x32xf32>
    %298 = arith.subf %294, %297 : vector<16x32xf32>
    %299 = math.exp %298 : vector<16x32xf32>
    %300 = tpu.concatenate %257, %263, %269, %275, %281, %287, %293, %299 in 1 : vector<16x32xf32>, vector<16x32xf32>, vector<16x32xf32>, vector<16x32xf32>, vector<16x32xf32>, vector<16x32xf32>, vector<16x32xf32>, vector<16x32xf32> -> vector<16x256xf32>
    %301 = arith.truncf %300 : vector<16x256xf32> to vector<16x256xbf16>
    %cst_83 = arith.constant dense<0.000000e+00> : vector<16x32xf32>
    %302 = tpu.matmul %301, %244, %cst_83 {dimension_numbers = #tpu.dot_dimension_numbers<[1], [0], [0], [1], [0, 0, 1, 1], [], []>} : vector<16x256xbf16>, vector<256x32xbf16>, vector<16x32xf32> -> vector<16x32xf32>
    %cst_84 = arith.constant dense<0.000000e+00> : vector<16x32xf32>
    %303 = tpu.matmul %301, %3, %cst_84 {dimension_numbers = #tpu.dot_dimension_numbers<[1], [0], [0], [1], [0, 0, 1, 1], [], []>} : vector<16x256xbf16>, vector<256x32xbf16>, vector<16x32xf32> -> vector<16x32xf32>
    %304 = tpu.reciprocal %303 : vector<16x32xf32> -> vector<16x32xf32>
    %305 = arith.mulf %302, %304 : vector<16x32xf32>
    %306 = vector.extract_strided_slice %31 {offsets = [64, 0], sizes = [16, 32], strides = [1, 1]} : vector<128x32xbf16> to vector<16x32xbf16>
    %307 = vector.extract_strided_slice %32 {offsets = [128, 0], sizes = [32, 32], strides = [1, 1]} : vector<256x32xbf16> to vector<32x32xbf16>
    %308 = vector.extract_strided_slice %33 {offsets = [128, 0], sizes = [32, 32], strides = [1, 1]} : vector<256x32xbf16> to vector<32x32xbf16>
    %309 = tpu.concatenate %307, %307, %307, %307, %307, %307, %307, %307 in 0 : vector<32x32xbf16>, vector<32x32xbf16>, vector<32x32xbf16>, vector<32x32xbf16>, vector<32x32xbf16>, vector<32x32xbf16>, vector<32x32xbf16>, vector<32x32xbf16> -> vector<256x32xbf16>
    %310 = arith.mulf %309, %3 : vector<256x32xbf16>
    %311 = tpu.concatenate %308, %308, %308, %308, %308, %308, %308, %308 in 0 : vector<32x32xbf16>, vector<32x32xbf16>, vector<32x32xbf16>, vector<32x32xbf16>, vector<32x32xbf16>, vector<32x32xbf16>, vector<32x32xbf16>, vector<32x32xbf16> -> vector<256x32xbf16>
    %312 = arith.mulf %311, %3 : vector<256x32xbf16>
    "tpu.trace_start"() <{level = 10 : i32, message = "qd,kd->qk"}> : () -> ()
    %cst_85 = arith.constant dense<0.000000e+00> : vector<16x256xf32>
    %313 = tpu.matmul %306, %310, %cst_85 {dimension_numbers = #tpu.dot_dimension_numbers<[1], [1], [0], [0], [0, 0, 1, 0], [], []>} : vector<16x32xbf16>, vector<256x32xbf16>, vector<16x256xf32> -> vector<16x256xf32>
    "tpu.trace_stop"() : () -> ()
    %cst_86 = arith.constant 5.000000e-01 : f32
    %314 = vector.broadcast %cst_86 : f32 to vector<16x256xf32>
    %315 = arith.mulf %313, %314 : vector<16x256xf32>
    %c4 = arith.constant 4 : index
    %c0_87 = arith.constant 0 : index
    %c0_88 = arith.constant 0 : index
    %316 = vector.load %arg5[%c4, %c0_87, %c0_88] : memref<8x16x256xbf16, #tpu.memory_space<vmem>>, vector<1x16x256xbf16>
    %317 = vector.shape_cast %316 : vector<1x16x256xbf16> to vector<16x256xbf16>
    %318 = arith.extf %317 : vector<16x256xbf16> to vector<16x256xf32>
    %319 = arith.addf %315, %318 : vector<16x256xf32>
    %320 = vector.extract_strided_slice %319 {offsets = [0, 0], sizes = [16, 32], strides = [1, 1]} : vector<16x256xf32> to vector<16x32xf32>
    %cst_89 = arith.constant dense<0xFF800000> : vector<16xf32>
    %321 = vector.multi_reduction <maximumf>, %320, %cst_89 [1] : vector<16x32xf32> to vector<16xf32>
    %322 = vector.shape_cast %321 : vector<16xf32> to vector<16x1xf32>
    %323 = vector.broadcast %322 : vector<16x1xf32> to vector<16x32xf32>
    %324 = arith.subf %320, %323 : vector<16x32xf32>
    %325 = math.exp %324 : vector<16x32xf32>
    %326 = vector.extract_strided_slice %319 {offsets = [0, 32], sizes = [16, 32], strides = [1, 1]} : vector<16x256xf32> to vector<16x32xf32>
    %cst_90 = arith.constant dense<0xFF800000> : vector<16xf32>
    %327 = vector.multi_reduction <maximumf>, %326, %cst_90 [1] : vector<16x32xf32> to vector<16xf32>
    %328 = vector.shape_cast %327 : vector<16xf32> to vector<16x1xf32>
    %329 = vector.broadcast %328 : vector<16x1xf32> to vector<16x32xf32>
    %330 = arith.subf %326, %329 : vector<16x32xf32>
    %331 = math.exp %330 : vector<16x32xf32>
    %332 = vector.extract_strided_slice %319 {offsets = [0, 64], sizes = [16, 32], strides = [1, 1]} : vector<16x256xf32> to vector<16x32xf32>
    %cst_91 = arith.constant dense<0xFF800000> : vector<16xf32>
    %333 = vector.multi_reduction <maximumf>, %332, %cst_91 [1] : vector<16x32xf32> to vector<16xf32>
    %334 = vector.shape_cast %333 : vector<16xf32> to vector<16x1xf32>
    %335 = vector.broadcast %334 : vector<16x1xf32> to vector<16x32xf32>
    %336 = arith.subf %332, %335 : vector<16x32xf32>
    %337 = math.exp %336 : vector<16x32xf32>
    %338 = vector.extract_strided_slice %319 {offsets = [0, 96], sizes = [16, 32], strides = [1, 1]} : vector<16x256xf32> to vector<16x32xf32>
    %cst_92 = arith.constant dense<0xFF800000> : vector<16xf32>
    %339 = vector.multi_reduction <maximumf>, %338, %cst_92 [1] : vector<16x32xf32> to vector<16xf32>
    %340 = vector.shape_cast %339 : vector<16xf32> to vector<16x1xf32>
    %341 = vector.broadcast %340 : vector<16x1xf32> to vector<16x32xf32>
    %342 = arith.subf %338, %341 : vector<16x32xf32>
    %343 = math.exp %342 : vector<16x32xf32>
    %344 = vector.extract_strided_slice %319 {offsets = [0, 128], sizes = [16, 32], strides = [1, 1]} : vector<16x256xf32> to vector<16x32xf32>
    %cst_93 = arith.constant dense<0xFF800000> : vector<16xf32>
    %345 = vector.multi_reduction <maximumf>, %344, %cst_93 [1] : vector<16x32xf32> to vector<16xf32>
    %346 = vector.shape_cast %345 : vector<16xf32> to vector<16x1xf32>
    %347 = vector.broadcast %346 : vector<16x1xf32> to vector<16x32xf32>
    %348 = arith.subf %344, %347 : vector<16x32xf32>
    %349 = math.exp %348 : vector<16x32xf32>
    %350 = vector.extract_strided_slice %319 {offsets = [0, 160], sizes = [16, 32], strides = [1, 1]} : vector<16x256xf32> to vector<16x32xf32>
    %cst_94 = arith.constant dense<0xFF800000> : vector<16xf32>
    %351 = vector.multi_reduction <maximumf>, %350, %cst_94 [1] : vector<16x32xf32> to vector<16xf32>
    %352 = vector.shape_cast %351 : vector<16xf32> to vector<16x1xf32>
    %353 = vector.broadcast %352 : vector<16x1xf32> to vector<16x32xf32>
    %354 = arith.subf %350, %353 : vector<16x32xf32>
    %355 = math.exp %354 : vector<16x32xf32>
    %356 = vector.extract_strided_slice %319 {offsets = [0, 192], sizes = [16, 32], strides = [1, 1]} : vector<16x256xf32> to vector<16x32xf32>
    %cst_95 = arith.constant dense<0xFF800000> : vector<16xf32>
    %357 = vector.multi_reduction <maximumf>, %356, %cst_95 [1] : vector<16x32xf32> to vector<16xf32>
    %358 = vector.shape_cast %357 : vector<16xf32> to vector<16x1xf32>
    %359 = vector.broadcast %358 : vector<16x1xf32> to vector<16x32xf32>
    %360 = arith.subf %356, %359 : vector<16x32xf32>
    %361 = math.exp %360 : vector<16x32xf32>
    %362 = vector.extract_strided_slice %319 {offsets = [0, 224], sizes = [16, 32], strides = [1, 1]} : vector<16x256xf32> to vector<16x32xf32>
    %cst_96 = arith.constant dense<0xFF800000> : vector<16xf32>
    %363 = vector.multi_reduction <maximumf>, %362, %cst_96 [1] : vector<16x32xf32> to vector<16xf32>
    %364 = vector.shape_cast %363 : vector<16xf32> to vector<16x1xf32>
    %365 = vector.broadcast %364 : vector<16x1xf32> to vector<16x32xf32>
    %366 = arith.subf %362, %365 : vector<16x32xf32>
    %367 = math.exp %366 : vector<16x32xf32>
    %368 = tpu.concatenate %325, %331, %337, %343, %349, %355, %361, %367 in 1 : vector<16x32xf32>, vector<16x32xf32>, vector<16x32xf32>, vector<16x32xf32>, vector<16x32xf32>, vector<16x32xf32>, vector<16x32xf32>, vector<16x32xf32> -> vector<16x256xf32>
    %369 = arith.truncf %368 : vector<16x256xf32> to vector<16x256xbf16>
    %cst_97 = arith.constant dense<0.000000e+00> : vector<16x32xf32>
    %370 = tpu.matmul %369, %312, %cst_97 {dimension_numbers = #tpu.dot_dimension_numbers<[1], [0], [0], [1], [0, 0, 1, 1], [], []>} : vector<16x256xbf16>, vector<256x32xbf16>, vector<16x32xf32> -> vector<16x32xf32>
    %cst_98 = arith.constant dense<0.000000e+00> : vector<16x32xf32>
    %371 = tpu.matmul %369, %3, %cst_98 {dimension_numbers = #tpu.dot_dimension_numbers<[1], [0], [0], [1], [0, 0, 1, 1], [], []>} : vector<16x256xbf16>, vector<256x32xbf16>, vector<16x32xf32> -> vector<16x32xf32>
    %372 = tpu.reciprocal %371 : vector<16x32xf32> -> vector<16x32xf32>
    %373 = arith.mulf %370, %372 : vector<16x32xf32>
    %374 = vector.extract_strided_slice %31 {offsets = [80, 0], sizes = [16, 32], strides = [1, 1]} : vector<128x32xbf16> to vector<16x32xbf16>
    %375 = vector.extract_strided_slice %32 {offsets = [160, 0], sizes = [32, 32], strides = [1, 1]} : vector<256x32xbf16> to vector<32x32xbf16>
    %376 = vector.extract_strided_slice %33 {offsets = [160, 0], sizes = [32, 32], strides = [1, 1]} : vector<256x32xbf16> to vector<32x32xbf16>
    %377 = tpu.concatenate %375, %375, %375, %375, %375, %375, %375, %375 in 0 : vector<32x32xbf16>, vector<32x32xbf16>, vector<32x32xbf16>, vector<32x32xbf16>, vector<32x32xbf16>, vector<32x32xbf16>, vector<32x32xbf16>, vector<32x32xbf16> -> vector<256x32xbf16>
    %378 = arith.mulf %377, %3 : vector<256x32xbf16>
    %379 = tpu.concatenate %376, %376, %376, %376, %376, %376, %376, %376 in 0 : vector<32x32xbf16>, vector<32x32xbf16>, vector<32x32xbf16>, vector<32x32xbf16>, vector<32x32xbf16>, vector<32x32xbf16>, vector<32x32xbf16>, vector<32x32xbf16> -> vector<256x32xbf16>
    %380 = arith.mulf %379, %3 : vector<256x32xbf16>
    "tpu.trace_start"() <{level = 10 : i32, message = "qd,kd->qk"}> : () -> ()
    %cst_99 = arith.constant dense<0.000000e+00> : vector<16x256xf32>
    %381 = tpu.matmul %374, %378, %cst_99 {dimension_numbers = #tpu.dot_dimension_numbers<[1], [1], [0], [0], [0, 0, 1, 0], [], []>} : vector<16x32xbf16>, vector<256x32xbf16>, vector<16x256xf32> -> vector<16x256xf32>
    "tpu.trace_stop"() : () -> ()
    %cst_100 = arith.constant 5.000000e-01 : f32
    %382 = vector.broadcast %cst_100 : f32 to vector<16x256xf32>
    %383 = arith.mulf %381, %382 : vector<16x256xf32>
    %c5 = arith.constant 5 : index
    %c0_101 = arith.constant 0 : index
    %c0_102 = arith.constant 0 : index
    %384 = vector.load %arg5[%c5, %c0_101, %c0_102] : memref<8x16x256xbf16, #tpu.memory_space<vmem>>, vector<1x16x256xbf16>
    %385 = vector.shape_cast %384 : vector<1x16x256xbf16> to vector<16x256xbf16>
    %386 = arith.extf %385 : vector<16x256xbf16> to vector<16x256xf32>
    %387 = arith.addf %383, %386 : vector<16x256xf32>
    %388 = vector.extract_strided_slice %387 {offsets = [0, 0], sizes = [16, 32], strides = [1, 1]} : vector<16x256xf32> to vector<16x32xf32>
    %cst_103 = arith.constant dense<0xFF800000> : vector<16xf32>
    %389 = vector.multi_reduction <maximumf>, %388, %cst_103 [1] : vector<16x32xf32> to vector<16xf32>
    %390 = vector.shape_cast %389 : vector<16xf32> to vector<16x1xf32>
    %391 = vector.broadcast %390 : vector<16x1xf32> to vector<16x32xf32>
    %392 = arith.subf %388, %391 : vector<16x32xf32>
    %393 = math.exp %392 : vector<16x32xf32>
    %394 = vector.extract_strided_slice %387 {offsets = [0, 32], sizes = [16, 32], strides = [1, 1]} : vector<16x256xf32> to vector<16x32xf32>
    %cst_104 = arith.constant dense<0xFF800000> : vector<16xf32>
    %395 = vector.multi_reduction <maximumf>, %394, %cst_104 [1] : vector<16x32xf32> to vector<16xf32>
    %396 = vector.shape_cast %395 : vector<16xf32> to vector<16x1xf32>
    %397 = vector.broadcast %396 : vector<16x1xf32> to vector<16x32xf32>
    %398 = arith.subf %394, %397 : vector<16x32xf32>
    %399 = math.exp %398 : vector<16x32xf32>
    %400 = vector.extract_strided_slice %387 {offsets = [0, 64], sizes = [16, 32], strides = [1, 1]} : vector<16x256xf32> to vector<16x32xf32>
    %cst_105 = arith.constant dense<0xFF800000> : vector<16xf32>
    %401 = vector.multi_reduction <maximumf>, %400, %cst_105 [1] : vector<16x32xf32> to vector<16xf32>
    %402 = vector.shape_cast %401 : vector<16xf32> to vector<16x1xf32>
    %403 = vector.broadcast %402 : vector<16x1xf32> to vector<16x32xf32>
    %404 = arith.subf %400, %403 : vector<16x32xf32>
    %405 = math.exp %404 : vector<16x32xf32>
    %406 = vector.extract_strided_slice %387 {offsets = [0, 96], sizes = [16, 32], strides = [1, 1]} : vector<16x256xf32> to vector<16x32xf32>
    %cst_106 = arith.constant dense<0xFF800000> : vector<16xf32>
    %407 = vector.multi_reduction <maximumf>, %406, %cst_106 [1] : vector<16x32xf32> to vector<16xf32>
    %408 = vector.shape_cast %407 : vector<16xf32> to vector<16x1xf32>
    %409 = vector.broadcast %408 : vector<16x1xf32> to vector<16x32xf32>
    %410 = arith.subf %406, %409 : vector<16x32xf32>
    %411 = math.exp %410 : vector<16x32xf32>
    %412 = vector.extract_strided_slice %387 {offsets = [0, 128], sizes = [16, 32], strides = [1, 1]} : vector<16x256xf32> to vector<16x32xf32>
    %cst_107 = arith.constant dense<0xFF800000> : vector<16xf32>
    %413 = vector.multi_reduction <maximumf>, %412, %cst_107 [1] : vector<16x32xf32> to vector<16xf32>
    %414 = vector.shape_cast %413 : vector<16xf32> to vector<16x1xf32>
    %415 = vector.broadcast %414 : vector<16x1xf32> to vector<16x32xf32>
    %416 = arith.subf %412, %415 : vector<16x32xf32>
    %417 = math.exp %416 : vector<16x32xf32>
    %418 = vector.extract_strided_slice %387 {offsets = [0, 160], sizes = [16, 32], strides = [1, 1]} : vector<16x256xf32> to vector<16x32xf32>
    %cst_108 = arith.constant dense<0xFF800000> : vector<16xf32>
    %419 = vector.multi_reduction <maximumf>, %418, %cst_108 [1] : vector<16x32xf32> to vector<16xf32>
    %420 = vector.shape_cast %419 : vector<16xf32> to vector<16x1xf32>
    %421 = vector.broadcast %420 : vector<16x1xf32> to vector<16x32xf32>
    %422 = arith.subf %418, %421 : vector<16x32xf32>
    %423 = math.exp %422 : vector<16x32xf32>
    %424 = vector.extract_strided_slice %387 {offsets = [0, 192], sizes = [16, 32], strides = [1, 1]} : vector<16x256xf32> to vector<16x32xf32>
    %cst_109 = arith.constant dense<0xFF800000> : vector<16xf32>
    %425 = vector.multi_reduction <maximumf>, %424, %cst_109 [1] : vector<16x32xf32> to vector<16xf32>
    %426 = vector.shape_cast %425 : vector<16xf32> to vector<16x1xf32>
    %427 = vector.broadcast %426 : vector<16x1xf32> to vector<16x32xf32>
    %428 = arith.subf %424, %427 : vector<16x32xf32>
    %429 = math.exp %428 : vector<16x32xf32>
    %430 = vector.extract_strided_slice %387 {offsets = [0, 224], sizes = [16, 32], strides = [1, 1]} : vector<16x256xf32> to vector<16x32xf32>
    %cst_110 = arith.constant dense<0xFF800000> : vector<16xf32>
    %431 = vector.multi_reduction <maximumf>, %430, %cst_110 [1] : vector<16x32xf32> to vector<16xf32>
    %432 = vector.shape_cast %431 : vector<16xf32> to vector<16x1xf32>
    %433 = vector.broadcast %432 : vector<16x1xf32> to vector<16x32xf32>
    %434 = arith.subf %430, %433 : vector<16x32xf32>
    %435 = math.exp %434 : vector<16x32xf32>
    %436 = tpu.concatenate %393, %399, %405, %411, %417, %423, %429, %435 in 1 : vector<16x32xf32>, vector<16x32xf32>, vector<16x32xf32>, vector<16x32xf32>, vector<16x32xf32>, vector<16x32xf32>, vector<16x32xf32>, vector<16x32xf32> -> vector<16x256xf32>
    %437 = arith.truncf %436 : vector<16x256xf32> to vector<16x256xbf16>
    %cst_111 = arith.constant dense<0.000000e+00> : vector<16x32xf32>
    %438 = tpu.matmul %437, %380, %cst_111 {dimension_numbers = #tpu.dot_dimension_numbers<[1], [0], [0], [1], [0, 0, 1, 1], [], []>} : vector<16x256xbf16>, vector<256x32xbf16>, vector<16x32xf32> -> vector<16x32xf32>
    %cst_112 = arith.constant dense<0.000000e+00> : vector<16x32xf32>
    %439 = tpu.matmul %437, %3, %cst_112 {dimension_numbers = #tpu.dot_dimension_numbers<[1], [0], [0], [1], [0, 0, 1, 1], [], []>} : vector<16x256xbf16>, vector<256x32xbf16>, vector<16x32xf32> -> vector<16x32xf32>
    %440 = tpu.reciprocal %439 : vector<16x32xf32> -> vector<16x32xf32>
    %441 = arith.mulf %438, %440 : vector<16x32xf32>
    %442 = vector.extract_strided_slice %31 {offsets = [96, 0], sizes = [16, 32], strides = [1, 1]} : vector<128x32xbf16> to vector<16x32xbf16>
    %443 = vector.extract_strided_slice %32 {offsets = [192, 0], sizes = [32, 32], strides = [1, 1]} : vector<256x32xbf16> to vector<32x32xbf16>
    %444 = vector.extract_strided_slice %33 {offsets = [192, 0], sizes = [32, 32], strides = [1, 1]} : vector<256x32xbf16> to vector<32x32xbf16>
    %445 = tpu.concatenate %443, %443, %443, %443, %443, %443, %443, %443 in 0 : vector<32x32xbf16>, vector<32x32xbf16>, vector<32x32xbf16>, vector<32x32xbf16>, vector<32x32xbf16>, vector<32x32xbf16>, vector<32x32xbf16>, vector<32x32xbf16> -> vector<256x32xbf16>
    %446 = arith.mulf %445, %3 : vector<256x32xbf16>
    %447 = tpu.concatenate %444, %444, %444, %444, %444, %444, %444, %444 in 0 : vector<32x32xbf16>, vector<32x32xbf16>, vector<32x32xbf16>, vector<32x32xbf16>, vector<32x32xbf16>, vector<32x32xbf16>, vector<32x32xbf16>, vector<32x32xbf16> -> vector<256x32xbf16>
    %448 = arith.mulf %447, %3 : vector<256x32xbf16>
    "tpu.trace_start"() <{level = 10 : i32, message = "qd,kd->qk"}> : () -> ()
    %cst_113 = arith.constant dense<0.000000e+00> : vector<16x256xf32>
    %449 = tpu.matmul %442, %446, %cst_113 {dimension_numbers = #tpu.dot_dimension_numbers<[1], [1], [0], [0], [0, 0, 1, 0], [], []>} : vector<16x32xbf16>, vector<256x32xbf16>, vector<16x256xf32> -> vector<16x256xf32>
    "tpu.trace_stop"() : () -> ()
    %cst_114 = arith.constant 5.000000e-01 : f32
    %450 = vector.broadcast %cst_114 : f32 to vector<16x256xf32>
    %451 = arith.mulf %449, %450 : vector<16x256xf32>
    %c6 = arith.constant 6 : index
    %c0_115 = arith.constant 0 : index
    %c0_116 = arith.constant 0 : index
    %452 = vector.load %arg5[%c6, %c0_115, %c0_116] : memref<8x16x256xbf16, #tpu.memory_space<vmem>>, vector<1x16x256xbf16>
    %453 = vector.shape_cast %452 : vector<1x16x256xbf16> to vector<16x256xbf16>
    %454 = arith.extf %453 : vector<16x256xbf16> to vector<16x256xf32>
    %455 = arith.addf %451, %454 : vector<16x256xf32>
    %456 = vector.extract_strided_slice %455 {offsets = [0, 0], sizes = [16, 32], strides = [1, 1]} : vector<16x256xf32> to vector<16x32xf32>
    %cst_117 = arith.constant dense<0xFF800000> : vector<16xf32>
    %457 = vector.multi_reduction <maximumf>, %456, %cst_117 [1] : vector<16x32xf32> to vector<16xf32>
    %458 = vector.shape_cast %457 : vector<16xf32> to vector<16x1xf32>
    %459 = vector.broadcast %458 : vector<16x1xf32> to vector<16x32xf32>
    %460 = arith.subf %456, %459 : vector<16x32xf32>
    %461 = math.exp %460 : vector<16x32xf32>
    %462 = vector.extract_strided_slice %455 {offsets = [0, 32], sizes = [16, 32], strides = [1, 1]} : vector<16x256xf32> to vector<16x32xf32>
    %cst_118 = arith.constant dense<0xFF800000> : vector<16xf32>
    %463 = vector.multi_reduction <maximumf>, %462, %cst_118 [1] : vector<16x32xf32> to vector<16xf32>
    %464 = vector.shape_cast %463 : vector<16xf32> to vector<16x1xf32>
    %465 = vector.broadcast %464 : vector<16x1xf32> to vector<16x32xf32>
    %466 = arith.subf %462, %465 : vector<16x32xf32>
    %467 = math.exp %466 : vector<16x32xf32>
    %468 = vector.extract_strided_slice %455 {offsets = [0, 64], sizes = [16, 32], strides = [1, 1]} : vector<16x256xf32> to vector<16x32xf32>
    %cst_119 = arith.constant dense<0xFF800000> : vector<16xf32>
    %469 = vector.multi_reduction <maximumf>, %468, %cst_119 [1] : vector<16x32xf32> to vector<16xf32>
    %470 = vector.shape_cast %469 : vector<16xf32> to vector<16x1xf32>
    %471 = vector.broadcast %470 : vector<16x1xf32> to vector<16x32xf32>
    %472 = arith.subf %468, %471 : vector<16x32xf32>
    %473 = math.exp %472 : vector<16x32xf32>
    %474 = vector.extract_strided_slice %455 {offsets = [0, 96], sizes = [16, 32], strides = [1, 1]} : vector<16x256xf32> to vector<16x32xf32>
    %cst_120 = arith.constant dense<0xFF800000> : vector<16xf32>
    %475 = vector.multi_reduction <maximumf>, %474, %cst_120 [1] : vector<16x32xf32> to vector<16xf32>
    %476 = vector.shape_cast %475 : vector<16xf32> to vector<16x1xf32>
    %477 = vector.broadcast %476 : vector<16x1xf32> to vector<16x32xf32>
    %478 = arith.subf %474, %477 : vector<16x32xf32>
    %479 = math.exp %478 : vector<16x32xf32>
    %480 = vector.extract_strided_slice %455 {offsets = [0, 128], sizes = [16, 32], strides = [1, 1]} : vector<16x256xf32> to vector<16x32xf32>
    %cst_121 = arith.constant dense<0xFF800000> : vector<16xf32>
    %481 = vector.multi_reduction <maximumf>, %480, %cst_121 [1] : vector<16x32xf32> to vector<16xf32>
    %482 = vector.shape_cast %481 : vector<16xf32> to vector<16x1xf32>
    %483 = vector.broadcast %482 : vector<16x1xf32> to vector<16x32xf32>
    %484 = arith.subf %480, %483 : vector<16x32xf32>
    %485 = math.exp %484 : vector<16x32xf32>
    %486 = vector.extract_strided_slice %455 {offsets = [0, 160], sizes = [16, 32], strides = [1, 1]} : vector<16x256xf32> to vector<16x32xf32>
    %cst_122 = arith.constant dense<0xFF800000> : vector<16xf32>
    %487 = vector.multi_reduction <maximumf>, %486, %cst_122 [1] : vector<16x32xf32> to vector<16xf32>
    %488 = vector.shape_cast %487 : vector<16xf32> to vector<16x1xf32>
    %489 = vector.broadcast %488 : vector<16x1xf32> to vector<16x32xf32>
    %490 = arith.subf %486, %489 : vector<16x32xf32>
    %491 = math.exp %490 : vector<16x32xf32>
    %492 = vector.extract_strided_slice %455 {offsets = [0, 192], sizes = [16, 32], strides = [1, 1]} : vector<16x256xf32> to vector<16x32xf32>
    %cst_123 = arith.constant dense<0xFF800000> : vector<16xf32>
    %493 = vector.multi_reduction <maximumf>, %492, %cst_123 [1] : vector<16x32xf32> to vector<16xf32>
    %494 = vector.shape_cast %493 : vector<16xf32> to vector<16x1xf32>
    %495 = vector.broadcast %494 : vector<16x1xf32> to vector<16x32xf32>
    %496 = arith.subf %492, %495 : vector<16x32xf32>
    %497 = math.exp %496 : vector<16x32xf32>
    %498 = vector.extract_strided_slice %455 {offsets = [0, 224], sizes = [16, 32], strides = [1, 1]} : vector<16x256xf32> to vector<16x32xf32>
    %cst_124 = arith.constant dense<0xFF800000> : vector<16xf32>
    %499 = vector.multi_reduction <maximumf>, %498, %cst_124 [1] : vector<16x32xf32> to vector<16xf32>
    %500 = vector.shape_cast %499 : vector<16xf32> to vector<16x1xf32>
    %501 = vector.broadcast %500 : vector<16x1xf32> to vector<16x32xf32>
    %502 = arith.subf %498, %501 : vector<16x32xf32>
    %503 = math.exp %502 : vector<16x32xf32>
    %504 = tpu.concatenate %461, %467, %473, %479, %485, %491, %497, %503 in 1 : vector<16x32xf32>, vector<16x32xf32>, vector<16x32xf32>, vector<16x32xf32>, vector<16x32xf32>, vector<16x32xf32>, vector<16x32xf32>, vector<16x32xf32> -> vector<16x256xf32>
    %505 = arith.truncf %504 : vector<16x256xf32> to vector<16x256xbf16>
    %cst_125 = arith.constant dense<0.000000e+00> : vector<16x32xf32>
    %506 = tpu.matmul %505, %448, %cst_125 {dimension_numbers = #tpu.dot_dimension_numbers<[1], [0], [0], [1], [0, 0, 1, 1], [], []>} : vector<16x256xbf16>, vector<256x32xbf16>, vector<16x32xf32> -> vector<16x32xf32>
    %cst_126 = arith.constant dense<0.000000e+00> : vector<16x32xf32>
    %507 = tpu.matmul %505, %3, %cst_126 {dimension_numbers = #tpu.dot_dimension_numbers<[1], [0], [0], [1], [0, 0, 1, 1], [], []>} : vector<16x256xbf16>, vector<256x32xbf16>, vector<16x32xf32> -> vector<16x32xf32>
    %508 = tpu.reciprocal %507 : vector<16x32xf32> -> vector<16x32xf32>
    %509 = arith.mulf %506, %508 : vector<16x32xf32>
    %510 = vector.extract_strided_slice %31 {offsets = [112, 0], sizes = [16, 32], strides = [1, 1]} : vector<128x32xbf16> to vector<16x32xbf16>
    %511 = vector.extract_strided_slice %32 {offsets = [224, 0], sizes = [32, 32], strides = [1, 1]} : vector<256x32xbf16> to vector<32x32xbf16>
    %512 = vector.extract_strided_slice %33 {offsets = [224, 0], sizes = [32, 32], strides = [1, 1]} : vector<256x32xbf16> to vector<32x32xbf16>
    %513 = tpu.concatenate %511, %511, %511, %511, %511, %511, %511, %511 in 0 : vector<32x32xbf16>, vector<32x32xbf16>, vector<32x32xbf16>, vector<32x32xbf16>, vector<32x32xbf16>, vector<32x32xbf16>, vector<32x32xbf16>, vector<32x32xbf16> -> vector<256x32xbf16>
    %514 = arith.mulf %513, %3 : vector<256x32xbf16>
    %515 = tpu.concatenate %512, %512, %512, %512, %512, %512, %512, %512 in 0 : vector<32x32xbf16>, vector<32x32xbf16>, vector<32x32xbf16>, vector<32x32xbf16>, vector<32x32xbf16>, vector<32x32xbf16>, vector<32x32xbf16>, vector<32x32xbf16> -> vector<256x32xbf16>
    %516 = arith.mulf %515, %3 : vector<256x32xbf16>
    "tpu.trace_start"() <{level = 10 : i32, message = "qd,kd->qk"}> : () -> ()
    %cst_127 = arith.constant dense<0.000000e+00> : vector<16x256xf32>
    %517 = tpu.matmul %510, %514, %cst_127 {dimension_numbers = #tpu.dot_dimension_numbers<[1], [1], [0], [0], [0, 0, 1, 0], [], []>} : vector<16x32xbf16>, vector<256x32xbf16>, vector<16x256xf32> -> vector<16x256xf32>
    "tpu.trace_stop"() : () -> ()
    %cst_128 = arith.constant 5.000000e-01 : f32
    %518 = vector.broadcast %cst_128 : f32 to vector<16x256xf32>
    %519 = arith.mulf %517, %518 : vector<16x256xf32>
    %c7 = arith.constant 7 : index
    %c0_129 = arith.constant 0 : index
    %c0_130 = arith.constant 0 : index
    %520 = vector.load %arg5[%c7, %c0_129, %c0_130] : memref<8x16x256xbf16, #tpu.memory_space<vmem>>, vector<1x16x256xbf16>
    %521 = vector.shape_cast %520 : vector<1x16x256xbf16> to vector<16x256xbf16>
    %522 = arith.extf %521 : vector<16x256xbf16> to vector<16x256xf32>
    %523 = arith.addf %519, %522 : vector<16x256xf32>
    %524 = vector.extract_strided_slice %523 {offsets = [0, 0], sizes = [16, 32], strides = [1, 1]} : vector<16x256xf32> to vector<16x32xf32>
    %cst_131 = arith.constant dense<0xFF800000> : vector<16xf32>
    %525 = vector.multi_reduction <maximumf>, %524, %cst_131 [1] : vector<16x32xf32> to vector<16xf32>
    %526 = vector.shape_cast %525 : vector<16xf32> to vector<16x1xf32>
    %527 = vector.broadcast %526 : vector<16x1xf32> to vector<16x32xf32>
    %528 = arith.subf %524, %527 : vector<16x32xf32>
    %529 = math.exp %528 : vector<16x32xf32>
    %530 = vector.extract_strided_slice %523 {offsets = [0, 32], sizes = [16, 32], strides = [1, 1]} : vector<16x256xf32> to vector<16x32xf32>
    %cst_132 = arith.constant dense<0xFF800000> : vector<16xf32>
    %531 = vector.multi_reduction <maximumf>, %530, %cst_132 [1] : vector<16x32xf32> to vector<16xf32>
    %532 = vector.shape_cast %531 : vector<16xf32> to vector<16x1xf32>
    %533 = vector.broadcast %532 : vector<16x1xf32> to vector<16x32xf32>
    %534 = arith.subf %530, %533 : vector<16x32xf32>
    %535 = math.exp %534 : vector<16x32xf32>
    %536 = vector.extract_strided_slice %523 {offsets = [0, 64], sizes = [16, 32], strides = [1, 1]} : vector<16x256xf32> to vector<16x32xf32>
    %cst_133 = arith.constant dense<0xFF800000> : vector<16xf32>
    %537 = vector.multi_reduction <maximumf>, %536, %cst_133 [1] : vector<16x32xf32> to vector<16xf32>
    %538 = vector.shape_cast %537 : vector<16xf32> to vector<16x1xf32>
    %539 = vector.broadcast %538 : vector<16x1xf32> to vector<16x32xf32>
    %540 = arith.subf %536, %539 : vector<16x32xf32>
    %541 = math.exp %540 : vector<16x32xf32>
    %542 = vector.extract_strided_slice %523 {offsets = [0, 96], sizes = [16, 32], strides = [1, 1]} : vector<16x256xf32> to vector<16x32xf32>
    %cst_134 = arith.constant dense<0xFF800000> : vector<16xf32>
    %543 = vector.multi_reduction <maximumf>, %542, %cst_134 [1] : vector<16x32xf32> to vector<16xf32>
    %544 = vector.shape_cast %543 : vector<16xf32> to vector<16x1xf32>
    %545 = vector.broadcast %544 : vector<16x1xf32> to vector<16x32xf32>
    %546 = arith.subf %542, %545 : vector<16x32xf32>
    %547 = math.exp %546 : vector<16x32xf32>
    %548 = vector.extract_strided_slice %523 {offsets = [0, 128], sizes = [16, 32], strides = [1, 1]} : vector<16x256xf32> to vector<16x32xf32>
    %cst_135 = arith.constant dense<0xFF800000> : vector<16xf32>
    %549 = vector.multi_reduction <maximumf>, %548, %cst_135 [1] : vector<16x32xf32> to vector<16xf32>
    %550 = vector.shape_cast %549 : vector<16xf32> to vector<16x1xf32>
    %551 = vector.broadcast %550 : vector<16x1xf32> to vector<16x32xf32>
    %552 = arith.subf %548, %551 : vector<16x32xf32>
    %553 = math.exp %552 : vector<16x32xf32>
    %554 = vector.extract_strided_slice %523 {offsets = [0, 160], sizes = [16, 32], strides = [1, 1]} : vector<16x256xf32> to vector<16x32xf32>
    %cst_136 = arith.constant dense<0xFF800000> : vector<16xf32>
    %555 = vector.multi_reduction <maximumf>, %554, %cst_136 [1] : vector<16x32xf32> to vector<16xf32>
    %556 = vector.shape_cast %555 : vector<16xf32> to vector<16x1xf32>
    %557 = vector.broadcast %556 : vector<16x1xf32> to vector<16x32xf32>
    %558 = arith.subf %554, %557 : vector<16x32xf32>
    %559 = math.exp %558 : vector<16x32xf32>
    %560 = vector.extract_strided_slice %523 {offsets = [0, 192], sizes = [16, 32], strides = [1, 1]} : vector<16x256xf32> to vector<16x32xf32>
    %cst_137 = arith.constant dense<0xFF800000> : vector<16xf32>
    %561 = vector.multi_reduction <maximumf>, %560, %cst_137 [1] : vector<16x32xf32> to vector<16xf32>
    %562 = vector.shape_cast %561 : vector<16xf32> to vector<16x1xf32>
    %563 = vector.broadcast %562 : vector<16x1xf32> to vector<16x32xf32>
    %564 = arith.subf %560, %563 : vector<16x32xf32>
    %565 = math.exp %564 : vector<16x32xf32>
    %566 = vector.extract_strided_slice %523 {offsets = [0, 224], sizes = [16, 32], strides = [1, 1]} : vector<16x256xf32> to vector<16x32xf32>
    %cst_138 = arith.constant dense<0xFF800000> : vector<16xf32>
    %567 = vector.multi_reduction <maximumf>, %566, %cst_138 [1] : vector<16x32xf32> to vector<16xf32>
    %568 = vector.shape_cast %567 : vector<16xf32> to vector<16x1xf32>
    %569 = vector.broadcast %568 : vector<16x1xf32> to vector<16x32xf32>
    %570 = arith.subf %566, %569 : vector<16x32xf32>
    %571 = math.exp %570 : vector<16x32xf32>
    %572 = tpu.concatenate %529, %535, %541, %547, %553, %559, %565, %571 in 1 : vector<16x32xf32>, vector<16x32xf32>, vector<16x32xf32>, vector<16x32xf32>, vector<16x32xf32>, vector<16x32xf32>, vector<16x32xf32>, vector<16x32xf32> -> vector<16x256xf32>
    %573 = arith.truncf %572 : vector<16x256xf32> to vector<16x256xbf16>
    %cst_139 = arith.constant dense<0.000000e+00> : vector<16x32xf32>
    %574 = tpu.matmul %573, %516, %cst_139 {dimension_numbers = #tpu.dot_dimension_numbers<[1], [0], [0], [1], [0, 0, 1, 1], [], []>} : vector<16x256xbf16>, vector<256x32xbf16>, vector<16x32xf32> -> vector<16x32xf32>
    %cst_140 = arith.constant dense<0.000000e+00> : vector<16x32xf32>
    %575 = tpu.matmul %573, %3, %cst_140 {dimension_numbers = #tpu.dot_dimension_numbers<[1], [0], [0], [1], [0, 0, 1, 1], [], []>} : vector<16x256xbf16>, vector<256x32xbf16>, vector<16x32xf32> -> vector<16x32xf32>
    %576 = tpu.reciprocal %575 : vector<16x32xf32> -> vector<16x32xf32>
    %577 = arith.mulf %574, %576 : vector<16x32xf32>
    %578 = tpu.concatenate %101, %169, %237, %305, %373, %441, %509, %577 in 0 : vector<16x32xf32>, vector<16x32xf32>, vector<16x32xf32>, vector<16x32xf32>, vector<16x32xf32>, vector<16x32xf32>, vector<16x32xf32>, vector<16x32xf32> -> vector<128x32xf32>
    %579 = arith.truncf %578 : vector<128x32xf32> to vector<128x32xbf16>
    %c0_141 = arith.constant 0 : index
    %c0_142 = arith.constant 0 : index
    %580 = vector.load %arg15[%c0_141, %c0_142] : memref<32x32xbf16, #tpu.memory_space<vmem>>, vector<32x32xbf16>
    %cst_143 = arith.constant dense<0.000000e+00> : vector<128x32xf32>
    %581 = tpu.matmul %579, %580, %cst_143 {dimension_numbers = #tpu.dot_dimension_numbers<[1], [0], [0], [1], [0, 0, 1, 1], [], []>} : vector<128x32xbf16>, vector<32x32xbf16>, vector<128x32xf32> -> vector<128x32xf32>
    %c0_144 = arith.constant 0 : index
    %c0_145 = arith.constant 0 : index
    %582 = vector.load %arg16[%c0_144, %c0_145] : memref<1x32xf32, #tpu.memory_space<vmem>>, vector<1x32xf32>
    %583 = vector.broadcast %582 : vector<1x32xf32> to vector<128x32xf32>
    %584 = arith.addf %581, %583 : vector<128x32xf32>
    %585 = arith.addf %0, %584 : vector<128x32xf32>
    %c0_146 = arith.constant 0 : index
    %c0_147 = arith.constant 0 : index
    %586 = vector.load %arg17[%c0_146, %c0_147] : memref<1x32xf32, #tpu.memory_space<vmem>>, vector<1x32xf32>
    %c0_148 = arith.constant 0 : index
    %c0_149 = arith.constant 0 : index
    %587 = vector.load %arg18[%c0_148, %c0_149] : memref<1x32xf32, #tpu.memory_space<vmem>>, vector<1x32xf32>
    %cst_150 = arith.constant dense<0.000000e+00> : vector<128xf32>
    %588 = vector.multi_reduction <add>, %585, %cst_150 [1] : vector<128x32xf32> to vector<128xf32>
    %589 = vector.shape_cast %588 : vector<128xf32> to vector<128x1xf32>
    %cst_151 = arith.constant 3.200000e+01 : f32
    %590 = vector.broadcast %cst_151 : f32 to vector<128x1xf32>
    %591 = arith.divf %589, %590 : vector<128x1xf32>
    %592 = vector.broadcast %591 : vector<128x1xf32> to vector<128x32xf32>
    %593 = arith.subf %585, %592 : vector<128x32xf32>
    %594 = arith.mulf %593, %593 : vector<128x32xf32>
    %cst_152 = arith.constant dense<0.000000e+00> : vector<128xf32>
    %595 = vector.multi_reduction <add>, %594, %cst_152 [1] : vector<128x32xf32> to vector<128xf32>
    %596 = vector.shape_cast %595 : vector<128xf32> to vector<128x1xf32>
    %cst_153 = arith.constant 3.200000e+01 : f32
    %597 = vector.broadcast %cst_153 : f32 to vector<128x1xf32>
    %598 = arith.divf %596, %597 : vector<128x1xf32>
    %599 = vector.broadcast %591 : vector<128x1xf32> to vector<128x32xf32>
    %600 = arith.subf %585, %599 : vector<128x32xf32>
    %cst_154 = arith.constant 9.99999974E-6 : f32
    %601 = vector.broadcast %cst_154 : f32 to vector<128x1xf32>
    %602 = arith.addf %598, %601 : vector<128x1xf32>
    %603 = math.rsqrt %602 : vector<128x1xf32>
    %604 = vector.broadcast %603 : vector<128x1xf32> to vector<128x32xf32>
    %605 = arith.mulf %600, %604 : vector<128x32xf32>
    %606 = vector.broadcast %586 : vector<1x32xf32> to vector<128x32xf32>
    %607 = arith.mulf %605, %606 : vector<128x32xf32>
    %608 = vector.broadcast %587 : vector<1x32xf32> to vector<128x32xf32>
    %609 = arith.addf %607, %608 : vector<128x32xf32>
    %610 = arith.truncf %609 : vector<128x32xf32> to vector<128x32xbf16>
    %c0_155 = arith.constant 0 : index
    %c0_156 = arith.constant 0 : index
    %611 = vector.load %arg19[%c0_155, %c0_156] : memref<32x64xbf16, #tpu.memory_space<vmem>>, vector<32x64xbf16>
    %cst_157 = arith.constant dense<0.000000e+00> : vector<128x64xf32>
    %612 = tpu.matmul %610, %611, %cst_157 {dimension_numbers = #tpu.dot_dimension_numbers<[1], [0], [0], [1], [0, 0, 1, 1], [], []>} : vector<128x32xbf16>, vector<32x64xbf16>, vector<128x64xf32> -> vector<128x64xf32>
    %c0_158 = arith.constant 0 : index
    %c0_159 = arith.constant 0 : index
    %613 = vector.load %arg20[%c0_158, %c0_159] : memref<1x64xf32, #tpu.memory_space<vmem>>, vector<1x64xf32>
    %614 = vector.broadcast %613 : vector<1x64xf32> to vector<128x64xf32>
    %615 = arith.addf %612, %614 : vector<128x64xf32>
    %cst_160 = arith.constant 0.000000e+00 : f32
    %616 = vector.broadcast %cst_160 : f32 to vector<128x64xf32>
    %617 = arith.maximumf %615, %616 : vector<128x64xf32>
    %618 = arith.truncf %617 : vector<128x64xf32> to vector<128x64xbf16>
    %c0_161 = arith.constant 0 : index
    %c0_162 = arith.constant 0 : index
    %619 = vector.load %arg21[%c0_161, %c0_162] : memref<64x32xbf16, #tpu.memory_space<vmem>>, vector<64x32xbf16>
    %cst_163 = arith.constant dense<0.000000e+00> : vector<128x32xf32>
    %620 = tpu.matmul %618, %619, %cst_163 {dimension_numbers = #tpu.dot_dimension_numbers<[1], [0], [0], [1], [0, 0, 1, 1], [], []>} : vector<128x64xbf16>, vector<64x32xbf16>, vector<128x32xf32> -> vector<128x32xf32>
    %c0_164 = arith.constant 0 : index
    %c0_165 = arith.constant 0 : index
    %621 = vector.load %arg22[%c0_164, %c0_165] : memref<1x32xf32, #tpu.memory_space<vmem>>, vector<1x32xf32>
    %622 = vector.broadcast %621 : vector<1x32xf32> to vector<128x32xf32>
    %623 = arith.addf %620, %622 : vector<128x32xf32>
    %624 = arith.addf %609, %623 : vector<128x32xf32>
    %c0_166 = arith.constant 0 : index
    %c0_167 = arith.constant 0 : index
    %625 = vector.load %arg23[%c0_166, %c0_167] : memref<1x32xf32, #tpu.memory_space<vmem>>, vector<1x32xf32>
    %c0_168 = arith.constant 0 : index
    %c0_169 = arith.constant 0 : index
    %626 = vector.load %arg24[%c0_168, %c0_169] : memref<1x32xf32, #tpu.memory_space<vmem>>, vector<1x32xf32>
    %cst_170 = arith.constant dense<0.000000e+00> : vector<128xf32>
    %627 = vector.multi_reduction <add>, %624, %cst_170 [1] : vector<128x32xf32> to vector<128xf32>
    %628 = vector.shape_cast %627 : vector<128xf32> to vector<128x1xf32>
    %cst_171 = arith.constant 3.200000e+01 : f32
    %629 = vector.broadcast %cst_171 : f32 to vector<128x1xf32>
    %630 = arith.divf %628, %629 : vector<128x1xf32>
    %631 = vector.broadcast %630 : vector<128x1xf32> to vector<128x32xf32>
    %632 = arith.subf %624, %631 : vector<128x32xf32>
    %633 = arith.mulf %632, %632 : vector<128x32xf32>
    %cst_172 = arith.constant dense<0.000000e+00> : vector<128xf32>
    %634 = vector.multi_reduction <add>, %633, %cst_172 [1] : vector<128x32xf32> to vector<128xf32>
    %635 = vector.shape_cast %634 : vector<128xf32> to vector<128x1xf32>
    %cst_173 = arith.constant 3.200000e+01 : f32
    %636 = vector.broadcast %cst_173 : f32 to vector<128x1xf32>
    %637 = arith.divf %635, %636 : vector<128x1xf32>
    %638 = vector.broadcast %630 : vector<128x1xf32> to vector<128x32xf32>
    %639 = arith.subf %624, %638 : vector<128x32xf32>
    %cst_174 = arith.constant 9.99999974E-6 : f32
    %640 = vector.broadcast %cst_174 : f32 to vector<128x1xf32>
    %641 = arith.addf %637, %640 : vector<128x1xf32>
    %642 = math.rsqrt %641 : vector<128x1xf32>
    %643 = vector.broadcast %642 : vector<128x1xf32> to vector<128x32xf32>
    %644 = arith.mulf %639, %643 : vector<128x32xf32>
    %645 = vector.broadcast %625 : vector<1x32xf32> to vector<128x32xf32>
    %646 = arith.mulf %644, %645 : vector<128x32xf32>
    %647 = vector.broadcast %626 : vector<1x32xf32> to vector<128x32xf32>
    %648 = arith.addf %646, %647 : vector<128x32xf32>
    %649 = vector.extract_strided_slice %648 {offsets = [0, 0], sizes = [16, 32], strides = [1, 1]} : vector<128x32xf32> to vector<16x32xf32>
    %650 = vector.extract_strided_slice %648 {offsets = [16, 0], sizes = [16, 32], strides = [1, 1]} : vector<128x32xf32> to vector<16x32xf32>
    %651 = vector.extract_strided_slice %648 {offsets = [32, 0], sizes = [16, 32], strides = [1, 1]} : vector<128x32xf32> to vector<16x32xf32>
    %652 = vector.extract_strided_slice %648 {offsets = [48, 0], sizes = [16, 32], strides = [1, 1]} : vector<128x32xf32> to vector<16x32xf32>
    %653 = vector.extract_strided_slice %648 {offsets = [64, 0], sizes = [16, 32], strides = [1, 1]} : vector<128x32xf32> to vector<16x32xf32>
    %654 = vector.extract_strided_slice %648 {offsets = [80, 0], sizes = [16, 32], strides = [1, 1]} : vector<128x32xf32> to vector<16x32xf32>
    %655 = vector.extract_strided_slice %648 {offsets = [96, 0], sizes = [16, 32], strides = [1, 1]} : vector<128x32xf32> to vector<16x32xf32>
    %656 = vector.extract_strided_slice %648 {offsets = [112, 0], sizes = [16, 32], strides = [1, 1]} : vector<128x32xf32> to vector<16x32xf32>
    %657 = tpu.concatenate %649, %650, %651, %652, %653, %654, %655, %656 in 1 : vector<16x32xf32>, vector<16x32xf32>, vector<16x32xf32>, vector<16x32xf32>, vector<16x32xf32>, vector<16x32xf32>, vector<16x32xf32>, vector<16x32xf32> -> vector<16x256xf32>
    %c0_175 = arith.constant 0 : index
    %c0_176 = arith.constant 0 : index
    %658 = vector.load %arg25[%c0_175, %c0_176] : memref<16x256xf32, #tpu.memory_space<vmem>>, vector<16x256xf32>
    tpu.vector_store %arg25[%c0_175, %c0_176], %657 {strides = array<i32>} : memref<16x256xf32, #tpu.memory_space<vmem>>, vector<16x256xf32>,
    return
  }
  func.func @transform_0(%arg0: i32) -> (i32, i32) {
    %c0_i32 = arith.constant 0 : i32
    %c0_i32_0 = arith.constant 0 : i32
    return %arg0, %c0_i32 : i32, i32
  }
  func.func @transform_1(%arg0: i32) -> (i32, i32) {
    %c0_i32 = arith.constant 0 : i32
    %c0_i32_0 = arith.constant 0 : i32
    return %arg0, %c0_i32 : i32, i32
  }
  func.func @transform_2(%arg0: i32) -> (i32, i32) {
    %c0_i32 = arith.constant 0 : i32
    %c0_i32_0 = arith.constant 0 : i32
    return %arg0, %c0_i32 : i32, i32
  }
  func.func @transform_3(%arg0: i32) -> (i32, i32) {
    %c0_i32 = arith.constant 0 : i32
    %c0_i32_0 = arith.constant 0 : i32
    return %arg0, %c0_i32 : i32, i32
  }
  func.func @transform_4(%arg0: i32) -> (i32, i32, i32) {
    %c0_i32 = arith.constant 0 : i32
    %c0_i32_0 = arith.constant 0 : i32
    %c0_i32_1 = arith.constant 0 : i32
    return %arg0, %c0_i32, %c0_i32_0 : i32, i32, i32
  }
  func.func @transform_5(%arg0: i32) -> (i32, i32) {
    %c0_i32 = arith.constant 0 : i32
    %c0_i32_0 = arith.constant 0 : i32
    %c0_i32_1 = arith.constant 0 : i32
    return %c0_i32, %c0_i32_0 : i32, i32
  }
  func.func @transform_6(%arg0: i32) -> (i32, i32) {
    %c0_i32 = arith.constant 0 : i32
    %c0_i32_0 = arith.constant 0 : i32
    %c0_i32_1 = arith.constant 0 : i32
    return %c0_i32, %c0_i32_0 : i32, i32
  }
  func.func @transform_7(%arg0: i32) -> (i32, i32) {
    %c0_i32 = arith.constant 0 : i32
    %c0_i32_0 = arith.constant 0 : i32
    %c0_i32_1 = arith.constant 0 : i32
    return %c0_i32, %c0_i32_0 : i32, i32
  }
  func.func @transform_8(%arg0: i32) -> (i32, i32) {
    %c0_i32 = arith.constant 0 : i32
    %c0_i32_0 = arith.constant 0 : i32
    %c0_i32_1 = arith.constant 0 : i32
    return %c0_i32, %c0_i32_0 : i32, i32
  }
  func.func @transform_9(%arg0: i32) -> (i32, i32) {
    %c0_i32 = arith.constant 0 : i32
    %c0_i32_0 = arith.constant 0 : i32
    %c0_i32_1 = arith.constant 0 : i32
    return %c0_i32, %c0_i32_0 : i32, i32
  }
  func.func @transform_10(%arg0: i32) -> (i32, i32) {
    %c0_i32 = arith.constant 0 : i32
    %c0_i32_0 = arith.constant 0 : i32
    %c0_i32_1 = arith.constant 0 : i32
    return %c0_i32, %c0_i32_0 : i32, i32
  }
  func.func @transform_11(%arg0: i32) -> (i32, i32) {
    %c0_i32 = arith.constant 0 : i32
    %c0_i32_0 = arith.constant 0 : i32
    %c0_i32_1 = arith.constant 0 : i32
    return %c0_i32, %c0_i32_0 : i32, i32
  }
  func.func @transform_12(%arg0: i32) -> (i32, i32) {
    %c0_i32 = arith.constant 0 : i32
    %c0_i32_0 = arith.constant 0 : i32
    %c0_i32_1 = arith.constant 0 : i32
    return %c0_i32, %c0_i32_0 : i32, i32
  }
  func.func @transform_13(%arg0: i32) -> (i32, i32) {
    %c0_i32 = arith.constant 0 : i32
    %c0_i32_0 = arith.constant 0 : i32
    %c0_i32_1 = arith.constant 0 : i32
    return %c0_i32, %c0_i32_0 : i32, i32
  }
  func.func @transform_14(%arg0: i32) -> (i32, i32) {
    %c0_i32 = arith.constant 0 : i32
    %c0_i32_0 = arith.constant 0 : i32
    %c0_i32_1 = arith.constant 0 : i32
    return %c0_i32, %c0_i32_0 : i32, i32
  }
  func.func @transform_15(%arg0: i32) -> (i32, i32) {
    %c0_i32 = arith.constant 0 : i32
    %c0_i32_0 = arith.constant 0 : i32
    %c0_i32_1 = arith.constant 0 : i32
    return %c0_i32, %c0_i32_0 : i32, i32
  }
  func.func @transform_16(%arg0: i32) -> (i32, i32) {
    %c0_i32 = arith.constant 0 : i32
    %c0_i32_0 = arith.constant 0 : i32
    %c0_i32_1 = arith.constant 0 : i32
    return %c0_i32, %c0_i32_0 : i32, i32
  }
  func.func @transform_17(%arg0: i32) -> (i32, i32) {
    %c0_i32 = arith.constant 0 : i32
    %c0_i32_0 = arith.constant 0 : i32
    %c0_i32_1 = arith.constant 0 : i32
    return %c0_i32, %c0_i32_0 : i32, i32
  }
  func.func @transform_18(%arg0: i32) -> (i32, i32) {
    %c0_i32 = arith.constant 0 : i32
    %c0_i32_0 = arith.constant 0 : i32
    %c0_i32_1 = arith.constant 0 : i32
    return %c0_i32, %c0_i32_0 : i32, i32
  }
  func.func @transform_19(%arg0: i32) -> (i32, i32) {
    %c0_i32 = arith.constant 0 : i32
    %c0_i32_0 = arith.constant 0 : i32
    %c0_i32_1 = arith.constant 0 : i32
    return %c0_i32, %c0_i32_0 : i32, i32
  }
  func.func @transform_20(%arg0: i32) -> (i32, i32) {
    %c0_i32 = arith.constant 0 : i32
    %c0_i32_0 = arith.constant 0 : i32
    %c0_i32_1 = arith.constant 0 : i32
    return %c0_i32, %c0_i32_0 : i32, i32
  }
  func.func @transform_21(%arg0: i32) -> (i32, i32) {
    %c0_i32 = arith.constant 0 : i32
    %c0_i32_0 = arith.constant 0 : i32
    %c0_i32_1 = arith.constant 0 : i32
    return %c0_i32, %c0_i32_0 : i32, i32
  }
  func.func @transform_22(%arg0: i32) -> (i32, i32) {
    %c0_i32 = arith.constant 0 : i32
    %c0_i32_0 = arith.constant 0 : i32
    %c0_i32_1 = arith.constant 0 : i32
    return %c0_i32, %c0_i32_0 : i32, i32
  }
  func.func @transform_23(%arg0: i32) -> (i32, i32) {
    %c0_i32 = arith.constant 0 : i32
    %c0_i32_0 = arith.constant 0 : i32
    %c0_i32_1 = arith.constant 0 : i32
    return %c0_i32, %c0_i32_0 : i32, i32
  }
  func.func @transform_24(%arg0: i32) -> (i32, i32) {
    %c0_i32 = arith.constant 0 : i32
    %c0_i32_0 = arith.constant 0 : i32
    return %c0_i32, %arg0 : i32, i32
  }
}

</mosaic_0001>

<bundles_post_ra>
// kernel: tpu_custom_call.1
= control target key start
LH: loop header
LB: loop body
LE: loop exit
PB: predicated region body
PF: predicated region fallthrough
CT: control target
= control target key end

     0   :  { %s9816_s0 = inlined_call_operand.vmem [shape: f32[128,32], index: 0, kind: input, shape index: {}]   ;;  %s9817_s1 = inlined_call_operand.vmem [shape: f32[128,32], index: 1, kind: input, shape index: {}]   ;;  %s9818_s2 = inlined_call_operand.vmem [shape: f32[256,16], index: 2, kind: input, shape index: {}]   ;;  %s9819_s3 = inlined_call_operand.vmem [shape: f32[256,32], index: 3, kind: input, shape index: {}]   ;;  %s9820_s4 = inlined_call_operand.vmem [shape: bf16[8,16,256], index: 4, kind: input, shape index: {}]   ;;  %s9821_s5 = inlined_call_operand.vmem [shape: bf16[256,32], index: 5, kind: input, shape index: {}]   ;;  %s9822_s6 = inlined_call_operand.vmem [shape: bf16[16,32], index: 6, kind: input, shape index: {}]   ;;  %s9823_s7 = inlined_call_operand.vmem [shape: f32[1,32], index: 7, kind: input, shape index: {}]   ;;  %s9824_s8 = inlined_call_operand.vmem [shape: bf16[32,32], index: 8, kind: input, shape index: {}]   ;;  %s9825_s9 = inlined_call_operand.vmem [shape: f32[1,32], index: 9, kind: input, shape index: {}]   ;;  %s9826_s10 = inlined_call_operand.vmem [shape: bf16[32,32], index: 10, kind: input, shape index: {}]   ;;  %s9827_s11 = inlined_call_operand.vmem [shape: f32[1,32], index: 11, kind: input, shape index: {}]   ;;  %s9828_s12 = inlined_call_operand.vmem [shape: bf16[32,32], index: 12, kind: input, shape index: {}]   ;;  %s9829_s13 = inlined_call_operand.vmem [shape: f32[1,32], index: 13, kind: input, shape index: {}]   ;;  %s9830_s14 = inlined_call_operand.vmem [shape: bf16[32,32], index: 14, kind: input, shape index: {}]   ;;  %s9831_s15 = inlined_call_operand.vmem [shape: f32[1,32], index: 15, kind: input, shape index: {}]   ;;  %s9832_s16 = inlined_call_operand.vmem [shape: f32[1,32], index: 16, kind: input, shape index: {}]   ;;  %s9833_s17 = inlined_call_operand.vmem [shape: f32[1,32], index: 17, kind: input, shape index: {}]   ;;  %s9834_s18 = inlined_call_operand.vmem [shape: bf16[32,64], index: 18, kind: input, shape index: {}]   ;;  %s9835_s19 = inlined_call_operand.vmem [shape: f32[1,64], index: 19, kind: input, shape index: {}]   ;;  %s9836_s20 = inlined_call_operand.vmem [shape: bf16[64,32], index: 20, kind: input, shape index: {}]   ;;  %s9837_s21 = inlined_call_operand.vmem [shape: f32[1,32], index: 21, kind: input, shape index: {}]   ;;  %s9838_s22 = inlined_call_operand.vmem [shape: f32[1,32], index: 22, kind: input, shape index: {}]   ;;  %s9839_s23 = inlined_call_operand.vmem [shape: f32[1,32], index: 23, kind: input, shape index: {}]   ;;  %s9840_s24 = inlined_call_operand.hbm [shape: f32[16,256], index: 24, kind: output, shape index: {}]  }
   0x1   :  { %9861 = sst [smem:[#allocation18_spill]] %s9816_s0 }
   0x2   :  { %9862 = sst [smem:[#allocation19_spill]] %s9817_s1 }
   0x3   :  { %9863 = sst [smem:[#allocation20_spill]] %s9818_s2 }
   0x4   :  { %9864 = sst [smem:[#allocation21_spill]] %s9819_s3 }
   0x5   :  { %9865 = sst [smem:[#allocation22_spill]] %s9820_s4 }
   0x6   :  { %9866 = sst [smem:[#allocation23_spill]] %s9821_s5 }
   0x7   :  { %9867 = sst [smem:[#allocation24_spill]] %s9822_s6 }
   0x8   :  { %9868 = sst [smem:[#allocation25_spill]] %s9823_s7 }
   0x9   :  { %9869 = sst [smem:[#allocation26_spill]] %s9824_s8 }
   0xa   :  { %9870 = sst [smem:[#allocation27_spill]] %s9835_s19 }
   0xb   :  { %s9871_s27 = sld [smem:[#allocation24_spill]]  ;;  %s9872_s19 = sld [smem:[#allocation20_spill]]  ;;  %vm238_vm0 = vcmask 130048   ;;  %v6090_v41 = vld [vmem:[%s9826_s10] sm:$0xff]   ;;  %vm495_vm1 = vcmask 261120  }
   0xc   :  { %s9873_s0 = sld [smem:[#allocation26_spill]]  ;;  %s9875_s29 = sld [smem:[#allocation19_spill]] }
   0xd   :  { %s9874_s26 = sld [smem:[#allocation18_spill]] }
  0x11   :  { %v6087_v0 = vld [vmem:[%s9871_s27] sm:$0xff]   ;;  %v176_v2 = vld [vmem:[%s9872_s19 + $0x8] sm:$0xff]  ;;  %v177_v3 = vld [vmem:[%s9872_s19 + $0x10] sm:$0xff] }
  0x12   :  { %v175_v1 = vld [vmem:[%s9872_s19] sm:$0xff]  ;;  %5825 = vmatprep.subr.bf16.mxu0 %v6087_v0  ;;  %v178_v5 = vld [vmem:[%s9872_s19 + $0x18] sm:$0xff]  ;;  %v180_v7 = vld [vmem:[%s9872_s19 + $0x28] sm:$0xff]  ;;  %6015 = vmatprep.subr.bf16.mxu1 %v6087_v0 }
  0x13   :  { %v207_v4 = vpack.c.bf16 %v176_v2, %v175_v1  ;;  %v179_v6 = vld [vmem:[%s9872_s19 + $0x20] sm:$0xff]  ;;  %5826 = vmatpush3.bf16.msra.mxu0 %v6087_v0  ;;  %v208_v8 = vpack.c.bf16 %v178_v5, %v177_v3  ;;  %6016 = vmatpush3.bf16.msra.mxu1 %v6087_v0  ;;  %v181_v10 = vld [vmem:[%s9872_s19 + $0x30] sm:$0xff]  ;;  %v182_v11 = vld [vmem:[%s9872_s19 + $0x38] sm:$0xff] }
  0x14   :  { %v209_v9 = vpack.c.bf16 %v180_v7, %v179_v6  ;;  %v183_v12 = vld [vmem:[%s9872_s19 + $0x40] sm:$0xff]  ;;  %v184_v13 = vld [vmem:[%s9872_s19 + $0x48] sm:$0xff]  ;;  %v201_v16 = vld [vmem:[%s9872_s19 + $0xd0] sm:$0xff]  ;;  %v210_v17 = vpack.c.bf16 %v182_v11, %v181_v10 }
  0x15   :  { %5827 = vmatprep.mubr.msk.bf16.mxu0 %vm238_vm0, %v207_v4  ;;  %v199_v14 = vld [vmem:[%s9872_s19 + $0xc0] sm:$0xff]  ;;  %v200_v15 = vld [vmem:[%s9872_s19 + $0xc8] sm:$0xff]  ;;  %v202_v19 = vld [vmem:[%s9872_s19 + $0xd8] sm:$0xff]  ;;  %v211_v22 = vpack.c.bf16 %v184_v13, %v183_v12 }
  0x16   :  { %5828 = vmatmul.mubr.msk.bf16.vlgmr.msra.gmra.mrb[0].mxu0 %vm238_vm0, %v208_v8  ;;  %v219_v18 = vpack.c.bf16 %v200_v15, %v199_v14  ;;  %v203_v20 = vld [vmem:[%s9872_s19 + $0xe0] sm:$0xff]  ;;  %v204_v21 = vld [vmem:[%s9872_s19 + $0xe8] sm:$0xff]  ;;  %v220_v23 = vpack.c.bf16 %v202_v19, %v201_v16  ;;  %v205_v26 = vld [vmem:[%s9872_s19 + $0xf0] sm:$0xff] }
  0x17   :  { %5831 = vmatprep.mubr.msk.bf16.mxu0 %vm238_vm0, %v209_v9  ;;  %v221_v24 = vpack.c.bf16 %v204_v21, %v203_v20  ;;  %v6088_v25 = vld [vmem:[%s9873_s0] sm:$0xff]   ;;  %v206_v27 = vld [vmem:[%s9872_s19 + $0xf8] sm:$0xff]  ;;  %v6089_v28 = vld [vmem:[%s9873_s0 + $0x8] sm:$0xff]  }
  0x18   :  { %5851 = vmatprep.mubr.msk.bf16.mxu1 %vm238_vm0, %v219_v18  ;;  %5859 = vmatprep.subr.bf16.mxu1 %v6088_v25  ;;  %v79_v29 = vld [vmem:[%s9874_s26] sm:$0xff]  ;;  %v80_v30 = vld [vmem:[%s9874_s26 + $0x8] sm:$0xff]  ;;  %v185_v33 = vld [vmem:[%s9872_s19 + $0x50] sm:$0xff]  ;;  %v222_v39 = vpack.c.bf16 %v206_v27, %v205_v26 }
  0x19   :  { %5852 = vmatmul.mubr.msk.bf16.vlgmr.msra.gmra.mrb[0].mxu1 %vm238_vm0, %v220_v23  ;;  %v95_v31 = vld [vmem:[%s9875_s29] sm:$0xff]  ;;  %v96_v32 = vld [vmem:[%s9875_s29 + $0x8] sm:$0xff]  ;;  %v186_v34 = vld [vmem:[%s9872_s19 + $0x58] sm:$0xff] }
  0x1a   :  { %5855 = vmatprep.mubr.msk.bf16.mxu1 %vm238_vm0, %v221_v24  ;;  %v187_v35 = vld [vmem:[%s9872_s19 + $0x60] sm:$0xff]  ;;  %5860 = vmatpush3.bf16.msra.mxu1 %v6088_v25  ;;  %v448_v36 = vadd.f32 %v95_v31, %v79_v29  ;;  %v449_v37 = vadd.f32 %v96_v32, %v80_v30  ;;  %v188_v38 = vld [vmem:[%s9872_s19 + $0x68] sm:$0xff]  ;;  %v81_v40 = vld [vmem:[%s9874_s26 + $0x10] sm:$0xff]  ;;  %v212_v42 = vpack.c.bf16 %v186_v34, %v185_v33 }
  0x1b   :  { %5861 = vmatprep.subr.bf16.mxu1 %v6089_v28  ;;  %v82_v44 = vld [vmem:[%s9874_s26 + $0x18] sm:$0xff]  ;;  %v97_v45 = vld [vmem:[%s9875_s29 + $0x10] sm:$0xff]  ;;  %v213_v47 = vpack.c.bf16 %v188_v38, %v187_v35  ;;  %v83_v48 = vld [vmem:[%s9874_s26 + $0x20] sm:$0xff] }
  0x1c   :  { %v464_v43 = vpack.c.bf16 %v449_v37, %v448_v36  ;;  %v98_v46 = vld [vmem:[%s9875_s29 + $0x18] sm:$0xff]  ;;  %v84_v49 = vld [vmem:[%s9874_s26 + $0x28] sm:$0xff]  ;;  %v99_v50 = vld [vmem:[%s9875_s29 + $0x20] sm:$0xff]  ;;  %v450_v52 = vadd.f32 %v97_v45, %v81_v40 }
  0x1d   :  { %v100_v51 = vld [vmem:[%s9875_s29 + $0x28] sm:$0xff]  ;;  %v451_v53 = vadd.f32 %v98_v46, %v82_v44  ;;  %v189_v54 = vld [vmem:[%s9872_s19 + $0x70] sm:$0xff]  ;;  %v190_v55 = vld [vmem:[%s9872_s19 + $0x78] sm:$0xff]  ;;  %v452_v58 = vadd.f32 %v99_v50, %v83_v48 }
  0x1e   :  { %5832 = vmatmul.mubr.msk.bf16.gmra.mrb[4].mxu0 %vm238_vm0, %v210_v17  ;;  %5862 = vmatpush3.bf16.msra.mxu1 %v6089_v28  ;;  %v191_v56 = vld [vmem:[%s9872_s19 + $0x80] sm:$0xff]  ;;  %v192_v57 = vld [vmem:[%s9872_s19 + $0x88] sm:$0xff]  ;;  %v453_v59 = vadd.f32 %v100_v51, %v84_v49  ;;  %v85_v60 = vld [vmem:[%s9874_s26 + $0x30] sm:$0xff]  ;;  %v214_v5 = vpack.c.bf16 %v190_v55, %v189_v54 }
  0x1f   :  { %5835 = vmatprep.mubr.msk.bf16.mxu0 %vm238_vm0, %v211_v22  ;;  %5879 = vmatprep.subr.bf16.mxu1 %v6090_v41  ;;  %v86_v61 = vld [vmem:[%s9874_s26 + $0x38] sm:$0xff]  ;;  %v101_v62 = vld [vmem:[%s9875_s29 + $0x30] sm:$0xff]  ;;  %v465_v0 = vpack.c.bf16 %v451_v53, %v450_v52  ;;  %v87_v1 = vld [vmem:[%s9874_s26 + $0x40] sm:$0xff]  ;;  %v215_v7 = vpack.c.bf16 %v192_v57, %v191_v56 }
  0x20   :  { %v102_v63 = vld [vmem:[%s9875_s29 + $0x38] sm:$0xff]  ;;  %v88_v2 = vld [vmem:[%s9874_s26 + $0x48] sm:$0xff]  ;;  %v103_v3 = vld [vmem:[%s9875_s29 + $0x40] sm:$0xff]  ;;  %v466_v8 = vpack.c.bf16 %v453_v59, %v452_v58  ;;  %v454_v11 = vadd.f32 %v101_v62, %v85_v60 }
  0x21   :  { %5856 = vmatmul.mubr.msk.bf16.gmra.mrb[4].mxu1 %vm238_vm0, %v222_v39  ;;  %v104_v4 = vld [vmem:[%s9875_s29 + $0x48] sm:$0xff]  ;;  %v193_v9 = vld [vmem:[%s9872_s19 + $0x90] sm:$0xff]  ;;  %v194_v10 = vld [vmem:[%s9872_s19 + $0x98] sm:$0xff]  ;;  %v455_v12 = vadd.f32 %v102_v63, %v86_v61  ;;  %v456_v15 = vadd.f32 %v103_v3, %v87_v1 }
  0x22   :  { %5863 = vmatprep.mubr.msk.bf16.mxu1 %vm495_vm1, %v464_v43  ;;  %v6091_v6 = vld [vmem:[%s9826_s10 + $0x8] sm:$0xff]   ;;  %v195_v13 = vld [vmem:[%s9872_s19 + $0xa0] sm:$0xff]  ;;  %v457_v16 = vadd.f32 %v104_v4, %v88_v2  ;;  %v89_v17 = vld [vmem:[%s9874_s26 + $0x50] sm:$0xff]  ;;  %v216_v26 = vpack.c.bf16 %v194_v10, %v193_v9 }
  0x23   :  { %v196_v14 = vld [vmem:[%s9872_s19 + $0xa8] sm:$0xff]  ;;  %v90_v18 = vld [vmem:[%s9874_s26 + $0x58] sm:$0xff]  ;;  %v105_v19 = vld [vmem:[%s9875_s29 + $0x50] sm:$0xff]  ;;  %v467_v21 = vpack.c.bf16 %v455_v12, %v454_v11 }
  0x24   :  { %v106_v20 = vld [vmem:[%s9875_s29 + $0x58] sm:$0xff]  ;;  %v91_v22 = vld [vmem:[%s9874_s26 + $0x60] sm:$0xff]  ;;  %v92_v23 = vld [vmem:[%s9874_s26 + $0x68] sm:$0xff]  ;;  %v468_v27 = vpack.c.bf16 %v457_v16, %v456_v15  ;;  %v217_v28 = vpack.c.bf16 %v196_v14, %v195_v13  ;;  %v458_v31 = vadd.f32 %v105_v19, %v89_v17 }
  0x25   :  { %v107_v24 = vld [vmem:[%s9875_s29 + $0x60] sm:$0xff]  ;;  %v108_v25 = vld [vmem:[%s9875_s29 + $0x68] sm:$0xff]  ;;  %v197_v29 = vld [vmem:[%s9872_s19 + $0xb0] sm:$0xff]  ;;  %v459_v32 = vadd.f32 %v106_v20, %v90_v18 }
  0x26   :  { %5836 = vmatmul.mubr.msk.bf16.gmra.mrb[8].mxu0 %vm238_vm0, %v212_v42  ;;  %v198_v30 = vld [vmem:[%s9872_s19 + $0xb8] sm:$0xff]  ;;  %v460_v33 = vadd.f32 %v107_v24, %v91_v22  ;;  %v461_v34 = vadd.f32 %v108_v25, %v92_v23 }
  0x27   :  { %5839 = vmatprep.mubr.msk.bf16.mxu0 %vm238_vm0, %v213_v47  ;;  %v469_v35 = vpack.c.bf16 %v459_v32, %v458_v31  ;;  %v218_v36 = vpack.c.bf16 %v198_v30, %v197_v29 }
  0x28   :  { %v470_v37 = vpack.c.bf16 %v461_v34, %v460_v33 }
  0x29   :  { %5864 = vmatmul.mubr.msk.bf16.vlgmr.msra.gmra.mrb[8].mxu1 %vm495_vm1, %v465_v0 }
  0x2a   :  { %5880 = vmatpush3.bf16.msra.mxu1 %v6090_v41  ;;  %5867 = vmatprep.mubr.msk.bf16.mxu1 %vm495_vm1, %v466_v8 }
  0x2b   :  { %5881 = vmatprep.subr.bf16.mxu1 %v6091_v6 }
  0x2e   :  { %5840 = vmatmul.mubr.msk.bf16.gmra.mrb[12].mxu0 %vm238_vm0, %v214_v5  ;;  %5882 = vmatpush3.bf16.msra.mxu1 %v6091_v6 }
  0x2f   :  { %5843 = vmatprep.mubr.msk.bf16.mxu0 %vm238_vm0, %v215_v7 }
  0x31   :  { %5868 = vmatmul.mubr.msk.bf16.gmra.mrb[12].mxu1 %vm495_vm1, %v467_v21 }
  0x32   :  { %5871 = vmatprep.mubr.msk.bf16.mxu1 %vm495_vm1, %v468_v27 }
  0x36   :  { %5844 = vmatmul.mubr.msk.bf16.gmra.mrb[16].mxu0 %vm238_vm0, %v216_v26 }
  0x37   :  { %5847 = vmatprep.mubr.msk.bf16.mxu0 %vm238_vm0, %v217_v28 }
  0x38   :  { %29 = vsyncpa [#allocation3], 0  ;;  %v93_v38 = vld [vmem:[%s9874_s26 + $0x70] sm:$0xff]  ;;  %v94_v39 = vld [vmem:[%s9874_s26 + $0x78] sm:$0xff]  ;;  %s9877_s0 = sld [smem:[#allocation21_spill]]  ;;  %vm1433_vm2 = vcmask 523520  }
  0x39   :  { %5872 = vmatmul.mubr.msk.bf16.gmra.mrb[16].mxu1 %vm495_vm1, %v469_v35  ;;  %v109_v40 = vld [vmem:[%s9875_s29 + $0x70] sm:$0xff]  ;;  %v110_v41 = vld [vmem:[%s9875_s29 + $0x78] sm:$0xff]  ;;  %v6092_v45 = vld [vmem:[%s9828_s12] sm:$0xff]   ;;  %s9876_s29 = sld [smem:[#allocation25_spill]]  ;;  %vm1446_vm3 = vcmask 785920   ;;  %vm1459_vm4 = vcmask 1048320  }
  0x3a   :  { %5875 = vmatprep.mubr.msk.bf16.mxu1 %vm495_vm1, %v470_v37  ;;  %v462_v42 = vadd.f32 %v109_v40, %v93_v38  ;;  %v463_v43 = vadd.f32 %v110_v41, %v94_v39  ;;  %5915 = vmatprep.subr.bf16.mxu0 %v6092_v45  ;;  %v6093_v46 = vld [vmem:[%s9828_s12 + $0x8] sm:$0xff]   ;;  %s9879_s12 = sld [smem:[#allocation23_spill]]  ;;  %vm1525_vm5 = vcmask 785408   ;;  %vm1522_vm6 = vcmask 523264   ;;  %s9906_s5 = sld [smem:[#allocation27_spill]] }
  0x3b   :  { %5916 = vmatpush3.bf16.msra.mxu0 %v6092_v45  ;;  %s6565_s2 = smov 96   ;;  %s6566_s7 = smov [#allocation2]  }
  0x3c   :  { %v471_v44 = vpack.c.bf16 %v463_v43, %v462_v42  ;;  %5917 = vmatprep.subr.bf16.mxu0 %v6093_v46 }
  0x3e   :  { %5848 = vmatmul.mubr.msk.bf16.gmra.mrb[20].mxu0 %vm238_vm0, %v218_v36  ;;  %v113_v51 = vld [vmem:[%s9877_s0 + $0x10] sm:$0xff]  ;;  %v114_v53 = vld [vmem:[%s9877_s0 + $0x18] sm:$0xff]  ;;  %v111_v55 = vld [vmem:[%s9877_s0] sm:$0xff] }
  0x3f   :  { %5918 = vmatpush3.bf16.msra.mxu0 %v6093_v46  ;;  %v6934_v47 = vld [vmem:[%s9876_s29] ss:$0 sm:$0xff]  ;;  %v112_v57 = vld [vmem:[%s9877_s0 + $0x8] sm:$0xff]  ;;  %v137_v3 = vld [vmem:[%s9877_s0 + $0xd0] sm:$0xff]  ;;  %s5079_s29 = sshll.u32 %s6566_s7, 4  ;;  %s5080_s29 = int_to_ptr.vmem [resolvable:$true] %s5079_s29 }
  0x40   :  { %v117_v6 = vld [vmem:[%s9877_s0 + $0x30] sm:$0xff]  ;;  %v135_v9 = vld [vmem:[%s9877_s0 + $0xc0] sm:$0xff]  ;;  %v138_v15 = vld [vmem:[%s9877_s0 + $0xd8] sm:$0xff]  ;;  %p6544_p1 = scmp.lt.s32.totalorder %s5080_s29, %s5080_s29 }
  0x41   :  { %5876 = vmatmul.mubr.msk.bf16.gmra.mrb[20].mxu1 %vm495_vm1, %v471_v44  ;;  %v115_v12 = vld [vmem:[%s9877_s0 + $0x20] sm:$0xff]  ;;  %v118_v18 = vld [vmem:[%s9877_s0 + $0x38] sm:$0xff]  ;;  %v136_v22 = vld [vmem:[%s9877_s0 + $0xc8] sm:$0xff] }
  0x42   :  { %v116_v26 = vld [vmem:[%s9877_s0 + $0x28] sm:$0xff]  ;;  %v141_v43 = vld [vmem:[%s9877_s0 + $0xf0] sm:$0xff] }
  0x43   :  { %v121_v46 = vld [vmem:[%s9877_s0 + $0x50] sm:$0xff] }
  0xe9   :  { %v5829_v48 = vpop.f32.mrb[0].mxu0 }
  0xea   :  { %v330_v49 = vadd.f32 %v5829_v48, %v6934_v47  ;;  %v321_v50 = vpop.f32.mrb[1].mxu0 }
  0xeb   :  { %v322_v52 = vadd.f32 %v6934_v47, %v321_v50  ;;  %v5830_v54 = vpop.f32.mrb[2].mxu0  ;;  %v139_v50 = vld [vmem:[%s9877_s0 + $0xe0] sm:$0xff] }
  0xec   :  { %v333_v56 = vadd.f32 %v5830_v54, %v6934_v47  ;;  %v324_v58 = vpop.f32.mrb[3].mxu0  ;;  %v619_v60 = vadd.f32 %v330_v49, %v113_v51  ;;  %v5853_v4 = vpop.f32.mrb[0].mxu1 }
  0xed   :  { %v325_v59 = vadd.f32 %v6934_v47, %v324_v58  ;;  %v617_v63 = vadd.f32 %v322_v52, %v111_v55  ;;  %v6960_v8 = vadd.f32 %v5853_v4, %v6934_v47  ;;  %v417_v10 = vpop.f32.mrb[1].mxu1 }
  0xee   :  { %v620_v61 = vadd.f32 %v333_v56, %v114_v53  ;;  %v898_v62 = vpack.c.bf16 %v333_v56, %v330_v49  ;;  %v6971_v14 = vadd.f32 %v6934_v47, %v417_v10  ;;  %v5854_v16 = vpop.f32.mrb[2].mxu1  ;;  %v119_v53 = vld [vmem:[%s9877_s0 + $0x40] sm:$0xff]  ;;  %v142_v56 = vld [vmem:[%s9877_s0 + $0xf8] sm:$0xff] }
  0xef   :  { %v618_v0 = vadd.f32 %v325_v59, %v112_v57  ;;  %v897_v1 = vpack.c.bf16 %v325_v59, %v322_v52  ;;  %v6982_v20 = vadd.f32 %v6960_v8, %v137_v3  ;;  %v6985_v21 = vadd.f32 %v5854_v16, %v6934_v47  ;;  %v420_v23 = vpop.f32.mrb[3].mxu1  ;;  %v122_v59 = vld [vmem:[%s9877_s0 + $0x58] sm:$0xff]  ;;  %v120_v3 = vld [vmem:[%s9877_s0 + $0x48] sm:$0xff] }
  0xf0   :  { %v650_v2 = vpack.c.bf16 %v620_v61, %v619_v60  ;;  %v6996_v28 = vadd.f32 %v6971_v14, %v135_v9  ;;  %v6999_v29 = vadd.f32 %v6934_v47, %v420_v23 }
  0xf1   :  { %v649_v5 = vpack.c.bf16 %v618_v0, %v617_v63  ;;  %5919 = vmatprep.mubr.msk.bf16.mxu0 %vm495_vm1, %v897_v1  ;;  %v5833_v7 = vpop.f32.mrb[4].mxu0  ;;  %v7003_v32 = vadd.f32 %v6985_v21, %v138_v15  ;;  %v910_v33 = vpack.c.bf16 %v6985_v21, %v6960_v8  ;;  %v140_v63 = vld [vmem:[%s9877_s0 + $0xe8] sm:$0xff] }
  0xf2   :  { %5920 = vmatmul.mubr.msk.bf16.vlgmr.msra.gmra.mrb[24].mxu0 %vm495_vm1, %v898_v62  ;;  %v346_v11 = vadd.f32 %v5833_v7, %v6934_v47  ;;  %v337_v13 = vpop.f32.mrb[5].mxu0  ;;  %v7008_v36 = vadd.f32 %v6999_v29, %v136_v22  ;;  %v909_v37 = vpack.c.bf16 %v6999_v29, %v6971_v14 }
  0xf3   :  { %5883 = vmatprep.mubr.msk.bf16.mxu1 %vm495_vm1, %v649_v5  ;;  %v338_v17 = vadd.f32 %v6934_v47, %v337_v13  ;;  %v5834_v19 = vpop.f32.mrb[6].mxu0  ;;  %v662_v40 = vpack.c.bf16 %v7003_v32, %v6982_v20 }
  0xf4   :  { %5884 = vmatmul.mubr.msk.bf16.vlgmr.msra.gmra.mrb[24].mxu1 %vm495_vm1, %v650_v2  ;;  %v623_v24 = vadd.f32 %v346_v11, %v117_v6  ;;  %v349_v25 = vadd.f32 %v5834_v19, %v6934_v47  ;;  %v340_v27 = vpop.f32.mrb[7].mxu0  ;;  %v661_v42 = vpack.c.bf16 %v7008_v36, %v6996_v28  ;;  %v5857_v44 = vpop.f32.mrb[4].mxu1 }
  0xf5   :  { %v621_v30 = vadd.f32 %v338_v17, %v115_v12  ;;  %v341_v31 = vadd.f32 %v6934_v47, %v340_v27  ;;  %v7024_v49 = vadd.f32 %v5857_v44, %v6934_v47  ;;  %v433_v51 = vpop.f32.mrb[5].mxu1  ;;  %v125_v27 = vld [vmem:[%s9877_s0 + $0x70] sm:$0xff] }
  0xf6   :  { %v624_v34 = vadd.f32 %v349_v25, %v118_v18  ;;  %v900_v35 = vpack.c.bf16 %v349_v25, %v346_v11  ;;  %v7035_v55 = vadd.f32 %v6934_v47, %v433_v51  ;;  %v5858_v57 = vpop.f32.mrb[6].mxu1 }
  0xf7   :  { %v622_v38 = vadd.f32 %v341_v31, %v116_v26  ;;  %v899_v39 = vpack.c.bf16 %v341_v31, %v338_v17  ;;  %v7046_v61 = vadd.f32 %v7024_v49, %v141_v43  ;;  %v7049_v62 = vadd.f32 %v5858_v57, %v6934_v47  ;;  %v436_v0 = vpop.f32.mrb[7].mxu1  ;;  %v7079_v17 = vld [vmem:[%s9825_s9] ss:$0 sm:$0xff] }
  0xf8   :  { %v652_v41 = vpack.c.bf16 %v624_v34, %v623_v24  ;;  %v7060_v5 = vadd.f32 %v7035_v55, %v139_v50  ;;  %v7063_v6 = vadd.f32 %v6934_v47, %v436_v0 }
  0xf9   :  { %v651_v45 = vpack.c.bf16 %v622_v38, %v621_v30  ;;  %v5837_v48 = vpop.f32.mrb[8].mxu0  ;;  %5923 = vmatprep.mubr.msk.bf16.mxu0 %vm495_vm1, %v899_v39  ;;  %v7067_v10 = vadd.f32 %v7049_v62, %v142_v56  ;;  %v912_v11 = vpack.c.bf16 %v7049_v62, %v7024_v49  ;;  %v123_v38 = vld [vmem:[%s9877_s0 + $0x60] sm:$0xff] }
  0xfa   :  { %v362_v52 = vadd.f32 %v5837_v48, %v6934_v47  ;;  %v353_v54 = vpop.f32.mrb[9].mxu0  ;;  %5924 = vmatmul.mubr.msk.bf16.gmra.mrb[28].mxu0 %vm495_vm1, %v900_v35  ;;  %v7072_v15 = vadd.f32 %v7063_v6, %v140_v63  ;;  %v911_v16 = vpack.c.bf16 %v7063_v6, %v7035_v55  ;;  %v7223_v55 = vld [vmem:[%s9827_s11] ss:$0 sm:$0xff] }
  0xfb   :  { %v354_v58 = vadd.f32 %v6934_v47, %v353_v54  ;;  %v5838_v60 = vpop.f32.mrb[10].mxu0  ;;  %5887 = vmatprep.mubr.msk.bf16.mxu1 %vm495_vm1, %v651_v45  ;;  %v664_v22 = vpack.c.bf16 %v7067_v10, %v7046_v61  ;;  %v126_v45 = vld [vmem:[%s9877_s0 + $0x78] sm:$0xff] }
  0xfc   :  { %v627_v1 = vadd.f32 %v362_v52, %v121_v46  ;;  %v365_v2 = vadd.f32 %v5838_v60, %v6934_v47  ;;  %v356_v4 = vpop.f32.mrb[11].mxu0  ;;  %5888 = vmatmul.mubr.msk.bf16.gmra.mrb[28].mxu1 %vm495_vm1, %v652_v41  ;;  %v663_v24 = vpack.c.bf16 %v7072_v15, %v7060_v5  ;;  %v5865_v25 = vpop.f32.mrb[8].mxu1 }
  0xfd   :  { %v625_v7 = vadd.f32 %v354_v58, %v119_v53  ;;  %v357_v9 = vadd.f32 %v6934_v47, %v356_v4  ;;  %v563_v31 = vadd.f32 %v5865_v25, %v7079_v17  ;;  %v554_v34 = vpop.f32.mrb[9].mxu1  ;;  %v124_v53 = vld [vmem:[%s9877_s0 + $0x68] sm:$0xff] }
  0xfe   :  { %v628_v12 = vadd.f32 %v365_v2, %v122_v59  ;;  %v902_v13 = vpack.c.bf16 %v365_v2, %v362_v52  ;;  %v555_v41 = vadd.f32 %v7079_v17, %v554_v34  ;;  %v5866_v43 = vpop.f32.mrb[10].mxu1 }
  0xff   :  { %v626_v18 = vadd.f32 %v357_v9, %v120_v3  ;;  %v901_v19 = vpack.c.bf16 %v357_v9, %v354_v58  ;;  %v566_v48 = vadd.f32 %v5866_v43, %v7079_v17  ;;  %v557_v50 = vpop.f32.mrb[11].mxu1  ;;  %v129_v9 = vld [vmem:[%s9877_s0 + $0x90] sm:$0xff]  ;;  %v128_v43 = vld [vmem:[%s9877_s0 + $0x88] sm:$0xff] }
 0x100   :  { %v654_v23 = vpack.c.bf16 %v628_v12, %v627_v1  ;;  %v558_v56 = vadd.f32 %v7079_v17, %v557_v50 }
 0x101   :  { %v653_v26 = vpack.c.bf16 %v626_v18, %v625_v7  ;;  %v5841_v30 = vpop.f32.mrb[12].mxu0  ;;  %5927 = vmatprep.mubr.msk.bf16.mxu0 %vm495_vm1, %v901_v19  ;;  %v7109_v59 = vpack.c.bf16 %v566_v48, %v563_v31  ;;  %v130_v31 = vld [vmem:[%s9877_s0 + $0x98] sm:$0xff] }
 0x102   :  { %v378_v35 = vadd.f32 %v5841_v30, %v6934_v47  ;;  %v369_v39 = vpop.f32.mrb[13].mxu0  ;;  %5928 = vmatmul.mubr.msk.bf16.gmra.mrb[32].mxu0 %vm495_vm1, %v902_v13  ;;  %v7111_v0 = vpack.c.bf16 %v558_v56, %v555_v41 }
 0x103   :  { %v370_v44 = vadd.f32 %v6934_v47, %v369_v39  ;;  %v5842_v46 = vpop.f32.mrb[14].mxu0  ;;  %5891 = vmatprep.mubr.msk.bf16.mxu1 %vm495_vm1, %v653_v26 }
 0x104   :  { %v631_v51 = vadd.f32 %v378_v35, %v125_v27  ;;  %v381_v52 = vadd.f32 %v5842_v46, %v6934_v47  ;;  %v372_v54 = vpop.f32.mrb[15].mxu0  ;;  %5892 = vmatmul.mubr.msk.bf16.gmra.mrb[32].mxu1 %vm495_vm1, %v654_v23  ;;  %v5869_v4 = vpop.f32.mrb[12].mxu1  ;;  %v127_v23 = vld [vmem:[%s9877_s0 + $0x80] sm:$0xff] }
 0x105   :  { %v629_v57 = vadd.f32 %v370_v44, %v123_v38  ;;  %v373_v58 = vadd.f32 %v6934_v47, %v372_v54  ;;  %v579_v13 = vadd.f32 %v5869_v4, %v7079_v17  ;;  %v570_v18 = vpop.f32.mrb[13].mxu1 }
 0x106   :  { %v632_v60 = vadd.f32 %v381_v52, %v126_v45  ;;  %v904_v63 = vpack.c.bf16 %v381_v52, %v378_v35  ;;  %v571_v26 = vadd.f32 %v7079_v17, %v570_v18  ;;  %v5870_v27 = vpop.f32.mrb[14].mxu1 }
 0x107   :  { %v630_v1 = vadd.f32 %v373_v58, %v124_v53  ;;  %v903_v2 = vpack.c.bf16 %v373_v58, %v370_v44  ;;  %v582_v35 = vadd.f32 %v5870_v27, %v7079_v17  ;;  %v573_v38 = vpop.f32.mrb[15].mxu1 }
 0x108   :  { %v656_v3 = vpack.c.bf16 %v632_v60, %v631_v51  ;;  %v574_v45 = vadd.f32 %v7079_v17, %v573_v38 }
 0x109   :  { %v655_v7 = vpack.c.bf16 %v630_v1, %v629_v57  ;;  %v5845_v12 = vpop.f32.mrb[16].mxu0  ;;  %5931 = vmatprep.mubr.msk.bf16.mxu0 %vm495_vm1, %v903_v2  ;;  %v7137_v50 = vpack.c.bf16 %v582_v35, %v579_v13 }
 0x10a   :  { %v394_v19 = vadd.f32 %v5845_v12, %v6934_v47  ;;  %v385_v25 = vpop.f32.mrb[17].mxu0  ;;  %5932 = vmatmul.mubr.msk.bf16.gmra.mrb[36].mxu0 %vm495_vm1, %v904_v63  ;;  %v7139_v53 = vpack.c.bf16 %v574_v45, %v571_v26  ;;  %v133_v63 = vld [vmem:[%s9877_s0 + $0xb0] sm:$0xff] }
 0x10b   :  { %v386_v30 = vadd.f32 %v6934_v47, %v385_v25  ;;  %v5846_v34 = vpop.f32.mrb[18].mxu0  ;;  %5895 = vmatprep.mubr.msk.bf16.mxu1 %vm495_vm1, %v655_v7  ;;  %v131_v7 = vld [vmem:[%s9877_s0 + $0xa0] sm:$0xff] }
 0x10c   :  { %v635_v39 = vadd.f32 %v394_v19, %v129_v9  ;;  %v397_v41 = vadd.f32 %v5846_v34, %v6934_v47  ;;  %v388_v44 = vpop.f32.mrb[19].mxu0  ;;  %5896 = vmatmul.mubr.msk.bf16.gmra.mrb[36].mxu1 %vm495_vm1, %v656_v3  ;;  %v5873_v58 = vpop.f32.mrb[16].mxu1 }
 0x10d   :  { %v633_v46 = vadd.f32 %v386_v30, %v127_v23  ;;  %v389_v48 = vadd.f32 %v6934_v47, %v388_v44  ;;  %v595_v2 = vadd.f32 %v5873_v58, %v7079_v17  ;;  %v586_v3 = vpop.f32.mrb[17].mxu1 }
 0x10e   :  { %v636_v51 = vadd.f32 %v397_v41, %v130_v31  ;;  %v906_v52 = vpack.c.bf16 %v397_v41, %v394_v19  ;;  %v587_v12 = vadd.f32 %v7079_v17, %v586_v3  ;;  %v5874_v13 = vpop.f32.mrb[18].mxu1  ;;  %v134_v19 = vld [vmem:[%s9877_s0 + $0xb8] sm:$0xff]  ;;  %v132_v31 = vld [vmem:[%s9877_s0 + $0xa8] sm:$0xff]  ;;  %s9892_s0 = sld [smem:[#allocation22_spill]] }
 0x10f   :  { %v634_v54 = vadd.f32 %v389_v48, %v128_v43  ;;  %v905_v56 = vpack.c.bf16 %v389_v48, %v386_v30  ;;  %v598_v25 = vadd.f32 %v5874_v13, %v7079_v17  ;;  %v589_v26 = vpop.f32.mrb[19].mxu1 }
 0x110   :  { %v658_v57 = vpack.c.bf16 %v636_v51, %v635_v39  ;;  %v590_v35 = vadd.f32 %v7079_v17, %v589_v26 }
 0x111   :  { %v657_v60 = vpack.c.bf16 %v634_v54, %v633_v46  ;;  %v5849_v1 = vpop.f32.mrb[20].mxu0  ;;  %5935 = vmatprep.mubr.msk.bf16.mxu0 %vm495_vm1, %v905_v56  ;;  %v7165_v41 = vpack.c.bf16 %v598_v25, %v595_v2  ;;  %v7274_v25 = vld [vmem:[%s9879_s12 + $0x50] sm:$0xff]  }
 0x112   :  { %v410_v4 = vadd.f32 %v5849_v1, %v6934_v47  ;;  %v401_v9 = vpop.f32.mrb[21].mxu0  ;;  %5936 = vmatmul.mubr.msk.bf16.gmra.mrb[40].mxu0 %vm495_vm1, %v906_v52  ;;  %v7167_v45 = vpack.c.bf16 %v590_v35, %v587_v12  ;;  %v7250_v1 = vld [vmem:[%s9879_s12 + $0x48] sm:$0xff]  }
 0x113   :  { %v402_v18 = vadd.f32 %v6934_v47, %v401_v9  ;;  %v5850_v23 = vpop.f32.mrb[22].mxu0  ;;  %5899 = vmatprep.mubr.msk.bf16.mxu1 %vm495_vm1, %v657_v60  ;;  %v7263_v12 = vld [vmem:[%s9879_s12 + $0x8] sm:$0xff]  }
 0x114   :  { %v639_v27 = vadd.f32 %v410_v4, %v133_v63  ;;  %v413_v30 = vadd.f32 %v5850_v23, %v6934_v47  ;;  %v404_v34 = vpop.f32.mrb[23].mxu0  ;;  %5900 = vmatmul.mubr.msk.bf16.gmra.mrb[40].mxu1 %vm495_vm1, %v658_v57 }
 0x115   :  { %v637_v38 = vadd.f32 %v402_v18, %v131_v7  ;;  %v405_v39 = vadd.f32 %v6934_v47, %v404_v34  ;;  %v5877_v47 = vpop.f32.mrb[20].mxu1 }
 0x116   :  { %v640_v43 = vadd.f32 %v413_v30, %v134_v19  ;;  %v908_v44 = vpack.c.bf16 %v413_v30, %v410_v4  ;;  %v611_v8 = vadd.f32 %v5877_v47, %v7079_v17  ;;  %v602_v14 = vpop.f32.mrb[21].mxu1 }
 0x117   :  { %v638_v46 = vadd.f32 %v405_v39, %v132_v31  ;;  %v907_v48 = vpack.c.bf16 %v405_v39, %v402_v18  ;;  %v603_v20 = vadd.f32 %v7079_v17, %v602_v14  ;;  %v5878_v21 = vpop.f32.mrb[22].mxu1  ;;  %v7288_v39 = vld [vmem:[%s9879_s12 + $0x58] sm:$0xff]  }
 0x118   :  { %v660_v51 = vpack.c.bf16 %v640_v43, %v639_v27  ;;  %v614_v28 = vadd.f32 %v5878_v21, %v7079_v17  ;;  %v605_v29 = vpop.f32.mrb[23].mxu1 }
 0x119   :  { %v659_v52 = vpack.c.bf16 %v638_v46, %v637_v38  ;;  %5939 = vmatprep.mubr.msk.bf16.mxu0 %vm495_vm1, %v907_v48  ;;  %v606_v32 = vadd.f32 %v7079_v17, %v605_v29  ;;  %v7232_v17 = vld [vmem:[%s9879_s12 + $0x40] sm:$0xff]   ;;  %v7283_v38 = vld [vmem:[%s9879_s12 + $0x10] sm:$0xff]   ;;  %v7295_v46 = vld [vmem:[%s9879_s12 + $0x18] sm:$0xff]  }
 0x11a   :  { %5940 = vmatmul.mubr.msk.bf16.gmra.mrb[44].mxu0 %vm495_vm1, %v908_v44 }
 0x11b   :  { %5903 = vmatprep.mubr.msk.bf16.mxu1 %vm495_vm1, %v659_v52  ;;  %5943 = vmatprep.mubr.msk.bf16.mxu0 %vm495_vm1, %v909_v37  ;;  %v7213_v36 = vpack.c.bf16 %v606_v32, %v603_v20 }
 0x11c   :  { %5904 = vmatmul.mubr.msk.bf16.gmra.mrb[44].mxu1 %vm495_vm1, %v660_v51 }
 0x11d   :  { %5907 = vmatprep.mubr.msk.bf16.mxu1 %vm495_vm1, %v661_v42 }
 0x122   :  { %5944 = vmatmul.mubr.msk.bf16.gmra.mrb[48].mxu0 %vm495_vm1, %v910_v33  ;;  %v7211_v33 = vpack.c.bf16 %v614_v28, %v611_v8 }
 0x123   :  { %5947 = vmatprep.mubr.msk.bf16.mxu0 %vm495_vm1, %v911_v16 }
 0x124   :  { %5908 = vmatmul.mubr.msk.bf16.gmra.mrb[48].mxu1 %vm495_vm1, %v662_v40  ;;  %9878 = vst [vmem:[#allocation5_spill] sm:$0xff] %v7211_v33  ;;  %v7218_v40 = vld [vmem:[%s9829_s13] ss:$0 sm:$0xff] }
 0x125   :  { %5911 = vmatprep.mubr.msk.bf16.mxu1 %vm495_vm1, %v663_v24 }
 0x12a   :  { %5948 = vmatmul.mubr.msk.bf16.gmra.mrb[52].mxu0 %vm495_vm1, %v912_v11 }
 0x12c   :  { %5912 = vmatmul.mubr.msk.bf16.gmra.mrb[52].mxu1 %vm495_vm1, %v664_v22  ;;  %v7237_v22 = vld [vmem:[%s9879_s12] sm:$0xff]  }
 0x12d   :  { %5313 = vmatprep.mubr.msk.bf16.mxu1 %vm495_vm1, %v7111_v0 }
 0x1c5   :  { %v5921_v37 = vpop.f32.mrb[24].mxu0 }
 0x1c6   :  { %v1018_v42 = vpop.f32.mrb[25].mxu0  ;;  %v1027_v62 = vadd.f32 %v5921_v37, %v7218_v40 }
 0x1c7   :  { %v5885_v49 = vpop.f32.mrb[24].mxu1  ;;  %v5922_v61 = vpop.f32.mrb[26].mxu0  ;;  %v1019_v11 = vadd.f32 %v7218_v40, %v1018_v42 }
 0x1c8   :  { %v1030_v5 = vadd.f32 %v5922_v61, %v7218_v40  ;;  %v770_v6 = vpop.f32.mrb[25].mxu1  ;;  %v1021_v10 = vpop.f32.mrb[27].mxu0  ;;  %v779_v24 = vadd.f32 %v5885_v49, %v7223_v55  ;;  %v7317_v49 = vld [vmem:[%s9879_s12 + $0x60] sm:$0xff]  }
 0x1c9   :  { %v1022_v15 = vadd.f32 %v7218_v40, %v1021_v10  ;;  %v5886_v16 = vpop.f32.mrb[26].mxu1  ;;  %v771_v58 = vadd.f32 %v7223_v55, %v770_v6 }
 0x1ca   :  { %v7240_v54 = vpack.c.bf16 %v1030_v5, %v1027_v62  ;;  %v782_v56 = vadd.f32 %v5886_v16, %v7223_v55  ;;  %v773_v57 = vpop.f32.mrb[27].mxu1 }
 0x1cb   :  { %v7244_v60 = vpack.c.bf16 %v1022_v15, %v1019_v11  ;;  %v774_v63 = vadd.f32 %v7223_v55, %v773_v57 }
 0x1cc   :  { %v7252_v2 = vpack.c.bf16 %v782_v56, %v779_v24  ;;  %v1306_v19 = vmul.bf16 %v7250_v1, %v7240_v54  ;;  %v1298_v44 = vmul.bf16 %v7263_v12, %v7240_v54  ;;  %v1308_v8 = vmul.bf16 %v7288_v39, %v7240_v54 }
 0x1cd   :  { %v7254_v3 = vpack.c.bf16 %v774_v63, %v771_v58  ;;  %v1305_v4 = vmul.bf16 %v7232_v17, %v7244_v60  ;;  %v1297_v7 = vmul.bf16 %v7237_v22, %v7244_v60  ;;  %v5925_v9 = vpop.f32.mrb[28].mxu0  ;;  %v1307_v51 = vmul.bf16 %v7274_v25, %v7244_v60 }
 0x1ce   :  { %v1034_v13 = vpop.f32.mrb[29].mxu0  ;;  %v1290_v35 = vmul.bf16 %v7250_v1, %v7252_v2  ;;  %v1282_v52 = vmul.bf16 %v7263_v12, %v7252_v2  ;;  %v1299_v47 = vmul.bf16 %v7283_v38, %v7244_v60  ;;  %v1043_v14 = vadd.f32 %v5925_v9, %v7218_v40 }
 0x1cf   :  { %5315 = vmatprep.subr.bf16.mxu0 %v1305_v4  ;;  %v1289_v18 = vmul.bf16 %v7232_v17, %v7254_v3  ;;  %v1281_v23 = vmul.bf16 %v7237_v22, %v7254_v3  ;;  %v5889_v26 = vpop.f32.mrb[28].mxu1  ;;  %v5926_v27 = vpop.f32.mrb[30].mxu0  ;;  %v1291_v21 = vmul.bf16 %v7274_v25, %v7254_v3  ;;  %v1300_v28 = vmul.bf16 %v7295_v46, %v7240_v54 }
 0x1d0   :  { %5316 = vmatpush3.bf16.msra.mxu0 %v1297_v7  ;;  %v786_v30 = vpop.f32.mrb[29].mxu1  ;;  %v1037_v31 = vpop.f32.mrb[31].mxu0  ;;  %v1035_v29 = vadd.f32 %v7218_v40, %v1034_v13  ;;  %v795_v32 = vadd.f32 %v5889_v26, %v7223_v55  ;;  %v1320_v42 = vsel %vm495_vm1, %v1282_v52, 0  ;;  %v1046_v61 = vadd.f32 %v5926_v27, %v7218_v40  ;;  %v7335_v13 = vld [vmem:[%s9879_s12 + $0x20] sm:$0xff]  }
 0x1d1   :  { %6017 = vmatprep.subr.msk.bf16.mxu1 %vm495_vm1, %v1289_v18  ;;  %5317 = vmatprep.subr.bf16.mxu0 %v1306_v19  ;;  %v1317_v34 = vsel %vm495_vm1, %v1281_v23, 0  ;;  %v5890_v43 = vpop.f32.mrb[30].mxu1  ;;  %v787_v62 = vadd.f32 %v7223_v55, %v786_v30  ;;  %v1038_v5 = vadd.f32 %v7218_v40, %v1037_v31  ;;  %v1309_v30 = vmul.bf16 %v7317_v49, %v7244_v60  ;;  %v7349_v31 = vld [vmem:[%s9879_s12 + $0x68] sm:$0xff]  }
 0x1d2   :  { %5298 = vmatpush3.bf16.xpose.msra.mxu1 %v1317_v34  ;;  %v789_v48 = vpop.f32.mrb[31].mxu1  ;;  %v798_v11 = vadd.f32 %v5890_v43, %v7223_v55  ;;  %v7326_v58 = vpack.c.bf16 %v1046_v61, %v1043_v14  ;;  %v7368_v14 = vld [vmem:[%s9879_s12 + $0x28] sm:$0xff]  }
 0x1d3   :  { %6018 = vmatprep.subr.msk.bf16.mxu1 %vm495_vm1, %v1290_v35  ;;  %v790_v16 = vadd.f32 %v7223_v55, %v789_v48  ;;  %v7328_v63 = vpack.c.bf16 %v1038_v5, %v1035_v29  ;;  %v1283_v48 = vmul.bf16 %v7283_v38, %v7254_v3  ;;  %v7376_v29 = vld [vmem:[%s9879_s12 + $0x70] sm:$0xff]  }
 0x1d4   :  { %5318 = vmatpush3.bf16.msra.mxu0 %v1298_v44  ;;  %v7337_v18 = vpack.c.bf16 %v798_v11, %v795_v32  ;;  %v1292_v11 = vmul.bf16 %v7288_v39, %v7252_v2 }
 0x1d5   :  { %5319 = vmatprep.subr.bf16.mxu0 %v1307_v51  ;;  %v5929_v20 = vpop.f32.mrb[32].mxu0  ;;  %v7339_v19 = vpack.c.bf16 %v790_v16, %v787_v62 }
 0x1d6   :  { %v1050_v37 = vpop.f32.mrb[33].mxu0  ;;  %v1059_v15 = vadd.f32 %v5929_v20, %v7218_v40 }
 0x1d7   :  { %v5893_v6 = vpop.f32.mrb[32].mxu1  ;;  %v5930_v10 = vpop.f32.mrb[34].mxu0  ;;  %v1051_v24 = vadd.f32 %v7218_v40, %v1050_v37 }
 0x1d8   :  { %5320 = vmatpush3.bf16.msra.mxu0 %v1299_v47  ;;  %v802_v56 = vpop.f32.mrb[33].mxu1  ;;  %v1053_v57 = vpop.f32.mrb[35].mxu0  ;;  %v811_v4 = vadd.f32 %v5893_v6, %v7223_v55  ;;  %v1062_v7 = vadd.f32 %v5930_v10, %v7218_v40  ;;  %v1323_v10 = vsel %vm495_vm1, %v1283_v48, 0 }
 0x1d9   :  { %5321 = vmatprep.subr.bf16.mxu0 %v1308_v8  ;;  %v5894_v9 = vpop.f32.mrb[34].mxu1  ;;  %v803_v23 = vadd.f32 %v7223_v55, %v802_v56  ;;  %v1054_v26 = vadd.f32 %v7218_v40, %v1053_v57  ;;  %v1301_v8 = vmul.bf16 %v7335_v13, %v7244_v60  ;;  %v1302_v56 = vmul.bf16 %v7368_v14, %v7240_v54  ;;  %v7391_v57 = vld [vmem:[%s9879_s12 + $0x30] sm:$0xff]  }
 0x1da   :  { %5300 = vmatpush3.bf16.xpose.msra.mxu1 %v1320_v42  ;;  %v805_v27 = vpop.f32.mrb[35].mxu1  ;;  %v7351_v34 = vpack.c.bf16 %v1062_v7, %v1059_v15  ;;  %v814_v35 = vadd.f32 %v5894_v9, %v7223_v55 }
 0x1db   :  { %6019 = vmatprep.subr.msk.bf16.mxu1 %vm495_vm1, %v1291_v21  ;;  %v806_v43 = vadd.f32 %v7223_v55, %v805_v27  ;;  %v7355_v44 = vpack.c.bf16 %v1054_v26, %v1051_v24  ;;  %v7402_v26 = vld [vmem:[%s9879_s12 + $0x78] sm:$0xff]  }
 0x1dc   :  { %9880 = vst [vmem:[#allocation6_spill] sm:$0xff] %v7351_v34  ;;  %5322 = vmatpush3.bf16.msra.mxu0 %v1300_v28  ;;  %v7359_v51 = vpack.c.bf16 %v814_v35, %v811_v4  ;;  %v1310_v28 = vmul.bf16 %v7349_v31, %v7240_v54 }
 0x1dd   :  { %9881 = vst [vmem:[#allocation7_spill] sm:$0xff] %v7355_v44  ;;  %5323 = vmatprep.subr.bf16.mxu0 %v1309_v30  ;;  %v5933_v52 = vpop.f32.mrb[36].mxu0  ;;  %v7361_v47 = vpack.c.bf16 %v806_v43, %v803_v23  ;;  %v1311_v23 = vmul.bf16 %v7376_v29, %v7244_v60  ;;  %v1284_v43 = vmul.bf16 %v7295_v46, %v7252_v2 }
 0x1de   :  { %v1075_v20 = vadd.f32 %v5933_v52, %v7218_v40  ;;  %v1066_v21 = vpop.f32.mrb[37].mxu0 }
 0x1df   :  { %v1067_v32 = vadd.f32 %v7218_v40, %v1066_v21  ;;  %v5897_v37 = vpop.f32.mrb[36].mxu1  ;;  %v5934_v42 = vpop.f32.mrb[38].mxu0 }
 0x1e0   :  { %5324 = vmatpush3.bf16.msra.mxu0 %v1301_v8  ;;  %v827_v61 = vadd.f32 %v5897_v37, %v7223_v55  ;;  %v1078_v62 = vadd.f32 %v5934_v42, %v7218_v40  ;;  %v818_v5 = vpop.f32.mrb[37].mxu1  ;;  %v1069_v6 = vpop.f32.mrb[39].mxu0  ;;  %v1303_v8 = vmul.bf16 %v7391_v57, %v7244_v60 }
 0x1e1   :  { %5325 = vmatprep.subr.bf16.mxu0 %v1310_v28  ;;  %v819_v15 = vadd.f32 %v7223_v55, %v818_v5  ;;  %v1070_v16 = vadd.f32 %v7218_v40, %v1069_v6  ;;  %v5898_v24 = vpop.f32.mrb[38].mxu1 }
 0x1e2   :  { %5302 = vmatpush3.bf16.xpose.msra.mxu1 %v1323_v10  ;;  %v7393_v4 = vpack.c.bf16 %v1078_v62, %v1075_v20  ;;  %v830_v7 = vadd.f32 %v5898_v24, %v7223_v55  ;;  %v821_v9 = vpop.f32.mrb[39].mxu1  ;;  %v7418_v20 = vld [vmem:[%s9879_s12 + $0x38] sm:$0xff]   ;;  %v1293_v62 = vmul.bf16 %v7317_v49, %v7254_v3 }
 0x1e3   :  { %6020 = vmatprep.subr.msk.bf16.mxu1 %vm495_vm1, %v1292_v11  ;;  %v7404_v27 = vpack.c.bf16 %v1070_v16, %v1067_v32  ;;  %v822_v30 = vadd.f32 %v7223_v55, %v821_v9  ;;  %v1312_v32 = vmul.bf16 %v7402_v26, %v7240_v54  ;;  %v1326_v11 = vsel %vm495_vm1, %v1284_v43, 0 }
 0x1e4   :  { %9882 = vst [vmem:[#allocation8_spill] sm:$0xff] %v7393_v4  ;;  %5326 = vmatpush3.bf16.msra.mxu0 %v1302_v56  ;;  %v7407_v35 = vpack.c.bf16 %v830_v7, %v827_v61  ;;  %v1630_v56 = vmul.bf16 %v7232_v17, %v7339_v19  ;;  %v1304_v7 = vmul.bf16 %v7418_v20, %v7240_v54 }
 0x1e5   :  { %9883 = vst [vmem:[#allocation9_spill] sm:$0xff] %v7404_v27  ;;  %5327 = vmatprep.subr.bf16.mxu0 %v1311_v23  ;;  %v5937_v48 = vpop.f32.mrb[40].mxu0  ;;  %v7411_v52 = vpack.c.bf16 %v822_v30, %v819_v15 }
 0x1e6   :  { %v1091_v21 = vadd.f32 %v5937_v48, %v7218_v40  ;;  %v1082_v28 = vpop.f32.mrb[41].mxu0 }
 0x1e7   :  { %v1083_v37 = vadd.f32 %v7218_v40, %v1082_v28  ;;  %v5901_v42 = vpop.f32.mrb[40].mxu1  ;;  %v5938_v61 = vpop.f32.mrb[42].mxu0  ;;  %v1285_v28 = vmul.bf16 %v7335_v13, %v7254_v3 }
 0x1e8   :  { %5328 = vmatpush3.bf16.msra.mxu0 %v1303_v8  ;;  %v843_v60 = vadd.f32 %v5901_v42, %v7223_v55  ;;  %v1094_v5 = vadd.f32 %v5938_v61, %v7218_v40  ;;  %v834_v6 = vpop.f32.mrb[41].mxu1  ;;  %v1085_v10 = vpop.f32.mrb[43].mxu0 }
 0x1e9   :  { %5329 = vmatprep.subr.bf16.mxu0 %v1312_v32  ;;  %v835_v15 = vadd.f32 %v7223_v55, %v834_v6  ;;  %v1086_v16 = vadd.f32 %v7218_v40, %v1085_v10  ;;  %v5902_v24 = vpop.f32.mrb[42].mxu1 }
 0x1ea   :  { %5304 = vmatpush3.bf16.xpose.msra.mxu1 %v1326_v11  ;;  %v7435_v9 = vpack.c.bf16 %v1094_v5, %v1091_v21  ;;  %v846_v23 = vadd.f32 %v5902_v24, %v7223_v55  ;;  %v837_v30 = vpop.f32.mrb[43].mxu1  ;;  %v1329_v11 = vsel %vm495_vm1, %v1285_v28, 0 }
 0x1eb   :  { %6021 = vmatprep.subr.msk.bf16.mxu1 %vm495_vm1, %v1293_v62  ;;  %v7439_v43 = vpack.c.bf16 %v1086_v16, %v1083_v37  ;;  %v838_v48 = vadd.f32 %v7223_v55, %v837_v30 }
 0x1ec   :  { %9884 = vst [vmem:[#allocation10_spill] sm:$0xff] %v7435_v9  ;;  %5330 = vmatpush3.bf16.msra.mxu0 %v1304_v7  ;;  %v7442_v8 = vpack.c.bf16 %v846_v23, %v843_v60 }
 0x1ed   :  { %9885 = vst [vmem:[#allocation11_spill] sm:$0xff] %v7439_v43  ;;  %v5941_v32 = vpop.f32.mrb[44].mxu0  ;;  %v7446_v42 = vpack.c.bf16 %v838_v48, %v835_v15  ;;  %6025 = vmatprep.subr.msk.bf16.mxu0 %vm495_vm1, %v1630_v56  ;;  %v1294_v15 = vmul.bf16 %v7349_v31, %v7252_v2 }
 0x1ee   :  { %v1107_v54 = vadd.f32 %v5941_v32, %v7218_v40  ;;  %v1098_v21 = vpop.f32.mrb[45].mxu0 }
 0x1ef   :  { %v1099_v61 = vadd.f32 %v7218_v40, %v1098_v21  ;;  %v5905_v37 = vpop.f32.mrb[44].mxu1  ;;  %v5942_v62 = vpop.f32.mrb[46].mxu0  ;;  %v1286_v21 = vmul.bf16 %v7368_v14, %v7252_v2 }
 0x1f0   :  { %v859_v5 = vadd.f32 %v5905_v37, %v7223_v55  ;;  %v1110_v60 = vadd.f32 %v5942_v62, %v7218_v40  ;;  %v850_v6 = vpop.f32.mrb[45].mxu1  ;;  %v1101_v10 = vpop.f32.mrb[47].mxu0 }
 0x1f1   :  { %v851_v16 = vadd.f32 %v7223_v55, %v850_v6  ;;  %v1102_v24 = vadd.f32 %v7218_v40, %v1101_v10  ;;  %v5906_v56 = vpop.f32.mrb[46].mxu1 }
 0x1f2   :  { %5306 = vmatpush3.bf16.xpose.msra.mxu1 %v1329_v11  ;;  %v7458_v7 = vpack.c.bf16 %v1110_v60, %v1107_v54  ;;  %v862_v23 = vadd.f32 %v5906_v56, %v7223_v55  ;;  %v853_v30 = vpop.f32.mrb[47].mxu1  ;;  %v1332_v56 = vsel %vm495_vm1, %v1286_v21, 0 }
 0x1f3   :  { %6022 = vmatprep.subr.msk.bf16.mxu1 %vm495_vm1, %v1294_v15  ;;  %v7462_v48 = vpack.c.bf16 %v1102_v24, %v1099_v61  ;;  %v854_v28 = vadd.f32 %v7223_v55, %v853_v30 }
 0x1f4   :  { %9886 = vst [vmem:[#allocation12_spill] sm:$0xff] %v7458_v7  ;;  %v7465_v32 = vpack.c.bf16 %v862_v23, %v859_v5  ;;  %v1295_v23 = vmul.bf16 %v7376_v29, %v7254_v3 }
 0x1f5   :  { %9887 = vst [vmem:[#allocation13_spill] sm:$0xff] %v7462_v48  ;;  %v5945_v37 = vpop.f32.mrb[48].mxu0  ;;  %v7469_v62 = vpack.c.bf16 %v854_v28, %v851_v16 }
 0x1f6   :  { %v1123_v54 = vadd.f32 %v5945_v37, %v7218_v40  ;;  %v1114_v60 = vpop.f32.mrb[49].mxu0 }
 0x1f7   :  { %v1115_v6 = vadd.f32 %v7218_v40, %v1114_v60  ;;  %v5909_v10 = vpop.f32.mrb[48].mxu1  ;;  %v5946_v11 = vpop.f32.mrb[50].mxu0 }
 0x1f8   :  { %v875_v61 = vadd.f32 %v5909_v10, %v7223_v55  ;;  %v1126_v15 = vadd.f32 %v5946_v11, %v7218_v40  ;;  %v866_v24 = vpop.f32.mrb[49].mxu1  ;;  %v1117_v5 = vpop.f32.mrb[51].mxu0 }
 0x1f9   :  { %v867_v16 = vadd.f32 %v7223_v55, %v866_v24  ;;  %v1118_v30 = vadd.f32 %v7218_v40, %v1117_v5  ;;  %v5910_v28 = vpop.f32.mrb[50].mxu1  ;;  %v1287_v24 = vmul.bf16 %v7391_v57, %v7254_v3  ;;  %v1296_v3 = vmul.bf16 %v7402_v26, %v7252_v2 }
 0x1fa   :  { %5308 = vmatpush3.bf16.xpose.msra.mxu1 %v1332_v56  ;;  %v7480_v37 = vpack.c.bf16 %v1126_v15, %v1123_v54  ;;  %v878_v60 = vadd.f32 %v5910_v28, %v7223_v55  ;;  %v869_v10 = vpop.f32.mrb[51].mxu1 }
 0x1fb   :  { %6023 = vmatprep.subr.msk.bf16.mxu1 %vm495_vm1, %v1295_v23  ;;  %v7484_v11 = vpack.c.bf16 %v1118_v30, %v1115_v6  ;;  %v870_v21 = vadd.f32 %v7223_v55, %v869_v10 }
 0x1fc   :  { %9888 = vst [vmem:[#allocation14_spill] sm:$0xff] %v7480_v37  ;;  %v7487_v7 = vpack.c.bf16 %v878_v60, %v875_v61  ;;  %v1335_v60 = vsel %vm495_vm1, %v1287_v24, 0 }
 0x1fd   :  { %9889 = vst [vmem:[#allocation15_spill] sm:$0xff] %v7484_v11  ;;  %v7491_v48 = vpack.c.bf16 %v870_v21, %v867_v16  ;;  %v5949_v5 = vpop.f32.mrb[52].mxu0 }
 0x1fe   :  { %v1139_v54 = vadd.f32 %v5949_v5, %v7218_v40  ;;  %v1130_v15 = vpop.f32.mrb[53].mxu0 }
 0x1ff   :  { %v1131_v56 = vadd.f32 %v7218_v40, %v1130_v15  ;;  %v5913_v28 = vpop.f32.mrb[52].mxu1  ;;  %v5950_v37 = vpop.f32.mrb[54].mxu0 }
 0x200   :  { %v891_v6 = vadd.f32 %v5913_v28, %v7223_v55  ;;  %v1142_v23 = vadd.f32 %v5950_v37, %v7218_v40  ;;  %v882_v30 = vpop.f32.mrb[53].mxu1  ;;  %v1133_v61 = vpop.f32.mrb[55].mxu0 }
 0x201   :  { %v883_v16 = vadd.f32 %v7223_v55, %v882_v30  ;;  %v1134_v10 = vadd.f32 %v7218_v40, %v1133_v61  ;;  %v5914_v21 = vpop.f32.mrb[54].mxu1  ;;  %v1288_v30 = vmul.bf16 %v7418_v20, %v7252_v2 }
 0x202   :  { %5310 = vmatpush3.bf16.xpose.msra.mxu1 %v1335_v60  ;;  %v7502_v5 = vpack.c.bf16 %v1142_v23, %v1139_v54  ;;  %v894_v15 = vadd.f32 %v5914_v21, %v7223_v55  ;;  %v885_v28 = vpop.f32.mrb[55].mxu1  ;;  %v1412_v54 = vld [vmem:[%s9892_s0 + $0x8] sm:$0xff] }
 0x203   :  { %6024 = vmatprep.subr.msk.bf16.mxu1 %vm495_vm1, %v1296_v3  ;;  %v7506_v37 = vpack.c.bf16 %v1134_v10, %v1131_v56  ;;  %v886_v24 = vadd.f32 %v7223_v55, %v885_v28  ;;  %v1338_v40 = vsel %vm495_vm1, %v1288_v30, 0  ;;  %v1411_v55 = vld [vmem:[%s9892_s0] sm:$0xff] }
 0x204   :  { %9890 = vst [vmem:[#allocation16_spill] sm:$0xff] %v7502_v5  ;;  %v7509_v11 = vpack.c.bf16 %v894_v15, %v891_v6  ;;  %v1413_v2 = vunpack.c.l.bf16 %v1411_v55  ;;  %v1414_v6 = vunpack.c.h.bf16 %v1411_v55 }
 0x205   :  { %9891 = vst [vmem:[#allocation17_spill] sm:$0xff] %v7506_v37  ;;  %v7513_v9 = vpack.c.bf16 %v886_v24, %v883_v16  ;;  %v1415_v16 = vunpack.c.l.bf16 %v1412_v54 }
 0x20a   :  { %5312 = vmatpush3.bf16.xpose.msra.mxu1 %v1338_v40 }
 0x20b   :  { %5337 = vmatprep.subr.bf16.mxu1 %v7232_v17 }
 0x211   :  { %5314 = vmatmul.mubr.msk.bf16.vlgmr.msra.gmra.mrb[56].mxu1 %vm495_vm1, %v7111_v0  ;;  %v1646_v0 = vmul.bf16 %v7232_v17, %v7328_v63 }
 0x212   :  { %5338 = vmatpush3.bf16.msra.mxu1 %v7237_v22 }
 0x213   :  { %5339 = vmatprep.subr.bf16.mxu1 %v7250_v1 }
 0x216   :  { %5340 = vmatpush3.bf16.msra.mxu1 %v7263_v12 }
 0x217   :  { %5341 = vmatprep.subr.bf16.mxu1 %v7274_v25 }
 0x21a   :  { %5342 = vmatpush3.bf16.msra.mxu1 %v7283_v38 }
 0x21b   :  { %5343 = vmatprep.subr.bf16.mxu1 %v7288_v39 }
 0x21e   :  { %5344 = vmatpush3.bf16.msra.mxu1 %v7295_v46 }
 0x21f   :  { %5345 = vmatprep.subr.bf16.mxu1 %v7317_v49 }
 0x222   :  { %5346 = vmatpush3.bf16.msra.mxu1 %v7335_v13 }
 0x223   :  { %5347 = vmatprep.subr.bf16.mxu1 %v7349_v31 }
 0x226   :  { %5348 = vmatpush3.bf16.msra.mxu1 %v7368_v14 }
 0x227   :  { %5349 = vmatprep.subr.bf16.mxu1 %v7376_v29 }
 0x22a   :  { %5350 = vmatpush3.bf16.msra.mxu1 %v7391_v57 }
 0x22b   :  { %5351 = vmatprep.subr.bf16.mxu1 %v7402_v26 }
 0x22e   :  { %5352 = vmatpush3.bf16.msra.mxu1 %v7418_v20 }
 0x22f   :  { %5377 = vmatprep.subr.bf16.mxu1 %v1646_v0 }
 0x2e4   :  { %v1398_v56 = vpop.f32.mrb[56].mxu1 }
 0x2e5   :  { %v1407_v23 = vmul.f32 0.5, %v1398_v56  ;;  %v1400_v61 = vpop.f32.mrb[57].mxu1 }
 0x2e6   :  { %v1408_v60 = vmul.f32 0.5, %v1400_v61  ;;  %v1402_v3 = vpop.f32.mrb[58].mxu1 }
 0x2e7   :  { %v7542_v10 = vadd.f32 %v1413_v2, %v1407_v23  ;;  %v1409_v21 = vmul.f32 0.5, %v1402_v3  ;;  %v1404_v15 = vpop.f32.mrb[59].mxu1 }
 0x2e8   :  { %v7544_v28 = vadd.f32 %v1414_v6, %v1408_v60  ;;  %v1410_v56 = vmul.f32 0.5, %v1404_v15  ;;  %v1416_v6 = vunpack.c.h.bf16 %v1412_v54 }
 0x2e9   :  { %v1421_v24 = vsel %vm495_vm1, %v7542_v10, -inf  ;;  %v7548_v30 = vadd.f32 %v1415_v16, %v1409_v21  ;;  %v1434_v0 = vsel %vm1433_vm2, %v7542_v10, -inf  ;;  %v1447_v2 = vsel %vm1446_vm3, %v7542_v10, -inf }
 0x2ea   :  { %1422 = vmax.xlane.f32.xlu0 %v1421_v24  ;;  %v1484_v40 = vsel %vm1433_vm2, %v7544_v28, -inf  ;;  %v1472_v61 = vsel %vm495_vm1, %v7544_v28, -inf  ;;  %v7562_v60 = vadd.f32 %v1416_v6, %v1410_v56  ;;  %v1496_v16 = vsel %vm1446_vm3, %v7544_v28, -inf }
 0x2eb   :  { %1485 = vmax.xlane.f32.xlu1 %v1484_v40  ;;  %v1424_v55 = vsel %vm495_vm1, %v7548_v30, -inf  ;;  %v1437_v23 = vsel %vm1433_vm2, %v7548_v30, -inf  ;;  %v1450_v3 = vsel %vm1446_vm3, %v7548_v30, -inf  ;;  %v1508_v21 = vsel %vm1459_vm4, %v7544_v28, -inf }
 0x2ec   :  { %v1487_v54 = vsel %vm1433_vm2, %v7562_v60, -inf  ;;  %v1499_v15 = vsel %vm1446_vm3, %v7562_v60, -inf  ;;  %v1475_v24 = vsel %vm495_vm1, %v7562_v60, -inf  ;;  %v1511_v40 = vsel %vm1459_vm4, %v7562_v60, -inf }
 0x2ee   :  { %1435 = vmax.xlane.f32.xlu0 %v1434_v0  ;;  %v1460_v0 = vsel %vm1459_vm4, %v7542_v10, -inf }
 0x2ef   :  { %1425 = vmax.xlane.f32.xlu1 %v1424_v55  ;;  %v1463_v55 = vsel %vm1459_vm4, %v7548_v30, -inf }
 0x2f2   :  { %1448 = vmax.xlane.f32.xlu0 %v1447_v2 }
 0x2f3   :  { %1438 = vmax.xlane.f32.xlu1 %v1437_v23 }
 0x2f6   :  { %1473 = vmax.xlane.f32.xlu0 %v1472_v61 }
 0x2f7   :  { %1451 = vmax.xlane.f32.xlu1 %v1450_v3 }
 0x2fa   :  { %1497 = vmax.xlane.f32.xlu0 %v1496_v16 }
 0x2fb   :  { %1488 = vmax.xlane.f32.xlu1 %v1487_v54 }
 0x2fe   :  { %1509 = vmax.xlane.f32.xlu0 %v1508_v21 }
 0x2ff   :  { %1500 = vmax.xlane.f32.xlu1 %v1499_v15 }
 0x302   :  { %1476 = vmax.xlane.f32.xlu0 %v1475_v24 }
 0x303   :  { %1512 = vmax.xlane.f32.xlu1 %v1511_v40 }
 0x306   :  { %1461 = vmax.xlane.f32.xlu0 %v1460_v0 }
 0x307   :  { %1464 = vmax.xlane.f32.xlu1 %v1463_v55 }
 0x377   :  { %v1423_v2 = vpop.xlane.xlu0 %1422 }
 0x378   :  { %v1486_v56 = vpop.xlane.xlu1 %1485  ;;  %v1427_v16 = vsub.f32 %v7542_v10, %v1423_v2 }
 0x379   :  { %v1490_v54 = vsub.f32 %v7544_v28, %v1486_v56 }
 0x37a   :  { %v1429_v0 = vmul.f32 1.442695, %v1427_v16 }
 0x37b   :  { %v1436_v6 = vpop.xlane.xlu0 %1435  ;;  %v1492_v55 = vmul.f32 1.442695, %v1490_v54 }
 0x37c   :  { %v1426_v23 = vpop.xlane.xlu1 %1425  ;;  %v1440_v15 = vsub.f32 %v7542_v10, %v1436_v6  ;;  %6118 = vpow2.f32 %v1429_v0 }
 0x37d   :  { %6120 = vpow2.f32 %v1492_v55 }
 0x37e   :  { %v1442_v4 = vmul.f32 1.442695, %v1440_v15 }
 0x37f   :  { %v1449_v61 = vpop.xlane.xlu0 %1448 }
 0x380   :  { %v1439_v3 = vpop.xlane.xlu1 %1438  ;;  %v1453_v40 = vsub.f32 %v7542_v10, %v1449_v61  ;;  %6122 = vpow2.f32 %v1442_v4 }
 0x381   :  { %v1441_v5 = vsub.f32 %v7548_v30, %v1439_v3 }
 0x382   :  { %v1455_v2 = vmul.f32 1.442695, %v1453_v40 }
 0x383   :  { %v1474_v21 = vpop.xlane.xlu0 %1473  ;;  %v1444_v44 = vmul.f32 1.442695, %v1441_v5 }
 0x384   :  { %v1452_v24 = vpop.xlane.xlu1 %1451  ;;  %v1478_v37 = vsub.f32 %v7544_v28, %v1474_v21  ;;  %6124 = vpow2.f32 %v1455_v2 }
 0x385   :  { %6126 = vpow2.f32 %v1444_v44 }
 0x386   :  { %v1480_v6 = vmul.f32 1.442695, %v1478_v37  ;;  %v6119_v55 = vpop.eup %6118 }
 0x387   :  { %v1498_v43 = vpop.xlane.xlu0 %1497 }
 0x388   :  { %v1502_v27 = vsub.f32 %v7544_v28, %v1498_v43  ;;  %v1489_v34 = vpop.xlane.xlu1 %1488  ;;  %v1454_v43 = vsub.f32 %v7548_v30, %v1452_v24  ;;  %6128 = vpow2.f32 %v1480_v6 }
 0x389   :  { %v1491_v56 = vsub.f32 %v7562_v60, %v1489_v34  ;;  %v1428_v34 = vsub.f32 %v7548_v30, %v1426_v23 }
 0x38a   :  { %v1504_v61 = vmul.f32 1.442695, %v1502_v27  ;;  %v1457_v37 = vmul.f32 1.442695, %v1454_v43 }
 0x38b   :  { %v1510_v33 = vpop.xlane.xlu0 %1509  ;;  %v1494_v54 = vmul.f32 1.442695, %v1491_v56  ;;  %v1431_v0 = vmul.f32 1.442695, %v1428_v34  ;;  %v6121_v56 = vpop.eup %6120 }
 0x38c   :  { %v1514_v3 = vsub.f32 %v7544_v28, %v1510_v33  ;;  %v1501_v16 = vpop.xlane.xlu1 %1500  ;;  %6130 = vpow2.f32 %v1504_v61  ;;  %v6123_v61 = vpop.eup %6122 }
 0x38d   :  { %v1503_v21 = vsub.f32 %v7562_v60, %v1501_v16  ;;  %6132 = vpow2.f32 %v1494_v54 }
 0x38e   :  { %v1516_v15 = vmul.f32 1.442695, %v1514_v3 }
 0x38f   :  { %v1506_v5 = vmul.f32 1.442695, %v1503_v21  ;;  %v1477_v40 = vpop.xlane.xlu0 %1476 }
 0x390   :  { %v1479_v4 = vsub.f32 %v7562_v60, %v1477_v40  ;;  %v1513_v27 = vpop.xlane.xlu1 %1512  ;;  %6134 = vpow2.f32 %v1516_v15 }
 0x391   :  { %v1515_v33 = vsub.f32 %v7562_v60, %v1513_v27  ;;  %6136 = vpow2.f32 %v1506_v5  ;;  %v6125_v60 = vpop.eup %6124 }
 0x392   :  { %v1482_v28 = vmul.f32 1.442695, %v1479_v4  ;;  %v6127_v54 = vpop.eup %6126 }
 0x393   :  { %v1518_v44 = vmul.f32 1.442695, %v1515_v33  ;;  %v1462_v24 = vpop.xlane.xlu0 %1461  ;;  %v6129_v21 = vpop.eup %6128 }
 0x394   :  { %6138 = vpow2.f32 %v1482_v28  ;;  %v1466_v23 = vsub.f32 %v7542_v10, %v1462_v24  ;;  %v1465_v2 = vpop.xlane.xlu1 %1464  ;;  %v1520_v24 = vsel %vm495_vm1, %v6119_v55, %v6123_v61  ;;  %v1638_v55 = vmul.bf16 %v7237_v22, %v7328_v63 }
 0x395   :  { %6140 = vpow2.f32 %v1518_v44  ;;  %v1467_v6 = vsub.f32 %v7548_v30, %v1465_v2  ;;  %v1528_v30 = vsel %vm495_vm1, %v6129_v21, %v6121_v56  ;;  %v1523_v56 = vsel %vm1522_vm6, %v1520_v24, %v6125_v60 }
 0x396   :  { %6142 = vpow2.f32 %v1457_v37  ;;  %v1468_v3 = vmul.f32 1.442695, %v1466_v23  ;;  %v6131_v43 = vpop.eup %6130  ;;  %v1631_v60 = vmul.bf16 %v7250_v1, %v7337_v18 }
 0x397   :  { %6144 = vpow2.f32 %v1431_v0  ;;  %v1470_v16 = vmul.f32 1.442695, %v1467_v6  ;;  %v6133_v15 = vpop.eup %6132  ;;  %v1530_v33 = vsel %vm1522_vm6, %v1528_v30, %v6131_v43  ;;  %v1622_v43 = vmul.bf16 %v7237_v22, %v7339_v19 }
 0x398   :  { %6146 = vpow2.f32 %v1468_v3  ;;  %v1640_v30 = vmul.bf16 %v7283_v38, %v7328_v63 }
 0x399   :  { %6148 = vpow2.f32 %v1470_v16  ;;  %v1658_v61 = vsel %vm495_vm1, %v1622_v43, 0  ;;  %v1634_v43 = vmul.bf16 %v7317_v49, %v7339_v19 }
 0x39a   :  { %v6135_v34 = vpop.eup %6134 }
 0x39b   :  { %v6137_v5 = vpop.eup %6136  ;;  %v1532_v0 = vsel %vm1525_vm5, %v1530_v33, %v6135_v34  ;;  %v1649_v33 = vmul.bf16 %v7288_v39, %v7326_v58 }
 0x39e   :  { %v6139_v10 = vpop.eup %6138 }
 0x39f   :  { %v6141_v40 = vpop.eup %6140  ;;  %v1529_v4 = vsel %vm495_vm1, %v6139_v10, %v6133_v15  ;;  %v1648_v10 = vmul.bf16 %v7274_v25, %v7328_v63 }
 0x3a0   :  { %v6143_v27 = vpop.eup %6142  ;;  %v1531_v37 = vsel %vm1522_vm6, %v1529_v4, %v6137_v5  ;;  %v1639_v5 = vmul.bf16 %v7263_v12, %v7326_v58 }
 0x3a1   :  { %v6145_v28 = vpop.eup %6144  ;;  %v1533_v44 = vsel %vm1525_vm5, %v1531_v37, %v6141_v40  ;;  %v1623_v40 = vmul.bf16 %v7263_v12, %v7337_v18  ;;  %v1641_v37 = vmul.bf16 %v7295_v46, %v7326_v58 }
 0x3a2   :  { %v6147_v23 = vpop.eup %6146  ;;  %v1535_v2 = vpack.c.bf16 %v1533_v44, %v1532_v0  ;;  %v1521_v6 = vsel %vm495_vm1, %v6145_v28, %v6127_v54  ;;  %v1647_v54 = vmul.bf16 %v7250_v1, %v7326_v58  ;;  %v1650_v28 = vmul.bf16 %v7317_v49, %v7328_v63 }
 0x3a3   :  { %v6149_v3 = vpop.eup %6148  ;;  %v1524_v16 = vsel %vm1522_vm6, %v1521_v6, %v6143_v27  ;;  %v1526_v21 = vsel %vm1525_vm5, %v1523_v56, %v6147_v23  ;;  %v1661_v4 = vsel %vm495_vm1, %v1623_v40, 0  ;;  %v1632_v27 = vmul.bf16 %v7274_v25, %v7339_v19 }
 0x3a4   :  { %1568 = vmatprep.mubr.bf16.mxu0 %v1535_v2  ;;  %1609 = vmatprep.mubr.bf16.mxu1 %v1535_v2  ;;  %v1527_v15 = vsel %vm1525_vm5, %v1524_v16, %v6149_v3  ;;  %v1624_v0 = vmul.bf16 %v7283_v38, %v7339_v19  ;;  %v1642_v44 = vmul.bf16 %v7335_v13, %v7328_v63 }
 0x3a5   :  { %v1534_v34 = vpack.c.bf16 %v1527_v15, %v1526_v21  ;;  %v1633_v23 = vmul.bf16 %v7288_v39, %v7337_v18  ;;  %v1651_v2 = vmul.bf16 %v7349_v31, %v7326_v58  ;;  %v1643_v6 = vmul.bf16 %v7368_v14, %v7326_v58 }
 0x3a6   :  { %v1664_v24 = vsel %vm495_vm1, %v1624_v0, 0  ;;  %v1652_v56 = vmul.bf16 %v7376_v29, %v7328_v63  ;;  %v1625_v3 = vmul.bf16 %v7295_v46, %v7337_v18  ;;  %v1644_v16 = vmul.bf16 %v7391_v57, %v7328_v63 }
 0x3a7   :  { %1569 = vmatmul.mubr.bf16.vlgmr.msra.gmra.mrb[56].mxu0 %v1534_v34  ;;  %1610 = vmatmul.mubr.bf16.vlgmr.msra.gmra.mrb[60].mxu1 %v1534_v34  ;;  %v1653_v15 = vmul.bf16 %v7402_v26, %v7326_v58  ;;  %v1645_v34 = vmul.bf16 %v7418_v20, %v7326_v58  ;;  %v1636_v58 = vmul.bf16 %v7376_v29, %v7339_v19 }
 0x3a8   :  { %5360 = vmatpush3.bf16.xpose.msra.mxu0 %v1658_v61  ;;  %5378 = vmatpush3.bf16.msra.mxu1 %v1638_v55  ;;  %v1667_v21 = vsel %vm495_vm1, %v1625_v3, 0  ;;  %v1626_v55 = vmul.bf16 %v7335_v13, %v7339_v19  ;;  %v1635_v61 = vmul.bf16 %v7349_v31, %v7337_v18  ;;  %v1637_v40 = vmul.bf16 %v7402_v26, %v7337_v18 }
 0x3a9   :  { %6026 = vmatprep.subr.msk.bf16.mxu0 %vm495_vm1, %v1631_v60  ;;  %5375 = vmatprep.mubr.msk.bf16.mxu0 %vm495_vm1, %v7109_v59  ;;  %v1627_v60 = vmul.bf16 %v7368_v14, %v7337_v18  ;;  %v1965_v3 = vmul.bf16 %v7391_v57, %v7361_v47 }
 0x3aa   :  { %5379 = vmatprep.subr.bf16.mxu1 %v1647_v54  ;;  %v1670_v63 = vsel %vm495_vm1, %v1626_v55, 0  ;;  %v7751_v55 = vld [vmem:[%s9879_s12] sm:$0xff]  }
 0x3ab   :  { %v1673_v54 = vsel %vm495_vm1, %v1627_v60, 0 }
 0x3ac   :  { %5380 = vmatpush3.bf16.msra.mxu1 %v1639_v5  ;;  %v1628_v5 = vmul.bf16 %v7391_v57, %v7339_v19  ;;  %v1959_v19 = vmul.bf16 %v7237_v22, %v7361_v47  ;;  %v1969_v22 = vmul.bf16 %v7274_v25, %v7361_v47  ;;  %v1971_v25 = vmul.bf16 %v7317_v49, %v7361_v47 }
 0x3ad   :  { %5381 = vmatprep.subr.bf16.mxu1 %v1648_v10 }
 0x3ae   :  { %v1676_v10 = vsel %vm495_vm1, %v1628_v5, 0  ;;  %v7779_v5 = vld [vmem:[%s9879_s12 + $0x50] sm:$0xff]  }
 0x3b0   :  { %5362 = vmatpush3.bf16.xpose.msra.mxu0 %v1661_v4  ;;  %5382 = vmatpush3.bf16.msra.mxu1 %v1640_v30  ;;  %v1629_v30 = vmul.bf16 %v7418_v20, %v7337_v18 }
 0x3b1   :  { %6027 = vmatprep.subr.msk.bf16.mxu0 %vm495_vm1, %v1632_v27  ;;  %5383 = vmatprep.subr.bf16.mxu1 %v1649_v33  ;;  %v1967_v27 = vmul.bf16 %v7232_v17, %v7361_v47  ;;  %v1995_v33 = vsel %vm495_vm1, %v1959_v19, 0 }
 0x3b2   :  { %v1679_v4 = vsel %vm495_vm1, %v1629_v30, 0 }
 0x3b4   :  { %5384 = vmatpush3.bf16.msra.mxu1 %v1641_v37  ;;  %v1968_v37 = vmul.bf16 %v7250_v1, %v7359_v51 }
 0x3b5   :  { %5385 = vmatprep.subr.bf16.mxu1 %v1650_v28  ;;  %v1970_v28 = vmul.bf16 %v7288_v39, %v7359_v51 }
 0x3b8   :  { %5364 = vmatpush3.bf16.xpose.msra.mxu0 %v1664_v24  ;;  %5386 = vmatpush3.bf16.msra.mxu1 %v1642_v44  ;;  %v1963_v44 = vmul.bf16 %v7335_v13, %v7361_v47 }
 0x3b9   :  { %6028 = vmatprep.subr.msk.bf16.mxu0 %vm495_vm1, %v1633_v23  ;;  %5387 = vmatprep.subr.bf16.mxu1 %v1651_v2  ;;  %v1972_v23 = vmul.bf16 %v7349_v31, %v7359_v51  ;;  %v1964_v2 = vmul.bf16 %v7368_v14, %v7359_v51 }
 0x3ba   :  { %v2007_v24 = vsel %vm495_vm1, %v1963_v44, 0  ;;  %v7847_v44 = vld [vmem:[%s9879_s12 + $0x58] sm:$0xff]  }
 0x3bc   :  { %5388 = vmatpush3.bf16.msra.mxu1 %v1643_v6  ;;  %v2010_v6 = vsel %vm495_vm1, %v1964_v2, 0 }
 0x3bd   :  { %5389 = vmatprep.subr.bf16.mxu1 %v1652_v56  ;;  %v1973_v56 = vmul.bf16 %v7376_v29, %v7361_v47 }
 0x3c0   :  { %5366 = vmatpush3.bf16.xpose.msra.mxu0 %v1667_v21  ;;  %5390 = vmatpush3.bf16.msra.mxu1 %v1644_v16  ;;  %v2013_v16 = vsel %vm495_vm1, %v1965_v3, 0  ;;  %v1974_v21 = vmul.bf16 %v7402_v26, %v7359_v51  ;;  %v7855_v3 = vld [vmem:[%s9879_s12 + $0x18] sm:$0xff]  }
 0x3c1   :  { %6029 = vmatprep.subr.msk.bf16.mxu0 %vm495_vm1, %v1634_v43  ;;  %5391 = vmatprep.subr.bf16.mxu1 %v1653_v15  ;;  %v1966_v43 = vmul.bf16 %v7418_v20, %v7359_v51 }
 0x3c3   :  { %v2016_v15 = vsel %vm495_vm1, %v1966_v43, 0 }
 0x3c4   :  { %5392 = vmatpush3.bf16.msra.mxu1 %v1645_v34  ;;  %v7743_v34 = vld [vmem:[%s9879_s12 + $0x40] sm:$0xff]  }
 0x3c5   :  { %5399 = vmatprep.subr.bf16.mxu1 %v7232_v17  ;;  %v1960_v17 = vmul.bf16 %v7263_v12, %v7359_v51  ;;  %v1962_v12 = vmul.bf16 %v7295_v46, %v7359_v51  ;;  %v2296_v51 = vmul.bf16 %v7751_v55, %v7411_v52 }
 0x3c7   :  { %v1998_v18 = vsel %vm495_vm1, %v1960_v17, 0  ;;  %v2004_v0 = vsel %vm495_vm1, %v1962_v12, 0  ;;  %v2643_v12 = vmul.bf16 %v7779_v5, %v7446_v42 }
 0x3c8   :  { %5368 = vmatpush3.bf16.xpose.msra.mxu0 %v1670_v63  ;;  %v2332_v63 = vsel %vm495_vm1, %v2296_v51, 0 }
 0x3c9   :  { %6030 = vmatprep.subr.msk.bf16.mxu0 %vm495_vm1, %v1635_v61  ;;  %v7761_v61 = vld [vmem:[%s9879_s12 + $0x48] sm:$0xff]  }
 0x3ca   :  { %v2305_v60 = vmul.bf16 %v7761_v61, %v7407_v35 }
 0x3d0   :  { %5370 = vmatpush3.bf16.xpose.msra.mxu0 %v1673_v54 }
 0x3d1   :  { %6031 = vmatprep.subr.msk.bf16.mxu0 %vm495_vm1, %v1636_v58 }
 0x3d8   :  { %5372 = vmatpush3.bf16.xpose.msra.mxu0 %v1676_v10  ;;  %v2306_v10 = vmul.bf16 %v7779_v5, %v7411_v52 }
 0x3d9   :  { %6032 = vmatprep.subr.msk.bf16.mxu0 %vm495_vm1, %v1637_v40  ;;  %v2298_v40 = vmul.bf16 %v7283_v38, %v7411_v52 }
 0x3db   :  { %v2338_v30 = vsel %vm495_vm1, %v2298_v40, 0 }
 0x3e0   :  { %5374 = vmatpush3.bf16.xpose.msra.mxu0 %v1679_v4  ;;  %v2307_v4 = vmul.bf16 %v7288_v39, %v7407_v35  ;;  %v2309_v39 = vmul.bf16 %v7349_v31, %v7407_v35  ;;  %v2311_v31 = vmul.bf16 %v7402_v26, %v7407_v35 }
 0x3e1   :  { %6033 = vmatprep.subr.msk.bf16.mxu0 %vm495_vm1, %v1967_v27  ;;  %v2299_v27 = vmul.bf16 %v7295_v46, %v7407_v35  ;;  %v2301_v46 = vmul.bf16 %v7368_v14, %v7407_v35  ;;  %v2303_v14 = vmul.bf16 %v7418_v20, %v7407_v35 }
 0x3e3   :  { %v2341_v19 = vsel %vm495_vm1, %v2299_v27, 0  ;;  %v2347_v17 = vsel %vm495_vm1, %v2301_v46, 0  ;;  %v7889_v46 = vld [vmem:[%s9879_s12 + $0x28] sm:$0xff]  }
 0x3e7   :  { %5376 = vmatmul.mubr.msk.bf16.vlgmr.msra.gmra.mrb[60].mxu0 %vm495_vm1, %v7109_v59  ;;  %v1961_v59 = vmul.bf16 %v7283_v38, %v7361_v47  ;;  %v2304_v47 = vmul.bf16 %v7743_v34, %v7411_v52  ;;  %v2300_v38 = vmul.bf16 %v7335_v13, %v7411_v52  ;;  %v2302_v13 = vmul.bf16 %v7391_v57, %v7411_v52 }
 0x3e8   :  { %5422 = vmatpush3.bf16.xpose.msra.mxu0 %v1995_v33  ;;  %5437 = vmatprep.mubr.msk.bf16.mxu0 %vm495_vm1, %v7139_v53  ;;  %v2308_v33 = vmul.bf16 %v7317_v49, %v7411_v52  ;;  %v2310_v49 = vmul.bf16 %v7376_v29, %v7411_v52  ;;  %v2641_v29 = vmul.bf16 %v7743_v34, %v7446_v42 }
 0x3e9   :  { %6034 = vmatprep.subr.msk.bf16.mxu0 %vm495_vm1, %v1968_v37  ;;  %v2001_v1 = vsel %vm495_vm1, %v1961_v59, 0  ;;  %v2344_v37 = vsel %vm495_vm1, %v2300_v38, 0  ;;  %v2633_v52 = vmul.bf16 %v7751_v55, %v7446_v42 }
 0x3eb   :  { %v2669_v59 = vsel %vm495_vm1, %v2633_v52, 0  ;;  %v2648_v52 = vmul.bf16 %v7402_v26, %v7442_v8 }
 0x3f0   :  { %5424 = vmatpush3.bf16.xpose.msra.mxu0 %v1998_v18  ;;  %v2350_v18 = vsel %vm495_vm1, %v2302_v13, 0 }
 0x3f1   :  { %6035 = vmatprep.subr.msk.bf16.mxu0 %vm495_vm1, %v1969_v22  ;;  %v2353_v22 = vsel %vm495_vm1, %v2303_v14, 0 }
 0x3f8   :  { %5426 = vmatpush3.bf16.xpose.msra.mxu0 %v2001_v1  ;;  %v2642_v1 = vmul.bf16 %v7761_v61, %v7442_v8 }
 0x3f9   :  { %6036 = vmatprep.subr.msk.bf16.mxu0 %vm495_vm1, %v1970_v28 }
 0x400   :  { %5428 = vmatpush3.bf16.xpose.msra.mxu0 %v2004_v0 }
 0x401   :  { %6037 = vmatprep.subr.msk.bf16.mxu0 %vm495_vm1, %v1971_v25 }
 0x408   :  { %5430 = vmatpush3.bf16.xpose.msra.mxu0 %v2007_v24  ;;  %v2644_v24 = vmul.bf16 %v7847_v44, %v7442_v8 }
 0x409   :  { %6038 = vmatprep.subr.msk.bf16.mxu0 %vm495_vm1, %v1972_v23 }
 0x410   :  { %5432 = vmatpush3.bf16.xpose.msra.mxu0 %v2010_v6 }
 0x411   :  { %6039 = vmatprep.subr.msk.bf16.mxu0 %vm495_vm1, %v1973_v56 }
 0x418   :  { %5434 = vmatpush3.bf16.xpose.msra.mxu0 %v2013_v16  ;;  %v2636_v16 = vmul.bf16 %v7855_v3, %v7442_v8 }
 0x419   :  { %6040 = vmatprep.subr.msk.bf16.mxu0 %vm495_vm1, %v1974_v21 }
 0x420   :  { %5436 = vmatpush3.bf16.xpose.msra.mxu0 %v2016_v15 }
 0x421   :  { %6041 = vmatprep.subr.msk.bf16.mxu0 %vm495_vm1, %v2304_v47 }
 0x427   :  { %5438 = vmatmul.mubr.msk.bf16.vlgmr.msra.gmra.mrb[64].mxu0 %vm495_vm1, %v7139_v53  ;;  %v7771_v53 = vld [vmem:[%s9879_s12 + $0x8] sm:$0xff]  }
 0x428   :  { %5484 = vmatpush3.bf16.xpose.msra.mxu0 %v2332_v63  ;;  %5499 = vmatprep.mubr.msk.bf16.mxu0 %vm495_vm1, %v7137_v50  ;;  %v2297_v54 = vmul.bf16 %v7771_v53, %v7407_v35  ;;  %v2634_v35 = vmul.bf16 %v7771_v53, %v7442_v8 }
 0x429   :  { %6042 = vmatprep.subr.msk.bf16.mxu0 %vm495_vm1, %v2305_v60 }
 0x42a   :  { %v2335_v58 = vsel %vm495_vm1, %v2297_v54, 0  ;;  %v2672_v28 = vsel %vm495_vm1, %v2634_v35, 0  ;;  %v2978_v35 = vmul.bf16 %v7743_v34, %v7469_v62 }
 0x430   :  { %5486 = vmatpush3.bf16.xpose.msra.mxu0 %v2335_v58  ;;  %v2678_v58 = vsel %vm495_vm1, %v2636_v16, 0 }
 0x431   :  { %6043 = vmatprep.subr.msk.bf16.mxu0 %vm495_vm1, %v2306_v10  ;;  %v7863_v10 = vld [vmem:[%s9879_s12 + $0x60] sm:$0xff]  }
 0x432   :  { %v2645_v40 = vmul.bf16 %v7863_v10, %v7446_v42 }
 0x438   :  { %5488 = vmatpush3.bf16.xpose.msra.mxu0 %v2338_v30  ;;  %v7871_v30 = vld [vmem:[%s9879_s12 + $0x20] sm:$0xff]  }
 0x439   :  { %6044 = vmatprep.subr.msk.bf16.mxu0 %vm495_vm1, %v2307_v4  ;;  %v2637_v4 = vmul.bf16 %v7871_v30, %v7446_v42 }
 0x43b   :  { %v2681_v27 = vsel %vm495_vm1, %v2637_v4, 0 }
 0x440   :  { %5490 = vmatpush3.bf16.xpose.msra.mxu0 %v2341_v19  ;;  %v7879_v19 = vld [vmem:[%s9879_s12 + $0x68] sm:$0xff]  }
 0x441   :  { %6045 = vmatprep.subr.msk.bf16.mxu0 %vm495_vm1, %v2308_v33  ;;  %v2646_v33 = vmul.bf16 %v7879_v19, %v7442_v8 }
 0x448   :  { %5492 = vmatpush3.bf16.xpose.msra.mxu0 %v2344_v37 }
 0x449   :  { %6046 = vmatprep.subr.msk.bf16.mxu0 %vm495_vm1, %v2309_v39 }
 0x450   :  { %5494 = vmatpush3.bf16.xpose.msra.mxu0 %v2347_v17  ;;  %v2638_v17 = vmul.bf16 %v7889_v46, %v7442_v8 }
 0x451   :  { %6047 = vmatprep.subr.msk.bf16.mxu0 %vm495_vm1, %v2310_v49 }
 0x458   :  { %5496 = vmatpush3.bf16.xpose.msra.mxu0 %v2350_v18  ;;  %v2684_v18 = vsel %vm495_vm1, %v2638_v17, 0 }
 0x459   :  { %6048 = vmatprep.subr.msk.bf16.mxu0 %vm495_vm1, %v2311_v31  ;;  %v7901_v31 = vld [vmem:[%s9879_s12 + $0x70] sm:$0xff]  }
 0x45a   :  { %v2647_v14 = vmul.bf16 %v7901_v31, %v7446_v42 }
 0x460   :  { %5498 = vmatpush3.bf16.xpose.msra.mxu0 %v2353_v22  ;;  %v2639_v22 = vmul.bf16 %v7391_v57, %v7446_v42  ;;  %v2970_v57 = vmul.bf16 %v7751_v55, %v7469_v62 }
 0x461   :  { %6049 = vmatprep.subr.msk.bf16.mxu0 %vm495_vm1, %v2641_v29 }
 0x462   :  { %v2687_v29 = vsel %vm495_vm1, %v2639_v22, 0  ;;  %v3006_v26 = vsel %vm495_vm1, %v2970_v57, 0  ;;  %v2975_v57 = vmul.bf16 %v7889_v46, %v7465_v32 }
 0x467   :  { %5500 = vmatmul.mubr.msk.bf16.vlgmr.msra.gmra.mrb[68].mxu0 %vm495_vm1, %v7137_v50  ;;  %v7839_v50 = vld [vmem:[%s9879_s12 + $0x10] sm:$0xff]  }
 0x468   :  { %5546 = vmatpush3.bf16.xpose.msra.mxu0 %v2669_v59  ;;  %5561 = vmatprep.mubr.msk.bf16.mxu0 %vm495_vm1, %v7167_v45  ;;  %v2635_v0 = vmul.bf16 %v7839_v50, %v7446_v42  ;;  %v2640_v59 = vmul.bf16 %v7418_v20, %v7442_v8  ;;  %v2979_v42 = vmul.bf16 %v7761_v61, %v7465_v32 }
 0x469   :  { %6050 = vmatprep.subr.msk.bf16.mxu0 %vm495_vm1, %v2642_v1  ;;  %v2971_v20 = vmul.bf16 %v7771_v53, %v7465_v32 }
 0x46a   :  { %v2675_v25 = vsel %vm495_vm1, %v2635_v0, 0  ;;  %v2690_v1 = vsel %vm495_vm1, %v2640_v59, 0 }
 0x46b   :  { %v3009_v8 = vsel %vm495_vm1, %v2971_v20, 0 }
 0x470   :  { %5548 = vmatpush3.bf16.xpose.msra.mxu0 %v2672_v28  ;;  %v2980_v28 = vmul.bf16 %v7779_v5, %v7469_v62 }
 0x471   :  { %6051 = vmatprep.subr.msk.bf16.mxu0 %vm495_vm1, %v2643_v12  ;;  %v5175_v12 = vld [vmem:[%s9892_s0 + $0x10] sm:$0xff] }
 0x478   :  { %5550 = vmatpush3.bf16.xpose.msra.mxu0 %v2675_v25  ;;  %v2981_v25 = vmul.bf16 %v7847_v44, %v7465_v32 }
 0x479   :  { %6052 = vmatprep.subr.msk.bf16.mxu0 %vm495_vm1, %v2644_v24  ;;  %v5176_v24 = vld [vmem:[%s9892_s0 + $0x18] sm:$0xff] }
 0x47a   :  { %v5331_v23 = vpop.f32.mrb[56].mxu0  ;;  %v5353_v2 = vpop.f32.mrb[60].mxu1  ;;  %v1757_v16 = vunpack.c.l.bf16 %v5176_v24  ;;  %v1758_v17 = vunpack.c.h.bf16 %v5176_v24 }
 0x47b   :  { %v5332_v6 = vpop.f32.mrb[57].mxu0  ;;  %v5354_v56 = vpop.f32.mrb[61].mxu1 }
 0x47c   :  { %v5333_v21 = vadd.f32 %v5332_v6, %v5331_v23  ;;  %v5355_v43 = vadd.f32 %v5354_v56, %v5353_v2  ;;  %v5334_v15 = vpop.f32.mrb[58].mxu0  ;;  %v5356_v47 = vpop.f32.mrb[62].mxu1  ;;  %v1755_v23 = vunpack.c.l.bf16 %v5175_v12 }
 0x47d   :  { %v5335_v51 = vpop.f32.mrb[59].mxu0  ;;  %v5357_v63 = vpop.f32.mrb[63].mxu1 }
 0x47e   :  { %6150 = vrcp.f32 %v5355_v43  ;;  %v5336_v60 = vadd.f32 %v5335_v51, %v5334_v15  ;;  %v5358_v54 = vadd.f32 %v5357_v63, %v5356_v47 }
 0x480   :  { %6152 = vrcp.f32 %v5358_v54  ;;  %5552 = vmatpush3.bf16.xpose.msra.mxu0 %v2678_v58  ;;  %v2982_v58 = vmul.bf16 %v7863_v10, %v7469_v62 }
 0x481   :  { %6053 = vmatprep.subr.msk.bf16.mxu0 %vm495_vm1, %v2645_v40 }
 0x488   :  { %v6151_v38 = vpop.eup %6150  ;;  %5554 = vmatpush3.bf16.xpose.msra.mxu0 %v2681_v27  ;;  %v1756_v27 = vunpack.c.h.bf16 %v5175_v12  ;;  %v7997_v12 = vld [vmem:[%s9879_s12 + $0x30] sm:$0xff]  }
 0x489   :  { %6054 = vmatprep.subr.msk.bf16.mxu0 %vm495_vm1, %v2646_v33  ;;  %v7884_v37 = vmul.f32 %v6151_v38, %v5333_v21  ;;  %v2973_v21 = vmul.bf16 %v7855_v3, %v7465_v32  ;;  %v2974_v38 = vmul.bf16 %v7871_v30, %v7469_v62 }
 0x48a   :  { %v6153_v39 = vpop.eup %6152 }
 0x48b   :  { %v7893_v49 = vmul.f32 %v6153_v39, %v5336_v60  ;;  %v3015_v60 = vsel %vm495_vm1, %v2973_v21, 0  ;;  %v3018_v22 = vsel %vm495_vm1, %v2974_v38, 0  ;;  %v3318_v38 = vmul.bf16 %v7847_v44, %v7487_v7 }
 0x48d   :  { %v3981_v13 = vpack.c.bf16 %v7893_v49, %v7884_v37 }
 0x490   :  { %5556 = vmatpush3.bf16.xpose.msra.mxu0 %v2684_v18 }
 0x491   :  { %6055 = vmatprep.subr.msk.bf16.mxu0 %vm495_vm1, %v2647_v14 }
 0x498   :  { %5558 = vmatpush3.bf16.xpose.msra.mxu0 %v2687_v29 }
 0x499   :  { %6056 = vmatprep.subr.msk.bf16.mxu0 %vm495_vm1, %v2648_v52  ;;  %v2983_v52 = vmul.bf16 %v7879_v19, %v7465_v32 }
 0x4a0   :  { %5560 = vmatpush3.bf16.xpose.msra.mxu0 %v2690_v1 }
 0x4a1   :  { %6057 = vmatprep.subr.msk.bf16.mxu0 %vm495_vm1, %v2978_v35 }
 0x4a7   :  { %5562 = vmatmul.mubr.msk.bf16.vlgmr.msra.gmra.mrb[72].mxu0 %vm495_vm1, %v7167_v45  ;;  %v2972_v45 = vmul.bf16 %v7839_v50, %v7469_v62 }
 0x4a8   :  { %5608 = vmatpush3.bf16.xpose.msra.mxu0 %v3006_v26  ;;  %5623 = vmatprep.mubr.msk.bf16.mxu0 %vm495_vm1, %v7165_v41 }
 0x4a9   :  { %6058 = vmatprep.subr.msk.bf16.mxu0 %vm495_vm1, %v2979_v42  ;;  %v3012_v0 = vsel %vm495_vm1, %v2972_v45, 0  ;;  %v3021_v42 = vsel %vm495_vm1, %v2975_v57, 0 }
 0x4b0   :  { %5610 = vmatpush3.bf16.xpose.msra.mxu0 %v3009_v8  ;;  %v2984_v8 = vmul.bf16 %v7901_v31, %v7469_v62 }
 0x4b1   :  { %6059 = vmatprep.subr.msk.bf16.mxu0 %vm495_vm1, %v2980_v28 }
 0x4b8   :  { %5612 = vmatpush3.bf16.xpose.msra.mxu0 %v3012_v0  ;;  %v2976_v0 = vmul.bf16 %v7997_v12, %v7469_v62 }
 0x4b9   :  { %6060 = vmatprep.subr.msk.bf16.mxu0 %vm495_vm1, %v2981_v25 }
 0x4ba   :  { %v1739_v2 = vpop.f32.mrb[60].mxu0  ;;  %v3024_v24 = vsel %vm495_vm1, %v2976_v0, 0 }
 0x4bb   :  { %v1748_v6 = vmul.f32 0.5, %v1739_v2  ;;  %v1741_v56 = vpop.f32.mrb[61].mxu0  ;;  %v8009_v2 = vld [vmem:[%s9879_s12 + $0x78] sm:$0xff]  }
 0x4bc   :  { %v1743_v43 = vpop.f32.mrb[62].mxu0  ;;  %v1749_v4 = vmul.f32 0.5, %v1741_v56 }
 0x4bd   :  { %v7948_v15 = vadd.f32 %v1755_v23, %v1748_v6  ;;  %v1750_v47 = vmul.f32 0.5, %v1743_v43  ;;  %v1745_v51 = vpop.f32.mrb[63].mxu0  ;;  %v2985_v6 = vmul.bf16 %v8009_v2, %v7465_v32 }
 0x4be   :  { %v1751_v39 = vmul.f32 0.5, %v1745_v51  ;;  %v7966_v14 = vadd.f32 %v1756_v27, %v1749_v4  ;;  %v3315_v51 = vmul.bf16 %v7743_v34, %v7491_v48  ;;  %v3317_v4 = vmul.bf16 %v7779_v5, %v7491_v48  ;;  %v5178_v27 = vld [vmem:[%s9892_s0 + $0x20] sm:$0xff] }
 0x4bf   :  { %v7950_v63 = vadd.f32 %v1757_v16, %v1750_v47  ;;  %v1763_v54 = vsel %vm495_vm1, %v7948_v15, -inf  ;;  %v1775_v33 = vsel %vm1433_vm2, %v7948_v15, -inf  ;;  %v1787_v29 = vsel %vm1446_vm3, %v7948_v15, -inf  ;;  %v8021_v16 = vld [vmem:[%s9879_s12 + $0x38] sm:$0xff]  }
 0x4c0   :  { %5614 = vmatpush3.bf16.xpose.msra.mxu0 %v3015_v60  ;;  %1764 = vmax.xlane.f32.xlu0 %v1763_v54  ;;  %v7973_v59 = vadd.f32 %v1758_v17, %v1751_v39  ;;  %v1811_v35 = vsel %vm495_vm1, %v7966_v14, -inf  ;;  %v1823_v20 = vsel %vm1433_vm2, %v7966_v14, -inf  ;;  %v1835_v45 = vsel %vm1446_vm3, %v7966_v14, -inf  ;;  %v5179_v39 = vld [vmem:[%s9892_s0 + $0x28] sm:$0xff] }
 0x4c1   :  { %6061 = vmatprep.subr.msk.bf16.mxu0 %vm495_vm1, %v2982_v58  ;;  %v1766_v40 = vsel %vm495_vm1, %v7950_v63, -inf  ;;  %v1778_v18 = vsel %vm1433_vm2, %v7950_v63, -inf  ;;  %v1790_v1 = vsel %vm1446_vm3, %v7950_v63, -inf  ;;  %v1847_v23 = vsel %vm1459_vm4, %v7966_v14, -inf }
 0x4c2   :  { %1767 = vmax.xlane.f32.xlu1 %v1766_v40  ;;  %v1814_v26 = vsel %vm495_vm1, %v7973_v59, -inf  ;;  %v1826_v28 = vsel %vm1433_vm2, %v7973_v59, -inf  ;;  %v1838_v25 = vsel %vm1446_vm3, %v7973_v59, -inf  ;;  %v1850_v62 = vsel %vm1459_vm4, %v7973_v59, -inf }
 0x4c3   :  { %v1799_v56 = vsel %vm1459_vm4, %v7948_v15, -inf  ;;  %v2977_v21 = vmul.bf16 %v8021_v16, %v7465_v32  ;;  %v1802_v43 = vsel %vm1459_vm4, %v7950_v63, -inf  ;;  %v3307_v60 = vmul.bf16 %v7751_v55, %v7491_v48 }
 0x4c4   :  { %1776 = vmax.xlane.f32.xlu0 %v1775_v33  ;;  %v3316_v54 = vmul.bf16 %v7761_v61, %v7487_v7  ;;  %v3308_v58 = vmul.bf16 %v7771_v53, %v7487_v7  ;;  %v2092_v17 = vunpack.c.l.bf16 %v5178_v27 }
 0x4c5   :  { %v3027_v47 = vsel %vm495_vm1, %v2977_v21, 0  ;;  %v3343_v32 = vsel %vm495_vm1, %v3307_v60, 0  ;;  %v3320_v60 = vmul.bf16 %v7879_v19, %v7487_v7 }
 0x4c6   :  { %1779 = vmax.xlane.f32.xlu1 %v1778_v18  ;;  %v3346_v40 = vsel %vm495_vm1, %v3308_v58, 0 }
 0x4c8   :  { %5616 = vmatpush3.bf16.xpose.msra.mxu0 %v3018_v22  ;;  %1788 = vmax.xlane.f32.xlu0 %v1787_v29 }
 0x4c9   :  { %6062 = vmatprep.subr.msk.bf16.mxu0 %vm495_vm1, %v2983_v52  ;;  %v2094_v52 = vunpack.c.l.bf16 %v5179_v39 }
 0x4ca   :  { %1791 = vmax.xlane.f32.xlu1 %v1790_v1  ;;  %v3310_v1 = vmul.bf16 %v7855_v3, %v7487_v7 }
 0x4cc   :  { %1812 = vmax.xlane.f32.xlu0 %v1811_v35 }
 0x4ce   :  { %1815 = vmax.xlane.f32.xlu1 %v1814_v26 }
 0x4d0   :  { %5618 = vmatpush3.bf16.xpose.msra.mxu0 %v3021_v42  ;;  %1824 = vmax.xlane.f32.xlu0 %v1823_v20 }
 0x4d1   :  { %6063 = vmatprep.subr.msk.bf16.mxu0 %vm495_vm1, %v2984_v8  ;;  %v3352_v8 = vsel %vm495_vm1, %v3310_v1, 0 }
 0x4d2   :  { %1827 = vmax.xlane.f32.xlu1 %v1826_v28 }
 0x4d4   :  { %1836 = vmax.xlane.f32.xlu0 %v1835_v45  ;;  %v3319_v45 = vmul.bf16 %v7863_v10, %v7491_v48 }
 0x4d6   :  { %1839 = vmax.xlane.f32.xlu1 %v1838_v25 }
 0x4d8   :  { %5620 = vmatpush3.bf16.xpose.msra.mxu0 %v3024_v24  ;;  %1848 = vmax.xlane.f32.xlu0 %v1847_v23  ;;  %v2093_v24 = vunpack.c.h.bf16 %v5178_v27 }
 0x4d9   :  { %6064 = vmatprep.subr.msk.bf16.mxu0 %vm495_vm1, %v2985_v6  ;;  %v3311_v6 = vmul.bf16 %v7871_v30, %v7491_v48 }
 0x4da   :  { %1851 = vmax.xlane.f32.xlu1 %v1850_v62 }
 0x4dc   :  { %1800 = vmax.xlane.f32.xlu0 %v1799_v56  ;;  %v2095_v56 = vunpack.c.h.bf16 %v5179_v39 }
 0x4de   :  { %1803 = vmax.xlane.f32.xlu1 %v1802_v43 }
 0x4e0   :  { %5622 = vmatpush3.bf16.xpose.msra.mxu0 %v3027_v47  ;;  %v3355_v47 = vsel %vm495_vm1, %v3311_v6, 0 }
 0x4e1   :  { %6065 = vmatprep.subr.msk.bf16.mxu0 %vm495_vm1, %v3315_v51 }
 0x4e7   :  { %5624 = vmatmul.mubr.msk.bf16.vlgmr.msra.gmra.mrb[76].mxu0 %vm495_vm1, %v7165_v41  ;;  %v3309_v41 = vmul.bf16 %v7839_v50, %v7491_v48 }
 0x4e8   :  { %5670 = vmatpush3.bf16.xpose.msra.mxu0 %v3343_v32  ;;  %5685 = vmatprep.mubr.msk.bf16.mxu0 %vm495_vm1, %v7213_v36 }
 0x4e9   :  { %6066 = vmatprep.subr.msk.bf16.mxu0 %vm495_vm1, %v3316_v54  ;;  %v3349_v33 = vsel %vm495_vm1, %v3309_v41, 0 }
 0x4f0   :  { %5672 = vmatpush3.bf16.xpose.msra.mxu0 %v3346_v40  ;;  %v3312_v40 = vmul.bf16 %v7889_v46, %v7487_v7 }
 0x4f1   :  { %6067 = vmatprep.subr.msk.bf16.mxu0 %vm495_vm1, %v3317_v4 }
 0x4f2   :  { %v3358_v41 = vsel %vm495_vm1, %v3312_v40, 0 }
 0x4f8   :  { %5674 = vmatpush3.bf16.xpose.msra.mxu0 %v3349_v33  ;;  %v3321_v33 = vmul.bf16 %v7901_v31, %v7491_v48 }
 0x4f9   :  { %6068 = vmatprep.subr.msk.bf16.mxu0 %vm495_vm1, %v3318_v38 }
 0x4fa   :  { %v2076_v18 = vpop.f32.mrb[64].mxu0 }
 0x4fb   :  { %v2085_v22 = vmul.f32 0.5, %v2076_v18  ;;  %v2078_v29 = vpop.f32.mrb[65].mxu0 }
 0x4fc   :  { %v2080_v35 = vpop.f32.mrb[66].mxu0  ;;  %v2086_v25 = vmul.f32 0.5, %v2078_v29 }
 0x4fd   :  { %v8061_v57 = vadd.f32 %v2092_v17, %v2085_v22  ;;  %v2087_v26 = vmul.f32 0.5, %v2080_v35  ;;  %v2082_v42 = vpop.f32.mrb[67].mxu0  ;;  %v3313_v17 = vmul.bf16 %v7997_v12, %v7491_v48  ;;  %v3314_v35 = vmul.bf16 %v8021_v16, %v7487_v7 }
 0x4fe   :  { %v2088_v62 = vmul.f32 0.5, %v2082_v42  ;;  %v8079_v43 = vadd.f32 %v2093_v24, %v2086_v25  ;;  %v3654_v24 = vmul.bf16 %v7779_v5, %v7513_v9 }
 0x4ff   :  { %v8063_v20 = vadd.f32 %v2094_v52, %v2087_v26  ;;  %v2100_v28 = vsel %vm495_vm1, %v8061_v57, -inf  ;;  %v2112_v23 = vsel %vm1433_vm2, %v8061_v57, -inf  ;;  %v2124_v51 = vsel %vm1446_vm3, %v8061_v57, -inf }
 0x500   :  { %5676 = vmatpush3.bf16.xpose.msra.mxu0 %v3352_v8  ;;  %2101 = vmax.xlane.f32.xlu0 %v2100_v28  ;;  %v8086_v32 = vadd.f32 %v2095_v56, %v2088_v62  ;;  %v2148_v58 = vsel %vm495_vm1, %v8079_v43, -inf  ;;  %v2160_v27 = vsel %vm1433_vm2, %v8079_v43, -inf  ;;  %v2172_v39 = vsel %vm1446_vm3, %v8079_v43, -inf  ;;  %v5182_v56 = vld [vmem:[%s9892_s0 + $0x38] sm:$0xff] }
 0x501   :  { %6069 = vmatprep.subr.msk.bf16.mxu0 %vm495_vm1, %v3319_v45  ;;  %v2103_v0 = vsel %vm495_vm1, %v8063_v20, -inf  ;;  %v2115_v21 = vsel %vm1433_vm2, %v8063_v20, -inf  ;;  %v2127_v54 = vsel %vm1446_vm3, %v8063_v20, -inf  ;;  %v3361_v22 = vsel %vm495_vm1, %v3313_v17, 0 }
 0x502   :  { %2104 = vmax.xlane.f32.xlu1 %v2103_v0  ;;  %v2151_v4 = vsel %vm495_vm1, %v8086_v32, -inf  ;;  %v2163_v38 = vsel %vm1433_vm2, %v8086_v32, -inf  ;;  %v2175_v18 = vsel %vm1446_vm3, %v8086_v32, -inf  ;;  %v2184_v29 = vsel %vm1459_vm4, %v8079_v43, -inf  ;;  %v9893_v0 = vld [vmem:[#allocation5_spill] sm:$0xff] }
 0x503   :  { %v3322_v52 = vmul.bf16 %v8009_v2, %v7487_v7  ;;  %v2187_v48 = vsel %vm1459_vm4, %v8086_v32, -inf  ;;  %v2136_v1 = vsel %vm1459_vm4, %v8061_v57, -inf  ;;  %v2139_v26 = vsel %vm1459_vm4, %v8063_v20, -inf }
 0x504   :  { %2113 = vmax.xlane.f32.xlu0 %v2112_v23  ;;  %v3364_v42 = vsel %vm495_vm1, %v3314_v35, 0  ;;  %v3652_v8 = vmul.bf16 %v7743_v34, %v7513_v9  ;;  %v3644_v28 = vmul.bf16 %v7751_v55, %v7513_v9  ;;  %v3653_v45 = vmul.bf16 %v7761_v61, %v7509_v11  ;;  %v5181_v23 = vld [vmem:[%s9892_s0 + $0x30] sm:$0xff] }
 0x505   :  { %v3645_v34 = vmul.bf16 %v7771_v53, %v7509_v11  ;;  %v3655_v62 = vmul.bf16 %v7847_v44, %v7509_v11  ;;  %v3656_v17 = vmul.bf16 %v7863_v10, %v7513_v9  ;;  %v2432_v35 = vunpack.c.h.bf16 %v5182_v56 }
 0x506   :  { %2116 = vmax.xlane.f32.xlu1 %v2115_v21  ;;  %v3680_v7 = vsel %vm495_vm1, %v3644_v28, 0  ;;  %v2429_v21 = vunpack.c.l.bf16 %v5181_v23 }
 0x507   :  { %v3683_v25 = vsel %vm495_vm1, %v3645_v34, 0 }
 0x508   :  { %5678 = vmatpush3.bf16.xpose.msra.mxu0 %v3355_v47  ;;  %2125 = vmax.xlane.f32.xlu0 %v2124_v51 }
 0x509   :  { %6070 = vmatprep.subr.msk.bf16.mxu0 %vm495_vm1, %v3320_v60 }
 0x50a   :  { %2128 = vmax.xlane.f32.xlu1 %v2127_v54  ;;  %v2431_v54 = vunpack.c.l.bf16 %v5182_v56 }
 0x50c   :  { %2149 = vmax.xlane.f32.xlu0 %v2148_v58  ;;  %v3647_v58 = vmul.bf16 %v7855_v3, %v7509_v11 }
 0x50e   :  { %2152 = vmax.xlane.f32.xlu1 %v2151_v4 }
 0x510   :  { %5680 = vmatpush3.bf16.xpose.msra.mxu0 %v3358_v41  ;;  %2161 = vmax.xlane.f32.xlu0 %v2160_v27 }
 0x511   :  { %6071 = vmatprep.subr.msk.bf16.mxu0 %vm495_vm1, %v3321_v33 }
 0x512   :  { %2164 = vmax.xlane.f32.xlu1 %v2163_v38  ;;  %v3689_v38 = vsel %vm495_vm1, %v3647_v58, 0  ;;  %v3650_v58 = vmul.bf16 %v7997_v12, %v7513_v9 }
 0x514   :  { %2173 = vmax.xlane.f32.xlu0 %v2172_v39 }
 0x516   :  { %2176 = vmax.xlane.f32.xlu1 %v2175_v18 }
 0x518   :  { %5682 = vmatpush3.bf16.xpose.msra.mxu0 %v3361_v22  ;;  %2185 = vmax.xlane.f32.xlu0 %v2184_v29  ;;  %v2430_v29 = vunpack.c.h.bf16 %v5181_v23 }
 0x519   :  { %6072 = vmatprep.subr.msk.bf16.mxu0 %vm495_vm1, %v3322_v52 }
 0x51a   :  { %2188 = vmax.xlane.f32.xlu1 %v2187_v48  ;;  %v3648_v48 = vmul.bf16 %v7871_v30, %v7513_v9 }
 0x51c   :  { %2137 = vmax.xlane.f32.xlu0 %v2136_v1 }
 0x51e   :  { %2140 = vmax.xlane.f32.xlu1 %v2139_v26 }
 0x520   :  { %5684 = vmatpush3.bf16.xpose.msra.mxu0 %v3364_v42 }
 0x521   :  { %6073 = vmatprep.subr.msk.bf16.mxu0 %vm495_vm1, %v3652_v8  ;;  %v3692_v8 = vsel %vm495_vm1, %v3648_v48, 0 }
 0x527   :  { %5686 = vmatmul.mubr.msk.bf16.vlgmr.msra.gmra.mrb[80].mxu0 %vm495_vm1, %v7213_v36  ;;  %v3646_v36 = vmul.bf16 %v7839_v50, %v7513_v9 }
 0x528   :  { %5732 = vmatpush3.bf16.xpose.msra.mxu0 %v3680_v7  ;;  %5747 = vmatprep.mubr.msk.bf16.mxu0 %vm495_vm1, %v9893_v0  ;;  %v3657_v7 = vmul.bf16 %v7879_v19, %v7509_v11 }
 0x529   :  { %6074 = vmatprep.subr.msk.bf16.mxu0 %vm495_vm1, %v3653_v45  ;;  %v3686_v6 = vsel %vm495_vm1, %v3646_v36, 0 }
 0x530   :  { %5734 = vmatpush3.bf16.xpose.msra.mxu0 %v3683_v25 }
 0x531   :  { %6075 = vmatprep.subr.msk.bf16.mxu0 %vm495_vm1, %v3654_v24  ;;  %v3649_v24 = vmul.bf16 %v7889_v46, %v7509_v11 }
 0x538   :  { %5736 = vmatpush3.bf16.xpose.msra.mxu0 %v3686_v6 }
 0x539   :  { %6076 = vmatprep.subr.msk.bf16.mxu0 %vm495_vm1, %v3655_v62  ;;  %v3695_v62 = vsel %vm495_vm1, %v3649_v24, 0 }
 0x53a   :  { %v2413_v47 = vpop.f32.mrb[68].mxu0 }
 0x53b   :  { %v2422_v51 = vmul.f32 0.5, %v2413_v47  ;;  %v2415_v60 = vpop.f32.mrb[69].mxu0 }
 0x53c   :  { %v2417_v40 = vpop.f32.mrb[70].mxu0  ;;  %v2423_v22 = vmul.f32 0.5, %v2415_v60 }
 0x53d   :  { %v8159_v4 = vadd.f32 %v2429_v21, %v2422_v51  ;;  %v2424_v41 = vmul.f32 0.5, %v2417_v40  ;;  %v2419_v27 = vpop.f32.mrb[71].mxu0  ;;  %v3658_v21 = vmul.bf16 %v7901_v31, %v7513_v9 }
 0x53e   :  { %v2425_v1 = vmul.f32 0.5, %v2419_v27  ;;  %v8177_v42 = vadd.f32 %v2430_v29, %v2423_v22 }
 0x53f   :  { %v8161_v33 = vadd.f32 %v2431_v54, %v2424_v41  ;;  %v2437_v39 = vsel %vm495_vm1, %v8159_v4, -inf  ;;  %v2449_v52 = vsel %vm1433_vm2, %v8159_v4, -inf  ;;  %v2461_v28 = vsel %vm1446_vm3, %v8159_v4, -inf }
 0x540   :  { %5738 = vmatpush3.bf16.xpose.msra.mxu0 %v3689_v38  ;;  %2438 = vmax.xlane.f32.xlu0 %v2437_v39  ;;  %v8184_v45 = vadd.f32 %v2432_v35, %v2425_v1  ;;  %v2485_v25 = vsel %vm495_vm1, %v8177_v42, -inf  ;;  %v2497_v56 = vsel %vm1433_vm2, %v8177_v42, -inf  ;;  %v2509_v54 = vsel %vm1446_vm3, %v8177_v42, -inf }
 0x541   :  { %6077 = vmatprep.subr.msk.bf16.mxu0 %vm495_vm1, %v3656_v17  ;;  %v2440_v18 = vsel %vm495_vm1, %v8161_v33, -inf  ;;  %v2452_v26 = vsel %vm1433_vm2, %v8161_v33, -inf  ;;  %v2464_v34 = vsel %vm1446_vm3, %v8161_v33, -inf  ;;  %v3698_v38 = vsel %vm495_vm1, %v3650_v58, 0 }
 0x542   :  { %2441 = vmax.xlane.f32.xlu1 %v2440_v18  ;;  %v2488_v23 = vsel %vm495_vm1, %v8184_v45, -inf  ;;  %v2500_v51 = vsel %vm1433_vm2, %v8184_v45, -inf  ;;  %v2512_v41 = vsel %vm1446_vm3, %v8184_v45, -inf  ;;  %v2521_v39 = vsel %vm1459_vm4, %v8177_v42, -inf }
 0x543   :  { %v3659_v17 = vmul.bf16 %v8009_v2, %v7509_v11  ;;  %v2524_v29 = vsel %vm1459_vm4, %v8184_v45, -inf  ;;  %v2473_v35 = vsel %vm1459_vm4, %v8159_v4, -inf  ;;  %v2476_v24 = vsel %vm1459_vm4, %v8161_v33, -inf }
 0x544   :  { %2450 = vmax.xlane.f32.xlu0 %v2449_v52 }
 0x546   :  { %2453 = vmax.xlane.f32.xlu1 %v2452_v26  ;;  %v3651_v26 = vmul.bf16 %v8021_v16, %v7509_v11 }
 0x548   :  { %5740 = vmatpush3.bf16.xpose.msra.mxu0 %v3692_v8  ;;  %2462 = vmax.xlane.f32.xlu0 %v2461_v28 }
 0x549   :  { %6078 = vmatprep.subr.msk.bf16.mxu0 %vm495_vm1, %v3657_v7 }
 0x54a   :  { %2465 = vmax.xlane.f32.xlu1 %v2464_v34 }
 0x54c   :  { %2486 = vmax.xlane.f32.xlu0 %v2485_v25 }
 0x54d   :  { %v1765_v36 = vpop.xlane.xlu0 %1764 }
 0x54e   :  { %2489 = vmax.xlane.f32.xlu1 %v2488_v23  ;;  %v1769_v18 = vsub.f32 %v7948_v15, %v1765_v36 }
 0x54f   :  { %v1768_v6 = vpop.xlane.xlu1 %1767 }
 0x550   :  { %5742 = vmatpush3.bf16.xpose.msra.mxu0 %v3695_v62  ;;  %2498 = vmax.xlane.f32.xlu0 %v2497_v56  ;;  %v1770_v9 = vsub.f32 %v7950_v63, %v1768_v6  ;;  %v1771_v8 = vmul.f32 1.442695, %v1769_v18  ;;  %v3701_v56 = vsel %vm495_vm1, %v3651_v26, 0 }
 0x551   :  { %6079 = vmatprep.subr.msk.bf16.mxu0 %vm495_vm1, %v3658_v21  ;;  %v1777_v47 = vpop.xlane.xlu0 %1776 }
 0x552   :  { %2501 = vmax.xlane.f32.xlu1 %v2500_v51  ;;  %v1781_v52 = vsub.f32 %v7948_v15, %v1777_v47  ;;  %v1773_v7 = vmul.f32 1.442695, %v1770_v9  ;;  %6154 = vpow2.f32 %v1771_v8 }
 0x553   :  { %v1780_v60 = vpop.xlane.xlu1 %1779 }
 0x554   :  { %2510 = vmax.xlane.f32.xlu0 %v2509_v54  ;;  %v1782_v48 = vsub.f32 %v7950_v63, %v1780_v60  ;;  %v1783_v36 = vmul.f32 1.442695, %v1781_v52  ;;  %6156 = vpow2.f32 %v1773_v7 }
 0x555   :  { %v1789_v40 = vpop.xlane.xlu0 %1788 }
 0x556   :  { %2513 = vmax.xlane.f32.xlu1 %v2512_v41  ;;  %v1785_v6 = vmul.f32 1.442695, %v1782_v48  ;;  %6158 = vpow2.f32 %v1783_v36  ;;  %v1793_v58 = vsub.f32 %v7948_v15, %v1789_v40 }
 0x557   :  { %v1792_v27 = vpop.xlane.xlu1 %1791 }
 0x558   :  { %5744 = vmatpush3.bf16.xpose.msra.mxu0 %v3698_v38  ;;  %2522 = vmax.xlane.f32.xlu0 %v2521_v39  ;;  %6160 = vpow2.f32 %v1785_v6  ;;  %v1794_v18 = vsub.f32 %v7950_v63, %v1792_v27  ;;  %v1795_v52 = vmul.f32 1.442695, %v1793_v58 }
 0x559   :  { %6080 = vmatprep.subr.msk.bf16.mxu0 %vm495_vm1, %v3659_v17  ;;  %v1813_v22 = vpop.xlane.xlu0 %1812 }
 0x55a   :  { %2525 = vmax.xlane.f32.xlu1 %v2524_v29  ;;  %v1817_v28 = vsub.f32 %v7966_v14, %v1813_v22  ;;  %v1797_v27 = vmul.f32 1.442695, %v1794_v18 }
 0x55b   :  { %v1816_v1 = vpop.xlane.xlu1 %1815 }
 0x55c   :  { %2474 = vmax.xlane.f32.xlu0 %v2473_v35  ;;  %v1818_v34 = vsub.f32 %v7973_v59, %v1816_v1  ;;  %v1819_v11 = vmul.f32 1.442695, %v1817_v28  ;;  %v6155_v26 = vpop.eup %6154 }
 0x55d   :  { %v1825_v25 = vpop.xlane.xlu0 %1824 }
 0x55e   :  { %v1829_v23 = vsub.f32 %v7966_v14, %v1825_v25  ;;  %2477 = vmax.xlane.f32.xlu1 %v2476_v24  ;;  %v1821_v47 = vmul.f32 1.442695, %v1818_v34  ;;  %6162 = vpow2.f32 %v1819_v11  ;;  %v6157_v28 = vpop.eup %6156 }
 0x55f   :  { %v1828_v62 = vpop.xlane.xlu1 %1827 }
 0x560   :  { %v1830_v21 = vsub.f32 %v7973_v59, %v1828_v62  ;;  %5746 = vmatpush3.bf16.xpose.msra.mxu0 %v3701_v56  ;;  %v1831_v60 = vmul.f32 1.442695, %v1829_v23  ;;  %6164 = vpow2.f32 %v1821_v47  ;;  %v6159_v7 = vpop.eup %6158 }
 0x561   :  { %v1837_v51 = vpop.xlane.xlu0 %1836  ;;  %v1859_v18 = vsel %vm495_vm1, %v6155_v26, %v6159_v7 }
 0x562   :  { %v1841_v54 = vsub.f32 %v7966_v14, %v1837_v51  ;;  %v1833_v41 = vmul.f32 1.442695, %v1830_v21  ;;  %6166 = vpow2.f32 %v1831_v60  ;;  %v6161_v25 = vpop.eup %6160  ;;  %v5184_v51 = vld [vmem:[%s9892_s0 + $0x40] sm:$0xff] }
 0x563   :  { %v1840_v38 = vpop.xlane.xlu1 %1839 }
 0x564   :  { %v1843_v39 = vmul.f32 1.442695, %v1841_v54  ;;  %v1842_v17 = vsub.f32 %v7973_v59, %v1840_v38  ;;  %6168 = vpow2.f32 %v1833_v41 }
 0x565   :  { %v1849_v9 = vpop.xlane.xlu0 %1848 }
 0x566   :  { %v1845_v22 = vmul.f32 1.442695, %v1842_v17  ;;  %v1853_v29 = vsub.f32 %v7966_v14, %v1849_v9  ;;  %6170 = vpow2.f32 %v1843_v39  ;;  %v5185_v39 = vld [vmem:[%s9892_s0 + $0x48] sm:$0xff]  ;;  %v2766_v17 = vunpack.c.l.bf16 %v5184_v51 }
 0x567   :  { %5748 = vmatmul.mubr.msk.bf16.vlgmr.msra.gmra.mrb[84].mxu0 %vm495_vm1, %v9893_v0  ;;  %v1852_v40 = vpop.xlane.xlu1 %1851  ;;  %v1860_v9 = vsel %vm495_vm1, %v6157_v28, %v6161_v25 }
 0x568   :  { %v1855_v48 = vmul.f32 1.442695, %v1853_v29  ;;  %v1854_v1 = vsub.f32 %v7973_v59, %v1852_v40  ;;  %5955 = vmatprep.mubr.msk.bf16.mxu0 %vm495_vm1, %v3981_v13  ;;  %6172 = vpow2.f32 %v1845_v22  ;;  %v6163_v37 = vpop.eup %6162 }
 0x569   :  { %v1801_v35 = vpop.xlane.xlu0 %1800 }
 0x56a   :  { %6174 = vpow2.f32 %v1855_v48  ;;  %v1857_v14 = vmul.f32 1.442695, %v1854_v1  ;;  %v1805_v8 = vsub.f32 %v7948_v15, %v1801_v35  ;;  %v6165_v13 = vpop.eup %6164 }
 0x56b   :  { %6176 = vpow2.f32 %v1795_v52  ;;  %v1804_v0 = vpop.xlane.xlu1 %1803 }
 0x56c   :  { %6178 = vpow2.f32 %v1857_v14  ;;  %v1807_v34 = vmul.f32 1.442695, %v1805_v8  ;;  %v1806_v59 = vsub.f32 %v7950_v63, %v1804_v0  ;;  %v6167_v24 = vpop.eup %6166 }
 0x56d   :  { %6180 = vpow2.f32 %v1797_v27  ;;  %v1865_v56 = vsel %vm495_vm1, %v6163_v37, %v6167_v24  ;;  %v2768_v27 = vunpack.c.l.bf16 %v5185_v39  ;;  %v2769_v24 = vunpack.c.h.bf16 %v5185_v39 }
 0x56e   :  { %6182 = vpow2.f32 %v1807_v34  ;;  %v1809_v49 = vmul.f32 1.442695, %v1806_v59  ;;  %v6169_v36 = vpop.eup %6168 }
 0x56f   :  { %v1866_v11 = vsel %vm495_vm1, %v6165_v13, %v6169_v36 }
 0x570   :  { %6184 = vpow2.f32 %v1809_v49  ;;  %v6171_v23 = vpop.eup %6170  ;;  %v2767_v49 = vunpack.c.h.bf16 %v5184_v51 }
 0x571   :  { %v1867_v63 = vsel %vm1522_vm6, %v1865_v56, %v6171_v23 }
 0x572   :  { %v6173_v6 = vpop.eup %6172 }
 0x573   :  { %v1868_v47 = vsel %vm1522_vm6, %v1866_v11, %v6173_v6 }
 0x574   :  { %v6175_v15 = vpop.eup %6174 }
 0x575   :  { %v6177_v62 = vpop.eup %6176  ;;  %v1869_v54 = vsel %vm1525_vm5, %v1867_v63, %v6175_v15 }
 0x576   :  { %v6179_v21 = vpop.eup %6178  ;;  %v1861_v52 = vsel %vm1522_vm6, %v1859_v18, %v6177_v62 }
 0x577   :  { %v6181_v60 = vpop.eup %6180  ;;  %v1870_v58 = vsel %vm1525_vm5, %v1868_v47, %v6179_v21 }
 0x578   :  { %v6183_v41 = vpop.eup %6182  ;;  %v1872_v38 = vpack.c.bf16 %v1870_v58, %v1869_v54  ;;  %v1862_v40 = vsel %vm1522_vm6, %v1860_v9, %v6181_v60  ;;  %v8327_v54 = vld [vmem:[%s9879_s12 + $0x40] sm:$0xff]   ;;  %v9894_v58 = vld [vmem:[#allocation7_spill] sm:$0xff] }
 0x579   :  { %v1863_v35 = vsel %vm1525_vm5, %v1861_v52, %v6183_v41  ;;  %v1983_v41 = vmul.bf16 %v8327_v54, %v9894_v58 }
 0x57a   :  { %v6185_v22 = vpop.eup %6184  ;;  %1905 = vmatprep.mubr.bf16.mxu1 %v1872_v38  ;;  %v2750_v29 = vpop.f32.mrb[72].mxu0 }
 0x57b   :  { %v2759_v48 = vmul.f32 0.5, %v2750_v29  ;;  %v2752_v1 = vpop.f32.mrb[73].mxu0  ;;  %v1864_v14 = vsel %vm1525_vm5, %v1862_v40, %v6185_v22 }
 0x57c   :  { %v2754_v8 = vpop.f32.mrb[74].mxu0  ;;  %v8264_v0 = vpack.c.bf16 %v1864_v14, %v1863_v35  ;;  %v2760_v37 = vmul.f32 0.5, %v2752_v1  ;;  %v8351_v14 = vld [vmem:[%s9879_s12 + $0x48] sm:$0xff]  }
 0x57d   :  { %v8266_v26 = vadd.f32 %v2766_v17, %v2759_v48  ;;  %v2761_v28 = vmul.f32 0.5, %v2754_v8  ;;  %v2756_v7 = vpop.f32.mrb[75].mxu0  ;;  %v8342_v48 = vld [vmem:[%s9879_s12] sm:$0xff]   ;;  %v9895_v8 = vld [vmem:[#allocation6_spill] sm:$0xff] }
 0x57e   :  { %1906 = vmatmul.mubr.bf16.vlgmr.msra.gmra.mrb[64].mxu1 %v8264_v0  ;;  %v1975_v1 = vmul.bf16 %v8342_v48, %v9894_v58 }
 0x57f   :  { %v8269_v34 = vadd.f32 %v2768_v27, %v2761_v28  ;;  %5400 = vmatpush3.bf16.msra.mxu1 %v7751_v55  ;;  %1946 = vmatprep.mubr.bf16.mxu1 %v1872_v38  ;;  %v2774_v59 = vsel %vm495_vm1, %v8266_v26, -inf  ;;  %v2786_v13 = vsel %vm1433_vm2, %v8266_v26, -inf  ;;  %v2762_v55 = vmul.f32 0.5, %v2756_v7 }
 0x580   :  { %2775 = vmax.xlane.f32.xlu0 %v2774_v59  ;;  %5401 = vmatprep.subr.bf16.mxu1 %v7761_v61  ;;  %v8283_v61 = vadd.f32 %v2767_v49, %v2760_v37  ;;  %v2798_v23 = vsel %vm1446_vm3, %v8266_v26, -inf  ;;  %v2810_v17 = vsel %vm1459_vm4, %v8266_v26, -inf  ;;  %v1984_v28 = vmul.bf16 %v8351_v14, %v9895_v8 }
 0x581   :  { %v2777_v25 = vsel %vm495_vm1, %v8269_v34, -inf  ;;  %v2789_v36 = vsel %vm1433_vm2, %v8269_v34, -inf  ;;  %v2813_v40 = vsel %vm1459_vm4, %v8269_v34, -inf }
 0x582   :  { %2778 = vmax.xlane.f32.xlu1 %v2777_v25  ;;  %v2822_v6 = vsel %vm495_vm1, %v8283_v61, -inf  ;;  %v2834_v62 = vsel %vm1433_vm2, %v8283_v61, -inf  ;;  %v2846_v11 = vsel %vm1446_vm3, %v8283_v61, -inf }
 0x583   :  { %5402 = vmatpush3.bf16.msra.mxu1 %v7771_v53  ;;  %v8289_v53 = vadd.f32 %v2769_v24, %v2762_v55 }
 0x584   :  { %2787 = vmax.xlane.f32.xlu0 %v2786_v13  ;;  %5403 = vmatprep.subr.bf16.mxu1 %v7779_v5  ;;  %v2801_v5 = vsel %vm1446_vm3, %v8269_v34, -inf  ;;  %v8359_v13 = vld [vmem:[%s9879_s12 + $0x8] sm:$0xff]  }
 0x585   :  { %v2825_v15 = vsel %vm495_vm1, %v8289_v53, -inf  ;;  %v2837_v56 = vsel %vm1433_vm2, %v8289_v53, -inf  ;;  %v2849_v21 = vsel %vm1446_vm3, %v8289_v53, -inf  ;;  %v2861_v51 = vsel %vm1459_vm4, %v8289_v53, -inf }
 0x586   :  { %2790 = vmax.xlane.f32.xlu1 %v2789_v36  ;;  %v1976_v55 = vmul.bf16 %v8359_v13, %v9895_v8 }
 0x587   :  { %5404 = vmatpush3.bf16.msra.mxu1 %v7839_v50 }
 0x588   :  { %2799 = vmax.xlane.f32.xlu0 %v2798_v23  ;;  %5405 = vmatprep.subr.bf16.mxu1 %v7847_v44  ;;  %v8367_v23 = vld [vmem:[%s9879_s12 + $0x50] sm:$0xff]  }
 0x58a   :  { %2802 = vmax.xlane.f32.xlu1 %v2801_v5  ;;  %v1985_v5 = vmul.bf16 %v8367_v23, %v9894_v58 }
 0x58b   :  { %5406 = vmatpush3.bf16.msra.mxu1 %v7855_v3 }
 0x58c   :  { %2823 = vmax.xlane.f32.xlu0 %v2822_v6  ;;  %5407 = vmatprep.subr.bf16.mxu1 %v7863_v10 }
 0x58d   :  { %v2102_v50 = vpop.xlane.xlu0 %2101 }
 0x58e   :  { %2826 = vmax.xlane.f32.xlu1 %v2825_v15  ;;  %v2106_v63 = vsub.f32 %v8061_v57, %v2102_v50 }
 0x58f   :  { %5408 = vmatpush3.bf16.msra.mxu1 %v7871_v30  ;;  %v2105_v44 = vpop.xlane.xlu1 %2104 }
 0x590   :  { %2835 = vmax.xlane.f32.xlu0 %v2834_v62  ;;  %5409 = vmatprep.subr.bf16.mxu1 %v7879_v19  ;;  %v2108_v18 = vmul.f32 1.442695, %v2106_v63 }
 0x591   :  { %v2114_v3 = vpop.xlane.xlu0 %2113 }
 0x592   :  { %2838 = vmax.xlane.f32.xlu1 %v2837_v56  ;;  %v2118_v60 = vsub.f32 %v8061_v57, %v2114_v3  ;;  %6186 = vpow2.f32 %v2108_v18 }
 0x593   :  { %5410 = vmatpush3.bf16.msra.mxu1 %v7889_v46  ;;  %v2117_v10 = vpop.xlane.xlu1 %2116  ;;  %v2858_v46 = vsel %vm1459_vm4, %v8283_v61, -inf }
 0x594   :  { %2847 = vmax.xlane.f32.xlu0 %v2846_v11  ;;  %5411 = vmatprep.subr.bf16.mxu1 %v7901_v31  ;;  %v2107_v31 = vsub.f32 %v8063_v20, %v2105_v44  ;;  %v2119_v38 = vsub.f32 %v8063_v20, %v2117_v10  ;;  %v2120_v27 = vmul.f32 1.442695, %v2118_v60  ;;  %v8379_v10 = vld [vmem:[%s9879_s12 + $0x10] sm:$0xff]  }
 0x595   :  { %v8309_v30 = vpop.xlane.xlu0 %2125  ;;  %v1977_v11 = vmul.bf16 %v8379_v10, %v9894_v58 }
 0x596   :  { %2850 = vmax.xlane.f32.xlu1 %v2849_v21  ;;  %v2110_v22 = vmul.f32 1.442695, %v2107_v31  ;;  %v2122_v7 = vmul.f32 1.442695, %v2119_v38  ;;  %v2130_v6 = vsub.f32 %v8061_v57, %v8309_v30 }
 0x597   :  { %5412 = vmatpush3.bf16.msra.mxu1 %v7997_v12  ;;  %v8314_v19 = vpop.xlane.xlu1 %2128 }
 0x598   :  { %2859 = vmax.xlane.f32.xlu0 %v2858_v46  ;;  %5413 = vmatprep.subr.bf16.mxu1 %v8009_v2  ;;  %6188 = vpow2.f32 %v2110_v22  ;;  %v2131_v3 = vsub.f32 %v8063_v20, %v8314_v19  ;;  %v8387_v46 = vld [vmem:[%s9879_s12 + $0x58] sm:$0xff]   ;;  %v2132_v63 = vmul.f32 1.442695, %v2130_v6 }
 0x599   :  { %v2150_v47 = vpop.xlane.xlu0 %2149  ;;  %6190 = vpow2.f32 %v2120_v27  ;;  %v1986_v19 = vmul.bf16 %v8387_v46, %v9895_v8 }
 0x59a   :  { %2862 = vmax.xlane.f32.xlu1 %v2861_v51  ;;  %v2154_v9 = vsub.f32 %v8079_v43, %v2150_v47  ;;  %6192 = vpow2.f32 %v2122_v7  ;;  %v2134_v60 = vmul.f32 1.442695, %v2131_v3 }
 0x59b   :  { %5414 = vmatpush3.bf16.msra.mxu1 %v8021_v16  ;;  %v2153_v39 = vpop.xlane.xlu1 %2152 }
 0x59c   :  { %5439 = vmatprep.subr.bf16.mxu1 %v1983_v41  ;;  %2811 = vmax.xlane.f32.xlu0 %v2810_v17  ;;  %v2155_v29 = vsub.f32 %v8086_v32, %v2153_v39  ;;  %v2156_v25 = vmul.f32 1.442695, %v2154_v9  ;;  %v8395_v41 = vld [vmem:[%s9879_s12 + $0x18] sm:$0xff]   ;;  %v6187_v39 = vpop.eup %6186 }
 0x59d   :  { %v2162_v52 = vpop.xlane.xlu0 %2161  ;;  %v1978_v38 = vmul.bf16 %v8395_v41, %v9895_v8 }
 0x59e   :  { %v2166_v35 = vsub.f32 %v8079_v43, %v2162_v52  ;;  %1947 = vmatmul.mubr.bf16.vlgmr.msra.gmra.mrb[68].mxu1 %v8264_v0  ;;  %2814 = vmax.xlane.f32.xlu1 %v2813_v40  ;;  %v2158_v49 = vmul.f32 1.442695, %v2155_v29  ;;  %6194 = vpow2.f32 %v2156_v25 }
 0x59f   :  { %5440 = vmatpush3.bf16.msra.mxu1 %v1975_v1  ;;  %v2165_v59 = vpop.xlane.xlu1 %2164 }
 0x5a0   :  { %5441 = vmatprep.subr.bf16.mxu1 %v1984_v28  ;;  %v2167_v37 = vsub.f32 %v8086_v32, %v2165_v59  ;;  %v2168_v24 = vmul.f32 1.442695, %v2166_v35  ;;  %6196 = vpow2.f32 %v2158_v49  ;;  %v8418_v59 = vld [vmem:[%s9879_s12 + $0x68] sm:$0xff]  }
 0x5a1   :  { %v2174_v0 = vpop.xlane.xlu0 %2173 }
 0x5a2   :  { %v2178_v36 = vsub.f32 %v8079_v43, %v2174_v0  ;;  %v2170_v50 = vmul.f32 1.442695, %v2167_v37  ;;  %6198 = vpow2.f32 %v2168_v24  ;;  %v6189_v22 = vpop.eup %6188  ;;  %v8425_v0 = vld [vmem:[%s9879_s12 + $0x28] sm:$0xff]  }
 0x5a3   :  { %5442 = vmatpush3.bf16.msra.mxu1 %v1976_v55  ;;  %v2177_v15 = vpop.xlane.xlu1 %2176  ;;  %v6191_v52 = vpop.eup %6190  ;;  %v1980_v55 = vmul.bf16 %v8425_v0, %v9895_v8 }
 0x5a4   :  { %v2180_v44 = vmul.f32 1.442695, %v2178_v36  ;;  %5443 = vmatprep.subr.bf16.mxu1 %v1985_v5  ;;  %v2179_v62 = vsub.f32 %v8086_v32, %v2177_v15  ;;  %6200 = vpow2.f32 %v2170_v50  ;;  %v6193_v27 = vpop.eup %6192  ;;  %v8432_v36 = vld [vmem:[%s9879_s12 + $0x70] sm:$0xff]  }
 0x5a5   :  { %v2186_v56 = vpop.xlane.xlu0 %2185  ;;  %v1989_v5 = vmul.bf16 %v8432_v36, %v9894_v58 }
 0x5a6   :  { %v2182_v30 = vmul.f32 1.442695, %v2179_v62  ;;  %v2190_v21 = vsub.f32 %v8079_v43, %v2186_v56  ;;  %6202 = vpow2.f32 %v2180_v44  ;;  %v1981_v44 = vmul.bf16 %v7997_v12, %v9894_v58 }
 0x5a7   :  { %5444 = vmatpush3.bf16.msra.mxu1 %v1977_v11  ;;  %v2189_v31 = vpop.xlane.xlu1 %2188  ;;  %v1990_v11 = vmul.bf16 %v8009_v2, %v9895_v8  ;;  %v5188_v2 = vld [vmem:[%s9892_s0 + $0x58] sm:$0xff] }
 0x5a8   :  { %v2192_v47 = vmul.f32 1.442695, %v2190_v21  ;;  %5445 = vmatprep.subr.bf16.mxu1 %v1986_v19  ;;  %v2191_v51 = vsub.f32 %v8086_v32, %v2189_v31  ;;  %6204 = vpow2.f32 %v2182_v30  ;;  %v8403_v32 = vld [vmem:[%s9879_s12 + $0x60] sm:$0xff]   ;;  %v6195_v28 = vpop.eup %6194  ;;  %v5187_v19 = vld [vmem:[%s9892_s0 + $0x50] sm:$0xff] }
 0x5a9   :  { %v2138_v43 = vpop.xlane.xlu0 %2137  ;;  %v1987_v9 = vmul.bf16 %v8403_v32, %v9894_v58 }
 0x5aa   :  { %6206 = vpow2.f32 %v2192_v47  ;;  %v2194_v17 = vmul.f32 1.442695, %v2191_v51  ;;  %v2142_v18 = vsub.f32 %v8061_v57, %v2138_v43  ;;  %v8411_v57 = vld [vmem:[%s9879_s12 + $0x20] sm:$0xff]   ;;  %v6197_v25 = vpop.eup %6196  ;;  %v1982_v51 = vmul.bf16 %v8021_v16, %v9895_v8 }
 0x5ab   :  { %6208 = vpow2.f32 %v2132_v63  ;;  %5446 = vmatpush3.bf16.msra.mxu1 %v1978_v38  ;;  %v2141_v29 = vpop.xlane.xlu1 %2140  ;;  %v1979_v35 = vmul.bf16 %v8411_v57, %v9894_v58  ;;  %v2196_v43 = vsel %vm495_vm1, %v6187_v39, %v6191_v52  ;;  %v2197_v38 = vsel %vm495_vm1, %v6189_v22, %v6193_v27 }
 0x5ac   :  { %6210 = vpow2.f32 %v2194_v17  ;;  %v2144_v40 = vmul.f32 1.442695, %v2142_v18  ;;  %5447 = vmatprep.subr.bf16.mxu1 %v1987_v9  ;;  %v2143_v1 = vsub.f32 %v8063_v20, %v2141_v29  ;;  %v1988_v20 = vmul.bf16 %v8418_v59, %v9895_v8  ;;  %v6199_v37 = vpop.eup %6198 }
 0x5ad   :  { %6212 = vpow2.f32 %v2134_v60  ;;  %v2202_v62 = vsel %vm495_vm1, %v6195_v28, %v6199_v37  ;;  %v3103_v60 = vunpack.c.l.bf16 %v5187_v19 }
 0x5ae   :  { %6214 = vpow2.f32 %v2144_v40  ;;  %v2146_v7 = vmul.f32 1.442695, %v2143_v1  ;;  %v6201_v49 = vpop.eup %6200 }
 0x5af   :  { %5448 = vmatpush3.bf16.msra.mxu1 %v1979_v35  ;;  %v2203_v3 = vsel %vm495_vm1, %v6197_v25, %v6201_v49  ;;  %v3105_v35 = vunpack.c.l.bf16 %v5188_v2  ;;  %v3104_v49 = vunpack.c.h.bf16 %v5187_v19 }
 0x5b0   :  { %6216 = vpow2.f32 %v2146_v7  ;;  %5449 = vmatprep.subr.bf16.mxu1 %v1988_v20  ;;  %v6203_v24 = vpop.eup %6202 }
 0x5b1   :  { %v2204_v30 = vsel %vm1522_vm6, %v2202_v62, %v6203_v24 }
 0x5b2   :  { %v6205_v6 = vpop.eup %6204 }
 0x5b3   :  { %5450 = vmatpush3.bf16.msra.mxu1 %v1980_v55  ;;  %v2205_v21 = vsel %vm1522_vm6, %v2203_v3, %v6205_v6 }
 0x5b4   :  { %v6207_v50 = vpop.eup %6206  ;;  %5451 = vmatprep.subr.bf16.mxu1 %v1989_v5  ;;  %v3106_v5 = vunpack.c.h.bf16 %v5188_v2  ;;  %v8513_v2 = vld [vmem:[%s9879_s12 + $0x30] sm:$0xff]  }
 0x5b5   :  { %v6209_v15 = vpop.eup %6208  ;;  %v2206_v12 = vsel %vm1525_vm5, %v2204_v30, %v6207_v50 }
 0x5b6   :  { %v6211_v56 = vpop.eup %6210  ;;  %v2198_v9 = vsel %vm1522_vm6, %v2196_v43, %v6209_v15 }
 0x5b7   :  { %v6213_v63 = vpop.eup %6212  ;;  %5452 = vmatpush3.bf16.msra.mxu1 %v1981_v44  ;;  %v2207_v58 = vsel %vm1525_vm5, %v2205_v21, %v6211_v56 }
 0x5b8   :  { %v6215_v31 = vpop.eup %6214  ;;  %5453 = vmatprep.subr.bf16.mxu1 %v1990_v11  ;;  %v2209_v47 = vpack.c.bf16 %v2207_v58, %v2206_v12  ;;  %v2199_v29 = vsel %vm1522_vm6, %v2197_v38, %v6213_v63  ;;  %v8524_v38 = vld [vmem:[%s9879_s12 + $0x78] sm:$0xff]  }
 0x5b9   :  { %v2200_v28 = vsel %vm1525_vm5, %v2198_v9, %v6215_v31 }
 0x5ba   :  { %v6217_v17 = vpop.eup %6216  ;;  %2242 = vmatprep.mubr.bf16.mxu1 %v2209_v47  ;;  %v3087_v18 = vpop.f32.mrb[76].mxu0 }
 0x5bb   :  { %5454 = vmatpush3.bf16.msra.mxu1 %v1982_v51  ;;  %v3096_v40 = vmul.f32 0.5, %v3087_v18  ;;  %v3089_v1 = vpop.f32.mrb[77].mxu0  ;;  %v2201_v16 = vsel %vm1525_vm5, %v2199_v29, %v6217_v17 }
 0x5bc   :  { %v3091_v8 = vpop.f32.mrb[78].mxu0  ;;  %5461 = vmatprep.subr.bf16.mxu1 %v8327_v54  ;;  %v8461_v39 = vpack.c.bf16 %v2201_v16, %v2200_v28  ;;  %v3097_v37 = vmul.f32 0.5, %v3089_v1  ;;  %v8537_v28 = vld [vmem:[%s9879_s12 + $0x38] sm:$0xff]  }
 0x5bd   :  { %v8463_v22 = vadd.f32 %v3103_v60, %v3096_v40  ;;  %v3098_v52 = vmul.f32 0.5, %v3091_v8  ;;  %v3093_v27 = vpop.f32.mrb[79].mxu0  ;;  %v9896_v40 = vld [vmem:[#allocation9_spill] sm:$0xff] }
 0x5be   :  { %2243 = vmatmul.mubr.bf16.vlgmr.msra.gmra.mrb[72].mxu1 %v8461_v39  ;;  %v3099_v24 = vmul.f32 0.5, %v3093_v27  ;;  %v8480_v50 = vadd.f32 %v3104_v49, %v3097_v37  ;;  %v2320_v1 = vmul.bf16 %v8327_v54, %v9896_v40 }
 0x5bf   :  { %v8466_v7 = vadd.f32 %v3105_v35, %v3098_v52  ;;  %5462 = vmatpush3.bf16.msra.mxu1 %v8342_v48  ;;  %2283 = vmatprep.mubr.bf16.mxu1 %v2209_v47  ;;  %v3111_v20 = vsel %vm495_vm1, %v8463_v22, -inf  ;;  %v3123_v55 = vsel %vm1433_vm2, %v8463_v22, -inf  ;;  %v3135_v15 = vsel %vm1446_vm3, %v8463_v22, -inf }
 0x5c0   :  { %3112 = vmax.xlane.f32.xlu0 %v3111_v20  ;;  %5463 = vmatprep.subr.bf16.mxu1 %v8351_v14  ;;  %v8486_v44 = vadd.f32 %v3106_v5, %v3099_v24  ;;  %v3159_v3 = vsel %vm495_vm1, %v8480_v50, -inf  ;;  %v3171_v21 = vsel %vm1433_vm2, %v8480_v50, -inf  ;;  %v3183_v58 = vsel %vm1446_vm3, %v8480_v50, -inf }
 0x5c1   :  { %v3114_v25 = vsel %vm495_vm1, %v8466_v7, -inf  ;;  %v3126_v6 = vsel %vm1433_vm2, %v8466_v7, -inf  ;;  %v3138_v62 = vsel %vm1446_vm3, %v8466_v7, -inf  ;;  %v3195_v60 = vsel %vm1459_vm4, %v8480_v50, -inf }
 0x5c2   :  { %3115 = vmax.xlane.f32.xlu1 %v3114_v25  ;;  %v3162_v11 = vsel %vm495_vm1, %v8486_v44, -inf  ;;  %v3174_v63 = vsel %vm1433_vm2, %v8486_v44, -inf  ;;  %v3186_v47 = vsel %vm1446_vm3, %v8486_v44, -inf  ;;  %v3198_v9 = vsel %vm1459_vm4, %v8486_v44, -inf }
 0x5c3   :  { %5464 = vmatpush3.bf16.msra.mxu1 %v8359_v13  ;;  %v3147_v8 = vsel %vm1459_vm4, %v8463_v22, -inf  ;;  %v3150_v49 = vsel %vm1459_vm4, %v8466_v7, -inf }
 0x5c4   :  { %3124 = vmax.xlane.f32.xlu0 %v3123_v55  ;;  %5465 = vmatprep.subr.bf16.mxu1 %v8367_v23  ;;  %v2312_v55 = vmul.bf16 %v8342_v48, %v9896_v40 }
 0x5c6   :  { %3127 = vmax.xlane.f32.xlu1 %v3126_v6  ;;  %v9897_v6 = vld [vmem:[#allocation8_spill] sm:$0xff] }
 0x5c7   :  { %5466 = vmatpush3.bf16.msra.mxu1 %v8379_v10 }
 0x5c8   :  { %3136 = vmax.xlane.f32.xlu0 %v3135_v15  ;;  %5467 = vmatprep.subr.bf16.mxu1 %v8387_v46  ;;  %v2321_v15 = vmul.bf16 %v8351_v14, %v9897_v6 }
 0x5ca   :  { %3139 = vmax.xlane.f32.xlu1 %v3138_v62 }
 0x5cb   :  { %5468 = vmatpush3.bf16.msra.mxu1 %v8395_v41 }
 0x5cc   :  { %3160 = vmax.xlane.f32.xlu0 %v3159_v3  ;;  %5469 = vmatprep.subr.bf16.mxu1 %v8403_v32 }
 0x5cd   :  { %v2439_v56 = vpop.xlane.xlu0 %2438 }
 0x5ce   :  { %3163 = vmax.xlane.f32.xlu1 %v3162_v11  ;;  %v2443_v43 = vsub.f32 %v8159_v4, %v2439_v56 }
 0x5cf   :  { %5470 = vmatpush3.bf16.msra.mxu1 %v8411_v57  ;;  %v2442_v30 = vpop.xlane.xlu1 %2441 }
 0x5d0   :  { %3172 = vmax.xlane.f32.xlu0 %v3171_v21  ;;  %5471 = vmatprep.subr.bf16.mxu1 %v8418_v59  ;;  %v2444_v17 = vsub.f32 %v8161_v33, %v2442_v30  ;;  %v2445_v52 = vmul.f32 1.442695, %v2443_v43 }
 0x5d1   :  { %v2451_v19 = vpop.xlane.xlu0 %2450 }
 0x5d2   :  { %3175 = vmax.xlane.f32.xlu1 %v3174_v63  ;;  %v2455_v29 = vsub.f32 %v8159_v4, %v2451_v19  ;;  %v2447_v20 = vmul.f32 1.442695, %v2444_v17  ;;  %6218 = vpow2.f32 %v2445_v52  ;;  %v2313_v19 = vmul.bf16 %v8359_v13, %v9897_v6 }
 0x5d3   :  { %5472 = vmatpush3.bf16.msra.mxu1 %v8425_v0  ;;  %v2454_v12 = vpop.xlane.xlu1 %2453 }
 0x5d4   :  { %3184 = vmax.xlane.f32.xlu0 %v3183_v58  ;;  %5473 = vmatprep.subr.bf16.mxu1 %v8432_v36  ;;  %v2456_v35 = vsub.f32 %v8161_v33, %v2454_v12  ;;  %v2457_v24 = vmul.f32 1.442695, %v2455_v29  ;;  %6220 = vpow2.f32 %v2447_v20  ;;  %v2322_v12 = vmul.bf16 %v8367_v23, %v9896_v40 }
 0x5d5   :  { %v8506_v31 = vpop.xlane.xlu0 %2462  ;;  %v2314_v29 = vmul.bf16 %v8379_v10, %v9896_v40 }
 0x5d6   :  { %3187 = vmax.xlane.f32.xlu1 %v3186_v47  ;;  %v2459_v62 = vmul.f32 1.442695, %v2456_v35  ;;  %6222 = vpow2.f32 %v2457_v24  ;;  %v2467_v58 = vsub.f32 %v8159_v4, %v8506_v31  ;;  %v2323_v35 = vmul.bf16 %v8387_v46, %v9897_v6 }
 0x5d7   :  { %5474 = vmatpush3.bf16.msra.mxu1 %v8513_v2  ;;  %v8516_v51 = vpop.xlane.xlu1 %2465 }
 0x5d8   :  { %3196 = vmax.xlane.f32.xlu0 %v3195_v60  ;;  %5475 = vmatprep.subr.bf16.mxu1 %v8524_v38  ;;  %6224 = vpow2.f32 %v2459_v62 }
 0x5d9   :  { %v2487_v18 = vpop.xlane.xlu0 %2486 }
 0x5da   :  { %3199 = vmax.xlane.f32.xlu1 %v3198_v9  ;;  %v2491_v27 = vsub.f32 %v8177_v42, %v2487_v18  ;;  %v2468_v18 = vsub.f32 %v8161_v33, %v8516_v51 }
 0x5db   :  { %5476 = vmatpush3.bf16.msra.mxu1 %v8537_v28  ;;  %v2490_v16 = vpop.xlane.xlu1 %2489 }
 0x5dc   :  { %5501 = vmatprep.subr.bf16.mxu1 %v2320_v1  ;;  %3148 = vmax.xlane.f32.xlu0 %v3147_v8  ;;  %v2492_v25 = vsub.f32 %v8184_v45, %v2490_v16  ;;  %v2493_v56 = vmul.f32 1.442695, %v2491_v27  ;;  %v2469_v16 = vmul.f32 1.442695, %v2467_v58  ;;  %v2471_v27 = vmul.f32 1.442695, %v2468_v18 }
 0x5dd   :  { %v2499_v37 = vpop.xlane.xlu0 %2498 }
 0x5de   :  { %v2503_v5 = vsub.f32 %v8177_v42, %v2499_v37  ;;  %2284 = vmatmul.mubr.bf16.vlgmr.msra.gmra.mrb[76].mxu1 %v8461_v39  ;;  %3151 = vmax.xlane.f32.xlu1 %v3150_v49  ;;  %v2495_v30 = vmul.f32 1.442695, %v2492_v25  ;;  %6226 = vpow2.f32 %v2493_v56  ;;  %v2315_v25 = vmul.bf16 %v8395_v41, %v9897_v6  ;;  %v6219_v37 = vpop.eup %6218 }
 0x5df   :  { %5502 = vmatpush3.bf16.msra.mxu1 %v2312_v55  ;;  %v2502_v3 = vpop.xlane.xlu1 %2501  ;;  %v2324_v55 = vmul.bf16 %v8403_v32, %v9896_v40  ;;  %v6221_v24 = vpop.eup %6220  ;;  %v2316_v56 = vmul.bf16 %v8411_v57, %v9896_v40 }
 0x5e0   :  { %5503 = vmatprep.subr.bf16.mxu1 %v2321_v15  ;;  %v2504_v11 = vsub.f32 %v8184_v45, %v2502_v3  ;;  %v2505_v39 = vmul.f32 1.442695, %v2503_v5  ;;  %6228 = vpow2.f32 %v2495_v30  ;;  %v6223_v15 = vpop.eup %6222  ;;  %v2325_v30 = vmul.bf16 %v8418_v59, %v9897_v6 }
 0x5e1   :  { %v2511_v21 = vpop.xlane.xlu0 %2510 }
 0x5e2   :  { %v2515_v63 = vsub.f32 %v8177_v42, %v2511_v21  ;;  %v2507_v47 = vmul.f32 1.442695, %v2504_v11  ;;  %6230 = vpow2.f32 %v2505_v39  ;;  %v6225_v3 = vpop.eup %6224 }
 0x5e3   :  { %5504 = vmatpush3.bf16.msra.mxu1 %v2313_v19  ;;  %v2514_v60 = vpop.xlane.xlu1 %2513 }
 0x5e4   :  { %v2517_v43 = vmul.f32 1.442695, %v2515_v63  ;;  %5505 = vmatprep.subr.bf16.mxu1 %v2322_v12  ;;  %v2516_v17 = vsub.f32 %v8184_v45, %v2514_v60  ;;  %6232 = vpow2.f32 %v2507_v47  ;;  %v2326_v12 = vmul.bf16 %v8432_v36, %v9896_v40 }
 0x5e5   :  { %v2523_v9 = vpop.xlane.xlu0 %2522 }
 0x5e6   :  { %v2519_v1 = vmul.f32 1.442695, %v2516_v17  ;;  %v2527_v31 = vsub.f32 %v8177_v42, %v2523_v9  ;;  %6234 = vpow2.f32 %v2517_v43  ;;  %v2318_v43 = vmul.bf16 %v8513_v2, %v9896_v40 }
 0x5e7   :  { %5506 = vmatpush3.bf16.msra.mxu1 %v2314_v29  ;;  %v2526_v8 = vpop.xlane.xlu1 %2525  ;;  %v2327_v29 = vmul.bf16 %v8524_v38, %v9897_v6 }
 0x5e8   :  { %v2529_v52 = vmul.f32 1.442695, %v2527_v31  ;;  %5507 = vmatprep.subr.bf16.mxu1 %v2323_v35  ;;  %v2528_v51 = vsub.f32 %v8184_v45, %v2526_v8  ;;  %6236 = vpow2.f32 %v2519_v1  ;;  %v6227_v11 = vpop.eup %6226  ;;  %v5190_v35 = vld [vmem:[%s9892_s0 + $0x60] sm:$0xff] }
 0x5e9   :  { %v2475_v20 = vpop.xlane.xlu0 %2474 }
 0x5ea   :  { %6238 = vpow2.f32 %v2529_v52  ;;  %v2531_v42 = vmul.f32 1.442695, %v2528_v51  ;;  %v2479_v49 = vsub.f32 %v8159_v4, %v2475_v20  ;;  %v6229_v21 = vpop.eup %6228  ;;  %v2319_v20 = vmul.bf16 %v8537_v28, %v9897_v6 }
 0x5eb   :  { %6240 = vpow2.f32 %v2469_v16  ;;  %5508 = vmatpush3.bf16.msra.mxu1 %v2315_v25  ;;  %v2478_v5 = vpop.xlane.xlu1 %2477  ;;  %v3440_v25 = vunpack.c.l.bf16 %v5190_v35 }
 0x5ec   :  { %6242 = vpow2.f32 %v2531_v42  ;;  %v2481_v45 = vmul.f32 1.442695, %v2479_v49  ;;  %5509 = vmatprep.subr.bf16.mxu1 %v2324_v55  ;;  %v2480_v62 = vsub.f32 %v8161_v33, %v2478_v5  ;;  %v6231_v19 = vpop.eup %6230  ;;  %v2317_v33 = vmul.bf16 %v8425_v0, %v9897_v6 }
 0x5ed   :  { %6244 = vpow2.f32 %v2471_v27  ;;  %v2539_v17 = vsel %vm495_vm1, %v6227_v11, %v6231_v19  ;;  %v5191_v27 = vld [vmem:[%s9892_s0 + $0x68] sm:$0xff]  ;;  %v2533_v42 = vsel %vm495_vm1, %v6219_v37, %v6223_v15  ;;  %v2534_v49 = vsel %vm495_vm1, %v6221_v24, %v6225_v3 }
 0x5ee   :  { %6246 = vpow2.f32 %v2481_v45  ;;  %v2483_v4 = vmul.f32 1.442695, %v2480_v62  ;;  %v6233_v39 = vpop.eup %6232 }
 0x5ef   :  { %5510 = vmatpush3.bf16.msra.mxu1 %v2316_v56  ;;  %v2540_v18 = vsel %vm495_vm1, %v6229_v21, %v6233_v39 }
 0x5f0   :  { %6248 = vpow2.f32 %v2483_v4  ;;  %5511 = vmatprep.subr.bf16.mxu1 %v2325_v30  ;;  %v6235_v63 = vpop.eup %6234  ;;  %v3442_v4 = vunpack.c.l.bf16 %v5191_v27 }
 0x5f1   :  { %v2541_v1 = vsel %vm1522_vm6, %v2539_v17, %v6235_v63  ;;  %v6110_v63 = vld [vmem:[%s9830_s14] sm:$0xff]   ;;  %v3443_v17 = vunpack.c.h.bf16 %v5191_v27 }
 0x5f2   :  { %v6237_v58 = vpop.eup %6236  ;;  %5951 = vmatprep.subr.bf16.mxu0 %v6110_v63 }
 0x5f3   :  { %5512 = vmatpush3.bf16.msra.mxu1 %v2317_v33  ;;  %v2542_v31 = vsel %vm1522_vm6, %v2540_v18, %v6237_v58  ;;  %5952 = vmatpush3.bf16.msra.mxu0 %v6110_v63 }
 0x5f4   :  { %v6239_v47 = vpop.eup %6238  ;;  %5513 = vmatprep.subr.bf16.mxu1 %v2326_v12  ;;  %v6111_v12 = vld [vmem:[%s9830_s14 + $0x8] sm:$0xff]  }
 0x5f5   :  { %v6241_v60 = vpop.eup %6240  ;;  %v2543_v40 = vsel %vm1525_vm5, %v2541_v1, %v6239_v47  ;;  %v3441_v47 = vunpack.c.h.bf16 %v5190_v35  ;;  %5953 = vmatprep.subr.bf16.mxu0 %v6111_v12 }
 0x5f6   :  { %v6243_v9 = vpop.eup %6242  ;;  %v2535_v45 = vsel %vm1522_vm6, %v2533_v42, %v6241_v60 }
 0x5f7   :  { %v6245_v16 = vpop.eup %6244  ;;  %5514 = vmatpush3.bf16.msra.mxu1 %v2318_v43  ;;  %v2544_v8 = vsel %vm1525_vm5, %v2542_v31, %v6243_v9  ;;  %5954 = vmatpush3.bf16.msra.mxu0 %v6111_v12 }
 0x5f8   :  { %v6247_v52 = vpop.eup %6246  ;;  %5515 = vmatprep.subr.bf16.mxu1 %v2327_v29  ;;  %v2546_v51 = vpack.c.bf16 %v2544_v8, %v2543_v40  ;;  %v2536_v62 = vsel %vm1522_vm6, %v2534_v49, %v6245_v16 }
 0x5f9   :  { %v2537_v30 = vsel %vm1525_vm5, %v2535_v45, %v6247_v52 }
 0x5fa   :  { %v6249_v55 = vpop.eup %6248  ;;  %2579 = vmatprep.mubr.bf16.mxu1 %v2546_v51  ;;  %v3424_v5 = vpop.f32.mrb[80].mxu0 }
 0x5fb   :  { %5516 = vmatpush3.bf16.msra.mxu1 %v2319_v20  ;;  %v3433_v56 = vmul.f32 0.5, %v3424_v5  ;;  %v3426_v11 = vpop.f32.mrb[81].mxu0  ;;  %v2538_v6 = vsel %vm1525_vm5, %v2536_v62, %v6249_v55 }
 0x5fc   :  { %v3428_v21 = vpop.f32.mrb[82].mxu0  ;;  %5523 = vmatprep.subr.bf16.mxu1 %v8327_v54  ;;  %v8608_v37 = vpack.c.bf16 %v2538_v6, %v2537_v30  ;;  %v3434_v58 = vmul.f32 0.5, %v3426_v11  ;;  %v9898_v30 = vld [vmem:[#allocation11_spill] sm:$0xff] }
 0x5fd   :  { %v8610_v24 = vadd.f32 %v3440_v25, %v3433_v56  ;;  %v3435_v15 = vmul.f32 0.5, %v3428_v21  ;;  %v3430_v3 = vpop.f32.mrb[83].mxu0  ;;  %v2657_v6 = vmul.bf16 %v8327_v54, %v9898_v30 }
 0x5fe   :  { %2580 = vmatmul.mubr.bf16.vlgmr.msra.gmra.mrb[80].mxu1 %v8608_v37  ;;  %v3436_v43 = vmul.f32 0.5, %v3430_v3  ;;  %v8633_v9 = vadd.f32 %v3441_v47, %v3434_v58  ;;  %v2649_v47 = vmul.bf16 %v8342_v48, %v9898_v30 }
 0x5ff   :  { %v8613_v19 = vadd.f32 %v3442_v4, %v3435_v15  ;;  %5524 = vmatpush3.bf16.msra.mxu1 %v8342_v48  ;;  %2620 = vmatprep.mubr.bf16.mxu1 %v2546_v51  ;;  %v3448_v39 = vsel %vm495_vm1, %v8610_v24, -inf  ;;  %v3460_v60 = vsel %vm1433_vm2, %v8610_v24, -inf  ;;  %v3472_v29 = vsel %vm1446_vm3, %v8610_v24, -inf }
 0x600   :  { %3449 = vmax.xlane.f32.xlu0 %v3448_v39  ;;  %5525 = vmatprep.subr.bf16.mxu1 %v8351_v14  ;;  %v8639_v1 = vadd.f32 %v3443_v17, %v3436_v43  ;;  %v3496_v35 = vsel %vm495_vm1, %v8633_v9, -inf  ;;  %v3508_v52 = vsel %vm1433_vm2, %v8633_v9, -inf  ;;  %v3520_v25 = vsel %vm1446_vm3, %v8633_v9, -inf  ;;  %v9899_v17 = vld [vmem:[#allocation10_spill] sm:$0xff] }
 0x601   :  { %v3451_v33 = vsel %vm495_vm1, %v8613_v19, -inf  ;;  %v3463_v18 = vsel %vm1433_vm2, %v8613_v19, -inf  ;;  %v3475_v31 = vsel %vm1446_vm3, %v8613_v19, -inf  ;;  %v3532_v5 = vsel %vm1459_vm4, %v8633_v9, -inf }
 0x602   :  { %3452 = vmax.xlane.f32.xlu1 %v3451_v33  ;;  %v3499_v40 = vsel %vm495_vm1, %v8639_v1, -inf  ;;  %v3511_v27 = vsel %vm1433_vm2, %v8639_v1, -inf  ;;  %v3523_v49 = vsel %vm1446_vm3, %v8639_v1, -inf  ;;  %v3535_v11 = vsel %vm1459_vm4, %v8639_v1, -inf }
 0x603   :  { %5526 = vmatpush3.bf16.msra.mxu1 %v8359_v13  ;;  %v3484_v3 = vsel %vm1459_vm4, %v8610_v24, -inf  ;;  %v3487_v54 = vsel %vm1459_vm4, %v8613_v19, -inf }
 0x604   :  { %3461 = vmax.xlane.f32.xlu0 %v3460_v60  ;;  %5527 = vmatprep.subr.bf16.mxu1 %v8367_v23 }
 0x606   :  { %3464 = vmax.xlane.f32.xlu1 %v3463_v18  ;;  %v2658_v18 = vmul.bf16 %v8351_v14, %v9899_v17  ;;  %v2659_v14 = vmul.bf16 %v8367_v23, %v9898_v30  ;;  %v2651_v23 = vmul.bf16 %v8379_v10, %v9898_v30 }
 0x607   :  { %5528 = vmatpush3.bf16.msra.mxu1 %v8379_v10 }
 0x608   :  { %3473 = vmax.xlane.f32.xlu0 %v3472_v29  ;;  %5529 = vmatprep.subr.bf16.mxu1 %v8387_v46 }
 0x60a   :  { %3476 = vmax.xlane.f32.xlu1 %v3475_v31 }
 0x60b   :  { %5530 = vmatpush3.bf16.msra.mxu1 %v8395_v41 }
 0x60c   :  { %3497 = vmax.xlane.f32.xlu0 %v3496_v35  ;;  %5531 = vmatprep.subr.bf16.mxu1 %v8403_v32 }
 0x60d   :  { %v2776_v16 = vpop.xlane.xlu0 %2775 }
 0x60e   :  { %3500 = vmax.xlane.f32.xlu1 %v3499_v40  ;;  %v2780_v45 = vsub.f32 %v8266_v26, %v2776_v16 }
 0x60f   :  { %5532 = vmatpush3.bf16.msra.mxu1 %v8411_v57  ;;  %v2779_v8 = vpop.xlane.xlu1 %2778 }
 0x610   :  { %3509 = vmax.xlane.f32.xlu0 %v3508_v52  ;;  %5533 = vmatprep.subr.bf16.mxu1 %v8418_v59  ;;  %v2781_v62 = vsub.f32 %v8269_v34, %v2779_v8  ;;  %v2782_v39 = vmul.f32 1.442695, %v2780_v45  ;;  %v2650_v8 = vmul.bf16 %v8359_v13, %v9899_v17 }
 0x611   :  { %v2788_v51 = vpop.xlane.xlu0 %2787 }
 0x612   :  { %3512 = vmax.xlane.f32.xlu1 %v3511_v27  ;;  %v2792_v4 = vsub.f32 %v8266_v26, %v2788_v51  ;;  %v2784_v63 = vmul.f32 1.442695, %v2781_v62  ;;  %6250 = vpow2.f32 %v2782_v39  ;;  %v2660_v62 = vmul.bf16 %v8387_v46, %v9899_v17 }
 0x613   :  { %5534 = vmatpush3.bf16.msra.mxu1 %v8425_v0  ;;  %v2791_v20 = vpop.xlane.xlu1 %2790 }
 0x614   :  { %3521 = vmax.xlane.f32.xlu0 %v3520_v25  ;;  %5535 = vmatprep.subr.bf16.mxu1 %v8432_v36  ;;  %v2793_v21 = vsub.f32 %v8269_v34, %v2791_v20  ;;  %v2794_v60 = vmul.f32 1.442695, %v2792_v4  ;;  %6252 = vpow2.f32 %v2784_v63 }
 0x615   :  { %v8659_v42 = vpop.xlane.xlu0 %2799 }
 0x616   :  { %3524 = vmax.xlane.f32.xlu1 %v3523_v49  ;;  %v2796_v29 = vmul.f32 1.442695, %v2793_v21  ;;  %6254 = vpow2.f32 %v2794_v60  ;;  %v2804_v51 = vsub.f32 %v8266_v26, %v8659_v42  ;;  %v2653_v60 = vmul.bf16 %v8411_v57, %v9898_v30 }
 0x617   :  { %5536 = vmatpush3.bf16.msra.mxu1 %v8513_v2  ;;  %v8664_v55 = vpop.xlane.xlu1 %2802 }
 0x618   :  { %3533 = vmax.xlane.f32.xlu0 %v3532_v5  ;;  %5537 = vmatprep.subr.bf16.mxu1 %v8524_v38  ;;  %6256 = vpow2.f32 %v2796_v29  ;;  %v2805_v13 = vsub.f32 %v8269_v34, %v8664_v55 }
 0x619   :  { %v2824_v56 = vpop.xlane.xlu0 %2823 }
 0x61a   :  { %3536 = vmax.xlane.f32.xlu1 %v3535_v11  ;;  %v2828_v33 = vsub.f32 %v8283_v61, %v2824_v56  ;;  %v2806_v56 = vmul.f32 1.442695, %v2804_v51 }
 0x61b   :  { %5538 = vmatpush3.bf16.msra.mxu1 %v8537_v28  ;;  %v2827_v15 = vpop.xlane.xlu1 %2826 }
 0x61c   :  { %5563 = vmatprep.subr.bf16.mxu1 %v2657_v6  ;;  %3485 = vmax.xlane.f32.xlu0 %v3484_v3  ;;  %v2829_v12 = vsub.f32 %v8289_v53, %v2827_v15  ;;  %v2830_v35 = vmul.f32 1.442695, %v2828_v33  ;;  %v2808_v6 = vmul.f32 1.442695, %v2805_v13  ;;  %v2652_v15 = vmul.bf16 %v8395_v41, %v9899_v17  ;;  %v6251_v3 = vpop.eup %6250  ;;  %v5193_v13 = vld [vmem:[%s9892_s0 + $0x70] sm:$0xff] }
 0x61d   :  { %v2836_v58 = vpop.xlane.xlu0 %2835  ;;  %v2661_v33 = vmul.bf16 %v8403_v32, %v9898_v30 }
 0x61e   :  { %v2840_v43 = vsub.f32 %v8283_v61, %v2836_v58  ;;  %2621 = vmatmul.mubr.bf16.vlgmr.msra.gmra.mrb[84].mxu1 %v8608_v37  ;;  %3488 = vmax.xlane.f32.xlu1 %v3487_v54  ;;  %v2832_v40 = vmul.f32 1.442695, %v2829_v12  ;;  %6258 = vpow2.f32 %v2830_v35  ;;  %v6253_v63 = vpop.eup %6252 }
 0x61f   :  { %5564 = vmatpush3.bf16.msra.mxu1 %v2649_v47  ;;  %v2839_v31 = vpop.xlane.xlu1 %2838 }
 0x620   :  { %5565 = vmatprep.subr.bf16.mxu1 %v2658_v18  ;;  %v2841_v16 = vsub.f32 %v8289_v53, %v2839_v31  ;;  %v2842_v37 = vmul.f32 1.442695, %v2840_v43  ;;  %6260 = vpow2.f32 %v2832_v40  ;;  %v6255_v58 = vpop.eup %6254  ;;  %v2662_v18 = vmul.bf16 %v8418_v59, %v9899_v17 }
 0x621   :  { %v2848_v48 = vpop.xlane.xlu0 %2847  ;;  %v2663_v40 = vmul.bf16 %v8432_v36, %v9898_v30 }
 0x622   :  { %v2852_v52 = vsub.f32 %v8283_v61, %v2848_v48  ;;  %v2844_v27 = vmul.f32 1.442695, %v2841_v16  ;;  %6262 = vpow2.f32 %v2842_v37  ;;  %v6257_v47 = vpop.eup %6256 }
 0x623   :  { %5566 = vmatpush3.bf16.msra.mxu1 %v2650_v8  ;;  %v2851_v20 = vpop.xlane.xlu1 %2850 }
 0x624   :  { %v2854_v25 = vmul.f32 1.442695, %v2852_v52  ;;  %5567 = vmatprep.subr.bf16.mxu1 %v2659_v14  ;;  %v2853_v49 = vsub.f32 %v8289_v53, %v2851_v20  ;;  %6264 = vpow2.f32 %v2844_v27  ;;  %v2655_v52 = vmul.bf16 %v8513_v2, %v9898_v30 }
 0x625   :  { %v2860_v5 = vpop.xlane.xlu0 %2859  ;;  %v2664_v20 = vmul.bf16 %v8524_v38, %v9899_v17 }
 0x626   :  { %v2856_v45 = vmul.f32 1.442695, %v2853_v49  ;;  %v2864_v42 = vsub.f32 %v8283_v61, %v2860_v5  ;;  %6266 = vpow2.f32 %v2854_v25 }
 0x627   :  { %5568 = vmatpush3.bf16.msra.mxu1 %v2651_v23  ;;  %v2863_v11 = vpop.xlane.xlu1 %2862 }
 0x628   :  { %v2866_v4 = vmul.f32 1.442695, %v2864_v42  ;;  %5569 = vmatprep.subr.bf16.mxu1 %v2660_v62  ;;  %v2865_v55 = vsub.f32 %v8289_v53, %v2863_v11  ;;  %6268 = vpow2.f32 %v2856_v45  ;;  %v6259_v43 = vpop.eup %6258  ;;  %v5194_v62 = vld [vmem:[%s9892_s0 + $0x78] sm:$0xff]  ;;  %v3777_v11 = vunpack.c.l.bf16 %v5193_v13 }
 0x629   :  { %v2812_v21 = vpop.xlane.xlu0 %2811 }
 0x62a   :  { %6270 = vpow2.f32 %v2866_v4  ;;  %v2868_v61 = vmul.f32 1.442695, %v2865_v55  ;;  %v2816_v39 = vsub.f32 %v8266_v26, %v2812_v21  ;;  %v6261_v29 = vpop.eup %6260  ;;  %v2870_v4 = vsel %vm495_vm1, %v6251_v3, %v6255_v58  ;;  %v8748_v3 = vld [vmem:[%s9879_s12 + $0x40] sm:$0xff]  }
 0x62b   :  { %6272 = vpow2.f32 %v2806_v56  ;;  %5570 = vmatpush3.bf16.msra.mxu1 %v2652_v15  ;;  %v2815_v12 = vpop.xlane.xlu1 %2814  ;;  %v2656_v56 = vmul.bf16 %v8537_v28, %v9899_v17  ;;  %v2871_v55 = vsel %vm495_vm1, %v6253_v63, %v6257_v47 }
 0x62c   :  { %6274 = vpow2.f32 %v2868_v61  ;;  %v2818_v53 = vmul.f32 1.442695, %v2816_v39  ;;  %5571 = vmatprep.subr.bf16.mxu1 %v2661_v33  ;;  %v2817_v54 = vsub.f32 %v8269_v34, %v2815_v12  ;;  %v6263_v31 = vpop.eup %6262  ;;  %v2654_v34 = vmul.bf16 %v8425_v0, %v9899_v17 }
 0x62d   :  { %6276 = vpow2.f32 %v2808_v6  ;;  %v2876_v14 = vsel %vm495_vm1, %v6259_v43, %v6263_v31  ;;  %v3779_v12 = vunpack.c.l.bf16 %v5194_v62 }
 0x62e   :  { %6278 = vpow2.f32 %v2818_v53  ;;  %v2820_v26 = vmul.f32 1.442695, %v2817_v54  ;;  %v6265_v35 = vpop.eup %6264 }
 0x62f   :  { %5572 = vmatpush3.bf16.msra.mxu1 %v2653_v60  ;;  %v2877_v51 = vsel %vm495_vm1, %v6261_v29, %v6265_v35  ;;  %v8769_v29 = vld [vmem:[%s9879_s12 + $0x48] sm:$0xff]  }
 0x630   :  { %6280 = vpow2.f32 %v2820_v26  ;;  %5573 = vmatprep.subr.bf16.mxu1 %v2662_v18  ;;  %v6267_v16 = vpop.eup %6266  ;;  %v8761_v26 = vld [vmem:[%s9879_s12] sm:$0xff]  }
 0x631   :  { %v2878_v25 = vsel %vm1522_vm6, %v2876_v14, %v6267_v16  ;;  %v8777_v16 = vld [vmem:[%s9879_s12 + $0x8] sm:$0xff]  }
 0x632   :  { %v6269_v48 = vpop.eup %6268 }
 0x633   :  { %5574 = vmatpush3.bf16.msra.mxu1 %v2654_v34  ;;  %v2879_v49 = vsel %vm1522_vm6, %v2877_v51, %v6269_v48  ;;  %v3778_v34 = vunpack.c.h.bf16 %v5193_v13  ;;  %v8785_v48 = vld [vmem:[%s9879_s12 + $0x50] sm:$0xff]  }
 0x634   :  { %v6271_v8 = vpop.eup %6270  ;;  %5575 = vmatprep.subr.bf16.mxu1 %v2663_v40 }
 0x635   :  { %v6273_v37 = vpop.eup %6272  ;;  %v2880_v30 = vsel %vm1525_vm5, %v2878_v25, %v6271_v8 }
 0x636   :  { %v6275_v27 = vpop.eup %6274  ;;  %v2872_v15 = vsel %vm1522_vm6, %v2870_v4, %v6273_v37  ;;  %v3780_v37 = vunpack.c.h.bf16 %v5194_v62 }
 0x637   :  { %v6277_v5 = vpop.eup %6276  ;;  %5576 = vmatpush3.bf16.msra.mxu1 %v2655_v52  ;;  %v2881_v23 = vsel %vm1525_vm5, %v2879_v49, %v6275_v27 }
 0x638   :  { %v6279_v45 = vpop.eup %6278  ;;  %5577 = vmatprep.subr.bf16.mxu1 %v2664_v20  ;;  %v2883_v42 = vpack.c.bf16 %v2881_v23, %v2880_v30  ;;  %v2873_v61 = vsel %vm1522_vm6, %v2871_v55, %v6277_v5 }
 0x639   :  { %v2874_v53 = vsel %vm1525_vm5, %v2872_v15, %v6279_v45 }
 0x63a   :  { %v6281_v6 = vpop.eup %6280  ;;  %2916 = vmatprep.mubr.bf16.mxu1 %v2883_v42  ;;  %v3761_v21 = vpop.f32.mrb[84].mxu0 }
 0x63b   :  { %5578 = vmatpush3.bf16.msra.mxu1 %v2656_v56  ;;  %v3770_v39 = vmul.f32 0.5, %v3761_v21  ;;  %v3763_v33 = vpop.f32.mrb[85].mxu0  ;;  %v2875_v17 = vsel %vm1525_vm5, %v2873_v61, %v6281_v6 }
 0x63c   :  { %v3765_v54 = vpop.f32.mrb[86].mxu0  ;;  %5585 = vmatprep.subr.bf16.mxu1 %v8748_v3  ;;  %v8751_v63 = vpack.c.bf16 %v2875_v17, %v2874_v53  ;;  %v3771_v35 = vmul.f32 0.5, %v3763_v33 }
 0x63d   :  { %v8753_v58 = vadd.f32 %v3777_v11, %v3770_v39  ;;  %v3772_v47 = vmul.f32 0.5, %v3765_v54  ;;  %v3767_v60 = vpop.f32.mrb[87].mxu0 }
 0x63e   :  { %2917 = vmatmul.mubr.bf16.vlgmr.msra.gmra.mrb[88].mxu1 %v8751_v63  ;;  %v3773_v8 = vmul.f32 0.5, %v3767_v60  ;;  %v8790_v14 = vadd.f32 %v3778_v34, %v3771_v35  ;;  %v9901_v35 = vld [vmem:[#allocation12_spill] sm:$0xff] }
 0x63f   :  { %v8756_v43 = vadd.f32 %v3779_v12, %v3772_v47  ;;  %5586 = vmatpush3.bf16.msra.mxu1 %v8761_v26  ;;  %2957 = vmatprep.mubr.bf16.mxu1 %v2883_v42  ;;  %v3785_v18 = vsel %vm495_vm1, %v8753_v58, -inf  ;;  %v3797_v40 = vsel %vm1433_vm2, %v8753_v58, -inf  ;;  %v3809_v51 = vsel %vm1446_vm3, %v8753_v58, -inf }
 0x640   :  { %3786 = vmax.xlane.f32.xlu0 %v3785_v18  ;;  %5587 = vmatprep.subr.bf16.mxu1 %v8769_v29  ;;  %v8796_v27 = vadd.f32 %v3780_v37, %v3773_v8  ;;  %v3833_v25 = vsel %vm495_vm1, %v8790_v14, -inf  ;;  %v3845_v13 = vsel %vm1433_vm2, %v8790_v14, -inf  ;;  %v3857_v42 = vsel %vm1446_vm3, %v8790_v14, -inf }
 0x641   :  { %v3788_v31 = vsel %vm495_vm1, %v8756_v43, -inf  ;;  %v3800_v52 = vsel %vm1433_vm2, %v8756_v43, -inf  ;;  %v3812_v20 = vsel %vm1446_vm3, %v8756_v43, -inf  ;;  %v3869_v4 = vsel %vm1459_vm4, %v8790_v14, -inf }
 0x642   :  { %3789 = vmax.xlane.f32.xlu1 %v3788_v31  ;;  %v3836_v49 = vsel %vm495_vm1, %v8796_v27, -inf  ;;  %v3848_v30 = vsel %vm1433_vm2, %v8796_v27, -inf  ;;  %v3860_v11 = vsel %vm1446_vm3, %v8796_v27, -inf  ;;  %v3872_v21 = vsel %vm1459_vm4, %v8796_v27, -inf }
 0x643   :  { %5588 = vmatpush3.bf16.msra.mxu1 %v8777_v16  ;;  %v3824_v60 = vsel %vm1459_vm4, %v8756_v43, -inf  ;;  %v2995_v34 = vmul.bf16 %v8769_v29, %v9901_v35 }
 0x644   :  { %3798 = vmax.xlane.f32.xlu0 %v3797_v40  ;;  %5589 = vmatprep.subr.bf16.mxu1 %v8785_v48 }
 0x646   :  { %3801 = vmax.xlane.f32.xlu1 %v3800_v52 }
 0x647   :  { %5590 = vmatpush3.bf16.msra.mxu1 %v8379_v10 }
 0x648   :  { %3810 = vmax.xlane.f32.xlu0 %v3809_v51  ;;  %5591 = vmatprep.subr.bf16.mxu1 %v8387_v46 }
 0x64a   :  { %3813 = vmax.xlane.f32.xlu1 %v3812_v20 }
 0x64b   :  { %5592 = vmatpush3.bf16.msra.mxu1 %v8395_v41 }
 0x64c   :  { %3834 = vmax.xlane.f32.xlu0 %v3833_v25  ;;  %5593 = vmatprep.subr.bf16.mxu1 %v8403_v32  ;;  %v2987_v25 = vmul.bf16 %v8777_v16, %v9901_v35 }
 0x64d   :  { %v3113_v10 = vpop.xlane.xlu0 %3112 }
 0x64e   :  { %3837 = vmax.xlane.f32.xlu1 %v3836_v49  ;;  %v3117_v55 = vsub.f32 %v8463_v22, %v3113_v10 }
 0x64f   :  { %5594 = vmatpush3.bf16.msra.mxu1 %v8411_v57  ;;  %v3116_v46 = vpop.xlane.xlu1 %3115 }
 0x650   :  { %3846 = vmax.xlane.f32.xlu0 %v3845_v13  ;;  %5595 = vmatprep.subr.bf16.mxu1 %v8418_v59  ;;  %v3119_v12 = vmul.f32 1.442695, %v3117_v55 }
 0x651   :  { %v3125_v41 = vpop.xlane.xlu0 %3124  ;;  %v5393_v5 = vpop.f32.mrb[64].mxu1 }
 0x652   :  { %3849 = vmax.xlane.f32.xlu1 %v3848_v30  ;;  %v5394_v32 = vpop.f32.mrb[65].mxu1  ;;  %v3129_v15 = vsub.f32 %v8463_v22, %v3125_v41  ;;  %6282 = vpow2.f32 %v3119_v12 }
 0x653   :  { %v8812_v23 = vadd.f32 %v5394_v32, %v5393_v5  ;;  %5596 = vmatpush3.bf16.msra.mxu1 %v8425_v0  ;;  %v5396_v45 = vpop.f32.mrb[66].mxu1  ;;  %v3128_v57 = vpop.xlane.xlu1 %3127 }
 0x654   :  { %3858 = vmax.xlane.f32.xlu0 %v3857_v42  ;;  %v5397_v62 = vpop.f32.mrb[67].mxu1  ;;  %5597 = vmatprep.subr.bf16.mxu1 %v8432_v36  ;;  %v3118_v36 = vsub.f32 %v8466_v7, %v3116_v46  ;;  %v3130_v39 = vsub.f32 %v8466_v7, %v3128_v57  ;;  %v8865_v57 = vld [vmem:[%s9879_s12 + $0x10] sm:$0xff]  }
 0x655   :  { %v8818_v59 = vadd.f32 %v5397_v62, %v5396_v45  ;;  %v8820_v56 = vpop.xlane.xlu0 %3136 }
 0x656   :  { %3861 = vmax.xlane.f32.xlu1 %v3860_v11  ;;  %v3121_v17 = vmul.f32 1.442695, %v3118_v36  ;;  %v3133_v40 = vmul.f32 1.442695, %v3130_v39  ;;  %v3141_v46 = vsub.f32 %v8463_v22, %v8820_v56  ;;  %v8873_v11 = vld [vmem:[%s9879_s12 + $0x58] sm:$0xff]  }
 0x657   :  { %5598 = vmatpush3.bf16.msra.mxu1 %v8513_v2  ;;  %v8825_v0 = vpop.xlane.xlu1 %3139  ;;  %v9900_v2 = vld [vmem:[#allocation13_spill] sm:$0xff] }
 0x658   :  { %3870 = vmax.xlane.f32.xlu0 %v3869_v4  ;;  %5599 = vmatprep.subr.bf16.mxu1 %v8524_v38  ;;  %v2994_v61 = vmul.bf16 %v8748_v3, %v9900_v2  ;;  %v3821_v38 = vsel %vm1459_vm4, %v8753_v58, -inf  ;;  %v2986_v18 = vmul.bf16 %v8761_v26, %v9900_v2  ;;  %6284 = vpow2.f32 %v3121_v17 }
 0x659   :  { %v3161_v6 = vpop.xlane.xlu0 %3160  ;;  %v2996_v49 = vmul.bf16 %v8785_v48, %v9900_v2  ;;  %v3142_v32 = vsub.f32 %v8466_v7, %v8825_v0  ;;  %v2988_v42 = vmul.bf16 %v8865_v57, %v9900_v2  ;;  %v2997_v0 = vmul.bf16 %v8873_v11, %v9901_v35 }
 0x65a   :  { %3873 = vmax.xlane.f32.xlu1 %v3872_v21  ;;  %v3165_v53 = vsub.f32 %v8480_v50, %v3161_v6  ;;  %v3143_v4 = vmul.f32 1.442695, %v3141_v46 }
 0x65b   :  { %5600 = vmatpush3.bf16.msra.mxu1 %v8537_v28  ;;  %v3164_v33 = vpop.xlane.xlu1 %3163  ;;  %v3131_v28 = vmul.f32 1.442695, %v3129_v15  ;;  %v3145_v21 = vmul.f32 1.442695, %v3142_v32  ;;  %v8881_v15 = vld [vmem:[%s9879_s12 + $0x18] sm:$0xff]  }
 0x65c   :  { %5625 = vmatprep.subr.bf16.mxu1 %v2994_v61  ;;  %3822 = vmax.xlane.f32.xlu0 %v3821_v38  ;;  %v3166_v54 = vsub.f32 %v8486_v44, %v3164_v33  ;;  %v3167_v37 = vmul.f32 1.442695, %v3165_v53  ;;  %v2989_v61 = vmul.bf16 %v8881_v15, %v9901_v35  ;;  %v8885_v39 = vpop.eup %6282 }
 0x65d   :  { %v3173_v47 = vpop.xlane.xlu0 %3172  ;;  %6286 = vpow2.f32 %v3131_v28 }
 0x65e   :  { %v3177_v31 = vsub.f32 %v8480_v50, %v3173_v47  ;;  %2958 = vmatmul.mubr.bf16.vlgmr.msra.gmra.mrb[92].mxu1 %v8751_v63  ;;  %3825 = vmax.xlane.f32.xlu1 %v3824_v60  ;;  %v3169_v51 = vmul.f32 1.442695, %v3166_v54  ;;  %6288 = vpow2.f32 %v3133_v40  ;;  %v8906_v40 = vld [vmem:[%s9879_s12 + $0x68] sm:$0xff]  }
 0x65f   :  { %5626 = vmatpush3.bf16.msra.mxu1 %v2986_v18  ;;  %v3176_v8 = vpop.xlane.xlu1 %3175  ;;  %6290 = vpow2.f32 %v3167_v37 }
 0x660   :  { %5627 = vmatprep.subr.bf16.mxu1 %v2995_v34  ;;  %v3178_v52 = vsub.f32 %v8486_v44, %v3176_v8  ;;  %v3179_v63 = vmul.f32 1.442695, %v3177_v31  ;;  %6292 = vpow2.f32 %v3169_v51 }
 0x661   :  { %v3185_v20 = vpop.xlane.xlu0 %3184 }
 0x662   :  { %v3189_v10 = vsub.f32 %v8480_v50, %v3185_v20  ;;  %v3181_v13 = vmul.f32 1.442695, %v3178_v52  ;;  %6294 = vpow2.f32 %v3179_v63  ;;  %v6285_v53 = vpop.eup %6284  ;;  %v8913_v20 = vld [vmem:[%s9879_s12 + $0x28] sm:$0xff]  }
 0x663   :  { %5628 = vmatpush3.bf16.msra.mxu1 %v2987_v25  ;;  %v3188_v41 = vpop.xlane.xlu1 %3187  ;;  %v2991_v25 = vmul.bf16 %v8913_v20, %v9901_v35 }
 0x664   :  { %v3191_v5 = vmul.f32 1.442695, %v3189_v10  ;;  %5629 = vmatprep.subr.bf16.mxu1 %v2996_v49  ;;  %v3190_v30 = vsub.f32 %v8486_v44, %v3188_v41  ;;  %6296 = vpow2.f32 %v3181_v13  ;;  %v8920_v49 = vld [vmem:[%s9879_s12 + $0x70] sm:$0xff]  }
 0x665   :  { %v3197_v45 = vpop.xlane.xlu0 %3196  ;;  %v3000_v46 = vmul.bf16 %v8920_v49, %v9900_v2 }
 0x666   :  { %v3193_v62 = vmul.f32 1.442695, %v3190_v30  ;;  %v3201_v56 = vsub.f32 %v8480_v50, %v3197_v45  ;;  %6298 = vpow2.f32 %v3191_v5  ;;  %v8927_v45 = vld [vmem:[%s9879_s12 + $0x30] sm:$0xff]  }
 0x667   :  { %5630 = vmatpush3.bf16.msra.mxu1 %v2988_v42  ;;  %v3200_v55 = vpop.xlane.xlu1 %3199  ;;  %v6287_v54 = vpop.eup %6286  ;;  %v2992_v42 = vmul.bf16 %v8927_v45, %v9900_v2 }
 0x668   :  { %v3203_v36 = vmul.f32 1.442695, %v3201_v56  ;;  %5631 = vmatprep.subr.bf16.mxu1 %v2997_v0  ;;  %v3202_v6 = vsub.f32 %v8486_v44, %v3200_v55  ;;  %6300 = vpow2.f32 %v3193_v62  ;;  %v8891_v44 = vld [vmem:[%s9879_s12 + $0x60] sm:$0xff]   ;;  %v6289_v18 = vpop.eup %6288 }
 0x669   :  { %v3149_v50 = vpop.xlane.xlu0 %3148  ;;  %v2998_v12 = vmul.bf16 %v8891_v44, %v9900_v2  ;;  %v6291_v31 = vpop.eup %6290 }
 0x66a   :  { %6302 = vpow2.f32 %v3203_v36  ;;  %v3205_v33 = vmul.f32 1.442695, %v3202_v6  ;;  %v3153_v38 = vsub.f32 %v8463_v22, %v3149_v50  ;;  %v8899_v22 = vld [vmem:[%s9879_s12 + $0x20] sm:$0xff]   ;;  %v6293_v8 = vpop.eup %6292  ;;  %v8936_v36 = vld [vmem:[%s9879_s12 + $0x78] sm:$0xff]  }
 0x66b   :  { %6304 = vpow2.f32 %v3143_v4  ;;  %5632 = vmatpush3.bf16.msra.mxu1 %v2989_v61  ;;  %v3152_v17 = vpop.xlane.xlu1 %3151  ;;  %v2990_v28 = vmul.bf16 %v8899_v22, %v9900_v2  ;;  %v3001_v6 = vmul.bf16 %v8936_v36, %v9901_v35 }
 0x66c   :  { %6306 = vpow2.f32 %v3205_v33  ;;  %v3155_v47 = vmul.f32 1.442695, %v3153_v38  ;;  %5633 = vmatprep.subr.bf16.mxu1 %v2998_v12  ;;  %v3154_v60 = vsub.f32 %v8466_v7, %v3152_v17  ;;  %v2999_v7 = vmul.bf16 %v8906_v40, %v9901_v35  ;;  %v6295_v37 = vpop.eup %6294  ;;  %v8947_v17 = vld [vmem:[%s9879_s12 + $0x38] sm:$0xff]  }
 0x66d   :  { %6308 = vpow2.f32 %v3145_v21  ;;  %v3213_v0 = vsel %vm495_vm1, %v6291_v31, %v6295_v37 }
 0x66e   :  { %6310 = vpow2.f32 %v3155_v47  ;;  %v3157_v34 = vmul.f32 1.442695, %v3154_v60  ;;  %v6297_v52 = vpop.eup %6296  ;;  %v2993_v47 = vmul.bf16 %v8947_v17, %v9901_v35  ;;  %v3207_v60 = vsel %vm495_vm1, %v8885_v39, %v6287_v54 }
 0x66f   :  { %5634 = vmatpush3.bf16.msra.mxu1 %v2990_v28  ;;  %v3214_v4 = vsel %vm495_vm1, %v6293_v8, %v6297_v52  ;;  %v3208_v28 = vsel %vm495_vm1, %v6285_v53, %v6289_v18 }
 0x670   :  { %6312 = vpow2.f32 %v3157_v34  ;;  %5635 = vmatprep.subr.bf16.mxu1 %v2999_v7  ;;  %v6299_v63 = vpop.eup %6298 }
 0x671   :  { %v5415_v51 = vpop.f32.mrb[68].mxu1  ;;  %v3215_v21 = vsel %vm1522_vm6, %v3213_v0, %v6299_v63 }
 0x672   :  { %v5416_v10 = vpop.f32.mrb[69].mxu1  ;;  %v6301_v13 = vpop.eup %6300 }
 0x673   :  { %v5417_v41 = vadd.f32 %v5416_v10, %v5415_v51  ;;  %v5418_v5 = vpop.f32.mrb[70].mxu1  ;;  %5636 = vmatpush3.bf16.msra.mxu1 %v2991_v25  ;;  %v3216_v2 = vsel %vm1522_vm6, %v3214_v4, %v6301_v13  ;;  %v9902_v4 = vld [vmem:[#allocation15_spill] sm:$0xff] }
 0x674   :  { %v6303_v30 = vpop.eup %6302  ;;  %v5419_v32 = vpop.f32.mrb[71].mxu1  ;;  %5637 = vmatprep.subr.bf16.mxu1 %v3000_v46 }
 0x675   :  { %v6305_v62 = vpop.eup %6304  ;;  %6314 = vrcp.f32 %v5417_v41  ;;  %v5420_v56 = vadd.f32 %v5419_v32, %v5418_v5  ;;  %v3217_v61 = vsel %vm1525_vm5, %v3215_v21, %v6303_v30 }
 0x676   :  { %v6307_v55 = vpop.eup %6306  ;;  %v3209_v34 = vsel %vm1522_vm6, %v3207_v60, %v6305_v62 }
 0x677   :  { %v6309_v50 = vpop.eup %6308  ;;  %6316 = vrcp.f32 %v5420_v56  ;;  %5638 = vmatpush3.bf16.msra.mxu1 %v2992_v42  ;;  %v3218_v33 = vsel %vm1525_vm5, %v3216_v2, %v6307_v55  ;;  %v3331_v55 = vmul.bf16 %v8748_v3, %v9902_v4 }
 0x678   :  { %v6311_v38 = vpop.eup %6310  ;;  %5639 = vmatprep.subr.bf16.mxu1 %v3001_v6  ;;  %v3220_v12 = vpack.c.bf16 %v3218_v33, %v3217_v61  ;;  %v3210_v7 = vsel %vm1522_vm6, %v3208_v28, %v6309_v50  ;;  %v9903_v28 = vld [vmem:[#allocation14_spill] sm:$0xff] }
 0x679   :  { %v3211_v8 = vsel %vm1525_vm5, %v3209_v34, %v6311_v38 }
 0x67a   :  { %v6313_v31 = vpop.eup %6312  ;;  %3253 = vmatprep.mubr.bf16.mxu1 %v3220_v12 }
 0x67b   :  { %5640 = vmatpush3.bf16.msra.mxu1 %v2993_v47  ;;  %v3212_v37 = vsel %vm1525_vm5, %v3210_v7, %v6313_v31  ;;  %v3332_v31 = vmul.bf16 %v8769_v29, %v9903_v28 }
 0x67c   :  { %5647 = vmatprep.subr.bf16.mxu1 %v8748_v3  ;;  %v3219_v52 = vpack.c.bf16 %v3212_v37, %v3211_v8 }
 0x67e   :  { %3254 = vmatmul.mubr.bf16.vlgmr.msra.gmra.mrb[96].mxu1 %v3219_v52 }
 0x67f   :  { %v6315_v35 = vpop.eup %6314  ;;  %5648 = vmatpush3.bf16.msra.mxu1 %v8761_v26  ;;  %3294 = vmatprep.mubr.bf16.mxu1 %v3220_v12  ;;  %v3323_v12 = vmul.bf16 %v8761_v26, %v9902_v4 }
 0x680   :  { %v1957_v39 = vmul.f32 %v6315_v35, %v8812_v23  ;;  %5649 = vmatprep.subr.bf16.mxu1 %v8769_v29 }
 0x681   :  { %v6317_v53 = vpop.eup %6316 }
 0x682   :  { %v1958_v54 = vmul.f32 %v6317_v53, %v8818_v59  ;;  %v3324_v53 = vmul.bf16 %v8777_v16, %v9903_v28 }
 0x683   :  { %5650 = vmatpush3.bf16.msra.mxu1 %v8777_v16 }
 0x684   :  { %5651 = vmatprep.subr.bf16.mxu1 %v8785_v48  ;;  %v3982_v18 = vpack.c.bf16 %v1958_v54, %v1957_v39 }
 0x686   :  { %5956 = vmatmul.mubr.msk.bf16.vlgmr.msra.gmra.mrb[88].mxu0 %vm495_vm1, %v3982_v18  ;;  %v3333_v18 = vmul.bf16 %v8785_v48, %v9902_v4 }
 0x687   :  { %5652 = vmatpush3.bf16.msra.mxu1 %v8865_v57 }
 0x688   :  { %5653 = vmatprep.subr.bf16.mxu1 %v8873_v11 }
 0x68b   :  { %5654 = vmatpush3.bf16.msra.mxu1 %v8881_v15 }
 0x68c   :  { %5655 = vmatprep.subr.bf16.mxu1 %v8891_v44 }
 0x68d   :  { %v3450_v23 = vpop.xlane.xlu0 %3449 }
 0x68e   :  { %v3454_v42 = vsub.f32 %v8610_v24, %v3450_v23 }
 0x68f   :  { %5656 = vmatpush3.bf16.msra.mxu1 %v8899_v22  ;;  %v3453_v51 = vpop.xlane.xlu1 %3452 }
 0x690   :  { %5657 = vmatprep.subr.bf16.mxu1 %v8906_v40  ;;  %v3455_v62 = vsub.f32 %v8613_v19, %v3453_v51  ;;  %v3456_v2 = vmul.f32 1.442695, %v3454_v42 }
 0x691   :  { %v3462_v59 = vpop.xlane.xlu0 %3461  ;;  %v5455_v25 = vpop.f32.mrb[72].mxu1 }
 0x692   :  { %v5456_v63 = vpop.f32.mrb[73].mxu1  ;;  %v3466_v0 = vsub.f32 %v8610_v24, %v3462_v59  ;;  %v3458_v61 = vmul.f32 1.442695, %v3455_v62  ;;  %6318 = vpow2.f32 %v3456_v2  ;;  %v3326_v2 = vmul.bf16 %v8881_v15, %v9903_v28 }
 0x693   :  { %v8972_v10 = vadd.f32 %v5456_v63, %v5455_v25  ;;  %5658 = vmatpush3.bf16.msra.mxu1 %v8913_v20  ;;  %v5458_v46 = vpop.f32.mrb[74].mxu1  ;;  %v3465_v13 = vpop.xlane.xlu1 %3464 }
 0x694   :  { %v5459_v41 = vpop.f32.mrb[75].mxu1  ;;  %5659 = vmatprep.subr.bf16.mxu1 %v8920_v49  ;;  %v3467_v6 = vsub.f32 %v8613_v19, %v3465_v13  ;;  %v3468_v47 = vmul.f32 1.442695, %v3466_v0  ;;  %6320 = vpow2.f32 %v3458_v61 }
 0x695   :  { %v8976_v5 = vadd.f32 %v5459_v41, %v5458_v46  ;;  %v3474_v30 = vpop.xlane.xlu0 %3473  ;;  %v3325_v41 = vmul.bf16 %v8865_v57, %v9902_v4 }
 0x696   :  { %v3470_v34 = vmul.f32 1.442695, %v3467_v6  ;;  %6322 = vpow2.f32 %v3468_v47  ;;  %v3478_v23 = vsub.f32 %v8610_v24, %v3474_v30  ;;  %v3334_v30 = vmul.bf16 %v8873_v11, %v9903_v28 }
 0x697   :  { %5660 = vmatpush3.bf16.msra.mxu1 %v8927_v45  ;;  %v3477_v32 = vpop.xlane.xlu1 %3476 }
 0x698   :  { %5661 = vmatprep.subr.bf16.mxu1 %v8936_v36  ;;  %6324 = vpow2.f32 %v3470_v34  ;;  %v3479_v46 = vsub.f32 %v8613_v19, %v3477_v32  ;;  %v3327_v34 = vmul.bf16 %v8899_v22, %v9902_v4 }
 0x699   :  { %v3498_v56 = vpop.xlane.xlu0 %3497 }
 0x69a   :  { %v3502_v50 = vsub.f32 %v8633_v9, %v3498_v56  ;;  %v3480_v56 = vmul.f32 1.442695, %v3478_v23  ;;  %v3482_v6 = vmul.f32 1.442695, %v3479_v46  ;;  %v3329_v46 = vmul.bf16 %v8927_v45, %v9902_v4 }
 0x69b   :  { %5662 = vmatpush3.bf16.msra.mxu1 %v8947_v17  ;;  %v3501_v21 = vpop.xlane.xlu1 %3500 }
 0x69c   :  { %5687 = vmatprep.subr.bf16.mxu1 %v3331_v55  ;;  %v3503_v33 = vsub.f32 %v8639_v1, %v3501_v21  ;;  %v3504_v8 = vmul.f32 1.442695, %v3502_v50  ;;  %v6319_v50 = vpop.eup %6318 }
 0x69d   :  { %v3510_v38 = vpop.xlane.xlu0 %3509 }
 0x69e   :  { %v3514_v60 = vsub.f32 %v8633_v9, %v3510_v38  ;;  %3295 = vmatmul.mubr.bf16.vlgmr.msra.gmra.mrb[100].mxu1 %v3219_v52  ;;  %v3506_v35 = vmul.f32 1.442695, %v3503_v33  ;;  %6326 = vpow2.f32 %v3504_v8  ;;  %v3335_v33 = vmul.bf16 %v8891_v44, %v9902_v4  ;;  %v6321_v38 = vpop.eup %6320 }
 0x69f   :  { %5688 = vmatpush3.bf16.msra.mxu1 %v3323_v12  ;;  %v3513_v7 = vpop.xlane.xlu1 %3512  ;;  %v3336_v8 = vmul.bf16 %v8906_v40, %v9903_v28 }
 0x6a0   :  { %5689 = vmatprep.subr.bf16.mxu1 %v3332_v31  ;;  %v3515_v37 = vsub.f32 %v8639_v1, %v3513_v7  ;;  %v3516_v54 = vmul.f32 1.442695, %v3514_v60  ;;  %6328 = vpow2.f32 %v3506_v35  ;;  %v6323_v47 = vpop.eup %6322 }
 0x6a1   :  { %v3522_v39 = vpop.xlane.xlu0 %3521 }
 0x6a2   :  { %v3526_v52 = vsub.f32 %v8633_v9, %v3522_v39  ;;  %v3518_v51 = vmul.f32 1.442695, %v3515_v37  ;;  %6330 = vpow2.f32 %v3516_v54  ;;  %v6325_v31 = vpop.eup %6324 }
 0x6a3   :  { %5690 = vmatpush3.bf16.msra.mxu1 %v3324_v53  ;;  %v3525_v59 = vpop.xlane.xlu1 %3524 }
 0x6a4   :  { %v3528_v25 = vmul.f32 1.442695, %v3526_v52  ;;  %5691 = vmatprep.subr.bf16.mxu1 %v3333_v18  ;;  %v3527_v63 = vsub.f32 %v8639_v1, %v3525_v59  ;;  %6332 = vpow2.f32 %v3518_v51  ;;  %v3337_v18 = vmul.bf16 %v8920_v49, %v9902_v4 }
 0x6a5   :  { %v3534_v13 = vpop.xlane.xlu0 %3533 }
 0x6a6   :  { %v3530_v42 = vmul.f32 1.442695, %v3527_v63  ;;  %v3538_v62 = vsub.f32 %v8633_v9, %v3534_v13  ;;  %6334 = vpow2.f32 %v3528_v25 }
 0x6a7   :  { %5692 = vmatpush3.bf16.msra.mxu1 %v3325_v41  ;;  %v3537_v0 = vpop.xlane.xlu1 %3536 }
 0x6a8   :  { %v3540_v55 = vmul.f32 1.442695, %v3538_v62  ;;  %5693 = vmatprep.subr.bf16.mxu1 %v3334_v30  ;;  %v3539_v32 = vsub.f32 %v8639_v1, %v3537_v0  ;;  %6336 = vpow2.f32 %v3530_v42  ;;  %v6327_v7 = vpop.eup %6326 }
 0x6a9   :  { %v3486_v21 = vpop.xlane.xlu0 %3485 }
 0x6aa   :  { %6338 = vpow2.f32 %v3540_v55  ;;  %v3542_v9 = vmul.f32 1.442695, %v3539_v32  ;;  %v3490_v61 = vsub.f32 %v8610_v24, %v3486_v21  ;;  %v6329_v37 = vpop.eup %6328 }
 0x6ab   :  { %6340 = vpow2.f32 %v3480_v56  ;;  %5694 = vmatpush3.bf16.msra.mxu1 %v3326_v2  ;;  %v3489_v12 = vpop.xlane.xlu1 %3488  ;;  %v3338_v56 = vmul.bf16 %v8936_v36, %v9903_v28 }
 0x6ac   :  { %6342 = vpow2.f32 %v3542_v9  ;;  %v3492_v1 = vmul.f32 1.442695, %v3490_v61  ;;  %5695 = vmatprep.subr.bf16.mxu1 %v3335_v33  ;;  %v3491_v60 = vsub.f32 %v8613_v19, %v3489_v12  ;;  %v6331_v35 = vpop.eup %6330  ;;  %v3328_v19 = vmul.bf16 %v8913_v20, %v9903_v28 }
 0x6ad   :  { %6344 = vpow2.f32 %v3482_v6  ;;  %v3550_v42 = vsel %vm495_vm1, %v6327_v7, %v6331_v35  ;;  %v3330_v9 = vmul.bf16 %v8947_v17, %v9903_v28  ;;  %v3544_v61 = vsel %vm495_vm1, %v6319_v50, %v6323_v47 }
 0x6ae   :  { %6346 = vpow2.f32 %v3492_v1  ;;  %v3494_v24 = vmul.f32 1.442695, %v3491_v60  ;;  %v6333_v39 = vpop.eup %6332  ;;  %v3545_v33 = vsel %vm495_vm1, %v6321_v38, %v6325_v31 }
 0x6af   :  { %5696 = vmatpush3.bf16.msra.mxu1 %v3327_v34  ;;  %v3551_v62 = vsel %vm495_vm1, %v6329_v37, %v6333_v39 }
 0x6b0   :  { %6348 = vpow2.f32 %v3494_v24  ;;  %5697 = vmatprep.subr.bf16.mxu1 %v3336_v8  ;;  %v6335_v54 = vpop.eup %6334 }
 0x6b1   :  { %v5477_v53 = vpop.f32.mrb[76].mxu1  ;;  %v3552_v0 = vsel %vm1522_vm6, %v3550_v42, %v6335_v54 }
 0x6b2   :  { %v5478_v52 = vpop.f32.mrb[77].mxu1  ;;  %v6337_v23 = vpop.eup %6336 }
 0x6b3   :  { %v5479_v51 = vadd.f32 %v5478_v52, %v5477_v53  ;;  %v5480_v59 = vpop.f32.mrb[78].mxu1  ;;  %5698 = vmatpush3.bf16.msra.mxu1 %v3328_v19  ;;  %v3553_v55 = vsel %vm1522_vm6, %v3551_v62, %v6337_v23 }
 0x6b4   :  { %v6339_v25 = vpop.eup %6338  ;;  %v5481_v63 = vpop.f32.mrb[79].mxu1  ;;  %5699 = vmatprep.subr.bf16.mxu1 %v3337_v18 }
 0x6b5   :  { %v6341_v13 = vpop.eup %6340  ;;  %6350 = vrcp.f32 %v5479_v51  ;;  %v5482_v41 = vadd.f32 %v5481_v63, %v5480_v59  ;;  %v3554_v4 = vsel %vm1525_vm5, %v3552_v0, %v6339_v25 }
 0x6b6   :  { %v6343_v30 = vpop.eup %6342  ;;  %v3546_v1 = vsel %vm1522_vm6, %v3544_v61, %v6341_v13 }
 0x6b7   :  { %v6345_v32 = vpop.eup %6344  ;;  %6352 = vrcp.f32 %v5482_v41  ;;  %5700 = vmatpush3.bf16.msra.mxu1 %v3329_v46  ;;  %v3555_v6 = vsel %vm1525_vm5, %v3553_v55, %v6343_v30  ;;  %v9904_v46 = vld [vmem:[#allocation17_spill] sm:$0xff] }
 0x6b8   :  { %v6347_v21 = vpop.eup %6346  ;;  %5701 = vmatprep.subr.bf16.mxu1 %v3338_v56  ;;  %v3557_v2 = vpack.c.bf16 %v3555_v6, %v3554_v4  ;;  %v3547_v60 = vsel %vm1522_vm6, %v3545_v33, %v6345_v32  ;;  %v3668_v13 = vmul.bf16 %v8748_v3, %v9904_v46  ;;  %v3660_v32 = vmul.bf16 %v8761_v26, %v9904_v46 }
 0x6b9   :  { %v3548_v34 = vsel %vm1525_vm5, %v3546_v1, %v6347_v21 }
 0x6ba   :  { %v6349_v12 = vpop.eup %6348  ;;  %3590 = vmatprep.mubr.bf16.mxu1 %v3557_v2 }
 0x6bb   :  { %5702 = vmatpush3.bf16.msra.mxu1 %v3330_v9  ;;  %v3549_v7 = vsel %vm1525_vm5, %v3547_v60, %v6349_v12 }
 0x6bc   :  { %5709 = vmatprep.subr.bf16.mxu1 %v8748_v3  ;;  %v3556_v24 = vpack.c.bf16 %v3549_v7, %v3548_v34  ;;  %v9905_v3 = vld [vmem:[#allocation16_spill] sm:$0xff] }
 0x6bd   :  { %v3669_v21 = vmul.bf16 %v8769_v29, %v9905_v3 }
 0x6be   :  { %3591 = vmatmul.mubr.bf16.vlgmr.msra.gmra.mrb[104].mxu1 %v3556_v24 }
 0x6bf   :  { %v6351_v28 = vpop.eup %6350  ;;  %5710 = vmatpush3.bf16.msra.mxu1 %v8761_v26  ;;  %3631 = vmatprep.mubr.bf16.mxu1 %v3557_v2  ;;  %v3661_v26 = vmul.bf16 %v8777_v16, %v9905_v3 }
 0x6c0   :  { %5711 = vmatprep.subr.bf16.mxu1 %v8769_v29  ;;  %v2294_v50 = vmul.f32 %v6351_v28, %v8972_v10  ;;  %v3670_v29 = vmul.bf16 %v8785_v48, %v9904_v46 }
 0x6c1   :  { %v6353_v38 = vpop.eup %6352 }
 0x6c2   :  { %v2295_v47 = vmul.f32 %v6353_v38, %v8976_v5 }
 0x6c3   :  { %5712 = vmatpush3.bf16.msra.mxu1 %v8777_v16 }
 0x6c4   :  { %5713 = vmatprep.subr.bf16.mxu1 %v8785_v48  ;;  %v3983_v31 = vpack.c.bf16 %v2295_v47, %v2294_v50 }
 0x6c6   :  { %5959 = vmatprep.mubr.msk.bf16.mxu0 %vm495_vm1, %v3983_v31  ;;  %v3662_v31 = vmul.bf16 %v8865_v57, %v9904_v46 }
 0x6c7   :  { %5714 = vmatpush3.bf16.msra.mxu1 %v8865_v57 }
 0x6c8   :  { %5715 = vmatprep.subr.bf16.mxu1 %v8873_v11 }
 0x6cb   :  { %5716 = vmatpush3.bf16.msra.mxu1 %v8881_v15 }
 0x6cc   :  { %5717 = vmatprep.subr.bf16.mxu1 %v8891_v44 }
 0x6cd   :  { %v3787_v8 = vpop.xlane.xlu0 %3786 }
 0x6ce   :  { %v3791_v51 = vsub.f32 %v8753_v58, %v3787_v8 }
 0x6cf   :  { %5718 = vmatpush3.bf16.msra.mxu1 %v8899_v22  ;;  %v3790_v10 = vpop.xlane.xlu1 %3789 }
 0x6d0   :  { %5719 = vmatprep.subr.bf16.mxu1 %v8906_v40  ;;  %v3792_v59 = vsub.f32 %v8756_v43, %v3790_v10  ;;  %v3793_v62 = vmul.f32 1.442695, %v3791_v51  ;;  %v3671_v10 = vmul.bf16 %v8873_v11, %v9905_v3 }
 0x6d1   :  { %v3799_v5 = vpop.xlane.xlu0 %3798  ;;  %v5517_v37 = vpop.f32.mrb[80].mxu1 }
 0x6d2   :  { %v5518_v35 = vpop.f32.mrb[81].mxu1  ;;  %v3803_v63 = vsub.f32 %v8753_v58, %v3799_v5  ;;  %v3795_v56 = vmul.f32 1.442695, %v3792_v59  ;;  %6354 = vpow2.f32 %v3793_v62  ;;  %v3672_v59 = vmul.bf16 %v8891_v44, %v9904_v46 }
 0x6d3   :  { %v9055_v39 = vadd.f32 %v5518_v35, %v5517_v37  ;;  %5720 = vmatpush3.bf16.msra.mxu1 %v8913_v20  ;;  %v5520_v53 = vpop.f32.mrb[82].mxu1  ;;  %v3802_v19 = vpop.xlane.xlu1 %3801  ;;  %v3664_v62 = vmul.bf16 %v8899_v22, %v9904_v46 }
 0x6d4   :  { %v5521_v54 = vpop.f32.mrb[83].mxu1  ;;  %5721 = vmatprep.subr.bf16.mxu1 %v8920_v49  ;;  %v3804_v41 = vsub.f32 %v8756_v43, %v3802_v19  ;;  %v3805_v4 = vmul.f32 1.442695, %v3803_v63  ;;  %6356 = vpow2.f32 %v3795_v56  ;;  %v3673_v56 = vmul.bf16 %v8906_v40, %v9905_v3 }
 0x6d5   :  { %v9059_v52 = vadd.f32 %v5521_v54, %v5520_v53  ;;  %v3811_v18 = vpop.xlane.xlu0 %3810 }
 0x6d6   :  { %v3807_v2 = vmul.f32 1.442695, %v3804_v41  ;;  %6358 = vpow2.f32 %v3805_v4  ;;  %v3815_v7 = vsub.f32 %v8753_v58, %v3811_v18  ;;  %v3663_v18 = vmul.bf16 %v8881_v15, %v9905_v3 }
 0x6d7   :  { %5722 = vmatpush3.bf16.msra.mxu1 %v8927_v45  ;;  %v3814_v23 = vpop.xlane.xlu1 %3813 }
 0x6d8   :  { %5723 = vmatprep.subr.bf16.mxu1 %v8936_v36  ;;  %6360 = vpow2.f32 %v3807_v2  ;;  %v3816_v16 = vsub.f32 %v8756_v43, %v3814_v23  ;;  %v3817_v5 = vmul.f32 1.442695, %v3815_v7  ;;  %v3674_v2 = vmul.bf16 %v8920_v49, %v9904_v46 }
 0x6d9   :  { %v3835_v25 = vpop.xlane.xlu0 %3834 }
 0x6da   :  { %v3839_v30 = vsub.f32 %v8790_v14, %v3835_v25  ;;  %v3819_v19 = vmul.f32 1.442695, %v3816_v16 }
 0x6db   :  { %5724 = vmatpush3.bf16.msra.mxu1 %v8947_v17  ;;  %v3838_v42 = vpop.xlane.xlu1 %3837 }
 0x6dc   :  { %5749 = vmatprep.subr.bf16.mxu1 %v3668_v13  ;;  %v3840_v0 = vsub.f32 %v8796_v27, %v3838_v42  ;;  %v3841_v61 = vmul.f32 1.442695, %v3839_v30  ;;  %v6355_v23 = vpop.eup %6354 }
 0x6dd   :  { %v3847_v55 = vpop.xlane.xlu0 %3846 }
 0x6de   :  { %v3851_v6 = vsub.f32 %v8790_v14, %v3847_v55  ;;  %3632 = vmatmul.mubr.bf16.vlgmr.msra.gmra.mrb[108].mxu1 %v3556_v24  ;;  %v3843_v12 = vmul.f32 1.442695, %v3840_v0  ;;  %6362 = vpow2.f32 %v3841_v61  ;;  %v6357_v25 = vpop.eup %6356 }
 0x6df   :  { %5750 = vmatpush3.bf16.msra.mxu1 %v3660_v32  ;;  %v3850_v9 = vpop.xlane.xlu1 %3849 }
 0x6e0   :  { %5751 = vmatprep.subr.bf16.mxu1 %v3669_v21  ;;  %v3852_v33 = vsub.f32 %v8796_v27, %v3850_v9  ;;  %v3853_v60 = vmul.f32 1.442695, %v3851_v6  ;;  %6364 = vpow2.f32 %v3843_v12  ;;  %v6359_v13 = vpop.eup %6358 }
 0x6e1   :  { %v3859_v1 = vpop.xlane.xlu0 %3858 }
 0x6e2   :  { %v3863_v34 = vsub.f32 %v8790_v14, %v3859_v1  ;;  %v3855_v24 = vmul.f32 1.442695, %v3852_v33  ;;  %6366 = vpow2.f32 %v3853_v60  ;;  %v6361_v42 = vpop.eup %6360 }
 0x6e3   :  { %5752 = vmatpush3.bf16.msra.mxu1 %v3661_v26  ;;  %v3862_v28 = vpop.xlane.xlu1 %3861  ;;  %v3666_v26 = vmul.bf16 %v8927_v45, %v9904_v46 }
 0x6e4   :  { %v3865_v50 = vmul.f32 1.442695, %v3863_v34  ;;  %5753 = vmatprep.subr.bf16.mxu1 %v3670_v29  ;;  %v3864_v38 = vsub.f32 %v8796_v27, %v3862_v28  ;;  %6368 = vpow2.f32 %v3855_v24  ;;  %v3675_v28 = vmul.bf16 %v8936_v36, %v9905_v3 }
 0x6e5   :  { %v3871_v47 = vpop.xlane.xlu0 %3870 }
 0x6e6   :  { %v3867_v48 = vmul.f32 1.442695, %v3864_v38  ;;  %v3875_v8 = vsub.f32 %v8790_v14, %v3871_v47  ;;  %6370 = vpow2.f32 %v3865_v50 }
 0x6e7   :  { %5754 = vmatpush3.bf16.msra.mxu1 %v3662_v31  ;;  %v3874_v37 = vpop.xlane.xlu1 %3873 }
 0x6e8   :  { %v3877_v35 = vmul.f32 1.442695, %v3875_v8  ;;  %5755 = vmatprep.subr.bf16.mxu1 %v3671_v10  ;;  %v3876_v53 = vsub.f32 %v8796_v27, %v3874_v37  ;;  %6372 = vpow2.f32 %v3867_v48  ;;  %v6363_v30 = vpop.eup %6362  ;;  %v3667_v8 = vmul.bf16 %v8947_v17, %v9905_v3 }
 0x6e9   :  { %v3823_v54 = vpop.xlane.xlu0 %3822  ;;  %v3881_v10 = vsel %vm495_vm1, %v6355_v23, %v6359_v13  ;;  %v6521_v13 = vld [vmem:[%s9879_s12 + $0x8] sm:$0xff]  }
 0x6ea   :  { %6374 = vpow2.f32 %v3877_v35  ;;  %v3879_v14 = vmul.f32 1.442695, %v3876_v53  ;;  %v3827_v51 = vsub.f32 %v8753_v58, %v3823_v54  ;;  %v6365_v0 = vpop.eup %6364 }
 0x6eb   :  { %6376 = vpow2.f32 %v3817_v5  ;;  %5756 = vmatpush3.bf16.msra.mxu1 %v3663_v18  ;;  %v3826_v63 = vpop.xlane.xlu1 %3825  ;;  %v3882_v5 = vsel %vm495_vm1, %v6357_v25, %v6361_v42  ;;  %v6518_v18 = vld [vmem:[%s9879_s12 + $0x40] sm:$0xff]  }
 0x6ec   :  { %6378 = vpow2.f32 %v3879_v14  ;;  %v3829_v27 = vmul.f32 1.442695, %v3827_v51  ;;  %5757 = vmatprep.subr.bf16.mxu1 %v3672_v59  ;;  %v3828_v41 = vsub.f32 %v8756_v43, %v3826_v63  ;;  %v6367_v55 = vpop.eup %6366  ;;  %v3665_v43 = vmul.bf16 %v8913_v20, %v9905_v3  ;;  %v6519_v14 = vld [vmem:[%s9879_s12] sm:$0xff]   ;;  %v6520_v51 = vld [vmem:[%s9879_s12 + $0x48] sm:$0xff]  }
 0x6ed   :  { %6380 = vpow2.f32 %v3819_v19  ;;  %v3887_v29 = vsel %vm495_vm1, %v6363_v30, %v6367_v55 }
 0x6ee   :  { %6382 = vpow2.f32 %v3829_v27  ;;  %v3831_v58 = vmul.f32 1.442695, %v3828_v41  ;;  %v6369_v32 = vpop.eup %6368  ;;  %v6522_v27 = vld [vmem:[%s9879_s12 + $0x50] sm:$0xff]  }
 0x6ef   :  { %5758 = vmatpush3.bf16.msra.mxu1 %v3664_v62  ;;  %v3888_v7 = vsel %vm495_vm1, %v6365_v0, %v6369_v32 }
 0x6f0   :  { %6384 = vpow2.f32 %v3831_v58  ;;  %5759 = vmatprep.subr.bf16.mxu1 %v3673_v56  ;;  %v6371_v6 = vpop.eup %6370 }
 0x6f1   :  { %v5539_v4 = vpop.f32.mrb[84].mxu1  ;;  %v3889_v50 = vsel %vm1522_vm6, %v3887_v29, %v6371_v6  ;;  %v9157_v6 = vld [vmem:[%s9831_s15] ss:$0 sm:$0xff]  ;;  %v6524_v29 = vld [vmem:[%s9874_s26 + $0x10] sm:$0xff] }
 0x6f2   :  { %v5540_v21 = vpop.f32.mrb[85].mxu1  ;;  %v6373_v9 = vpop.eup %6372 }
 0x6f3   :  { %v5541_v61 = vadd.f32 %v5540_v21, %v5539_v4  ;;  %v5542_v33 = vpop.f32.mrb[86].mxu1  ;;  %5760 = vmatpush3.bf16.msra.mxu1 %v3665_v43  ;;  %v3890_v38 = vsel %vm1522_vm6, %v3888_v7, %v6373_v9 }
 0x6f4   :  { %v6375_v12 = vpop.eup %6374  ;;  %v5543_v1 = vpop.f32.mrb[87].mxu1  ;;  %5761 = vmatprep.subr.bf16.mxu1 %v3674_v2 }
 0x6f5   :  { %v6377_v60 = vpop.eup %6376  ;;  %6386 = vrcp.f32 %v5541_v61  ;;  %v5544_v34 = vadd.f32 %v5543_v1, %v5542_v33  ;;  %v3891_v46 = vsel %vm1525_vm5, %v3889_v50, %v6375_v12  ;;  %v6523_v1 = vld [vmem:[%s9874_s26] sm:$0xff] }
 0x6f6   :  { %v6379_v24 = vpop.eup %6378  ;;  %v3883_v35 = vsel %vm1522_vm6, %v3881_v10, %v6377_v60 }
 0x6f7   :  { %v6381_v16 = vpop.eup %6380  ;;  %6388 = vrcp.f32 %v5544_v34  ;;  %5762 = vmatpush3.bf16.msra.mxu1 %v3666_v26  ;;  %v3892_v47 = vsel %vm1525_vm5, %v3890_v38, %v6379_v24  ;;  %v6525_v24 = vld [vmem:[%s9874_s26 + $0x8] sm:$0xff]  ;;  %v6526_v38 = vld [vmem:[%s9874_s26 + $0x18] sm:$0xff] }
 0x6f8   :  { %v6383_v31 = vpop.eup %6382  ;;  %5763 = vmatprep.subr.bf16.mxu1 %v3675_v28  ;;  %v3894_v48 = vpack.c.bf16 %v3892_v47, %v3891_v46  ;;  %v3884_v53 = vsel %vm1522_vm6, %v3882_v5, %v6381_v16 }
 0x6f9   :  { %v3885_v19 = vsel %vm1525_vm5, %v3883_v35, %v6383_v31 }
 0x6fa   :  { %v6385_v37 = vpop.eup %6384  ;;  %3927 = vmatprep.mubr.bf16.mxu1 %v3894_v48 }
 0x6fb   :  { %5764 = vmatpush3.bf16.msra.mxu1 %v3667_v8  ;;  %v3886_v54 = vsel %vm1525_vm5, %v3884_v53, %v6385_v37 }
 0x6fc   :  { %5771 = vmatprep.subr.bf16.mxu1 %v6518_v18  ;;  %v3893_v3 = vpack.c.bf16 %v3886_v54, %v3885_v19 }
 0x6fe   :  { %3928 = vmatmul.mubr.bf16.vlgmr.msra.gmra.mrb[112].mxu1 %v3893_v3 }
 0x6ff   :  { %v6387_v23 = vpop.eup %6386  ;;  %5772 = vmatpush3.bf16.msra.mxu1 %v6519_v14  ;;  %3968 = vmatprep.mubr.bf16.mxu1 %v3894_v48 }
 0x700   :  { %5773 = vmatprep.subr.bf16.mxu1 %v6520_v51  ;;  %v2631_v59 = vmul.f32 %v6387_v23, %v9055_v39 }
 0x701   :  { %v6389_v25 = vpop.eup %6388 }
 0x702   :  { %v2632_v63 = vmul.f32 %v6389_v25, %v9059_v52 }
 0x703   :  { %5774 = vmatpush3.bf16.msra.mxu1 %v6521_v13 }
 0x704   :  { %5775 = vmatprep.subr.bf16.mxu1 %v6522_v27  ;;  %v3984_v41 = vpack.c.bf16 %v2632_v63, %v2631_v59 }
 0x706   :  { %5960 = vmatmul.mubr.msk.bf16.gmra.mrb[92].mxu0 %vm495_vm1, %v3984_v41 }
 0x707   :  { %5776 = vmatpush3.bf16.msra.mxu1 %v8865_v57 }
 0x708   :  { %5777 = vmatprep.subr.bf16.mxu1 %v8873_v11 }
 0x70b   :  { %5778 = vmatpush3.bf16.msra.mxu1 %v8881_v15 }
 0x70c   :  { %5779 = vmatprep.subr.bf16.mxu1 %v8891_v44 }
 0x70f   :  { %5780 = vmatpush3.bf16.msra.mxu1 %v8899_v22 }
 0x710   :  { %5781 = vmatprep.subr.bf16.mxu1 %v8906_v40 }
 0x711   :  { %v5579_v39 = vpop.f32.mrb[88].mxu1 }
 0x712   :  { %v5580_v52 = vpop.f32.mrb[89].mxu1 }
 0x713   :  { %v5581_v42 = vadd.f32 %v5580_v52, %v5579_v39  ;;  %5782 = vmatpush3.bf16.msra.mxu1 %v8913_v20  ;;  %v5582_v62 = vpop.f32.mrb[90].mxu1 }
 0x714   :  { %v5583_v30 = vpop.f32.mrb[91].mxu1  ;;  %5783 = vmatprep.subr.bf16.mxu1 %v8920_v49 }
 0x715   :  { %v5584_v57 = vadd.f32 %v5583_v30, %v5582_v62 }
 0x717   :  { %5784 = vmatpush3.bf16.msra.mxu1 %v8927_v45 }
 0x718   :  { %5785 = vmatprep.subr.bf16.mxu1 %v8936_v36 }
 0x71b   :  { %5786 = vmatpush3.bf16.msra.mxu1 %v8947_v17 }
 0x71e   :  { %3969 = vmatmul.mubr.bf16.vlgmr.msra.gmra.mrb[116].mxu1 %v3893_v3 }
 0x731   :  { %v5601_v11 = vpop.f32.mrb[92].mxu1 }
 0x732   :  { %v5602_v15 = vpop.f32.mrb[93].mxu1 }
 0x733   :  { %v5603_v44 = vadd.f32 %v5602_v15, %v5601_v11  ;;  %v5604_v22 = vpop.f32.mrb[94].mxu1 }
 0x734   :  { %v5605_v40 = vpop.f32.mrb[95].mxu1 }
 0x735   :  { %6390 = vrcp.f32 %v5603_v44  ;;  %v5606_v58 = vadd.f32 %v5605_v40, %v5604_v22 }
 0x737   :  { %6392 = vrcp.f32 %v5606_v58 }
 0x73f   :  { %v6391_v20 = vpop.eup %6390 }
 0x740   :  { %v2968_v56 = vmul.f32 %v6391_v20, %v5581_v42 }
 0x741   :  { %v6393_v0 = vpop.eup %6392 }
 0x742   :  { %v2969_v49 = vmul.f32 %v6393_v0, %v5584_v57 }
 0x744   :  { %v3985_v55 = vpack.c.bf16 %v2969_v49, %v2968_v56 }
 0x746   :  { %5963 = vmatprep.mubr.msk.bf16.mxu0 %vm495_vm1, %v3985_v55 }
 0x751   :  { %v5641_v45 = vpop.f32.mrb[96].mxu1 }
 0x752   :  { %v5642_v36 = vpop.f32.mrb[97].mxu1 }
 0x753   :  { %v5643_v32 = vadd.f32 %v5642_v36, %v5641_v45  ;;  %v5644_v17 = vpop.f32.mrb[98].mxu1 }
 0x754   :  { %v5645_v4 = vpop.f32.mrb[99].mxu1 }
 0x755   :  { %v5646_v43 = vadd.f32 %v5645_v4, %v5644_v17  ;;  %v6527_v17 = vld [vmem:[%s9874_s26 + $0x20] sm:$0xff] }
 0x759   :  { %v5957_v21 = vpop.f32.mrb[88].mxu0 }
 0x75a   :  { %v4070_v2 = vpop.f32.mrb[89].mxu0  ;;  %v4079_v9 = vadd.f32 %v5957_v21, %v9157_v6 }
 0x75b   :  { %v4071_v61 = vadd.f32 %v9157_v6, %v4070_v2  ;;  %v5958_v33 = vpop.f32.mrb[90].mxu0  ;;  %v6528_v2 = vld [vmem:[%s9874_s26 + $0x30] sm:$0xff] }
 0x75c   :  { %v4073_v12 = vpop.f32.mrb[91].mxu0  ;;  %v4082_v60 = vadd.f32 %v5958_v33, %v9157_v6  ;;  %v9171_v7 = vadd.f32 %v6524_v29, %v4079_v9 }
 0x75d   :  { %v9164_v26 = vadd.f32 %v6523_v1, %v4071_v61  ;;  %v4074_v34 = vadd.f32 %v9157_v6, %v4073_v12  ;;  %v6529_v61 = vld [vmem:[%s9874_s26 + $0x28] sm:$0xff]  ;;  %v6530_v1 = vld [vmem:[%s9874_s26 + $0x38] sm:$0xff] }
 0x75e   :  { %v9183_v16 = vadd.f32 %v6526_v38, %v4082_v60  ;;  %v4157_v47 = vsel %vm495_vm1, %v9171_v7, 0.0 }
 0x75f   :  { %v9176_v28 = vadd.f32 %v6525_v24, %v4074_v34  ;;  %v4151_v50 = vsel %vm495_vm1, %v9164_v26, 0.0 }
 0x760   :  { %4152 = vadd.xlane.f32.xlu0 %v4151_v50  ;;  %v4160_v31 = vsel %vm495_vm1, %v9183_v16, 0.0 }
 0x761   :  { %v4154_v46 = vsel %vm495_vm1, %v9176_v28, 0.0 }
 0x762   :  { %4155 = vadd.xlane.f32.xlu1 %v4154_v46 }
 0x764   :  { %4158 = vadd.xlane.f32.xlu0 %v4157_v47 }
 0x766   :  { %4161 = vadd.xlane.f32.xlu1 %v4160_v31 }
 0x771   :  { %v5663_v48 = vpop.f32.mrb[100].mxu1 }
 0x772   :  { %v5664_v8 = vpop.f32.mrb[101].mxu1 }
 0x773   :  { %v5665_v10 = vadd.f32 %v5664_v8, %v5663_v48  ;;  %v5666_v5 = vpop.f32.mrb[102].mxu1 }
 0x774   :  { %v5667_v37 = vpop.f32.mrb[103].mxu1 }
 0x775   :  { %6394 = vrcp.f32 %v5665_v10  ;;  %v5668_v35 = vadd.f32 %v5667_v37, %v5666_v5 }
 0x777   :  { %6396 = vrcp.f32 %v5668_v35 }
 0x77f   :  { %v6395_v53 = vpop.eup %6394 }
 0x780   :  { %v3305_v19 = vmul.f32 %v6395_v53, %v5643_v32 }
 0x781   :  { %v6397_v54 = vpop.eup %6396 }
 0x782   :  { %v3306_v18 = vmul.f32 %v6397_v54, %v5646_v43 }
 0x784   :  { %v3986_v3 = vpack.c.bf16 %v3306_v18, %v3305_v19 }
 0x786   :  { %5964 = vmatmul.mubr.msk.bf16.gmra.mrb[96].mxu0 %vm495_vm1, %v3986_v3 }
 0x791   :  { %v5703_v23 = vpop.f32.mrb[104].mxu1 }
 0x792   :  { %v5704_v14 = vpop.f32.mrb[105].mxu1 }
 0x793   :  { %v5705_v51 = vadd.f32 %v5704_v14, %v5703_v23  ;;  %v5706_v59 = vpop.f32.mrb[106].mxu1  ;;  %v6531_v14 = vld [vmem:[%s9874_s26 + $0x40] sm:$0xff] }
 0x794   :  { %v5707_v25 = vpop.f32.mrb[107].mxu1 }
 0x795   :  { %v5708_v63 = vadd.f32 %v5707_v25, %v5706_v59 }
 0x7b1   :  { %v5725_v13 = vpop.f32.mrb[108].mxu1 }
 0x7b2   :  { %v5726_v27 = vpop.f32.mrb[109].mxu1 }
 0x7b3   :  { %v5727_v41 = vadd.f32 %v5726_v27, %v5725_v13  ;;  %v5728_v39 = vpop.f32.mrb[110].mxu1  ;;  %v6533_v27 = vld [vmem:[%s9874_s26 + $0x48] sm:$0xff] }
 0x7b4   :  { %v5729_v52 = vpop.f32.mrb[111].mxu1 }
 0x7b5   :  { %6398 = vrcp.f32 %v5727_v41  ;;  %v5730_v42 = vadd.f32 %v5729_v52, %v5728_v39  ;;  %v6534_v52 = vld [vmem:[%s9874_s26 + $0x58] sm:$0xff] }
 0x7b7   :  { %6400 = vrcp.f32 %v5730_v42 }
 0x7bf   :  { %v6399_v62 = vpop.eup %6398 }
 0x7c0   :  { %v3642_v30 = vmul.f32 %v6399_v62, %v5705_v51 }
 0x7c1   :  { %v6401_v57 = vpop.eup %6400 }
 0x7c2   :  { %v3643_v11 = vmul.f32 %v6401_v57, %v5708_v63  ;;  %v6532_v63 = vld [vmem:[%s9874_s26 + $0x50] sm:$0xff] }
 0x7c4   :  { %v3987_v15 = vpack.c.bf16 %v3643_v11, %v3642_v30 }
 0x7c6   :  { %5967 = vmatprep.mubr.msk.bf16.mxu0 %vm495_vm1, %v3987_v15 }
 0x7d1   :  { %v5765_v44 = vpop.f32.mrb[112].mxu1 }
 0x7d2   :  { %v5766_v22 = vpop.f32.mrb[113].mxu1 }
 0x7d3   :  { %v5767_v40 = vadd.f32 %v5766_v22, %v5765_v44  ;;  %v5768_v58 = vpop.f32.mrb[114].mxu1 }
 0x7d4   :  { %v5769_v20 = vpop.f32.mrb[115].mxu1 }
 0x7d5   :  { %v5770_v56 = vadd.f32 %v5769_v20, %v5768_v58 }
 0x7d9   :  { %v5961_v0 = vpop.f32.mrb[92].mxu0 }
 0x7da   :  { %v4086_v49 = vpop.f32.mrb[93].mxu0  ;;  %v4095_v55 = vadd.f32 %v5961_v0, %v9157_v6 }
 0x7db   :  { %v4087_v45 = vadd.f32 %v9157_v6, %v4086_v49  ;;  %v5962_v36 = vpop.f32.mrb[94].mxu0 }
 0x7dc   :  { %v4089_v32 = vpop.f32.mrb[95].mxu0  ;;  %v4098_v43 = vadd.f32 %v5962_v36, %v9157_v6  ;;  %v9205_v9 = vadd.f32 %v6528_v2, %v4095_v55  ;;  %v6535_v36 = vld [vmem:[%s9874_s26 + $0x60] sm:$0xff] }
 0x7dd   :  { %v9198_v4 = vadd.f32 %v6527_v17, %v4087_v45  ;;  %v4090_v21 = vadd.f32 %v9157_v6, %v4089_v32 }
 0x7de   :  { %v9217_v60 = vadd.f32 %v6530_v1, %v4098_v43  ;;  %v4169_v29 = vsel %vm495_vm1, %v9205_v9, 0.0 }
 0x7df   :  { %v9210_v33 = vadd.f32 %v6529_v61, %v4090_v21  ;;  %v4163_v12 = vsel %vm495_vm1, %v9198_v4, 0.0 }
 0x7e0   :  { %4164 = vadd.xlane.f32.xlu0 %v4163_v12  ;;  %v4172_v24 = vsel %vm495_vm1, %v9217_v60, 0.0  ;;  %v6536_v12 = vld [vmem:[%s9874_s26 + $0x70] sm:$0xff] }
 0x7e1   :  { %v4166_v34 = vsel %vm495_vm1, %v9210_v33, 0.0 }
 0x7e2   :  { %4167 = vadd.xlane.f32.xlu1 %v4166_v34  ;;  %v6537_v34 = vld [vmem:[%s9874_s26 + $0x68] sm:$0xff] }
 0x7e4   :  { %4170 = vadd.xlane.f32.xlu0 %v4169_v29 }
 0x7e6   :  { %4173 = vadd.xlane.f32.xlu1 %v4172_v24 }
 0x7ed   :  { %v4153_v11 = vpop.xlane.xlu0 %4152 }
 0x7ee   :  { %v4200_v22 = vmul.f32 0.03125, %v4153_v11 }
 0x7ef   :  { %v4156_v15 = vpop.xlane.xlu1 %4155 }
 0x7f0   :  { %v4201_v45 = vmul.f32 0.03125, %v4156_v15  ;;  %v9268_v21 = vsub.f32 %v9164_v26, %v4200_v22 }
 0x7f1   :  { %v5787_v50 = vpop.f32.mrb[116].mxu1 }
 0x7f2   :  { %v5788_v38 = vpop.f32.mrb[117].mxu1  ;;  %v9283_v26 = vsub.f32 %v9176_v28, %v4201_v45  ;;  %v4232_v28 = vmul.f32 %v9268_v21, %v9268_v21 }
 0x7f3   :  { %v5789_v46 = vadd.f32 %v5788_v38, %v5787_v50  ;;  %v5790_v47 = vpop.f32.mrb[118].mxu1  ;;  %v4162_v49 = vpop.xlane.xlu1 %4161  ;;  %v6538_v38 = vld [vmem:[%s9874_s26 + $0x78] sm:$0xff]  ;;  %s6539_s26 = scalar_lea.vmem %s5080_s29, 512 }
 0x7f4   :  { %v5791_v31 = vpop.f32.mrb[119].mxu1  ;;  %v4203_v50 = vmul.f32 0.03125, %v4162_v49  ;;  %p6540_p0 = scmp.ne.s32.totalorder %s5080_s29, %s6539_s26  ;;  %p6545_p2 = scmp.lt.s32.totalorder %s6539_s26, %s6539_s26 }
 0x7f5   :  { %6402 = vrcp.f32 %v5789_v46  ;;  %v5792_v48 = vadd.f32 %v5791_v31, %v5790_v47 }
 0x7f6   :  { %p6546_p3 = por %p6545_p2, %p6544_p1 }
 0x7f7   :  { %6404 = vrcp.f32 %v5792_v48 }
 0x7f8   :  { %p6547_p4 = pnand %p6546_p3, %p6540_p0 }
 0x7ff   :  { %v6403_v8 = vpop.eup %6402 }
 0x800   :  { %v3979_v10 = vmul.f32 %v6403_v8, %v5767_v40  ;;  %v4159_v40 = vpop.xlane.xlu0 %4158 }
 0x801   :  { %v6405_v5 = vpop.eup %6404  ;;  %v4202_v61 = vmul.f32 0.03125, %v4159_v40 }
 0x802   :  { %v3980_v37 = vmul.f32 %v6405_v5, %v5770_v56  ;;  %v9300_v5 = vsub.f32 %v9183_v16, %v4203_v50 }
 0x803   :  { %v9293_v31 = vsub.f32 %v9171_v7, %v4202_v61  ;;  %v4233_v7 = vmul.f32 %v9283_v26, %v9283_v26 }
 0x804   :  { %v3988_v35 = vpack.c.bf16 %v3980_v37, %v3979_v10 }
 0x806   :  { %5968 = vmatmul.mubr.msk.bf16.gmra.mrb[100].mxu0 %vm495_vm1, %v3988_v35 }
 0x859   :  { %v5965_v53 = vpop.f32.mrb[96].mxu0 }
 0x85a   :  { %v4102_v19 = vpop.f32.mrb[97].mxu0  ;;  %v4111_v54 = vadd.f32 %v5965_v53, %v9157_v6 }
 0x85b   :  { %v4103_v18 = vadd.f32 %v9157_v6, %v4102_v19  ;;  %v5966_v3 = vpop.f32.mrb[98].mxu0 }
 0x85c   :  { %v4105_v23 = vpop.f32.mrb[99].mxu0  ;;  %v4114_v59 = vadd.f32 %v5966_v3, %v9157_v6  ;;  %v9238_v13 = vadd.f32 %v6532_v63, %v4111_v54  ;;  %v4234_v3 = vmul.f32 %v9293_v31, %v9293_v31 }
 0x85d   :  { %v9231_v51 = vadd.f32 %v6531_v14, %v4103_v18  ;;  %v4106_v25 = vadd.f32 %v9157_v6, %v4105_v23  ;;  %v4248_v18 = vsel %vm495_vm1, %v4232_v28, 0.0  ;;  %v4251_v14 = vsel %vm495_vm1, %v4233_v7, 0.0 }
 0x85e   :  { %v9250_v42 = vadd.f32 %v6534_v52, %v4114_v59  ;;  %v4181_v30 = vsel %vm495_vm1, %v9238_v13, 0.0  ;;  %v4235_v59 = vmul.f32 %v9300_v5, %v9300_v5 }
 0x85f   :  { %v9243_v41 = vadd.f32 %v6533_v27, %v4106_v25  ;;  %v4175_v39 = vsel %vm495_vm1, %v9231_v51, 0.0  ;;  %v4254_v25 = vsel %vm495_vm1, %v4234_v3, 0.0 }
 0x860   :  { %4176 = vadd.xlane.f32.xlu0 %v4175_v39  ;;  %v4184_v57 = vsel %vm495_vm1, %v9250_v42, 0.0  ;;  %v4257_v39 = vsel %vm495_vm1, %v4235_v59, 0.0 }
 0x861   :  { %v4178_v62 = vsel %vm495_vm1, %v9243_v41, 0.0 }
 0x862   :  { %4179 = vadd.xlane.f32.xlu1 %v4178_v62 }
 0x864   :  { %4182 = vadd.xlane.f32.xlu0 %v4181_v30 }
 0x866   :  { %4185 = vadd.xlane.f32.xlu1 %v4184_v57 }
 0x86d   :  { %v4165_v2 = vpop.xlane.xlu0 %4164 }
 0x86e   :  { %v4204_v48 = vmul.f32 0.03125, %v4165_v2 }
 0x86f   :  { %v4168_v24 = vpop.xlane.xlu1 %4167 }
 0x870   :  { %v4205_v37 = vmul.f32 0.03125, %v4168_v24  ;;  %v9307_v19 = vsub.f32 %v9198_v4, %v4204_v48 }
 0x871   :  { %v4171_v10 = vpop.xlane.xlu0 %4170 }
 0x872   :  { %v4206_v54 = vmul.f32 0.03125, %v4171_v10  ;;  %v9313_v16 = vsub.f32 %v9210_v33, %v4205_v37  ;;  %v4236_v63 = vmul.f32 %v9307_v19, %v9307_v19 }
 0x873   :  { %v4174_v53 = vpop.xlane.xlu1 %4173 }
 0x874   :  { %v4207_v23 = vmul.f32 0.03125, %v4174_v53  ;;  %v9319_v4 = vsub.f32 %v9205_v9, %v4206_v54  ;;  %v4237_v52 = vmul.f32 %v9313_v16, %v9313_v16  ;;  %v4260_v9 = vsel %vm495_vm1, %v4236_v63, 0.0 }
 0x876   :  { %v9325_v27 = vsub.f32 %v9217_v60, %v4207_v23  ;;  %v4238_v57 = vmul.f32 %v9319_v4, %v9319_v4 }
 0x878   :  { %v4239_v22 = vmul.f32 %v9325_v27, %v9325_v27 }
 0x8d9   :  { %v5969_v44 = vpop.f32.mrb[100].mxu0 }
 0x8da   :  { %v4118_v58 = vpop.f32.mrb[101].mxu0  ;;  %v4127_v20 = vadd.f32 %v5969_v44, %v9157_v6  ;;  %v4263_v44 = vsel %vm495_vm1, %v4237_v52, 0.0 }
 0x8db   :  { %v4119_v56 = vadd.f32 %v9157_v6, %v4118_v58  ;;  %v5970_v0 = vpop.f32.mrb[102].mxu0 }
 0x8dc   :  { %v4121_v55 = vpop.f32.mrb[103].mxu0  ;;  %v4130_v17 = vadd.f32 %v5970_v0, %v9157_v6  ;;  %v9273_v1 = vadd.f32 %v6536_v12, %v4127_v20  ;;  %v6113_v12 = vld [vmem:[%s9834_s18 + $0x8] sm:$0xff]  }
 0x8dd   :  { %v9263_v32 = vadd.f32 %v6535_v36, %v4119_v56  ;;  %v4122_v43 = vadd.f32 %v9157_v6, %v4121_v55  ;;  %v4266_v56 = vsel %vm495_vm1, %v4238_v57, 0.0  ;;  %v4269_v55 = vsel %vm495_vm1, %v4239_v22, 0.0 }
 0x8de   :  { %v9288_v46 = vadd.f32 %v6538_v38, %v4130_v17  ;;  %v4193_v8 = vsel %vm495_vm1, %v9273_v1, 0.0 }
 0x8df   :  { %v9278_v29 = vadd.f32 %v6537_v34, %v4122_v43  ;;  %v4187_v6 = vsel %vm495_vm1, %v9263_v32, 0.0 }
 0x8e0   :  { %4188 = vadd.xlane.f32.xlu0 %v4187_v6  ;;  %v4196_v35 = vsel %vm495_vm1, %v9288_v46, 0.0 }
 0x8e1   :  { %v4190_v47 = vsel %vm495_vm1, %v9278_v29, 0.0 }
 0x8e2   :  { %4191 = vadd.xlane.f32.xlu1 %v4190_v47 }
 0x8e4   :  { %4194 = vadd.xlane.f32.xlu0 %v4193_v8 }
 0x8e6   :  { %4197 = vadd.xlane.f32.xlu1 %v4196_v35 }
 0x8e8   :  { %4249 = vadd.xlane.f32.xlu0 %v4248_v18 }
 0x8ea   :  { %4252 = vadd.xlane.f32.xlu1 %v4251_v14 }
 0x8ec   :  { %4255 = vadd.xlane.f32.xlu0 %v4254_v25 }
 0x8ed   :  { %v4177_v33 = vpop.xlane.xlu0 %4176 }
 0x8ee   :  { %v4208_v62 = vmul.f32 0.03125, %v4177_v33  ;;  %4258 = vadd.xlane.f32.xlu1 %v4257_v39 }
 0x8ef   :  { %v4180_v30 = vpop.xlane.xlu1 %4179 }
 0x8f0   :  { %v9334_v11 = vsub.f32 %v9231_v51, %v4208_v62  ;;  %v4209_v15 = vmul.f32 0.03125, %v4180_v30  ;;  %4261 = vadd.xlane.f32.xlu0 %v4260_v9 }
 0x8f1   :  { %v4183_v60 = vpop.xlane.xlu0 %4182 }
 0x8f2   :  { %v9340_v40 = vsub.f32 %v9243_v41, %v4209_v15  ;;  %v4210_v58 = vmul.f32 0.03125, %v4183_v60  ;;  %4264 = vadd.xlane.f32.xlu1 %v4263_v44  ;;  %v4240_v51 = vmul.f32 %v9334_v11, %v9334_v11 }
 0x8f3   :  { %v4186_v20 = vpop.xlane.xlu1 %4185 }
 0x8f4   :  { %v9346_v0 = vsub.f32 %v9238_v13, %v4210_v58  ;;  %v4211_v49 = vmul.f32 0.03125, %v4186_v20  ;;  %4267 = vadd.xlane.f32.xlu0 %v4266_v56  ;;  %v4241_v45 = vmul.f32 %v9340_v40, %v9340_v40  ;;  %v4272_v36 = vsel %vm495_vm1, %v4240_v51, 0.0 }
 0x8f6   :  { %v9352_v41 = vsub.f32 %v9250_v42, %v4211_v49  ;;  %4270 = vadd.xlane.f32.xlu1 %v4269_v55  ;;  %v4242_v17 = vmul.f32 %v9346_v0, %v9346_v0  ;;  %v4275_v13 = vsel %vm495_vm1, %v4241_v45, 0.0  ;;  %v6112_v42 = vld [vmem:[%s9834_s18] sm:$0xff]  }
 0x8f7   :  { %5971 = vmatprep.subr.bf16.mxu1 %v6112_v42  ;;  %v9395_v55 = vld [vmem:[%s9832_s16] ss:$0 sm:$0xff] }
 0x8f8   :  { %4273 = vadd.xlane.f32.xlu0 %v4272_v36  ;;  %v4243_v43 = vmul.f32 %v9352_v41, %v9352_v41  ;;  %v4278_v2 = vsel %vm495_vm1, %v4242_v17, 0.0  ;;  %5972 = vmatpush3.bf16.msra.mxu1 %v6112_v42 }
 0x8f9   :  { %5973 = vmatprep.subr.bf16.mxu1 %v6113_v12 }
 0x8fa   :  { %4276 = vadd.xlane.f32.xlu1 %v4275_v13  ;;  %v4281_v61 = vsel %vm495_vm1, %v4243_v43, 0.0 }
 0x8fc   :  { %4279 = vadd.xlane.f32.xlu0 %v4278_v2  ;;  %5974 = vmatpush3.bf16.msra.mxu1 %v6113_v12 }
 0x8fe   :  { %4282 = vadd.xlane.f32.xlu1 %v4281_v61 }
 0x96d   :  { %v4189_v34 = vpop.xlane.xlu0 %4188 }
 0x96e   :  { %v4212_v6 = vmul.f32 0.03125, %v4189_v34 }
 0x96f   :  { %v4192_v24 = vpop.xlane.xlu1 %4191 }
 0x970   :  { %v9369_v50 = vsub.f32 %v9263_v32, %v4212_v6  ;;  %v4213_v38 = vmul.f32 0.03125, %v4192_v24 }
 0x971   :  { %v4195_v47 = vpop.xlane.xlu0 %4194 }
 0x972   :  { %v9372_v48 = vsub.f32 %v9278_v29, %v4213_v38  ;;  %v4214_v8 = vmul.f32 0.03125, %v4195_v47  ;;  %v4244_v28 = vmul.f32 %v9369_v50, %v9369_v50  ;;  %v9403_v47 = vld [vmem:[%s9833_s17] ss:$0 sm:$0xff] }
 0x973   :  { %v4198_v10 = vpop.xlane.xlu1 %4197 }
 0x974   :  { %v9377_v37 = vsub.f32 %v9273_v1, %v4214_v8  ;;  %v4215_v35 = vmul.f32 0.03125, %v4198_v10  ;;  %v4284_v7 = vsel %vm495_vm1, %v4244_v28, 0.0  ;;  %v4245_v32 = vmul.f32 %v9372_v48, %v9372_v48 }
 0x975   :  { %4285 = vadd.xlane.f32.xlu0 %v4284_v7  ;;  %v4250_v53 = vpop.xlane.xlu0 %4249 }
 0x976   :  { %v9383_v54 = vsub.f32 %v9288_v46, %v4215_v35  ;;  %v4296_v29 = vmul.f32 0.03125, %v4250_v53  ;;  %v4287_v18 = vsel %vm495_vm1, %v4245_v32, 0.0  ;;  %v4246_v3 = vmul.f32 %v9377_v37, %v9377_v37 }
 0x977   :  { %4288 = vadd.xlane.f32.xlu1 %v4287_v18  ;;  %v4253_v1 = vpop.xlane.xlu1 %4252 }
 0x978   :  { %v4312_v23 = vadd.f32 1e-05, %v4296_v29  ;;  %v4297_v14 = vmul.f32 0.03125, %v4253_v1  ;;  %v4290_v59 = vsel %vm495_vm1, %v4246_v3, 0.0  ;;  %v4247_v25 = vmul.f32 %v9383_v54, %v9383_v54 }
 0x979   :  { %4291 = vadd.xlane.f32.xlu0 %v4290_v59  ;;  %v4256_v63 = vpop.xlane.xlu0 %4255 }
 0x97a   :  { %6406 = vrsqrt.f32 %v4312_v23  ;;  %v4313_v46 = vadd.f32 1e-05, %v4297_v14  ;;  %v4298_v33 = vmul.f32 0.03125, %v4256_v63  ;;  %v4293_v39 = vsel %vm495_vm1, %v4247_v25, 0.0 }
 0x97b   :  { %4294 = vadd.xlane.f32.xlu1 %v4293_v39  ;;  %v4259_v52 = vpop.xlane.xlu1 %4258 }
 0x97c   :  { %6408 = vrsqrt.f32 %v4313_v46  ;;  %v4314_v62 = vadd.f32 1e-05, %v4298_v33  ;;  %v4299_v30 = vmul.f32 0.03125, %v4259_v52 }
 0x97d   :  { %v4262_v9 = vpop.xlane.xlu0 %4261 }
 0x97e   :  { %6410 = vrsqrt.f32 %v4314_v62  ;;  %v4315_v57 = vadd.f32 1e-05, %v4299_v30  ;;  %v4300_v15 = vmul.f32 0.03125, %v4262_v9 }
 0x97f   :  { %v4265_v60 = vpop.xlane.xlu1 %4264 }
 0x980   :  { %6412 = vrsqrt.f32 %v4315_v57  ;;  %v4316_v44 = vadd.f32 1e-05, %v4300_v15  ;;  %v4301_v22 = vmul.f32 0.03125, %v4265_v60 }
 0x981   :  { %v4268_v58 = vpop.xlane.xlu0 %4267 }
 0x982   :  { %6414 = vrsqrt.f32 %v4316_v44  ;;  %v4317_v20 = vadd.f32 1e-05, %v4301_v22  ;;  %v4302_v56 = vmul.f32 0.03125, %v4268_v58 }
 0x983   :  { %v4271_v51 = vpop.xlane.xlu1 %4270 }
 0x984   :  { %v6407_v49 = vpop.eup %6406  ;;  %6416 = vrsqrt.f32 %v4317_v20  ;;  %v4318_v45 = vadd.f32 1e-05, %v4302_v56  ;;  %v4303_v36 = vmul.f32 0.03125, %v4271_v51 }
 0x985   :  { %v4344_v17 = vmul.f32 %v6407_v49, %v9268_v21  ;;  %v4274_v13 = vpop.xlane.xlu0 %4273 }
 0x986   :  { %v6409_v43 = vpop.eup %6408  ;;  %6418 = vrsqrt.f32 %v4318_v45  ;;  %v4319_v2 = vadd.f32 1e-05, %v4303_v36  ;;  %v4304_v61 = vmul.f32 0.03125, %v4274_v13 }
 0x987   :  { %v4345_v42 = vmul.f32 %v6409_v43, %v9283_v26  ;;  %v4277_v12 = vpop.xlane.xlu1 %4276  ;;  %v4366_v34 = vmul.f32 %v9395_v55, %v4344_v17 }
 0x988   :  { %v6411_v6 = vpop.eup %6410  ;;  %6420 = vrsqrt.f32 %v4319_v2  ;;  %v4320_v24 = vadd.f32 1e-05, %v4304_v61  ;;  %v4305_v38 = vmul.f32 0.03125, %v4277_v12 }
 0x989   :  { %v4346_v21 = vmul.f32 %v6411_v6, %v9293_v31  ;;  %v4280_v8 = vpop.xlane.xlu0 %4279  ;;  %v4367_v28 = vmul.f32 %v9395_v55, %v4345_v42  ;;  %v9410_v29 = vadd.f32 %v9403_v47, %v4366_v34  ;;  %v6114_v34 = vld [vmem:[%s9836_s20] sm:$0xff]   ;;  %v6115_v6 = vld [vmem:[%s9836_s20 + $0x8] sm:$0xff]  }
 0x98a   :  { %v6413_v10 = vpop.eup %6412  ;;  %6422 = vrsqrt.f32 %v4320_v24  ;;  %v4321_v26 = vadd.f32 1e-05, %v4305_v38  ;;  %v4306_v35 = vmul.f32 0.03125, %v4280_v8  ;;  %5991 = vmatprep.subr.bf16.mxu0 %v6114_v34  ;;  %v6116_v38 = vld [vmem:[%s9836_s20 + $0x10] sm:$0xff]  }
 0x98b   :  { %v4368_v7 = vmul.f32 %v9395_v55, %v4346_v21  ;;  %v4347_v32 = vmul.f32 %v6413_v10, %v9300_v5  ;;  %v4283_v53 = vpop.xlane.xlu1 %4282  ;;  %v9413_v18 = vadd.f32 %v9403_v47, %v4367_v28  ;;  %5992 = vmatpush3.bf16.msra.mxu0 %v6114_v34  ;;  %v6117_v21 = vld [vmem:[%s9836_s20 + $0x18] sm:$0xff]  }
 0x98c   :  { %v6415_v3 = vpop.eup %6414  ;;  %6424 = vrsqrt.f32 %v4321_v26  ;;  %v4322_v31 = vadd.f32 1e-05, %v4306_v35  ;;  %v4307_v1 = vmul.f32 0.03125, %v4283_v53  ;;  %5993 = vmatprep.subr.bf16.mxu0 %v6115_v6 }
 0x98d   :  { %v4369_v23 = vmul.f32 %v9395_v55, %v4347_v32  ;;  %v4348_v14 = vmul.f32 %v6415_v3, %v9307_v19  ;;  %v4404_v59 = vpack.c.bf16 %v9413_v18, %v9410_v29  ;;  %v9422_v46 = vadd.f32 %v9403_v47, %v4368_v7 }
 0x98e   :  { %v6417_v25 = vpop.eup %6416  ;;  %6426 = vrsqrt.f32 %v4322_v31  ;;  %v4323_v5 = vadd.f32 1e-05, %v4307_v1 }
 0x98f   :  { %v4349_v63 = vmul.f32 %v6417_v25, %v9313_v16  ;;  %5975 = vmatprep.mubr.msk.bf16.mxu1 %vm495_vm1, %v4404_v59  ;;  %v9425_v33 = vadd.f32 %v9403_v47, %v4369_v23  ;;  %v4370_v39 = vmul.f32 %v9395_v55, %v4348_v14  ;;  %5994 = vmatpush3.bf16.msra.mxu0 %v6115_v6 }
 0x990   :  { %v6419_v52 = vpop.eup %6418  ;;  %6428 = vrsqrt.f32 %v4323_v5  ;;  %5995 = vmatprep.subr.bf16.mxu0 %v6116_v38 }
 0x991   :  { %v4350_v19 = vmul.f32 %v6419_v52, %v9319_v4  ;;  %v4405_v62 = vpack.c.bf16 %v9425_v33, %v9422_v46  ;;  %v4371_v30 = vmul.f32 %v9395_v55, %v4349_v63  ;;  %v9435_v57 = vadd.f32 %v9403_v47, %v4370_v39 }
 0x992   :  { %v6421_v16 = vpop.eup %6420 }
 0x993   :  { %v4351_v9 = vmul.f32 %v6421_v16, %v9325_v27  ;;  %5976 = vmatmul.mubr.msk.bf16.vlgmr.msra.gmra.mrb[120].mxu1 %vm495_vm1, %v4405_v62  ;;  %v9438_v15 = vadd.f32 %v9403_v47, %v4371_v30  ;;  %v4372_v60 = vmul.f32 %v9395_v55, %v4350_v19  ;;  %5996 = vmatpush3.bf16.msra.mxu0 %v6116_v38 }
 0x994   :  { %v6423_v44 = vpop.eup %6422  ;;  %5997 = vmatprep.subr.bf16.mxu0 %v6117_v21 }
 0x995   :  { %v4352_v4 = vmul.f32 %v6423_v44, %v9334_v11  ;;  %v4406_v22 = vpack.c.bf16 %v9438_v15, %v9435_v57  ;;  %v4373_v58 = vmul.f32 %v9395_v55, %v4351_v9  ;;  %v9448_v56 = vadd.f32 %v9403_v47, %v4372_v60 }
 0x996   :  { %v6425_v20 = vpop.eup %6424 }
 0x997   :  { %v4353_v27 = vmul.f32 %v6425_v20, %v9340_v40  ;;  %5979 = vmatprep.mubr.msk.bf16.mxu1 %vm495_vm1, %v4406_v22  ;;  %v9451_v51 = vadd.f32 %v9403_v47, %v4373_v58  ;;  %v4374_v49 = vmul.f32 %v9395_v55, %v4352_v4  ;;  %5998 = vmatpush3.bf16.msra.mxu0 %v6117_v21  ;;  %v5208_v4 = vld [vmem:[%s9906_s5] ss:$0 sm:$0xff] }
 0x998   :  { %v6427_v45 = vpop.eup %6426 }
 0x999   :  { %v4354_v11 = vmul.f32 %v6427_v45, %v9346_v0  ;;  %v4407_v36 = vpack.c.bf16 %v9451_v51, %v9448_v56  ;;  %v4375_v17 = vmul.f32 %v9395_v55, %v4353_v27  ;;  %v9461_v43 = vadd.f32 %v9403_v47, %v4374_v49 }
 0x99a   :  { %v6429_v13 = vpop.eup %6428 }
 0x99b   :  { %v4355_v40 = vmul.f32 %v6429_v13, %v9352_v41  ;;  %5980 = vmatmul.mubr.msk.bf16.gmra.mrb[124].mxu1 %vm495_vm1, %v4407_v36  ;;  %v9464_v2 = vadd.f32 %v9403_v47, %v4375_v17  ;;  %v4376_v61 = vmul.f32 %v9395_v55, %v4354_v11 }
 0x99d   :  { %v4408_v0 = vpack.c.bf16 %v9464_v2, %v9461_v43  ;;  %v4377_v42 = vmul.f32 %v9395_v55, %v4355_v40  ;;  %v9472_v12 = vadd.f32 %v9403_v47, %v4376_v61 }
 0x99f   :  { %5983 = vmatprep.mubr.msk.bf16.mxu1 %vm495_vm1, %v4408_v0  ;;  %v9475_v41 = vadd.f32 %v9403_v47, %v4377_v42 }
 0x9a1   :  { %v4409_v24 = vpack.c.bf16 %v9475_v41, %v9472_v12 }
 0x9a3   :  { %5984 = vmatmul.mubr.msk.bf16.gmra.mrb[128].mxu1 %vm495_vm1, %v4409_v24 }
 0xa02   :  { %v4286_v8 = vpop.xlane.xlu0 %4285 }
 0xa03   :  { %v4308_v28 = vmul.f32 0.03125, %v4286_v8 }
 0xa04   :  { %v4289_v10 = vpop.xlane.xlu1 %4288 }
 0xa05   :  { %v4324_v26 = vadd.f32 1e-05, %v4308_v28  ;;  %v4309_v35 = vmul.f32 0.03125, %v4289_v10 }
 0xa06   :  { %v4292_v7 = vpop.xlane.xlu0 %4291 }
 0xa07   :  { %6430 = vrsqrt.f32 %v4324_v26  ;;  %v4325_v32 = vadd.f32 1e-05, %v4309_v35  ;;  %v4310_v53 = vmul.f32 0.03125, %v4292_v7 }
 0xa08   :  { %v4295_v3 = vpop.xlane.xlu1 %4294 }
 0xa09   :  { %6432 = vrsqrt.f32 %v4325_v32  ;;  %v4326_v31 = vadd.f32 1e-05, %v4310_v53  ;;  %v4311_v1 = vmul.f32 0.03125, %v4295_v3 }
 0xa0b   :  { %6434 = vrsqrt.f32 %v4326_v31  ;;  %v4327_v23 = vadd.f32 1e-05, %v4311_v1 }
 0xa0d   :  { %6436 = vrsqrt.f32 %v4327_v23 }
 0xa11   :  { %v6431_v14 = vpop.eup %6430 }
 0xa12   :  { %v4356_v59 = vmul.f32 %v6431_v14, %v9369_v50 }
 0xa13   :  { %v6433_v25 = vpop.eup %6432 }
 0xa14   :  { %v4357_v5 = vmul.f32 %v6433_v25, %v9372_v48  ;;  %v4378_v63 = vmul.f32 %v9395_v55, %v4356_v59 }
 0xa15   :  { %v6435_v39 = vpop.eup %6434 }
 0xa16   :  { %v4358_v52 = vmul.f32 %v6435_v39, %v9377_v37  ;;  %v4379_v19 = vmul.f32 %v9395_v55, %v4357_v5  ;;  %v9499_v16 = vadd.f32 %v9403_v47, %v4378_v63 }
 0xa17   :  { %v6437_v62 = vpop.eup %6436 }
 0xa18   :  { %v4359_v30 = vmul.f32 %v6437_v62, %v9383_v54  ;;  %v9502_v9 = vadd.f32 %v9403_v47, %v4379_v19  ;;  %v4380_v50 = vmul.f32 %v9395_v55, %v4358_v52 }
 0xa1a   :  { %v4410_v48 = vpack.c.bf16 %v9502_v9, %v9499_v16  ;;  %v4381_v60 = vmul.f32 %v9395_v55, %v4359_v30  ;;  %v9510_v37 = vadd.f32 %v9403_v47, %v4380_v50 }
 0xa1c   :  { %5987 = vmatprep.mubr.msk.bf16.mxu1 %vm495_vm1, %v4410_v48  ;;  %v9513_v54 = vadd.f32 %v9403_v47, %v4381_v60 }
 0xa1e   :  { %v4411_v44 = vpack.c.bf16 %v9513_v54, %v9510_v37 }
 0xa20   :  { %5988 = vmatmul.mubr.msk.bf16.gmra.mrb[132].mxu1 %vm495_vm1, %v4411_v44 }
 0xa66   :  { %v5977_v22 = vpop.f32.mrb[120].mxu1 }
 0xa67   :  { %v4502_v58 = vadd.f32 %v5977_v22, %v5208_v4  ;;  %v4493_v55 = vpop.f32.mrb[121].mxu1 }
 0xa68   :  { %v4494_v20 = vadd.f32 %v5208_v4, %v4493_v55  ;;  %v5978_v27 = vpop.f32.mrb[122].mxu1 }
 0xa69   :  { %v4505_v49 = vadd.f32 %v5978_v27, %v5208_v4  ;;  %v4496_v45 = vpop.f32.mrb[123].mxu1  ;;  %v4558_v36 = vmax.f32 %v4502_v58, 0.0 }
 0xa6a   :  { %v4497_v11 = vadd.f32 %v5208_v4, %v4496_v45  ;;  %v4556_v17 = vmax.f32 %v4494_v20, 0.0 }
 0xa6b   :  { %v4559_v47 = vmax.f32 %v4505_v49, 0.0 }
 0xa6c   :  { %v4557_v13 = vmax.f32 %v4497_v11, 0.0 }
 0xa6d   :  { %v4573_v40 = vpack.c.bf16 %v4559_v47, %v4558_v36  ;;  %v9532_v47 = vld [vmem:[%s9837_s21] ss:$0 sm:$0xff] }
 0xa6e   :  { %v4572_v61 = vpack.c.bf16 %v4557_v13, %v4556_v17  ;;  %v5981_v0 = vpop.f32.mrb[124].mxu1 }
 0xa6f   :  { %v4518_v42 = vadd.f32 %v5981_v0, %v5208_v4  ;;  %v4509_v34 = vpop.f32.mrb[125].mxu1 }
 0xa70   :  { %v4510_v6 = vadd.f32 %v5208_v4, %v4509_v34  ;;  %v5982_v24 = vpop.f32.mrb[126].mxu1  ;;  %5999 = vmatprep.mubr.msk.bf16.mxu0 %vm1522_vm6, %v4572_v61 }
 0xa71   :  { %v4521_v38 = vadd.f32 %v5982_v24, %v5208_v4  ;;  %v4512_v21 = vpop.f32.mrb[127].mxu1  ;;  %6000 = vmatmul.mubr.msk.bf16.vlgmr.msra.gmra.mrb[104].mxu0 %vm1522_vm6, %v4573_v40  ;;  %v4562_v28 = vmax.f32 %v4518_v42, 0.0 }
 0xa72   :  { %v4513_v8 = vadd.f32 %v5208_v4, %v4512_v21  ;;  %v4560_v26 = vmax.f32 %v4510_v6, 0.0 }
 0xa73   :  { %v4563_v10 = vmax.f32 %v4521_v38, 0.0 }
 0xa74   :  { %v4561_v35 = vmax.f32 %v4513_v8, 0.0 }
 0xa75   :  { %v4575_v7 = vpack.c.bf16 %v4563_v10, %v4562_v28 }
 0xa76   :  { %v4574_v32 = vpack.c.bf16 %v4561_v35, %v4560_v26  ;;  %v5985_v53 = vpop.f32.mrb[128].mxu1 }
 0xa77   :  { %v4534_v3 = vadd.f32 %v5985_v53, %v5208_v4  ;;  %v4525_v31 = vpop.f32.mrb[129].mxu1 }
 0xa78   :  { %v4526_v1 = vadd.f32 %v5208_v4, %v4525_v31  ;;  %v5986_v23 = vpop.f32.mrb[130].mxu1  ;;  %6003 = vmatprep.mubr.msk.bf16.mxu0 %vm1522_vm6, %v4574_v32 }
 0xa79   :  { %v4537_v14 = vadd.f32 %v5986_v23, %v5208_v4  ;;  %v4528_v59 = vpop.f32.mrb[131].mxu1  ;;  %6004 = vmatmul.mubr.msk.bf16.gmra.mrb[108].mxu0 %vm1522_vm6, %v4575_v7  ;;  %v4566_v5 = vmax.f32 %v4534_v3, 0.0 }
 0xa7a   :  { %v4529_v25 = vadd.f32 %v5208_v4, %v4528_v59  ;;  %v4564_v39 = vmax.f32 %v4526_v1, 0.0 }
 0xa7b   :  { %v4567_v63 = vmax.f32 %v4537_v14, 0.0 }
 0xa7c   :  { %v4565_v52 = vmax.f32 %v4529_v25, 0.0 }
 0xa7d   :  { %v4577_v19 = vpack.c.bf16 %v4567_v63, %v4566_v5 }
 0xa7e   :  { %v4576_v62 = vpack.c.bf16 %v4565_v52, %v4564_v39 }
 0xa80   :  { %6007 = vmatprep.mubr.msk.bf16.mxu0 %vm1522_vm6, %v4576_v62 }
 0xa81   :  { %6008 = vmatmul.mubr.msk.bf16.gmra.mrb[112].mxu0 %vm1522_vm6, %v4577_v19 }
 0xaf3   :  { %v5989_v30 = vpop.f32.mrb[132].mxu1 }
 0xaf4   :  { %v4550_v50 = vadd.f32 %v5989_v30, %v5208_v4  ;;  %v4541_v48 = vpop.f32.mrb[133].mxu1 }
 0xaf5   :  { %v4542_v60 = vadd.f32 %v5208_v4, %v4541_v48  ;;  %v5990_v44 = vpop.f32.mrb[134].mxu1 }
 0xaf6   :  { %v4553_v22 = vadd.f32 %v5990_v44, %v5208_v4  ;;  %v4544_v58 = vpop.f32.mrb[135].mxu1  ;;  %v4570_v20 = vmax.f32 %v4550_v50, 0.0 }
 0xaf7   :  { %v4545_v55 = vadd.f32 %v5208_v4, %v4544_v58  ;;  %v4568_v49 = vmax.f32 %v4542_v60, 0.0 }
 0xaf8   :  { %v4571_v27 = vmax.f32 %v4553_v22, 0.0 }
 0xaf9   :  { %v4569_v45 = vmax.f32 %v4545_v55, 0.0 }
 0xafa   :  { %v4579_v11 = vpack.c.bf16 %v4571_v27, %v4570_v20 }
 0xafb   :  { %v4578_v36 = vpack.c.bf16 %v4569_v45, %v4568_v49 }
 0xafd   :  { %6011 = vmatprep.mubr.msk.bf16.mxu0 %vm1522_vm6, %v4578_v36 }
 0xafe   :  { %6012 = vmatmul.mubr.msk.bf16.gmra.mrb[116].mxu0 %vm1522_vm6, %v4579_v11 }
 0xb44   :  { %v6001_v17 = vpop.f32.mrb[104].mxu0 }
 0xb45   :  { %v4686_v13 = vadd.f32 %v6001_v17, %v9532_v47  ;;  %v4677_v40 = vpop.f32.mrb[105].mxu0 }
 0xb46   :  { %v6002_v4 = vpop.f32.mrb[106].mxu0  ;;  %v4678_v44 = vadd.f32 %v9532_v47, %v4677_v40 }
 0xb47   :  { %v9536_v61 = vadd.f32 %v4686_v13, %v9422_v46  ;;  %v4689_v0 = vadd.f32 %v6002_v4, %v9532_v47  ;;  %v4680_v42 = vpop.f32.mrb[107].mxu0 }
 0xb49   :  { %v9540_v34 = vadd.f32 %v4689_v0, %v9425_v33  ;;  %v4764_v6 = vsel %vm495_vm1, %v9536_v61, 0.0 }
 0xb4a   :  { %4765 = vadd.xlane.f32.xlu0 %v4764_v6 }
 0xb4b   :  { %v4767_v24 = vsel %vm495_vm1, %v9540_v34, 0.0 }
 0xb4c   :  { %4768 = vadd.xlane.f32.xlu1 %v4767_v24  ;;  %v6005_v38 = vpop.f32.mrb[108].mxu0 }
 0xb4d   :  { %v4702_v21 = vadd.f32 %v6005_v38, %v9532_v47  ;;  %v4693_v8 = vpop.f32.mrb[109].mxu0 }
 0xb4e   :  { %v4694_v46 = vadd.f32 %v9532_v47, %v4693_v8  ;;  %v6006_v28 = vpop.f32.mrb[110].mxu0 }
 0xb4f   :  { %v9549_v10 = vadd.f32 %v4702_v21, %v9448_v56  ;;  %v4705_v33 = vadd.f32 %v6006_v28, %v9532_v47  ;;  %v4696_v26 = vpop.f32.mrb[111].mxu0 }
 0xb50   :  { %v4697_v35 = vadd.f32 %v9532_v47, %v4696_v26  ;;  %v9554_v7 = vadd.f32 %v4694_v46, %v9435_v57 }
 0xb51   :  { %v9557_v32 = vadd.f32 %v4705_v33, %v9451_v51  ;;  %v4776_v53 = vsel %vm495_vm1, %v9549_v10, 0.0 }
 0xb52   :  { %4777 = vadd.xlane.f32.xlu0 %v4776_v53  ;;  %v9562_v3 = vadd.f32 %v4697_v35, %v9438_v15  ;;  %v4770_v57 = vsel %vm495_vm1, %v9554_v7, 0.0 }
 0xb53   :  { %v4779_v56 = vsel %vm495_vm1, %v9557_v32, 0.0 }
 0xb54   :  { %4780 = vadd.xlane.f32.xlu1 %v4779_v56  ;;  %v6009_v31 = vpop.f32.mrb[112].mxu0  ;;  %v4773_v25 = vsel %vm495_vm1, %v9562_v3, 0.0 }
 0xb55   :  { %v4718_v1 = vadd.f32 %v6009_v31, %v9532_v47  ;;  %v4709_v23 = vpop.f32.mrb[113].mxu0 }
 0xb56   :  { %4771 = vadd.xlane.f32.xlu0 %v4770_v57  ;;  %v6010_v51 = vpop.f32.mrb[114].mxu0 }
 0xb57   :  { %v9570_v14 = vadd.f32 %v4718_v1, %v9472_v12  ;;  %v4721_v59 = vadd.f32 %v6010_v51, %v9532_v47  ;;  %v4712_v15 = vpop.f32.mrb[115].mxu0 }
 0xb58   :  { %4774 = vadd.xlane.f32.xlu1 %v4773_v25 }
 0xb59   :  { %v9576_v5 = vadd.f32 %v4721_v59, %v9475_v41  ;;  %v4788_v63 = vsel %vm495_vm1, %v9570_v14, 0.0 }
 0xb5a   :  { %4789 = vadd.xlane.f32.xlu0 %v4788_v63 }
 0xb5b   :  { %v4791_v39 = vsel %vm495_vm1, %v9576_v5, 0.0 }
 0xb5c   :  { %4792 = vadd.xlane.f32.xlu1 %v4791_v39 }
 0xbd1   :  { %v6013_v12 = vpop.f32.mrb[116].mxu0 }
 0xbd2   :  { %v4725_v52 = vpop.f32.mrb[117].mxu0  ;;  %v4734_v19 = vadd.f32 %v6013_v12, %v9532_v47 }
 0xbd3   :  { %v4726_v62 = vadd.f32 %v9532_v47, %v4725_v52  ;;  %v6014_v30 = vpop.f32.mrb[118].mxu0 }
 0xbd4   :  { %v4728_v50 = vpop.f32.mrb[119].mxu0  ;;  %v4737_v41 = vadd.f32 %v6014_v30, %v9532_v47  ;;  %v9591_v22 = vadd.f32 %v4734_v19, %v9510_v37  ;;  %v9605_v37 = vadd.f32 %v4678_v44, %v9410_v29 }
 0xbd5   :  { %v9585_v48 = vadd.f32 %v4726_v62, %v9499_v16  ;;  %v4729_v60 = vadd.f32 %v9532_v47, %v4728_v50  ;;  %v4681_v16 = vadd.f32 %v9532_v47, %v4680_v42 }
 0xbd6   :  { %v9600_v27 = vadd.f32 %v4737_v41, %v9513_v54  ;;  %v4800_v36 = vsel %vm495_vm1, %v9591_v22, 0.0  ;;  %v4713_v54 = vadd.f32 %v9532_v47, %v4712_v15  ;;  %v4758_v42 = vsel %vm495_vm1, %v9605_v37, 0.0 }
 0xbd7   :  { %v9594_v58 = vadd.f32 %v4729_v60, %v9502_v9  ;;  %v4794_v55 = vsel %vm495_vm1, %v9585_v48, 0.0  ;;  %v4766_v20 = vpop.xlane.xlu0 %4765  ;;  %v4710_v9 = vadd.f32 %v9532_v47, %v4709_v23  ;;  %v9611_v17 = vadd.f32 %v4681_v16, %v9413_v18 }
 0xbd8   :  { %4795 = vadd.xlane.f32.xlu0 %v4794_v55  ;;  %v4808_v11 = vmul.f32 0.03125, %v4766_v20  ;;  %v4803_v40 = vsel %vm495_vm1, %v9600_v27, 0.0  ;;  %v9625_v18 = vadd.f32 %v4713_v54, %v9464_v2 }
 0xbd9   :  { %v4797_v49 = vsel %vm495_vm1, %v9594_v58, 0.0  ;;  %v4769_v45 = vpop.xlane.xlu1 %4768  ;;  %v9617_v29 = vadd.f32 %v4710_v9, %v9461_v43  ;;  %v4761_v24 = vsel %vm495_vm1, %v9611_v17, 0.0 }
 0xbda   :  { %4798 = vadd.xlane.f32.xlu1 %v4797_v49  ;;  %v4809_v13 = vmul.f32 0.03125, %v4769_v45  ;;  %v9620_v4 = vsub.f32 %v9536_v61, %v4808_v11 }
 0xbdb   :  { %v4782_v61 = vsel %vm495_vm1, %v9617_v29, 0.0 }
 0xbdc   :  { %4801 = vadd.xlane.f32.xlu0 %v4800_v36  ;;  %v9628_v47 = vsub.f32 %v9540_v34, %v4809_v13  ;;  %v4840_v21 = vmul.f32 %v9620_v4, %v9620_v4  ;;  %v4785_v34 = vsel %vm495_vm1, %v9625_v18, 0.0 }
 0xbde   :  { %4804 = vadd.xlane.f32.xlu1 %v4803_v40  ;;  %v4841_v28 = vmul.f32 %v9628_v47, %v9628_v47  ;;  %v4860_v56 = vsel %vm495_vm1, %v4840_v21, 0.0 }
 0xbdf   :  { %v4778_v0 = vpop.xlane.xlu0 %4777 }
 0xbe0   :  { %4759 = vadd.xlane.f32.xlu0 %v4758_v42  ;;  %v4812_v43 = vmul.f32 0.03125, %v4778_v0  ;;  %v4863_v51 = vsel %vm495_vm1, %v4841_v28, 0.0 }
 0xbe1   :  { %v4781_v6 = vpop.xlane.xlu1 %4780 }
 0xbe2   :  { %4762 = vadd.xlane.f32.xlu1 %v4761_v24  ;;  %v4813_v2 = vmul.f32 0.03125, %v4781_v6  ;;  %v9644_v35 = vsub.f32 %v9549_v10, %v4812_v43 }
 0xbe3   :  { %v4772_v38 = vpop.xlane.xlu0 %4771 }
 0xbe4   :  { %v4810_v8 = vmul.f32 0.03125, %v4772_v38  ;;  %4783 = vadd.xlane.f32.xlu0 %v4782_v61  ;;  %v9653_v57 = vsub.f32 %v9557_v32, %v4813_v2  ;;  %v4844_v25 = vmul.f32 %v9644_v35, %v9644_v35 }
 0xbe5   :  { %v4775_v46 = vpop.xlane.xlu1 %4774 }
 0xbe6   :  { %v9641_v33 = vsub.f32 %v9554_v7, %v4810_v8  ;;  %v4811_v26 = vmul.f32 0.03125, %v4775_v46  ;;  %4786 = vadd.xlane.f32.xlu1 %v4785_v34  ;;  %v4845_v39 = vmul.f32 %v9653_v57, %v9653_v57  ;;  %v4872_v12 = vsel %vm495_vm1, %v4844_v25, 0.0 }
 0xbe7   :  { %v4790_v53 = vpop.xlane.xlu0 %4789 }
 0xbe8   :  { %v9648_v31 = vsub.f32 %v9562_v3, %v4811_v26  ;;  %v4816_v1 = vmul.f32 0.03125, %v4790_v53  ;;  %4861 = vadd.xlane.f32.xlu0 %v4860_v56  ;;  %v4842_v23 = vmul.f32 %v9641_v33, %v9641_v33 }
 0xbe9   :  { %v4793_v7 = vpop.xlane.xlu1 %4792 }
 0xbea   :  { %v4817_v59 = vmul.f32 0.03125, %v4793_v7  ;;  %4864 = vadd.xlane.f32.xlu1 %v4863_v51  ;;  %v4866_v10 = vsel %vm495_vm1, %v4842_v23, 0.0  ;;  %v4843_v15 = vmul.f32 %v9648_v31, %v9648_v31  ;;  %v9660_v3 = vsub.f32 %v9570_v14, %v4816_v1 }
 0xbeb   :  { %v4875_v14 = vsel %vm495_vm1, %v4845_v39, 0.0 }
 0xbec   :  { %4867 = vadd.xlane.f32.xlu0 %v4866_v10  ;;  %v4869_v32 = vsel %vm495_vm1, %v4843_v15, 0.0  ;;  %v9666_v63 = vsub.f32 %v9576_v5, %v4817_v59  ;;  %v4848_v52 = vmul.f32 %v9660_v3, %v9660_v3 }
 0xbee   :  { %4870 = vadd.xlane.f32.xlu1 %v4869_v32  ;;  %v4849_v19 = vmul.f32 %v9666_v63, %v9666_v63  ;;  %v4884_v62 = vsel %vm495_vm1, %v4848_v52, 0.0 }
 0xbf0   :  { %4873 = vadd.xlane.f32.xlu0 %v4872_v12  ;;  %v4887_v5 = vsel %vm495_vm1, %v4849_v19, 0.0 }
 0xbf2   :  { %4876 = vadd.xlane.f32.xlu1 %v4875_v14 }
 0xbf4   :  { %4885 = vadd.xlane.f32.xlu0 %v4884_v62 }
 0xbf6   :  { %4888 = vadd.xlane.f32.xlu1 %v4887_v5 }
 0xc65   :  { %v4796_v30 = vpop.xlane.xlu0 %4795 }
 0xc66   :  { %v4818_v50 = vmul.f32 0.03125, %v4796_v30 }
 0xc67   :  { %v4799_v41 = vpop.xlane.xlu1 %4798 }
 0xc68   :  { %v9679_v60 = vsub.f32 %v9585_v48, %v4818_v50  ;;  %v4819_v44 = vmul.f32 0.03125, %v4799_v41 }
 0xc69   :  { %v4802_v55 = vpop.xlane.xlu0 %4801 }
 0xc6a   :  { %v9682_v20 = vsub.f32 %v9594_v58, %v4819_v44  ;;  %v4820_v16 = vmul.f32 0.03125, %v4802_v55  ;;  %v4850_v49 = vmul.f32 %v9679_v60, %v9679_v60 }
 0xc6b   :  { %v4805_v45 = vpop.xlane.xlu1 %4804 }
 0xc6c   :  { %v9687_v9 = vsub.f32 %v9591_v22, %v4820_v16  ;;  %v4821_v11 = vmul.f32 0.03125, %v4805_v45  ;;  %v4890_v36 = vsel %vm495_vm1, %v4850_v49, 0.0  ;;  %v4851_v48 = vmul.f32 %v9682_v20, %v9682_v20 }
 0xc6d   :  { %4891 = vadd.xlane.f32.xlu0 %v4890_v36  ;;  %v4760_v54 = vpop.xlane.xlu0 %4759 }
 0xc6e   :  { %v9693_v13 = vsub.f32 %v9600_v27, %v4821_v11  ;;  %v4806_v58 = vmul.f32 0.03125, %v4760_v54  ;;  %v4893_v40 = vsel %vm495_vm1, %v4851_v48, 0.0  ;;  %v4852_v0 = vmul.f32 %v9687_v9, %v9687_v9  ;;  %v9730_v54 = vld [vmem:[%s9838_s22] ss:$0 sm:$0xff]  ;;  %s6563_s22 = smov 32  }
 0xc6f   :  { %4894 = vadd.xlane.f32.xlu1 %v4893_v40  ;;  %v4763_v22 = vpop.xlane.xlu1 %4762 }
 0xc70   :  { %v9699_v42 = vsub.f32 %v9605_v37, %v4806_v58  ;;  %v4807_v6 = vmul.f32 0.03125, %v4763_v22  ;;  %v4896_v24 = vsel %vm495_vm1, %v4852_v0, 0.0  ;;  %v4853_v43 = vmul.f32 %v9693_v13, %v9693_v13 }
 0xc71   :  { %4897 = vadd.xlane.f32.xlu0 %v4896_v24  ;;  %v4784_v27 = vpop.xlane.xlu0 %4783 }
 0xc72   :  { %v9705_v38 = vsub.f32 %v9611_v17, %v4807_v6  ;;  %v4814_v61 = vmul.f32 0.03125, %v4784_v27  ;;  %v4899_v21 = vsel %vm495_vm1, %v4853_v43, 0.0  ;;  %v4838_v8 = vmul.f32 %v9699_v42, %v9699_v42 }
 0xc73   :  { %4900 = vadd.xlane.f32.xlu1 %v4899_v21  ;;  %v4787_v37 = vpop.xlane.xlu1 %4786 }
 0xc74   :  { %v9711_v2 = vsub.f32 %v9617_v29, %v4814_v61  ;;  %v4815_v46 = vmul.f32 0.03125, %v4787_v37  ;;  %v4854_v34 = vsel %vm495_vm1, %v4838_v8, 0.0  ;;  %v4839_v28 = vmul.f32 %v9705_v38, %v9705_v38 }
 0xc75   :  { %4855 = vadd.xlane.f32.xlu0 %v4854_v34  ;;  %v4862_v17 = vpop.xlane.xlu0 %4861 }
 0xc76   :  { %v9717_v26 = vsub.f32 %v9625_v18, %v4815_v46  ;;  %v4904_v53 = vmul.f32 0.03125, %v4862_v17  ;;  %v4857_v56 = vsel %vm495_vm1, %v4839_v28, 0.0  ;;  %v4846_v1 = vmul.f32 %v9711_v2, %v9711_v2 }
 0xc77   :  { %4858 = vadd.xlane.f32.xlu1 %v4857_v56  ;;  %v4865_v29 = vpop.xlane.xlu1 %4864 }
 0xc78   :  { %v4920_v23 = vadd.f32 1e-05, %v4904_v53  ;;  %v4905_v7 = vmul.f32 0.03125, %v4865_v29  ;;  %v4878_v51 = vsel %vm495_vm1, %v4846_v1, 0.0  ;;  %v4847_v59 = vmul.f32 %v9717_v26, %v9717_v26 }
 0xc79   :  { %4879 = vadd.xlane.f32.xlu0 %v4878_v51  ;;  %v4868_v10 = vpop.xlane.xlu0 %4867 }
 0xc7a   :  { %6438 = vrsqrt.f32 %v4920_v23  ;;  %v4921_v18 = vadd.f32 1e-05, %v4905_v7  ;;  %v4906_v15 = vmul.f32 0.03125, %v4868_v10  ;;  %v4881_v25 = vsel %vm495_vm1, %v4847_v59, 0.0 }
 0xc7b   :  { %4882 = vadd.xlane.f32.xlu1 %v4881_v25  ;;  %v4871_v32 = vpop.xlane.xlu1 %4870 }
 0xc7c   :  { %6440 = vrsqrt.f32 %v4921_v18  ;;  %v4922_v39 = vadd.f32 1e-05, %v4906_v15  ;;  %v4907_v12 = vmul.f32 0.03125, %v4871_v32 }
 0xc7d   :  { %v4874_v52 = vpop.xlane.xlu0 %4873 }
 0xc7e   :  { %6442 = vrsqrt.f32 %v4922_v39  ;;  %v4923_v14 = vadd.f32 1e-05, %v4907_v12  ;;  %v4908_v19 = vmul.f32 0.03125, %v4874_v52 }
 0xc7f   :  { %v4877_v62 = vpop.xlane.xlu1 %4876 }
 0xc80   :  { %6444 = vrsqrt.f32 %v4923_v14  ;;  %v4924_v5 = vadd.f32 1e-05, %v4908_v19  ;;  %v4909_v30 = vmul.f32 0.03125, %v4877_v62 }
 0xc81   :  { %v4886_v50 = vpop.xlane.xlu0 %4885 }
 0xc82   :  { %6446 = vrsqrt.f32 %v4924_v5  ;;  %v4925_v41 = vadd.f32 1e-05, %v4909_v30  ;;  %v4912_v44 = vmul.f32 0.03125, %v4886_v50 }
 0xc83   :  { %v4889_v55 = vpop.xlane.xlu1 %4888 }
 0xc84   :  { %v6439_v16 = vpop.eup %6438  ;;  %6448 = vrsqrt.f32 %v4925_v41  ;;  %v4928_v49 = vadd.f32 1e-05, %v4912_v44  ;;  %v4913_v45 = vmul.f32 0.03125, %v4889_v55 }
 0xc85   :  { %v4952_v11 = vmul.f32 %v6439_v16, %v9620_v4  ;;  %v9739_v4 = vld [vmem:[%s9839_s23] ss:$0 sm:$0xff]  ;;  %s6564_s23 = smov 64  }
 0xc86   :  { %v6441_v36 = vpop.eup %6440  ;;  %6450 = vrsqrt.f32 %v4928_v49  ;;  %v4929_v48 = vadd.f32 1e-05, %v4913_v45 }
 0xc87   :  { %v4953_v58 = vmul.f32 %v6441_v36, %v9628_v47  ;;  %v4974_v22 = vmul.f32 %v9730_v54, %v4952_v11 }
 0xc88   :  { %v6443_v40 = vpop.eup %6442  ;;  %6452 = vrsqrt.f32 %v4929_v48 }
 0xc89   :  { %v4975_v0 = vmul.f32 %v9730_v54, %v4953_v58  ;;  %v4954_v6 = vmul.f32 %v6443_v40, %v9641_v33  ;;  %v4996_v47 = vadd.f32 %v9739_v4, %v4974_v22 }
 0xc8a   :  { %v6445_v24 = vpop.eup %6444 }
 0xc8b   :  { %v4997_v43 = vadd.f32 %v9739_v4, %v4975_v0  ;;  %v4955_v27 = vmul.f32 %v6445_v24, %v9648_v31  ;;  %v4976_v8 = vmul.f32 %v9730_v54, %v4954_v6 }
 0xc8c   :  { %v6447_v61 = vpop.eup %6446 }
 0xc8d   :  { %5014 = vrot.lane.b32.xlu1 %v4997_v43, %s6563_s22  ;;  %v4977_v21 = vmul.f32 %v9730_v54, %v4955_v27  ;;  %v4956_v33 = vmul.f32 %v6447_v61, %v9644_v35  ;;  %v4998_v31 = vadd.f32 %v9739_v4, %v4976_v8 }
 0xc8e   :  { %v6449_v37 = vpop.eup %6448 }
 0xc8f   :  { %5012 = vrot.lane.b32.xlu0 %v4996_v47, %s6563_s22  ;;  %v4999_v46 = vadd.f32 %v9739_v4, %v4977_v21  ;;  %v4957_v34 = vmul.f32 %v6449_v37, %v9653_v57  ;;  %v4978_v53 = vmul.f32 %v9730_v54, %v4956_v33 }
 0xc90   :  { %v6451_v28 = vpop.eup %6450 }
 0xc91   :  { %5022 = vrot.lane.b32.xlu1 %v4999_v46, %s6564_s23  ;;  %v4979_v17 = vmul.f32 %v9730_v54, %v4957_v34  ;;  %v4960_v56 = vmul.f32 %v6451_v28, %v9660_v3  ;;  %v5000_v23 = vadd.f32 %v9739_v4, %v4978_v53 }
 0xc92   :  { %v6453_v1 = vpop.eup %6452 }
 0xc93   :  { %5020 = vrot.lane.b32.xlu0 %v4998_v31, %s6564_s23  ;;  %v5001_v35 = vadd.f32 %v9739_v4, %v4979_v17  ;;  %v4982_v29 = vmul.f32 %v9730_v54, %v4960_v56  ;;  %v4961_v57 = vmul.f32 %v6453_v1, %v9666_v63 }
 0xc95   :  { %5030 = vrot.lane.b32.xlu1 %v5001_v35, %s6565_s2  ;;  %v5004_v7 = vadd.f32 %v9739_v4, %v4982_v29  ;;  %v4983_v3 = vmul.f32 %v9730_v54, %v4961_v57 }
 0xc97   :  { %5028 = vrot.lane.b32.xlu0 %v5000_v23, %s6565_s2  ;;  %v5005_v51 = vadd.f32 %v9739_v4, %v4983_v3 }
 0xc99   :  { %5036 = vrot.lane.b32.xlu1 %v5004_v7, %s6563_s22 }
 0xc9d   :  { %5038 = vrot.lane.b32.xlu1 %v5005_v51, %s6563_s22 }
 0xcfa   :  { %v4892_v59 = vpop.xlane.xlu0 %4891 }
 0xcfb   :  { %v4914_v10 = vmul.f32 0.03125, %v4892_v59 }
 0xcfc   :  { %v4895_v18 = vpop.xlane.xlu1 %4894 }
 0xcfd   :  { %v4930_v15 = vadd.f32 1e-05, %v4914_v10  ;;  %v4915_v63 = vmul.f32 0.03125, %v4895_v18 }
 0xcfe   :  { %v4898_v25 = vpop.xlane.xlu0 %4897 }
 0xcff   :  { %6454 = vrsqrt.f32 %v4930_v15  ;;  %v4931_v32 = vadd.f32 1e-05, %v4915_v63  ;;  %v4916_v39 = vmul.f32 0.03125, %v4898_v25 }
 0xd00   :  { %v4901_v12 = vpop.xlane.xlu1 %4900 }
 0xd01   :  { %6456 = vrsqrt.f32 %v4931_v32  ;;  %v4932_v52 = vadd.f32 1e-05, %v4916_v39  ;;  %v4917_v14 = vmul.f32 0.03125, %v4901_v12 }
 0xd02   :  { %v4856_v19 = vpop.xlane.xlu0 %4855 }
 0xd03   :  { %6458 = vrsqrt.f32 %v4932_v52  ;;  %v4933_v62 = vadd.f32 1e-05, %v4917_v14  ;;  %v4902_v5 = vmul.f32 0.03125, %v4856_v19 }
 0xd04   :  { %v4859_v30 = vpop.xlane.xlu1 %4858 }
 0xd05   :  { %6460 = vrsqrt.f32 %v4933_v62  ;;  %v4918_v50 = vadd.f32 1e-05, %v4902_v5  ;;  %v4903_v41 = vmul.f32 0.03125, %v4859_v30 }
 0xd06   :  { %v4880_v55 = vpop.xlane.xlu0 %4879 }
 0xd07   :  { %6462 = vrsqrt.f32 %v4918_v50  ;;  %v4919_v44 = vadd.f32 1e-05, %v4903_v41  ;;  %v4910_v23 = vmul.f32 0.03125, %v4880_v55 }
 0xd08   :  { %v4883_v49 = vpop.xlane.xlu1 %4882 }
 0xd09   :  { %v6455_v16 = vpop.eup %6454  ;;  %6464 = vrsqrt.f32 %v4919_v44  ;;  %v4911_v7 = vmul.f32 0.03125, %v4883_v49  ;;  %v4926_v3 = vadd.f32 1e-05, %v4910_v23 }
 0xd0a   :  { %v4962_v45 = vmul.f32 %v6455_v16, %v9679_v60  ;;  %v5013_v40 = vpop.permute.xlu0 %5012 }
 0xd0b   :  { %v6457_v11 = vpop.eup %6456  ;;  %v4927_v51 = vadd.f32 1e-05, %v4911_v7  ;;  %6466 = vrsqrt.f32 %v4926_v3 }
 0xd0c   :  { %v4984_v36 = vmul.f32 %v9730_v54, %v4962_v45  ;;  %v4963_v48 = vmul.f32 %v6457_v11, %v9682_v20  ;;  %v5015_v43 = vpop.permute.xlu1 %5014 }
 0xd0d   :  { %v6459_v58 = vpop.eup %6458  ;;  %6468 = vrsqrt.f32 %v4927_v51 }
 0xd0e   :  { %v5006_v0 = vadd.f32 %v9739_v4, %v4984_v36  ;;  %v4985_v22 = vmul.f32 %v9730_v54, %v4963_v48  ;;  %v4964_v6 = vmul.f32 %v6459_v58, %v9687_v9  ;;  %v5021_v33 = vpop.permute.xlu0 %5020 }
 0xd0f   :  { %v6461_v24 = vpop.eup %6460 }
 0xd10   :  { %5044 = vrot.lane.b32.xlu0 %v5006_v0, %s6564_s23  ;;  %v5007_v27 = vadd.f32 %v9739_v4, %v4985_v22  ;;  %v4986_v60 = vmul.f32 %v9730_v54, %v4964_v6  ;;  %v4965_v61 = vmul.f32 %v6461_v24, %v9693_v13  ;;  %v5023_v13 = vpop.permute.xlu1 %5022 }
 0xd11   :  { %v6463_v47 = vpop.eup %6462 }
 0xd12   :  { %v4950_v20 = vmul.f32 %v6463_v47, %v9699_v42  ;;  %5046 = vrot.lane.b32.xlu1 %v5007_v27, %s6564_s23  ;;  %v5008_v21 = vadd.f32 %v9739_v4, %v4986_v60  ;;  %v4987_v8 = vmul.f32 %v9730_v54, %v4965_v61  ;;  %v5029_v56 = vpop.permute.xlu0 %5028 }
 0xd13   :  { %v6465_v9 = vpop.eup %6464 }
 0xd14   :  { %v4972_v37 = vmul.f32 %v9730_v54, %v4950_v20  ;;  %v4951_v46 = vmul.f32 %v6465_v9, %v9705_v38  ;;  %5052 = vrot.lane.b32.xlu0 %v5008_v21, %s6565_s2  ;;  %v5009_v34 = vadd.f32 %v9739_v4, %v4987_v8  ;;  %v5031_v29 = vpop.permute.xlu1 %5030 }
 0xd15   :  { %v6467_v59 = vpop.eup %6466 }
 0xd16   :  { %v4994_v28 = vadd.f32 %v9739_v4, %v4972_v37  ;;  %v4973_v42 = vmul.f32 %v9730_v54, %v4951_v46  ;;  %5054 = vrot.lane.b32.xlu1 %v5009_v34, %s6565_s2  ;;  %v4958_v18 = vmul.f32 %v6467_v59, %v9711_v2 }
 0xd17   :  { %v6469_v10 = vpop.eup %6468 }
 0xd18   :  { %v5058_v31 = vsel %vm495_vm1, %v4994_v28, %v5013_v40  ;;  %v4995_v17 = vadd.f32 %v9739_v4, %v4973_v42  ;;  %v5037_v15 = vpop.permute.xlu1 %5036  ;;  %v4959_v63 = vmul.f32 %v6469_v10, %v9717_v26  ;;  %v4980_v25 = vmul.f32 %v9730_v54, %v4958_v18 }
 0xd19   :  { %v5060_v53 = vsel %vm1522_vm6, %v5058_v31, %v5021_v33 }
 0xd1a   :  { %v5059_v38 = vsel %vm495_vm1, %v4995_v17, %v5015_v43  ;;  %v5062_v1 = vsel %vm1525_vm5, %v5060_v53, %v5029_v56  ;;  %v4981_v32 = vmul.f32 %v9730_v54, %v4959_v63  ;;  %v5002_v12 = vadd.f32 %v9739_v4, %v4980_v25 }
 0xd1b   :  { %v5061_v35 = vsel %vm1522_vm6, %v5059_v38, %v5023_v13  ;;  %5070 = vst [vmem:[#allocation2] sm:$0xff] %v5062_v1 }
 0xd1c   :  { %v5063_v57 = vsel %vm1525_vm5, %v5061_v35, %v5031_v29  ;;  %v5039_v39 = vpop.permute.xlu1 %5038  ;;  %v5003_v14 = vadd.f32 %v9739_v4, %v4981_v32  ;;  %v5064_v62 = vsel %vm495_vm1, %v5002_v12, %v5037_v15 }
 0xd1d   :  { %5072 = vst [vmem:[#allocation2 + $0x10] sm:$0xff] %v5063_v57 }
 0xd1e   :  { %v5065_v26 = vsel %vm495_vm1, %v5003_v14, %v5039_v39 }
 0xd82   :  { %v5045_v52 = vpop.permute.xlu0 %5044 }
 0xd83   :  { %v5066_v2 = vsel %vm1522_vm6, %v5064_v62, %v5045_v52 }
 0xd84   :  { %v5047_v19 = vpop.permute.xlu1 %5046 }
 0xd85   :  { %v5067_v54 = vsel %vm1522_vm6, %v5065_v26, %v5047_v19 }
 0xd86   :  { %v5053_v5 = vpop.permute.xlu0 %5052 }
 0xd87   :  { %v5068_v30 = vsel %vm1525_vm5, %v5066_v2, %v5053_v5 }
 0xd88   :  { %5071 = vst [vmem:[#allocation2 + $0x8] sm:$0xff] %v5068_v30  ;;  %v5055_v50 = vpop.permute.xlu1 %5054 }
 0xd89   :  { %v5069_v41 = vsel %vm1525_vm5, %v5067_v54, %v5055_v50 }
 0xd8a   :  { %5073 = vst [vmem:[#allocation2 + $0x18] sm:$0xff] %v5069_v41 }
 0xd8b   :  { %6550 = shalt.err (!%p6547_p4)
}
 0xd8c   :  { %s6551_s3 = scalar_lea.hbm %s9840_s24, 512 }
 0xd8d   :  { %p6552_p5 = scmp.ne.s32.totalorder %s9840_s24, %s6551_s3  ;;  %p6555_p6 = scmp.lt.u32.totalorder %s6551_s3, %s9840_s24 }
 0xd8f   :  { %p6557_p7 = pnand %p6555_p6, %p6552_p5 }
 0xd91   :  { %6560 = shalt.err (!%p6557_p7)
}
 0xd92   :  { %s6567_s17 = smov 256   ;;  %s6568_s25 = smov 16  }
 0xd93   :  { %5085 = dma.vmem_to_hbm [thread:$0]  %s5080_s29, 512, %s9840_s24, [#allocation3], %s6567_s17, %s6567_s17, %s6568_s25  }
 0xd94   :  { %6561 = dma.done.wait [#allocation3], 512  }
 0xd95   :  { %6562 = vsyncadd [#allocation3], 4294966784 }
 0xd96   :  { %5089 = vsyncpa [#allocation3], 1 }

</bundles_post_ra>
